<compile_context>
chip_gen: v5e
topology: v5e:2x2
jax: 0.10.0
libtpu: 0.0.40
codegen_flags: <defaults>
</compile_context>

<pallas_src>
import functools

import jax
import jax.numpy as jnp
from jax import lax
from jax.experimental import pallas as pl
from jax.experimental.pallas import tpu as pltpu


def _round_up(n, m):
    return ((n + m - 1) // m) * m


def _feature_kernel(len_ref, xf_ref, xb_ref,
                    wihf_hbm, wihb_hbm, whhf_hbm, whhb_hbm,
                    out_ref,
                    wihf_v, wihb_v, whhf_v, whhb_v,
                    st_ref, gxf_ref, gxb_ref, sem,
                    *, time_chunk, split_gates, unroll):
    """Grid = (batch_tiles, time_chunks). One step = one time chunk, both dirs.

    len_ref : (Bp, 1)       int32  valid lengths for this batch tile (pads = 1)
    x*_ref  : (TC*Bp, E)    cdt    fwd / bwd time chunk (time-major rows)
    w*_hbm  : HBM refs             weights, copied once per tile into w*_v
    out_ref : (Bp, 4*Hp)    f32    [tanh(mean_f)|tanh(mean_b)|tanh(hk_f)|tanh(hk_b)]
    st_ref  : (8, Bp, Hp)   f32    persistent h_f,c_f,h_b,c_b,sum_f,sum_b,hk_f,hk_b
    gx*_ref : (TC*Bp, 4*Hp)        hoisted x @ W_ih for this chunk
    """
    TC = time_chunk
    TB, _E = xf_ref.shape
    Bp = TB // TC
    Hp = whhf_v.shape[0]

    i = pl.program_id(1)                 # time-chunk index ("arbitrary" axis)
    nc = pl.num_programs(1)
    t_pad = nc * TC

    # ---- once per batch tile: single-buffered weight fetch + state reset ----
    @pl.when(i == 0)
    def _():
        copies = [pltpu.make_async_copy(wihf_hbm, wihf_v, sem.at[0]),
                  pltpu.make_async_copy(wihb_hbm, wihb_v, sem.at[1]),
                  pltpu.make_async_copy(whhf_hbm, whhf_v, sem.at[2]),
                  pltpu.make_async_copy(whhb_hbm, whhb_v, sem.at[3])]
        for c in copies:
            c.start()
        for c in copies:
            c.wait()
        st_ref[...] = jnp.zeros_like(st_ref)

    # ---- phase 1: hoisted input projection (one big GEMM per direction) -----
    gxf_ref[...] = jnp.dot(xf_ref[...], wihf_v[...],
                           preferred_element_type=jnp.float32).astype(gxf_ref.dtype)
    gxb_ref[...] = jnp.dot(xb_ref[...], wihb_v[...],
                           preferred_element_type=jnp.float32).astype(gxb_ref.dtype)

    # ---- loop invariants (hoisted) -------------------------------------------
    lens = len_ref[...]                   # (Bp, 1) int32
    lens_m1 = lens - 1
    whh_f = whhf_v[...]
    whh_b = whhb_v[...]
    base_f = i * TC                       # global time of local step 0 (fwd)
    base_b = t_pad - 1 - i * TC           # global time of local step 0 (bwd)

    carry0 = tuple(st_ref[j] for j in range(8))

    def lstm_step(gx_slab, h_prev, c_prev, whh):
        h_in = h_prev.astype(whh.dtype)
        if split_gates:
            # per-gate 128-lane slabs: 4 small matmuls, gates consumed one at a
            # time to cap live vregs on the serial critical path.
            def gate(k):
                return (gx_slab[:, k * Hp:(k + 1) * Hp].astype(jnp.float32)
                        + jnp.dot(h_in, whh[:, k * Hp:(k + 1) * Hp],
                                  preferred_element_type=jnp.float32))
        else:
            g = gx_slab.astype(jnp.float32) + jnp.dot(
                h_in, whh, preferred_element_type=jnp.float32)

            def gate(k):
                return g[:, k * Hp:(k + 1) * Hp]
        # gate order i, f, g, o (PyTorch convention)
        c_new = jax.nn.sigmoid(gate(1)) * c_prev + \
            jax.nn.sigmoid(gate(0)) * jnp.tanh(gate(2))
        h_new = jax.nn.sigmoid(gate(3)) * jnp.tanh(c_new)
        return h_new, c_new

    # ---- phase 2: fused bidirectional recurrence over the chunk --------------
    def step(s, carry):
        h_f, c_f, h_b, c_b, s_f, s_b, k_f, k_b = carry
        t_f = base_f + s
        t_b = base_b - s

        row_f = pl.multiple_of(s * Bp, 8)
        row_b = pl.multiple_of((TC - 1 - s) * Bp, 8)
        gxf = gxf_ref[pl.ds(row_f, Bp), :]        # (Bp, 4Hp)
        gxb = gxb_ref[pl.ds(row_b, Bp), :]

        h_f, c_f = lstm_step(gxf, h_f, c_f, whh_f)
        h_b, c_b = lstm_step(gxb, h_b, c_b, whh_b)

        s_f = s_f + jnp.where(t_f < lens, h_f, 0.0)
        s_b = s_b + jnp.where(t_b < lens, h_b, 0.0)
        k_f = jnp.where(t_f == lens_m1, h_f, k_f)
        k_b = jnp.where(t_b == lens_m1, h_b, k_b)
        return h_f, c_f, h_b, c_b, s_f, s_b, k_f, k_b

    carry = lax.fori_loop(0, TC, step, carry0, unroll=unroll)
    for j in range(8):
        st_ref[j] = carry[j]

    # ---- finalize on the last chunk of this batch tile ------------------------
    @pl.when(i == nc - 1)
    def _():
        inv_len = 1.0 / jnp.maximum(lens, 1).astype(jnp.float32)     # (Bp, 1)
        out_ref[:, 0:Hp]          = jnp.tanh(carry[4] * inv_len)     # mean fwd
        out_ref[:, Hp:2 * Hp]     = jnp.tanh(carry[5] * inv_len)     # mean bwd
        out_ref[:, 2 * Hp:3 * Hp] = jnp.tanh(carry[6])               # last fwd
        out_ref[:, 3 * Hp:4 * Hp] = jnp.tanh(carry[7])               # last bwd


def feature_extraction(x, source_lengths, params, *, time_chunk=32,
                       batch_tile=64, compute_dtype=jnp.float32,
                       vmem_limit_bytes=None):
    """x: (B,T,E) f32; source_lengths: (B,) int in [1, T] (0 clamps to 1);
    params: transposed PyTorch LSTM weights {'wih_f':(E,4H),'whh_f':(H,4H),
    'wih_b','whh_b'}, gate order i,f,g,o.
    Returns (B, 4H) f32 = tanh([mean_f | mean_b | h_last_f | h_last_b])."""
    B, T, E = x.shape
    H = params["whh_f"].shape[0]

    itemsize = jnp.dtype(compute_dtype).itemsize
    is_bf16 = jnp.dtype(compute_dtype) == jnp.dtype(jnp.bfloat16)
    sub = 16 if itemsize == 2 else 8          # sublane tile (packed dtypes)
    Hp = _round_up(H, 128)                    # lane-aligned per-gate width
    G = 4 * Hp

    # batch tiling: cap per-kernel-instance batch, parallel axis over tiles
    Bp = min(_round_up(max(B, sub), sub), _round_up(max(batch_tile, sub), sub))
    B_pad = _round_up(B, Bp)
    BT = B_pad // Bp

    TC = max(1, min(time_chunk, T))
    # Zero time-padding is exact for a bias-free LSTM: zero input + zero state
    # stays exactly zero, so the backward scan is unaffected by trailing pads.
    T_pad = _round_up(T, TC)
    NC = T_pad // TC

    # host relayout: (B,T,E) -> (BT, T_pad*Bp, E), time-major rows per tile
    x_p = jnp.pad(x.astype(compute_dtype),
                  ((0, B_pad - B), (0, T_pad - T), (0, 0)))
    x_p = x_p.reshape(BT, Bp, T_pad, E).transpose(0, 2, 1, 3)
    x_p = x_p.reshape(BT, T_pad * Bp, E)

    lens = jnp.clip(source_lengths.astype(jnp.int32), 1, T).reshape(B, 1)
    lens = jnp.pad(lens, ((0, B_pad - B), (0, 0)), constant_values=1)

    def pad_gates(w, rows_to):        # (rows,4H) -> (rows_to,4*Hp), per-gate pad
        rows = w.shape[0]
        w4 = w.reshape(rows, 4, H)
        w4 = jnp.pad(w4, ((0, rows_to - rows), (0, 0), (0, Hp - H)))
        return w4.reshape(rows_to, G).astype(compute_dtype)

    wih_f = pad_gates(params["wih_f"], E)
    wih_b = pad_gates(params["wih_b"], E)
    whh_f = pad_gates(params["whh_f"], Hp)
    whh_b = pad_gates(params["whh_b"], Hp)

    gx_dtype = jnp.bfloat16 if is_bf16 else jnp.float32

    # vreg-pressure heuristics for the serial recurrence
    gate_bytes = Bp * G * 4
    split_gates = gate_bytes > 64 * 1024            # >16 f32 vregs of gate temps
    live_bytes = 8 * Bp * Hp * 4 + 2 * gate_bytes   # carry + both gate slabs
    unroll = min(TC, 8) if live_bytes <= 160 * 1024 else min(TC, 2)

    # explicit VMEM budget (weights single-buffered; x & out double-buffered)
    w_bytes = (2 * E + 2 * Hp) * G * itemsize
    x_bytes = 2 * 2 * TC * Bp * E * itemsize
    gx_bytes = 2 * TC * Bp * G * jnp.dtype(gx_dtype).itemsize
    misc = 8 * Bp * Hp * 4 + 2 * Bp * G * 4 + 4096
    if vmem_limit_bytes is None:
        vmem_limit_bytes = int(min(64 * 2 ** 20,
                                   max(32 * 2 ** 20,
                                       2 * (w_bytes + x_bytes + gx_bytes + misc))))

    grid_spec = pltpu.PrefetchScalarGridSpec(
        num_scalar_prefetch=0,
        grid=(BT, NC),
        in_specs=[
            pl.BlockSpec((Bp, 1), lambda b, i: (b, 0)),                   # lens
            pl.BlockSpec((None, TC * Bp, E), lambda b, i: (b, i, 0)),     # x fwd
            pl.BlockSpec((None, TC * Bp, E),
                         lambda b, i: (b, NC - 1 - i, 0)),                # x bwd
            pl.BlockSpec(memory_space=pl.ANY),                            # wih_f
            pl.BlockSpec(memory_space=pl.ANY),                            # wih_b
            pl.BlockSpec(memory_space=pl.ANY),                            # whh_f
            pl.BlockSpec(memory_space=pl.ANY),                            # whh_b
        ],
        out_specs=pl.BlockSpec((Bp, G), lambda b, i: (b, 0)),
        scratch_shapes=[
            pltpu.VMEM((E, G), compute_dtype),       # wih_f (single-buffered)
            pltpu.VMEM((E, G), compute_dtype),       # wih_b
            pltpu.VMEM((Hp, G), compute_dtype),      # whh_f
            pltpu.VMEM((Hp, G), compute_dtype),      # whh_b
            pltpu.VMEM((8, Bp, Hp), jnp.float32),    # persistent h/c/sum/last
            pltpu.VMEM((TC * Bp, G), gx_dtype),      # hoisted x@Wih (fwd chunk)
            pltpu.VMEM((TC * Bp, G), gx_dtype),      # hoisted x@Wih (bwd chunk)
            pltpu.SemaphoreType.DMA((4,)),           # weight-copy semaphores
        ],
    )

    out_p = pl.pallas_call(
        functools.partial(_feature_kernel, time_chunk=TC,
                          split_gates=split_gates, unroll=unroll),
        out_shape=jax.ShapeDtypeStruct((B_pad, G), jnp.float32),
        grid_spec=grid_spec,
        compiler_params=pltpu.CompilerParams(
            dimension_semantics=("parallel", "arbitrary"),
            vmem_limit_bytes=vmem_limit_bytes),
    )(lens, x_p, x_p, wih_f, wih_b, whh_f, whh_b)

    out_p = out_p[:B]                                # drop batch padding
    # Un-pad gate blocks and restore [mean_f | mean_b | hk_f | hk_b] layout.
    return jnp.concatenate([out_p[:, k * Hp:k * Hp + H] for k in range(4)],
                           axis=1)


# ----------------------------- pure-JAX reference -----------------------------
def _lstm_dir_ref(x, wih, whh, reverse):
    B, T, _E = x.shape
    H = whh.shape[0]
    xs = jnp.transpose(x, (1, 0, 2))
    if reverse:
        xs = xs[::-1]

    def step(carry, xt):
        h, c = carry
        gates = xt @ wih + h @ whh
        i = jax.nn.sigmoid(gates[:, :H])
        f = jax.nn.sigmoid(gates[:, H:2 * H])
        g = jnp.tanh(gates[:, 2 * H:3 * H])
        o = jax.nn.sigmoid(gates[:, 3 * H:])
        c = f * c + i * g
        h = o * jnp.tanh(c)
        return (h, c), h

    zero = jnp.zeros((B, H), jnp.float32)
    _, hs = lax.scan(step, (zero, zero), xs)
    if reverse:
        hs = hs[::-1]
    return jnp.transpose(hs, (1, 0, 2))               # (B, T, H)


def feature_extraction_ref(x, source_lengths, params):
    B, T, _E = x.shape
    hf = _lstm_dir_ref(x, params["wih_f"], params["whh_f"], reverse=False)
    hb = _lstm_dir_ref(x, params["wih_b"], params["whh_b"], reverse=True)
    hidden = jnp.concatenate([hf, hb], axis=-1)                     # (B, T, 2H)
    h_k = hidden[jnp.arange(B), source_lengths - 1]                 # (B, 2H)
    mask = (jnp.arange(T)[None, :] < source_lengths[:, None]).astype(jnp.float32)
    means = (hidden * mask[:, :, None]).sum(axis=1) / \
        source_lengths[:, None].astype(jnp.float32)
    return jnp.tanh(jnp.concatenate([means, h_k], axis=1))


# ----------------------------------- main -------------------------------------
if __name__ == "__main__":
    key = jax.random.PRNGKey(0)
    kp1, kx1, kp2, kx2, kl2 = jax.random.split(key, 5)

    def make_params(k, E, H):
        k1, k2, k3, k4 = jax.random.split(k, 4)
        bound = H ** -0.5                  # PyTorch LSTM default init range
        return {
            "wih_f": jax.random.uniform(k1, (E, 4 * H), jnp.float32, -bound, bound),
            "whh_f": jax.random.uniform(k2, (H, 4 * H), jnp.float32, -bound, bound),
            "wih_b": jax.random.uniform(k3, (E, 4 * H), jnp.float32, -bound, bound),
            "whh_b": jax.random.uniform(k4, (H, 4 * H), jnp.float32, -bound, bound),
        }

    # --- case 1: small shapes (embed_size=32, hidden_size=16) ------------------
    B, T, E, H = 2, 8, 32, 16
    params = make_params(kp1, E, H)
    x = jax.random.normal(kx1, (B, T, E), jnp.float32)
    source_lengths = jnp.array([6, 3], dtype=jnp.int32)

    ref = feature_extraction_ref(x, source_lengths, params)

    out = jax.block_until_ready(feature_extraction(x, source_lengths, params))
    assert out.shape == (B, 4 * H)
    err = float(jnp.max(jnp.abs(out - ref)))
    assert err < 1e-5, f"f32 max abs err {err}"

    # bf16 matmul operands (MXU-native), f32 accumulation/gates: sanity check.
    out_bf16 = jax.block_until_ready(
        feature_extraction(x, source_lengths, params,
                           compute_dtype=jnp.bfloat16))
    err_bf16 = float(jnp.max(jnp.abs(out_bf16 - ref)))
    assert err_bf16 < 1e-1, f"bf16 max abs err {err_bf16}"

    # --- case 2: multiple batch tiles + multiple time chunks + time padding ----
    B2, T2, E2, H2 = 10, 20, 32, 16
    params2 = make_params(kp2, E2, H2)
    x2 = jax.random.normal(kx2, (B2, T2, E2), jnp.float32)
    lens2 = jax.random.randint(kl2, (B2,), 1, T2 + 1).astype(jnp.int32)

    ref2 = feature_extraction_ref(x2, lens2, params2)
    out2 = jax.block_until_ready(
        feature_extraction(x2, lens2, params2, time_chunk=8, batch_tile=8))
    err2 = float(jnp.max(jnp.abs(out2 - ref2)))
    assert err2 < 1e-4, f"multi-tile f32 max abs err {err2}"

    print("KERNEL_OK")
</pallas_src>

<mosaic_0001>
module attributes {stable_mosaic.version = 11 : i64} {
  func.func @_feature_kernel(%arg0: i32, %arg1: i32, %arg2: memref<8x1xi32, #tpu.memory_space<vmem>>, %arg3: memref<1x64x32xf32, #tpu.memory_space<vmem>>, %arg4: memref<1x64x32xf32, #tpu.memory_space<vmem>>, %arg5: memref<32x512xf32, #tpu.memory_space<any>>, %arg6: memref<32x512xf32, #tpu.memory_space<any>>, %arg7: memref<128x512xf32, #tpu.memory_space<any>>, %arg8: memref<128x512xf32, #tpu.memory_space<any>>, %arg9: memref<8x512xf32, #tpu.memory_space<vmem>>, %arg10: memref<32x512xf32, #tpu.memory_space<vmem>>, %arg11: memref<32x512xf32, #tpu.memory_space<vmem>>, %arg12: memref<128x512xf32, #tpu.memory_space<vmem>>, %arg13: memref<128x512xf32, #tpu.memory_space<vmem>>, %arg14: memref<8x8x128xf32, #tpu.memory_space<vmem>>, %arg15: memref<64x512xf32, #tpu.memory_space<vmem>>, %arg16: memref<64x512xf32, #tpu.memory_space<vmem>>, %arg17: memref<4x!tpu.dma_semaphore, #tpu.memory_space<semaphore_mem>>) attributes {dimension_semantics = [#tpu.dimension_semantics<parallel>, #tpu.dimension_semantics<arbitrary>], iteration_bounds = array<i64: 1, 1>, scalar_prefetch = 0 : i64, scratch_operands = 8 : i64, tpu.core_type = #tpu.core_type<tc>, window_params = [{transform_indices = @transform_0, window_bounds = array<i64: 8, 1>}, {transform_indices = @transform_1, window_bounds = array<i64: 1, 64, 32>}, {transform_indices = @transform_2, window_bounds = array<i64: 1, 64, 32>}, {}, {}, {}, {}, {transform_indices = @transform_7, window_bounds = array<i64: 8, 512>}]} {
    %c0_i32 = arith.constant 0 : i32
    %0 = arith.cmpi eq, %arg1, %c0_i32 : i32
    %1 = arith.extui %0 : i1 to i32
    %c0_i32_0 = arith.constant 0 : i32
    %2 = arith.cmpi ne, %1, %c0_i32_0 : i32
    scf.if %2 {
      %c0_i32_189 = arith.constant 0 : i32
      %776 = tpu.memref_slice %arg17[%c0_i32_189] : memref<4x!tpu.dma_semaphore, #tpu.memory_space<semaphore_mem>> -> memref<1x!tpu.dma_semaphore, #tpu.memory_space<semaphore_mem>>
      %777 = tpu.memref_squeeze %776 : memref<1x!tpu.dma_semaphore, #tpu.memory_space<semaphore_mem>> -> memref<!tpu.dma_semaphore, #tpu.memory_space<semaphore_mem>>
      tpu.enqueue_dma source(%arg5 : memref<32x512xf32, #tpu.memory_space<any>>) target(%arg10 : memref<32x512xf32, #tpu.memory_space<vmem>>) target_semaphore(%777 : memref<!tpu.dma_semaphore, #tpu.memory_space<semaphore_mem>>)
      %c1_i32_190 = arith.constant 1 : i32
      %778 = tpu.memref_slice %arg17[%c1_i32_190] : memref<4x!tpu.dma_semaphore, #tpu.memory_space<semaphore_mem>> -> memref<1x!tpu.dma_semaphore, #tpu.memory_space<semaphore_mem>>
      %779 = tpu.memref_squeeze %778 : memref<1x!tpu.dma_semaphore, #tpu.memory_space<semaphore_mem>> -> memref<!tpu.dma_semaphore, #tpu.memory_space<semaphore_mem>>
      tpu.enqueue_dma source(%arg6 : memref<32x512xf32, #tpu.memory_space<any>>) target(%arg11 : memref<32x512xf32, #tpu.memory_space<vmem>>) target_semaphore(%779 : memref<!tpu.dma_semaphore, #tpu.memory_space<semaphore_mem>>)
      %c2_i32_191 = arith.constant 2 : i32
      %780 = tpu.memref_slice %arg17[%c2_i32_191] : memref<4x!tpu.dma_semaphore, #tpu.memory_space<semaphore_mem>> -> memref<1x!tpu.dma_semaphore, #tpu.memory_space<semaphore_mem>>
      %781 = tpu.memref_squeeze %780 : memref<1x!tpu.dma_semaphore, #tpu.memory_space<semaphore_mem>> -> memref<!tpu.dma_semaphore, #tpu.memory_space<semaphore_mem>>
      tpu.enqueue_dma source(%arg7 : memref<128x512xf32, #tpu.memory_space<any>>) target(%arg12 : memref<128x512xf32, #tpu.memory_space<vmem>>) target_semaphore(%781 : memref<!tpu.dma_semaphore, #tpu.memory_space<semaphore_mem>>)
      %c3_i32_192 = arith.constant 3 : i32
      %782 = tpu.memref_slice %arg17[%c3_i32_192] : memref<4x!tpu.dma_semaphore, #tpu.memory_space<semaphore_mem>> -> memref<1x!tpu.dma_semaphore, #tpu.memory_space<semaphore_mem>>
      %783 = tpu.memref_squeeze %782 : memref<1x!tpu.dma_semaphore, #tpu.memory_space<semaphore_mem>> -> memref<!tpu.dma_semaphore, #tpu.memory_space<semaphore_mem>>
      tpu.enqueue_dma source(%arg8 : memref<128x512xf32, #tpu.memory_space<any>>) target(%arg13 : memref<128x512xf32, #tpu.memory_space<vmem>>) target_semaphore(%783 : memref<!tpu.dma_semaphore, #tpu.memory_space<semaphore_mem>>)
      %c0_i32_193 = arith.constant 0 : i32
      %784 = tpu.memref_slice %arg17[%c0_i32_193] : memref<4x!tpu.dma_semaphore, #tpu.memory_space<semaphore_mem>> -> memref<1x!tpu.dma_semaphore, #tpu.memory_space<semaphore_mem>>
      %785 = tpu.memref_squeeze %784 : memref<1x!tpu.dma_semaphore, #tpu.memory_space<semaphore_mem>> -> memref<!tpu.dma_semaphore, #tpu.memory_space<semaphore_mem>>
      tpu.wait_dma2 semaphore(%785 : memref<!tpu.dma_semaphore, #tpu.memory_space<semaphore_mem>>) src(%arg5 : memref<32x512xf32, #tpu.memory_space<any>>) dst(%arg10 : memref<32x512xf32, #tpu.memory_space<vmem>>)
      %c1_i32_194 = arith.constant 1 : i32
      %786 = tpu.memref_slice %arg17[%c1_i32_194] : memref<4x!tpu.dma_semaphore, #tpu.memory_space<semaphore_mem>> -> memref<1x!tpu.dma_semaphore, #tpu.memory_space<semaphore_mem>>
      %787 = tpu.memref_squeeze %786 : memref<1x!tpu.dma_semaphore, #tpu.memory_space<semaphore_mem>> -> memref<!tpu.dma_semaphore, #tpu.memory_space<semaphore_mem>>
      tpu.wait_dma2 semaphore(%787 : memref<!tpu.dma_semaphore, #tpu.memory_space<semaphore_mem>>) src(%arg6 : memref<32x512xf32, #tpu.memory_space<any>>) dst(%arg11 : memref<32x512xf32, #tpu.memory_space<vmem>>)
      %c2_i32_195 = arith.constant 2 : i32
      %788 = tpu.memref_slice %arg17[%c2_i32_195] : memref<4x!tpu.dma_semaphore, #tpu.memory_space<semaphore_mem>> -> memref<1x!tpu.dma_semaphore, #tpu.memory_space<semaphore_mem>>
      %789 = tpu.memref_squeeze %788 : memref<1x!tpu.dma_semaphore, #tpu.memory_space<semaphore_mem>> -> memref<!tpu.dma_semaphore, #tpu.memory_space<semaphore_mem>>
      tpu.wait_dma2 semaphore(%789 : memref<!tpu.dma_semaphore, #tpu.memory_space<semaphore_mem>>) src(%arg7 : memref<128x512xf32, #tpu.memory_space<any>>) dst(%arg12 : memref<128x512xf32, #tpu.memory_space<vmem>>)
      %c3_i32_196 = arith.constant 3 : i32
      %790 = tpu.memref_slice %arg17[%c3_i32_196] : memref<4x!tpu.dma_semaphore, #tpu.memory_space<semaphore_mem>> -> memref<1x!tpu.dma_semaphore, #tpu.memory_space<semaphore_mem>>
      %791 = tpu.memref_squeeze %790 : memref<1x!tpu.dma_semaphore, #tpu.memory_space<semaphore_mem>> -> memref<!tpu.dma_semaphore, #tpu.memory_space<semaphore_mem>>
      tpu.wait_dma2 semaphore(%791 : memref<!tpu.dma_semaphore, #tpu.memory_space<semaphore_mem>>) src(%arg8 : memref<128x512xf32, #tpu.memory_space<any>>) dst(%arg13 : memref<128x512xf32, #tpu.memory_space<vmem>>)
      %cst_197 = arith.constant 0.000000e+00 : f32
      %792 = vector.broadcast %cst_197 : f32 to vector<8x8x128xf32>
      %c0_198 = arith.constant 0 : index
      %c0_199 = arith.constant 0 : index
      %c0_200 = arith.constant 0 : index
      %793 = vector.load %arg14[%c0_198, %c0_199, %c0_200] : memref<8x8x128xf32, #tpu.memory_space<vmem>>, vector<8x8x128xf32>
      tpu.vector_store %arg14[%c0_198, %c0_199, %c0_200], %792 {strides = array<i32>} : memref<8x8x128xf32, #tpu.memory_space<vmem>>, vector<8x8x128xf32>,
    } else {
    }
    %c0 = arith.constant 0 : index
    %c0_1 = arith.constant 0 : index
    %c0_2 = arith.constant 0 : index
    %3 = vector.load %arg3[%c0, %c0_1, %c0_2] : memref<1x64x32xf32, #tpu.memory_space<vmem>>, vector<1x64x32xf32>
    %4 = vector.shape_cast %3 : vector<1x64x32xf32> to vector<64x32xf32>
    %c0_3 = arith.constant 0 : index
    %c0_4 = arith.constant 0 : index
    %5 = vector.load %arg10[%c0_3, %c0_4] : memref<32x512xf32, #tpu.memory_space<vmem>>, vector<32x512xf32>
    %cst = arith.constant dense<0.000000e+00> : vector<64x512xf32>
    %6 = tpu.matmul %4, %5, %cst {dimension_numbers = #tpu.dot_dimension_numbers<[1], [0], [0], [1], [0, 0, 1, 1], [], []>} : vector<64x32xf32>, vector<32x512xf32>, vector<64x512xf32> -> vector<64x512xf32>
    %c0_5 = arith.constant 0 : index
    %c0_6 = arith.constant 0 : index
    %7 = vector.load %arg15[%c0_5, %c0_6] : memref<64x512xf32, #tpu.memory_space<vmem>>, vector<64x512xf32>
    tpu.vector_store %arg15[%c0_5, %c0_6], %6 {strides = array<i32>} : memref<64x512xf32, #tpu.memory_space<vmem>>, vector<64x512xf32>,
    %c0_7 = arith.constant 0 : index
    %c0_8 = arith.constant 0 : index
    %c0_9 = arith.constant 0 : index
    %8 = vector.load %arg4[%c0_7, %c0_8, %c0_9] : memref<1x64x32xf32, #tpu.memory_space<vmem>>, vector<1x64x32xf32>
    %9 = vector.shape_cast %8 : vector<1x64x32xf32> to vector<64x32xf32>
    %c0_10 = arith.constant 0 : index
    %c0_11 = arith.constant 0 : index
    %10 = vector.load %arg11[%c0_10, %c0_11] : memref<32x512xf32, #tpu.memory_space<vmem>>, vector<32x512xf32>
    %cst_12 = arith.constant dense<0.000000e+00> : vector<64x512xf32>
    %11 = tpu.matmul %9, %10, %cst_12 {dimension_numbers = #tpu.dot_dimension_numbers<[1], [0], [0], [1], [0, 0, 1, 1], [], []>} : vector<64x32xf32>, vector<32x512xf32>, vector<64x512xf32> -> vector<64x512xf32>
    %c0_13 = arith.constant 0 : index
    %c0_14 = arith.constant 0 : index
    %12 = vector.load %arg16[%c0_13, %c0_14] : memref<64x512xf32, #tpu.memory_space<vmem>>, vector<64x512xf32>
    tpu.vector_store %arg16[%c0_13, %c0_14], %11 {strides = array<i32>} : memref<64x512xf32, #tpu.memory_space<vmem>>, vector<64x512xf32>,
    %c0_15 = arith.constant 0 : index
    %c0_16 = arith.constant 0 : index
    %13 = vector.load %arg2[%c0_15, %c0_16] : memref<8x1xi32, #tpu.memory_space<vmem>>, vector<8x1xi32>
    %c1_i32 = arith.constant 1 : i32
    %14 = vector.broadcast %c1_i32 : i32 to vector<8x1xi32>
    %15 = arith.subi %13, %14 : vector<8x1xi32>
    %c0_17 = arith.constant 0 : index
    %c0_18 = arith.constant 0 : index
    %16 = vector.load %arg12[%c0_17, %c0_18] : memref<128x512xf32, #tpu.memory_space<vmem>>, vector<128x512xf32>
    %c0_19 = arith.constant 0 : index
    %c0_20 = arith.constant 0 : index
    %17 = vector.load %arg13[%c0_19, %c0_20] : memref<128x512xf32, #tpu.memory_space<vmem>>, vector<128x512xf32>
    %c8_i32 = arith.constant 8 : i32
    %18 = arith.muli %arg1, %c8_i32 : i32
    %c8_i32_21 = arith.constant 8 : i32
    %19 = arith.muli %arg1, %c8_i32_21 : i32
    %c7_i32 = arith.constant 7 : i32
    %20 = arith.subi %c7_i32, %19 : i32
    %c0_22 = arith.constant 0 : index
    %c0_23 = arith.constant 0 : index
    %c0_24 = arith.constant 0 : index
    %21 = vector.load %arg14[%c0_22, %c0_23, %c0_24] : memref<8x8x128xf32, #tpu.memory_space<vmem>>, vector<1x8x128xf32>
    %22 = vector.shape_cast %21 : vector<1x8x128xf32> to vector<8x128xf32>
    %c1 = arith.constant 1 : index
    %c0_25 = arith.constant 0 : index
    %c0_26 = arith.constant 0 : index
    %23 = vector.load %arg14[%c1, %c0_25, %c0_26] : memref<8x8x128xf32, #tpu.memory_space<vmem>>, vector<1x8x128xf32>
    %24 = vector.shape_cast %23 : vector<1x8x128xf32> to vector<8x128xf32>
    %c2 = arith.constant 2 : index
    %c0_27 = arith.constant 0 : index
    %c0_28 = arith.constant 0 : index
    %25 = vector.load %arg14[%c2, %c0_27, %c0_28] : memref<8x8x128xf32, #tpu.memory_space<vmem>>, vector<1x8x128xf32>
    %26 = vector.shape_cast %25 : vector<1x8x128xf32> to vector<8x128xf32>
    %c3 = arith.constant 3 : index
    %c0_29 = arith.constant 0 : index
    %c0_30 = arith.constant 0 : index
    %27 = vector.load %arg14[%c3, %c0_29, %c0_30] : memref<8x8x128xf32, #tpu.memory_space<vmem>>, vector<1x8x128xf32>
    %28 = vector.shape_cast %27 : vector<1x8x128xf32> to vector<8x128xf32>
    %c4 = arith.constant 4 : index
    %c0_31 = arith.constant 0 : index
    %c0_32 = arith.constant 0 : index
    %29 = vector.load %arg14[%c4, %c0_31, %c0_32] : memref<8x8x128xf32, #tpu.memory_space<vmem>>, vector<1x8x128xf32>
    %30 = vector.shape_cast %29 : vector<1x8x128xf32> to vector<8x128xf32>
    %c5 = arith.constant 5 : index
    %c0_33 = arith.constant 0 : index
    %c0_34 = arith.constant 0 : index
    %31 = vector.load %arg14[%c5, %c0_33, %c0_34] : memref<8x8x128xf32, #tpu.memory_space<vmem>>, vector<1x8x128xf32>
    %32 = vector.shape_cast %31 : vector<1x8x128xf32> to vector<8x128xf32>
    %c6 = arith.constant 6 : index
    %c0_35 = arith.constant 0 : index
    %c0_36 = arith.constant 0 : index
    %33 = vector.load %arg14[%c6, %c0_35, %c0_36] : memref<8x8x128xf32, #tpu.memory_space<vmem>>, vector<1x8x128xf32>
    %34 = vector.shape_cast %33 : vector<1x8x128xf32> to vector<8x128xf32>
    %c7 = arith.constant 7 : index
    %c0_37 = arith.constant 0 : index
    %c0_38 = arith.constant 0 : index
    %35 = vector.load %arg14[%c7, %c0_37, %c0_38] : memref<8x8x128xf32, #tpu.memory_space<vmem>>, vector<1x8x128xf32>
    %36 = vector.shape_cast %35 : vector<1x8x128xf32> to vector<8x128xf32>
    %c0_i32_39 = arith.constant 0 : i32
    %37 = arith.addi %18, %c0_i32_39 : i32
    %38 = arith.subi %20, %c0_i32_39 : i32
    %c8_i32_40 = arith.constant 8 : i32
    %39 = arith.muli %c0_i32_39, %c8_i32_40 : i32
    %40 = tpu.assume_multiple %39, 8 : i32
    %c7_i32_41 = arith.constant 7 : i32
    %41 = arith.subi %c7_i32_41, %c0_i32_39 : i32
    %c8_i32_42 = arith.constant 8 : i32
    %42 = arith.muli %41, %c8_i32_42 : i32
    %43 = tpu.assume_multiple %42, 8 : i32
    %44 = arith.index_cast %40 : i32 to index
    %c0_43 = arith.constant 0 : index
    %45 = vector.load %arg15[%44, %c0_43] : memref<64x512xf32, #tpu.memory_space<vmem>>, vector<8x512xf32>
    %46 = arith.index_cast %43 : i32 to index
    %c0_44 = arith.constant 0 : index
    %47 = vector.load %arg16[%46, %c0_44] : memref<64x512xf32, #tpu.memory_space<vmem>>, vector<8x512xf32>
    %cst_45 = arith.constant dense<0.000000e+00> : vector<8x512xf32>
    %48 = tpu.matmul %22, %16, %cst_45 {dimension_numbers = #tpu.dot_dimension_numbers<[1], [0], [0], [1], [0, 0, 1, 1], [], []>} : vector<8x128xf32>, vector<128x512xf32>, vector<8x512xf32> -> vector<8x512xf32>
    %49 = arith.addf %45, %48 : vector<8x512xf32>
    %50 = vector.extract_strided_slice %49 {offsets = [0, 128], sizes = [8, 128], strides = [1, 1]} : vector<8x512xf32> to vector<8x128xf32>
    %51 = arith.negf %50 : vector<8x128xf32>
    %52 = math.exp %51 : vector<8x128xf32>
    %cst_46 = arith.constant 1.000000e+00 : f32
    %53 = vector.broadcast %cst_46 : f32 to vector<8x128xf32>
    %54 = arith.addf %53, %52 : vector<8x128xf32>
    %55 = arith.divf %53, %54 : vector<8x128xf32>
    %56 = arith.mulf %55, %24 : vector<8x128xf32>
    %57 = vector.extract_strided_slice %49 {offsets = [0, 0], sizes = [8, 128], strides = [1, 1]} : vector<8x512xf32> to vector<8x128xf32>
    %58 = arith.negf %57 : vector<8x128xf32>
    %59 = math.exp %58 : vector<8x128xf32>
    %cst_47 = arith.constant 1.000000e+00 : f32
    %60 = vector.broadcast %cst_47 : f32 to vector<8x128xf32>
    %61 = arith.addf %60, %59 : vector<8x128xf32>
    %62 = arith.divf %60, %61 : vector<8x128xf32>
    %63 = vector.extract_strided_slice %49 {offsets = [0, 256], sizes = [8, 128], strides = [1, 1]} : vector<8x512xf32> to vector<8x128xf32>
    %64 = math.tanh %63 : vector<8x128xf32>
    %65 = arith.mulf %62, %64 : vector<8x128xf32>
    %66 = arith.addf %56, %65 : vector<8x128xf32>
    %67 = vector.extract_strided_slice %49 {offsets = [0, 384], sizes = [8, 128], strides = [1, 1]} : vector<8x512xf32> to vector<8x128xf32>
    %68 = arith.negf %67 : vector<8x128xf32>
    %69 = math.exp %68 : vector<8x128xf32>
    %cst_48 = arith.constant 1.000000e+00 : f32
    %70 = vector.broadcast %cst_48 : f32 to vector<8x128xf32>
    %71 = arith.addf %70, %69 : vector<8x128xf32>
    %72 = arith.divf %70, %71 : vector<8x128xf32>
    %73 = math.tanh %66 : vector<8x128xf32>
    %74 = arith.mulf %72, %73 : vector<8x128xf32>
    %cst_49 = arith.constant dense<0.000000e+00> : vector<8x512xf32>
    %75 = tpu.matmul %26, %17, %cst_49 {dimension_numbers = #tpu.dot_dimension_numbers<[1], [0], [0], [1], [0, 0, 1, 1], [], []>} : vector<8x128xf32>, vector<128x512xf32>, vector<8x512xf32> -> vector<8x512xf32>
    %76 = arith.addf %47, %75 : vector<8x512xf32>
    %77 = vector.extract_strided_slice %76 {offsets = [0, 128], sizes = [8, 128], strides = [1, 1]} : vector<8x512xf32> to vector<8x128xf32>
    %78 = arith.negf %77 : vector<8x128xf32>
    %79 = math.exp %78 : vector<8x128xf32>
    %cst_50 = arith.constant 1.000000e+00 : f32
    %80 = vector.broadcast %cst_50 : f32 to vector<8x128xf32>
    %81 = arith.addf %80, %79 : vector<8x128xf32>
    %82 = arith.divf %80, %81 : vector<8x128xf32>
    %83 = arith.mulf %82, %28 : vector<8x128xf32>
    %84 = vector.extract_strided_slice %76 {offsets = [0, 0], sizes = [8, 128], strides = [1, 1]} : vector<8x512xf32> to vector<8x128xf32>
    %85 = arith.negf %84 : vector<8x128xf32>
    %86 = math.exp %85 : vector<8x128xf32>
    %cst_51 = arith.constant 1.000000e+00 : f32
    %87 = vector.broadcast %cst_51 : f32 to vector<8x128xf32>
    %88 = arith.addf %87, %86 : vector<8x128xf32>
    %89 = arith.divf %87, %88 : vector<8x128xf32>
    %90 = vector.extract_strided_slice %76 {offsets = [0, 256], sizes = [8, 128], strides = [1, 1]} : vector<8x512xf32> to vector<8x128xf32>
    %91 = math.tanh %90 : vector<8x128xf32>
    %92 = arith.mulf %89, %91 : vector<8x128xf32>
    %93 = arith.addf %83, %92 : vector<8x128xf32>
    %94 = vector.extract_strided_slice %76 {offsets = [0, 384], sizes = [8, 128], strides = [1, 1]} : vector<8x512xf32> to vector<8x128xf32>
    %95 = arith.negf %94 : vector<8x128xf32>
    %96 = math.exp %95 : vector<8x128xf32>
    %cst_52 = arith.constant 1.000000e+00 : f32
    %97 = vector.broadcast %cst_52 : f32 to vector<8x128xf32>
    %98 = arith.addf %97, %96 : vector<8x128xf32>
    %99 = arith.divf %97, %98 : vector<8x128xf32>
    %100 = math.tanh %93 : vector<8x128xf32>
    %101 = arith.mulf %99, %100 : vector<8x128xf32>
    %102 = vector.broadcast %37 : i32 to vector<8x1xi32>
    %103 = arith.cmpi slt, %102, %13 : vector<8x1xi32>
    %cst_53 = arith.constant 0.000000e+00 : f32
    %104 = vector.shape_cast %103 : vector<8x1xi1> to vector<8x1xi1>
    %105 = vector.broadcast %104 : vector<8x1xi1> to vector<8x128xi1>
    %106 = vector.broadcast %cst_53 : f32 to vector<8x128xf32>
    %107 = arith.select %105, %74, %106 : vector<8x128xi1>, vector<8x128xf32>
    %108 = arith.addf %30, %107 : vector<8x128xf32>
    %109 = vector.broadcast %38 : i32 to vector<8x1xi32>
    %110 = arith.cmpi slt, %109, %13 : vector<8x1xi32>
    %cst_54 = arith.constant 0.000000e+00 : f32
    %111 = vector.shape_cast %110 : vector<8x1xi1> to vector<8x1xi1>
    %112 = vector.broadcast %111 : vector<8x1xi1> to vector<8x128xi1>
    %113 = vector.broadcast %cst_54 : f32 to vector<8x128xf32>
    %114 = arith.select %112, %101, %113 : vector<8x128xi1>, vector<8x128xf32>
    %115 = arith.addf %32, %114 : vector<8x128xf32>
    %116 = vector.broadcast %37 : i32 to vector<8x1xi32>
    %117 = arith.cmpi eq, %116, %15 : vector<8x1xi32>
    %118 = vector.shape_cast %117 : vector<8x1xi1> to vector<8x1xi1>
    %119 = vector.broadcast %118 : vector<8x1xi1> to vector<8x128xi1>
    %120 = arith.select %119, %74, %34 : vector<8x128xi1>, vector<8x128xf32>
    %121 = vector.broadcast %38 : i32 to vector<8x1xi32>
    %122 = arith.cmpi eq, %121, %15 : vector<8x1xi32>
    %123 = vector.shape_cast %122 : vector<8x1xi1> to vector<8x1xi1>
    %124 = vector.broadcast %123 : vector<8x1xi1> to vector<8x128xi1>
    %125 = arith.select %124, %101, %36 : vector<8x128xi1>, vector<8x128xf32>
    %c1_i32_55 = arith.constant 1 : i32
    %126 = arith.addi %18, %c1_i32_55 : i32
    %127 = arith.subi %20, %c1_i32_55 : i32
    %c8_i32_56 = arith.constant 8 : i32
    %128 = arith.muli %c1_i32_55, %c8_i32_56 : i32
    %129 = tpu.assume_multiple %128, 8 : i32
    %c7_i32_57 = arith.constant 7 : i32
    %130 = arith.subi %c7_i32_57, %c1_i32_55 : i32
    %c8_i32_58 = arith.constant 8 : i32
    %131 = arith.muli %130, %c8_i32_58 : i32
    %132 = tpu.assume_multiple %131, 8 : i32
    %133 = arith.index_cast %129 : i32 to index
    %c0_59 = arith.constant 0 : index
    %134 = vector.load %arg15[%133, %c0_59] : memref<64x512xf32, #tpu.memory_space<vmem>>, vector<8x512xf32>
    %135 = arith.index_cast %132 : i32 to index
    %c0_60 = arith.constant 0 : index
    %136 = vector.load %arg16[%135, %c0_60] : memref<64x512xf32, #tpu.memory_space<vmem>>, vector<8x512xf32>
    %cst_61 = arith.constant dense<0.000000e+00> : vector<8x512xf32>
    %137 = tpu.matmul %74, %16, %cst_61 {dimension_numbers = #tpu.dot_dimension_numbers<[1], [0], [0], [1], [0, 0, 1, 1], [], []>} : vector<8x128xf32>, vector<128x512xf32>, vector<8x512xf32> -> vector<8x512xf32>
    %138 = arith.addf %134, %137 : vector<8x512xf32>
    %139 = vector.extract_strided_slice %138 {offsets = [0, 128], sizes = [8, 128], strides = [1, 1]} : vector<8x512xf32> to vector<8x128xf32>
    %140 = arith.negf %139 : vector<8x128xf32>
    %141 = math.exp %140 : vector<8x128xf32>
    %cst_62 = arith.constant 1.000000e+00 : f32
    %142 = vector.broadcast %cst_62 : f32 to vector<8x128xf32>
    %143 = arith.addf %142, %141 : vector<8x128xf32>
    %144 = arith.divf %142, %143 : vector<8x128xf32>
    %145 = arith.mulf %144, %66 : vector<8x128xf32>
    %146 = vector.extract_strided_slice %138 {offsets = [0, 0], sizes = [8, 128], strides = [1, 1]} : vector<8x512xf32> to vector<8x128xf32>
    %147 = arith.negf %146 : vector<8x128xf32>
    %148 = math.exp %147 : vector<8x128xf32>
    %cst_63 = arith.constant 1.000000e+00 : f32
    %149 = vector.broadcast %cst_63 : f32 to vector<8x128xf32>
    %150 = arith.addf %149, %148 : vector<8x128xf32>
    %151 = arith.divf %149, %150 : vector<8x128xf32>
    %152 = vector.extract_strided_slice %138 {offsets = [0, 256], sizes = [8, 128], strides = [1, 1]} : vector<8x512xf32> to vector<8x128xf32>
    %153 = math.tanh %152 : vector<8x128xf32>
    %154 = arith.mulf %151, %153 : vector<8x128xf32>
    %155 = arith.addf %145, %154 : vector<8x128xf32>
    %156 = vector.extract_strided_slice %138 {offsets = [0, 384], sizes = [8, 128], strides = [1, 1]} : vector<8x512xf32> to vector<8x128xf32>
    %157 = arith.negf %156 : vector<8x128xf32>
    %158 = math.exp %157 : vector<8x128xf32>
    %cst_64 = arith.constant 1.000000e+00 : f32
    %159 = vector.broadcast %cst_64 : f32 to vector<8x128xf32>
    %160 = arith.addf %159, %158 : vector<8x128xf32>
    %161 = arith.divf %159, %160 : vector<8x128xf32>
    %162 = math.tanh %155 : vector<8x128xf32>
    %163 = arith.mulf %161, %162 : vector<8x128xf32>
    %cst_65 = arith.constant dense<0.000000e+00> : vector<8x512xf32>
    %164 = tpu.matmul %101, %17, %cst_65 {dimension_numbers = #tpu.dot_dimension_numbers<[1], [0], [0], [1], [0, 0, 1, 1], [], []>} : vector<8x128xf32>, vector<128x512xf32>, vector<8x512xf32> -> vector<8x512xf32>
    %165 = arith.addf %136, %164 : vector<8x512xf32>
    %166 = vector.extract_strided_slice %165 {offsets = [0, 128], sizes = [8, 128], strides = [1, 1]} : vector<8x512xf32> to vector<8x128xf32>
    %167 = arith.negf %166 : vector<8x128xf32>
    %168 = math.exp %167 : vector<8x128xf32>
    %cst_66 = arith.constant 1.000000e+00 : f32
    %169 = vector.broadcast %cst_66 : f32 to vector<8x128xf32>
    %170 = arith.addf %169, %168 : vector<8x128xf32>
    %171 = arith.divf %169, %170 : vector<8x128xf32>
    %172 = arith.mulf %171, %93 : vector<8x128xf32>
    %173 = vector.extract_strided_slice %165 {offsets = [0, 0], sizes = [8, 128], strides = [1, 1]} : vector<8x512xf32> to vector<8x128xf32>
    %174 = arith.negf %173 : vector<8x128xf32>
    %175 = math.exp %174 : vector<8x128xf32>
    %cst_67 = arith.constant 1.000000e+00 : f32
    %176 = vector.broadcast %cst_67 : f32 to vector<8x128xf32>
    %177 = arith.addf %176, %175 : vector<8x128xf32>
    %178 = arith.divf %176, %177 : vector<8x128xf32>
    %179 = vector.extract_strided_slice %165 {offsets = [0, 256], sizes = [8, 128], strides = [1, 1]} : vector<8x512xf32> to vector<8x128xf32>
    %180 = math.tanh %179 : vector<8x128xf32>
    %181 = arith.mulf %178, %180 : vector<8x128xf32>
    %182 = arith.addf %172, %181 : vector<8x128xf32>
    %183 = vector.extract_strided_slice %165 {offsets = [0, 384], sizes = [8, 128], strides = [1, 1]} : vector<8x512xf32> to vector<8x128xf32>
    %184 = arith.negf %183 : vector<8x128xf32>
    %185 = math.exp %184 : vector<8x128xf32>
    %cst_68 = arith.constant 1.000000e+00 : f32
    %186 = vector.broadcast %cst_68 : f32 to vector<8x128xf32>
    %187 = arith.addf %186, %185 : vector<8x128xf32>
    %188 = arith.divf %186, %187 : vector<8x128xf32>
    %189 = math.tanh %182 : vector<8x128xf32>
    %190 = arith.mulf %188, %189 : vector<8x128xf32>
    %191 = vector.broadcast %126 : i32 to vector<8x1xi32>
    %192 = arith.cmpi slt, %191, %13 : vector<8x1xi32>
    %cst_69 = arith.constant 0.000000e+00 : f32
    %193 = vector.shape_cast %192 : vector<8x1xi1> to vector<8x1xi1>
    %194 = vector.broadcast %193 : vector<8x1xi1> to vector<8x128xi1>
    %195 = vector.broadcast %cst_69 : f32 to vector<8x128xf32>
    %196 = arith.select %194, %163, %195 : vector<8x128xi1>, vector<8x128xf32>
    %197 = arith.addf %108, %196 : vector<8x128xf32>
    %198 = vector.broadcast %127 : i32 to vector<8x1xi32>
    %199 = arith.cmpi slt, %198, %13 : vector<8x1xi32>
    %cst_70 = arith.constant 0.000000e+00 : f32
    %200 = vector.shape_cast %199 : vector<8x1xi1> to vector<8x1xi1>
    %201 = vector.broadcast %200 : vector<8x1xi1> to vector<8x128xi1>
    %202 = vector.broadcast %cst_70 : f32 to vector<8x128xf32>
    %203 = arith.select %201, %190, %202 : vector<8x128xi1>, vector<8x128xf32>
    %204 = arith.addf %115, %203 : vector<8x128xf32>
    %205 = vector.broadcast %126 : i32 to vector<8x1xi32>
    %206 = arith.cmpi eq, %205, %15 : vector<8x1xi32>
    %207 = vector.shape_cast %206 : vector<8x1xi1> to vector<8x1xi1>
    %208 = vector.broadcast %207 : vector<8x1xi1> to vector<8x128xi1>
    %209 = arith.select %208, %163, %120 : vector<8x128xi1>, vector<8x128xf32>
    %210 = vector.broadcast %127 : i32 to vector<8x1xi32>
    %211 = arith.cmpi eq, %210, %15 : vector<8x1xi32>
    %212 = vector.shape_cast %211 : vector<8x1xi1> to vector<8x1xi1>
    %213 = vector.broadcast %212 : vector<8x1xi1> to vector<8x128xi1>
    %214 = arith.select %213, %190, %125 : vector<8x128xi1>, vector<8x128xf32>
    %c2_i32 = arith.constant 2 : i32
    %215 = arith.addi %18, %c2_i32 : i32
    %216 = arith.subi %20, %c2_i32 : i32
    %c8_i32_71 = arith.constant 8 : i32
    %217 = arith.muli %c2_i32, %c8_i32_71 : i32
    %218 = tpu.assume_multiple %217, 8 : i32
    %c7_i32_72 = arith.constant 7 : i32
    %219 = arith.subi %c7_i32_72, %c2_i32 : i32
    %c8_i32_73 = arith.constant 8 : i32
    %220 = arith.muli %219, %c8_i32_73 : i32
    %221 = tpu.assume_multiple %220, 8 : i32
    %222 = arith.index_cast %218 : i32 to index
    %c0_74 = arith.constant 0 : index
    %223 = vector.load %arg15[%222, %c0_74] : memref<64x512xf32, #tpu.memory_space<vmem>>, vector<8x512xf32>
    %224 = arith.index_cast %221 : i32 to index
    %c0_75 = arith.constant 0 : index
    %225 = vector.load %arg16[%224, %c0_75] : memref<64x512xf32, #tpu.memory_space<vmem>>, vector<8x512xf32>
    %cst_76 = arith.constant dense<0.000000e+00> : vector<8x512xf32>
    %226 = tpu.matmul %163, %16, %cst_76 {dimension_numbers = #tpu.dot_dimension_numbers<[1], [0], [0], [1], [0, 0, 1, 1], [], []>} : vector<8x128xf32>, vector<128x512xf32>, vector<8x512xf32> -> vector<8x512xf32>
    %227 = arith.addf %223, %226 : vector<8x512xf32>
    %228 = vector.extract_strided_slice %227 {offsets = [0, 128], sizes = [8, 128], strides = [1, 1]} : vector<8x512xf32> to vector<8x128xf32>
    %229 = arith.negf %228 : vector<8x128xf32>
    %230 = math.exp %229 : vector<8x128xf32>
    %cst_77 = arith.constant 1.000000e+00 : f32
    %231 = vector.broadcast %cst_77 : f32 to vector<8x128xf32>
    %232 = arith.addf %231, %230 : vector<8x128xf32>
    %233 = arith.divf %231, %232 : vector<8x128xf32>
    %234 = arith.mulf %233, %155 : vector<8x128xf32>
    %235 = vector.extract_strided_slice %227 {offsets = [0, 0], sizes = [8, 128], strides = [1, 1]} : vector<8x512xf32> to vector<8x128xf32>
    %236 = arith.negf %235 : vector<8x128xf32>
    %237 = math.exp %236 : vector<8x128xf32>
    %cst_78 = arith.constant 1.000000e+00 : f32
    %238 = vector.broadcast %cst_78 : f32 to vector<8x128xf32>
    %239 = arith.addf %238, %237 : vector<8x128xf32>
    %240 = arith.divf %238, %239 : vector<8x128xf32>
    %241 = vector.extract_strided_slice %227 {offsets = [0, 256], sizes = [8, 128], strides = [1, 1]} : vector<8x512xf32> to vector<8x128xf32>
    %242 = math.tanh %241 : vector<8x128xf32>
    %243 = arith.mulf %240, %242 : vector<8x128xf32>
    %244 = arith.addf %234, %243 : vector<8x128xf32>
    %245 = vector.extract_strided_slice %227 {offsets = [0, 384], sizes = [8, 128], strides = [1, 1]} : vector<8x512xf32> to vector<8x128xf32>
    %246 = arith.negf %245 : vector<8x128xf32>
    %247 = math.exp %246 : vector<8x128xf32>
    %cst_79 = arith.constant 1.000000e+00 : f32
    %248 = vector.broadcast %cst_79 : f32 to vector<8x128xf32>
    %249 = arith.addf %248, %247 : vector<8x128xf32>
    %250 = arith.divf %248, %249 : vector<8x128xf32>
    %251 = math.tanh %244 : vector<8x128xf32>
    %252 = arith.mulf %250, %251 : vector<8x128xf32>
    %cst_80 = arith.constant dense<0.000000e+00> : vector<8x512xf32>
    %253 = tpu.matmul %190, %17, %cst_80 {dimension_numbers = #tpu.dot_dimension_numbers<[1], [0], [0], [1], [0, 0, 1, 1], [], []>} : vector<8x128xf32>, vector<128x512xf32>, vector<8x512xf32> -> vector<8x512xf32>
    %254 = arith.addf %225, %253 : vector<8x512xf32>
    %255 = vector.extract_strided_slice %254 {offsets = [0, 128], sizes = [8, 128], strides = [1, 1]} : vector<8x512xf32> to vector<8x128xf32>
    %256 = arith.negf %255 : vector<8x128xf32>
    %257 = math.exp %256 : vector<8x128xf32>
    %cst_81 = arith.constant 1.000000e+00 : f32
    %258 = vector.broadcast %cst_81 : f32 to vector<8x128xf32>
    %259 = arith.addf %258, %257 : vector<8x128xf32>
    %260 = arith.divf %258, %259 : vector<8x128xf32>
    %261 = arith.mulf %260, %182 : vector<8x128xf32>
    %262 = vector.extract_strided_slice %254 {offsets = [0, 0], sizes = [8, 128], strides = [1, 1]} : vector<8x512xf32> to vector<8x128xf32>
    %263 = arith.negf %262 : vector<8x128xf32>
    %264 = math.exp %263 : vector<8x128xf32>
    %cst_82 = arith.constant 1.000000e+00 : f32
    %265 = vector.broadcast %cst_82 : f32 to vector<8x128xf32>
    %266 = arith.addf %265, %264 : vector<8x128xf32>
    %267 = arith.divf %265, %266 : vector<8x128xf32>
    %268 = vector.extract_strided_slice %254 {offsets = [0, 256], sizes = [8, 128], strides = [1, 1]} : vector<8x512xf32> to vector<8x128xf32>
    %269 = math.tanh %268 : vector<8x128xf32>
    %270 = arith.mulf %267, %269 : vector<8x128xf32>
    %271 = arith.addf %261, %270 : vector<8x128xf32>
    %272 = vector.extract_strided_slice %254 {offsets = [0, 384], sizes = [8, 128], strides = [1, 1]} : vector<8x512xf32> to vector<8x128xf32>
    %273 = arith.negf %272 : vector<8x128xf32>
    %274 = math.exp %273 : vector<8x128xf32>
    %cst_83 = arith.constant 1.000000e+00 : f32
    %275 = vector.broadcast %cst_83 : f32 to vector<8x128xf32>
    %276 = arith.addf %275, %274 : vector<8x128xf32>
    %277 = arith.divf %275, %276 : vector<8x128xf32>
    %278 = math.tanh %271 : vector<8x128xf32>
    %279 = arith.mulf %277, %278 : vector<8x128xf32>
    %280 = vector.broadcast %215 : i32 to vector<8x1xi32>
    %281 = arith.cmpi slt, %280, %13 : vector<8x1xi32>
    %cst_84 = arith.constant 0.000000e+00 : f32
    %282 = vector.shape_cast %281 : vector<8x1xi1> to vector<8x1xi1>
    %283 = vector.broadcast %282 : vector<8x1xi1> to vector<8x128xi1>
    %284 = vector.broadcast %cst_84 : f32 to vector<8x128xf32>
    %285 = arith.select %283, %252, %284 : vector<8x128xi1>, vector<8x128xf32>
    %286 = arith.addf %197, %285 : vector<8x128xf32>
    %287 = vector.broadcast %216 : i32 to vector<8x1xi32>
    %288 = arith.cmpi slt, %287, %13 : vector<8x1xi32>
    %cst_85 = arith.constant 0.000000e+00 : f32
    %289 = vector.shape_cast %288 : vector<8x1xi1> to vector<8x1xi1>
    %290 = vector.broadcast %289 : vector<8x1xi1> to vector<8x128xi1>
    %291 = vector.broadcast %cst_85 : f32 to vector<8x128xf32>
    %292 = arith.select %290, %279, %291 : vector<8x128xi1>, vector<8x128xf32>
    %293 = arith.addf %204, %292 : vector<8x128xf32>
    %294 = vector.broadcast %215 : i32 to vector<8x1xi32>
    %295 = arith.cmpi eq, %294, %15 : vector<8x1xi32>
    %296 = vector.shape_cast %295 : vector<8x1xi1> to vector<8x1xi1>
    %297 = vector.broadcast %296 : vector<8x1xi1> to vector<8x128xi1>
    %298 = arith.select %297, %252, %209 : vector<8x128xi1>, vector<8x128xf32>
    %299 = vector.broadcast %216 : i32 to vector<8x1xi32>
    %300 = arith.cmpi eq, %299, %15 : vector<8x1xi32>
    %301 = vector.shape_cast %300 : vector<8x1xi1> to vector<8x1xi1>
    %302 = vector.broadcast %301 : vector<8x1xi1> to vector<8x128xi1>
    %303 = arith.select %302, %279, %214 : vector<8x128xi1>, vector<8x128xf32>
    %c3_i32 = arith.constant 3 : i32
    %304 = arith.addi %18, %c3_i32 : i32
    %305 = arith.subi %20, %c3_i32 : i32
    %c8_i32_86 = arith.constant 8 : i32
    %306 = arith.muli %c3_i32, %c8_i32_86 : i32
    %307 = tpu.assume_multiple %306, 8 : i32
    %c7_i32_87 = arith.constant 7 : i32
    %308 = arith.subi %c7_i32_87, %c3_i32 : i32
    %c8_i32_88 = arith.constant 8 : i32
    %309 = arith.muli %308, %c8_i32_88 : i32
    %310 = tpu.assume_multiple %309, 8 : i32
    %311 = arith.index_cast %307 : i32 to index
    %c0_89 = arith.constant 0 : index
    %312 = vector.load %arg15[%311, %c0_89] : memref<64x512xf32, #tpu.memory_space<vmem>>, vector<8x512xf32>
    %313 = arith.index_cast %310 : i32 to index
    %c0_90 = arith.constant 0 : index
    %314 = vector.load %arg16[%313, %c0_90] : memref<64x512xf32, #tpu.memory_space<vmem>>, vector<8x512xf32>
    %cst_91 = arith.constant dense<0.000000e+00> : vector<8x512xf32>
    %315 = tpu.matmul %252, %16, %cst_91 {dimension_numbers = #tpu.dot_dimension_numbers<[1], [0], [0], [1], [0, 0, 1, 1], [], []>} : vector<8x128xf32>, vector<128x512xf32>, vector<8x512xf32> -> vector<8x512xf32>
    %316 = arith.addf %312, %315 : vector<8x512xf32>
    %317 = vector.extract_strided_slice %316 {offsets = [0, 128], sizes = [8, 128], strides = [1, 1]} : vector<8x512xf32> to vector<8x128xf32>
    %318 = arith.negf %317 : vector<8x128xf32>
    %319 = math.exp %318 : vector<8x128xf32>
    %cst_92 = arith.constant 1.000000e+00 : f32
    %320 = vector.broadcast %cst_92 : f32 to vector<8x128xf32>
    %321 = arith.addf %320, %319 : vector<8x128xf32>
    %322 = arith.divf %320, %321 : vector<8x128xf32>
    %323 = arith.mulf %322, %244 : vector<8x128xf32>
    %324 = vector.extract_strided_slice %316 {offsets = [0, 0], sizes = [8, 128], strides = [1, 1]} : vector<8x512xf32> to vector<8x128xf32>
    %325 = arith.negf %324 : vector<8x128xf32>
    %326 = math.exp %325 : vector<8x128xf32>
    %cst_93 = arith.constant 1.000000e+00 : f32
    %327 = vector.broadcast %cst_93 : f32 to vector<8x128xf32>
    %328 = arith.addf %327, %326 : vector<8x128xf32>
    %329 = arith.divf %327, %328 : vector<8x128xf32>
    %330 = vector.extract_strided_slice %316 {offsets = [0, 256], sizes = [8, 128], strides = [1, 1]} : vector<8x512xf32> to vector<8x128xf32>
    %331 = math.tanh %330 : vector<8x128xf32>
    %332 = arith.mulf %329, %331 : vector<8x128xf32>
    %333 = arith.addf %323, %332 : vector<8x128xf32>
    %334 = vector.extract_strided_slice %316 {offsets = [0, 384], sizes = [8, 128], strides = [1, 1]} : vector<8x512xf32> to vector<8x128xf32>
    %335 = arith.negf %334 : vector<8x128xf32>
    %336 = math.exp %335 : vector<8x128xf32>
    %cst_94 = arith.constant 1.000000e+00 : f32
    %337 = vector.broadcast %cst_94 : f32 to vector<8x128xf32>
    %338 = arith.addf %337, %336 : vector<8x128xf32>
    %339 = arith.divf %337, %338 : vector<8x128xf32>
    %340 = math.tanh %333 : vector<8x128xf32>
    %341 = arith.mulf %339, %340 : vector<8x128xf32>
    %cst_95 = arith.constant dense<0.000000e+00> : vector<8x512xf32>
    %342 = tpu.matmul %279, %17, %cst_95 {dimension_numbers = #tpu.dot_dimension_numbers<[1], [0], [0], [1], [0, 0, 1, 1], [], []>} : vector<8x128xf32>, vector<128x512xf32>, vector<8x512xf32> -> vector<8x512xf32>
    %343 = arith.addf %314, %342 : vector<8x512xf32>
    %344 = vector.extract_strided_slice %343 {offsets = [0, 128], sizes = [8, 128], strides = [1, 1]} : vector<8x512xf32> to vector<8x128xf32>
    %345 = arith.negf %344 : vector<8x128xf32>
    %346 = math.exp %345 : vector<8x128xf32>
    %cst_96 = arith.constant 1.000000e+00 : f32
    %347 = vector.broadcast %cst_96 : f32 to vector<8x128xf32>
    %348 = arith.addf %347, %346 : vector<8x128xf32>
    %349 = arith.divf %347, %348 : vector<8x128xf32>
    %350 = arith.mulf %349, %271 : vector<8x128xf32>
    %351 = vector.extract_strided_slice %343 {offsets = [0, 0], sizes = [8, 128], strides = [1, 1]} : vector<8x512xf32> to vector<8x128xf32>
    %352 = arith.negf %351 : vector<8x128xf32>
    %353 = math.exp %352 : vector<8x128xf32>
    %cst_97 = arith.constant 1.000000e+00 : f32
    %354 = vector.broadcast %cst_97 : f32 to vector<8x128xf32>
    %355 = arith.addf %354, %353 : vector<8x128xf32>
    %356 = arith.divf %354, %355 : vector<8x128xf32>
    %357 = vector.extract_strided_slice %343 {offsets = [0, 256], sizes = [8, 128], strides = [1, 1]} : vector<8x512xf32> to vector<8x128xf32>
    %358 = math.tanh %357 : vector<8x128xf32>
    %359 = arith.mulf %356, %358 : vector<8x128xf32>
    %360 = arith.addf %350, %359 : vector<8x128xf32>
    %361 = vector.extract_strided_slice %343 {offsets = [0, 384], sizes = [8, 128], strides = [1, 1]} : vector<8x512xf32> to vector<8x128xf32>
    %362 = arith.negf %361 : vector<8x128xf32>
    %363 = math.exp %362 : vector<8x128xf32>
    %cst_98 = arith.constant 1.000000e+00 : f32
    %364 = vector.broadcast %cst_98 : f32 to vector<8x128xf32>
    %365 = arith.addf %364, %363 : vector<8x128xf32>
    %366 = arith.divf %364, %365 : vector<8x128xf32>
    %367 = math.tanh %360 : vector<8x128xf32>
    %368 = arith.mulf %366, %367 : vector<8x128xf32>
    %369 = vector.broadcast %304 : i32 to vector<8x1xi32>
    %370 = arith.cmpi slt, %369, %13 : vector<8x1xi32>
    %cst_99 = arith.constant 0.000000e+00 : f32
    %371 = vector.shape_cast %370 : vector<8x1xi1> to vector<8x1xi1>
    %372 = vector.broadcast %371 : vector<8x1xi1> to vector<8x128xi1>
    %373 = vector.broadcast %cst_99 : f32 to vector<8x128xf32>
    %374 = arith.select %372, %341, %373 : vector<8x128xi1>, vector<8x128xf32>
    %375 = arith.addf %286, %374 : vector<8x128xf32>
    %376 = vector.broadcast %305 : i32 to vector<8x1xi32>
    %377 = arith.cmpi slt, %376, %13 : vector<8x1xi32>
    %cst_100 = arith.constant 0.000000e+00 : f32
    %378 = vector.shape_cast %377 : vector<8x1xi1> to vector<8x1xi1>
    %379 = vector.broadcast %378 : vector<8x1xi1> to vector<8x128xi1>
    %380 = vector.broadcast %cst_100 : f32 to vector<8x128xf32>
    %381 = arith.select %379, %368, %380 : vector<8x128xi1>, vector<8x128xf32>
    %382 = arith.addf %293, %381 : vector<8x128xf32>
    %383 = vector.broadcast %304 : i32 to vector<8x1xi32>
    %384 = arith.cmpi eq, %383, %15 : vector<8x1xi32>
    %385 = vector.shape_cast %384 : vector<8x1xi1> to vector<8x1xi1>
    %386 = vector.broadcast %385 : vector<8x1xi1> to vector<8x128xi1>
    %387 = arith.select %386, %341, %298 : vector<8x128xi1>, vector<8x128xf32>
    %388 = vector.broadcast %305 : i32 to vector<8x1xi32>
    %389 = arith.cmpi eq, %388, %15 : vector<8x1xi32>
    %390 = vector.shape_cast %389 : vector<8x1xi1> to vector<8x1xi1>
    %391 = vector.broadcast %390 : vector<8x1xi1> to vector<8x128xi1>
    %392 = arith.select %391, %368, %303 : vector<8x128xi1>, vector<8x128xf32>
    %c4_i32 = arith.constant 4 : i32
    %393 = arith.addi %18, %c4_i32 : i32
    %394 = arith.subi %20, %c4_i32 : i32
    %c8_i32_101 = arith.constant 8 : i32
    %395 = arith.muli %c4_i32, %c8_i32_101 : i32
    %396 = tpu.assume_multiple %395, 8 : i32
    %c7_i32_102 = arith.constant 7 : i32
    %397 = arith.subi %c7_i32_102, %c4_i32 : i32
    %c8_i32_103 = arith.constant 8 : i32
    %398 = arith.muli %397, %c8_i32_103 : i32
    %399 = tpu.assume_multiple %398, 8 : i32
    %400 = arith.index_cast %396 : i32 to index
    %c0_104 = arith.constant 0 : index
    %401 = vector.load %arg15[%400, %c0_104] : memref<64x512xf32, #tpu.memory_space<vmem>>, vector<8x512xf32>
    %402 = arith.index_cast %399 : i32 to index
    %c0_105 = arith.constant 0 : index
    %403 = vector.load %arg16[%402, %c0_105] : memref<64x512xf32, #tpu.memory_space<vmem>>, vector<8x512xf32>
    %cst_106 = arith.constant dense<0.000000e+00> : vector<8x512xf32>
    %404 = tpu.matmul %341, %16, %cst_106 {dimension_numbers = #tpu.dot_dimension_numbers<[1], [0], [0], [1], [0, 0, 1, 1], [], []>} : vector<8x128xf32>, vector<128x512xf32>, vector<8x512xf32> -> vector<8x512xf32>
    %405 = arith.addf %401, %404 : vector<8x512xf32>
    %406 = vector.extract_strided_slice %405 {offsets = [0, 128], sizes = [8, 128], strides = [1, 1]} : vector<8x512xf32> to vector<8x128xf32>
    %407 = arith.negf %406 : vector<8x128xf32>
    %408 = math.exp %407 : vector<8x128xf32>
    %cst_107 = arith.constant 1.000000e+00 : f32
    %409 = vector.broadcast %cst_107 : f32 to vector<8x128xf32>
    %410 = arith.addf %409, %408 : vector<8x128xf32>
    %411 = arith.divf %409, %410 : vector<8x128xf32>
    %412 = arith.mulf %411, %333 : vector<8x128xf32>
    %413 = vector.extract_strided_slice %405 {offsets = [0, 0], sizes = [8, 128], strides = [1, 1]} : vector<8x512xf32> to vector<8x128xf32>
    %414 = arith.negf %413 : vector<8x128xf32>
    %415 = math.exp %414 : vector<8x128xf32>
    %cst_108 = arith.constant 1.000000e+00 : f32
    %416 = vector.broadcast %cst_108 : f32 to vector<8x128xf32>
    %417 = arith.addf %416, %415 : vector<8x128xf32>
    %418 = arith.divf %416, %417 : vector<8x128xf32>
    %419 = vector.extract_strided_slice %405 {offsets = [0, 256], sizes = [8, 128], strides = [1, 1]} : vector<8x512xf32> to vector<8x128xf32>
    %420 = math.tanh %419 : vector<8x128xf32>
    %421 = arith.mulf %418, %420 : vector<8x128xf32>
    %422 = arith.addf %412, %421 : vector<8x128xf32>
    %423 = vector.extract_strided_slice %405 {offsets = [0, 384], sizes = [8, 128], strides = [1, 1]} : vector<8x512xf32> to vector<8x128xf32>
    %424 = arith.negf %423 : vector<8x128xf32>
    %425 = math.exp %424 : vector<8x128xf32>
    %cst_109 = arith.constant 1.000000e+00 : f32
    %426 = vector.broadcast %cst_109 : f32 to vector<8x128xf32>
    %427 = arith.addf %426, %425 : vector<8x128xf32>
    %428 = arith.divf %426, %427 : vector<8x128xf32>
    %429 = math.tanh %422 : vector<8x128xf32>
    %430 = arith.mulf %428, %429 : vector<8x128xf32>
    %cst_110 = arith.constant dense<0.000000e+00> : vector<8x512xf32>
    %431 = tpu.matmul %368, %17, %cst_110 {dimension_numbers = #tpu.dot_dimension_numbers<[1], [0], [0], [1], [0, 0, 1, 1], [], []>} : vector<8x128xf32>, vector<128x512xf32>, vector<8x512xf32> -> vector<8x512xf32>
    %432 = arith.addf %403, %431 : vector<8x512xf32>
    %433 = vector.extract_strided_slice %432 {offsets = [0, 128], sizes = [8, 128], strides = [1, 1]} : vector<8x512xf32> to vector<8x128xf32>
    %434 = arith.negf %433 : vector<8x128xf32>
    %435 = math.exp %434 : vector<8x128xf32>
    %cst_111 = arith.constant 1.000000e+00 : f32
    %436 = vector.broadcast %cst_111 : f32 to vector<8x128xf32>
    %437 = arith.addf %436, %435 : vector<8x128xf32>
    %438 = arith.divf %436, %437 : vector<8x128xf32>
    %439 = arith.mulf %438, %360 : vector<8x128xf32>
    %440 = vector.extract_strided_slice %432 {offsets = [0, 0], sizes = [8, 128], strides = [1, 1]} : vector<8x512xf32> to vector<8x128xf32>
    %441 = arith.negf %440 : vector<8x128xf32>
    %442 = math.exp %441 : vector<8x128xf32>
    %cst_112 = arith.constant 1.000000e+00 : f32
    %443 = vector.broadcast %cst_112 : f32 to vector<8x128xf32>
    %444 = arith.addf %443, %442 : vector<8x128xf32>
    %445 = arith.divf %443, %444 : vector<8x128xf32>
    %446 = vector.extract_strided_slice %432 {offsets = [0, 256], sizes = [8, 128], strides = [1, 1]} : vector<8x512xf32> to vector<8x128xf32>
    %447 = math.tanh %446 : vector<8x128xf32>
    %448 = arith.mulf %445, %447 : vector<8x128xf32>
    %449 = arith.addf %439, %448 : vector<8x128xf32>
    %450 = vector.extract_strided_slice %432 {offsets = [0, 384], sizes = [8, 128], strides = [1, 1]} : vector<8x512xf32> to vector<8x128xf32>
    %451 = arith.negf %450 : vector<8x128xf32>
    %452 = math.exp %451 : vector<8x128xf32>
    %cst_113 = arith.constant 1.000000e+00 : f32
    %453 = vector.broadcast %cst_113 : f32 to vector<8x128xf32>
    %454 = arith.addf %453, %452 : vector<8x128xf32>
    %455 = arith.divf %453, %454 : vector<8x128xf32>
    %456 = math.tanh %449 : vector<8x128xf32>
    %457 = arith.mulf %455, %456 : vector<8x128xf32>
    %458 = vector.broadcast %393 : i32 to vector<8x1xi32>
    %459 = arith.cmpi slt, %458, %13 : vector<8x1xi32>
    %cst_114 = arith.constant 0.000000e+00 : f32
    %460 = vector.shape_cast %459 : vector<8x1xi1> to vector<8x1xi1>
    %461 = vector.broadcast %460 : vector<8x1xi1> to vector<8x128xi1>
    %462 = vector.broadcast %cst_114 : f32 to vector<8x128xf32>
    %463 = arith.select %461, %430, %462 : vector<8x128xi1>, vector<8x128xf32>
    %464 = arith.addf %375, %463 : vector<8x128xf32>
    %465 = vector.broadcast %394 : i32 to vector<8x1xi32>
    %466 = arith.cmpi slt, %465, %13 : vector<8x1xi32>
    %cst_115 = arith.constant 0.000000e+00 : f32
    %467 = vector.shape_cast %466 : vector<8x1xi1> to vector<8x1xi1>
    %468 = vector.broadcast %467 : vector<8x1xi1> to vector<8x128xi1>
    %469 = vector.broadcast %cst_115 : f32 to vector<8x128xf32>
    %470 = arith.select %468, %457, %469 : vector<8x128xi1>, vector<8x128xf32>
    %471 = arith.addf %382, %470 : vector<8x128xf32>
    %472 = vector.broadcast %393 : i32 to vector<8x1xi32>
    %473 = arith.cmpi eq, %472, %15 : vector<8x1xi32>
    %474 = vector.shape_cast %473 : vector<8x1xi1> to vector<8x1xi1>
    %475 = vector.broadcast %474 : vector<8x1xi1> to vector<8x128xi1>
    %476 = arith.select %475, %430, %387 : vector<8x128xi1>, vector<8x128xf32>
    %477 = vector.broadcast %394 : i32 to vector<8x1xi32>
    %478 = arith.cmpi eq, %477, %15 : vector<8x1xi32>
    %479 = vector.shape_cast %478 : vector<8x1xi1> to vector<8x1xi1>
    %480 = vector.broadcast %479 : vector<8x1xi1> to vector<8x128xi1>
    %481 = arith.select %480, %457, %392 : vector<8x128xi1>, vector<8x128xf32>
    %c5_i32 = arith.constant 5 : i32
    %482 = arith.addi %18, %c5_i32 : i32
    %483 = arith.subi %20, %c5_i32 : i32
    %c8_i32_116 = arith.constant 8 : i32
    %484 = arith.muli %c5_i32, %c8_i32_116 : i32
    %485 = tpu.assume_multiple %484, 8 : i32
    %c7_i32_117 = arith.constant 7 : i32
    %486 = arith.subi %c7_i32_117, %c5_i32 : i32
    %c8_i32_118 = arith.constant 8 : i32
    %487 = arith.muli %486, %c8_i32_118 : i32
    %488 = tpu.assume_multiple %487, 8 : i32
    %489 = arith.index_cast %485 : i32 to index
    %c0_119 = arith.constant 0 : index
    %490 = vector.load %arg15[%489, %c0_119] : memref<64x512xf32, #tpu.memory_space<vmem>>, vector<8x512xf32>
    %491 = arith.index_cast %488 : i32 to index
    %c0_120 = arith.constant 0 : index
    %492 = vector.load %arg16[%491, %c0_120] : memref<64x512xf32, #tpu.memory_space<vmem>>, vector<8x512xf32>
    %cst_121 = arith.constant dense<0.000000e+00> : vector<8x512xf32>
    %493 = tpu.matmul %430, %16, %cst_121 {dimension_numbers = #tpu.dot_dimension_numbers<[1], [0], [0], [1], [0, 0, 1, 1], [], []>} : vector<8x128xf32>, vector<128x512xf32>, vector<8x512xf32> -> vector<8x512xf32>
    %494 = arith.addf %490, %493 : vector<8x512xf32>
    %495 = vector.extract_strided_slice %494 {offsets = [0, 128], sizes = [8, 128], strides = [1, 1]} : vector<8x512xf32> to vector<8x128xf32>
    %496 = arith.negf %495 : vector<8x128xf32>
    %497 = math.exp %496 : vector<8x128xf32>
    %cst_122 = arith.constant 1.000000e+00 : f32
    %498 = vector.broadcast %cst_122 : f32 to vector<8x128xf32>
    %499 = arith.addf %498, %497 : vector<8x128xf32>
    %500 = arith.divf %498, %499 : vector<8x128xf32>
    %501 = arith.mulf %500, %422 : vector<8x128xf32>
    %502 = vector.extract_strided_slice %494 {offsets = [0, 0], sizes = [8, 128], strides = [1, 1]} : vector<8x512xf32> to vector<8x128xf32>
    %503 = arith.negf %502 : vector<8x128xf32>
    %504 = math.exp %503 : vector<8x128xf32>
    %cst_123 = arith.constant 1.000000e+00 : f32
    %505 = vector.broadcast %cst_123 : f32 to vector<8x128xf32>
    %506 = arith.addf %505, %504 : vector<8x128xf32>
    %507 = arith.divf %505, %506 : vector<8x128xf32>
    %508 = vector.extract_strided_slice %494 {offsets = [0, 256], sizes = [8, 128], strides = [1, 1]} : vector<8x512xf32> to vector<8x128xf32>
    %509 = math.tanh %508 : vector<8x128xf32>
    %510 = arith.mulf %507, %509 : vector<8x128xf32>
    %511 = arith.addf %501, %510 : vector<8x128xf32>
    %512 = vector.extract_strided_slice %494 {offsets = [0, 384], sizes = [8, 128], strides = [1, 1]} : vector<8x512xf32> to vector<8x128xf32>
    %513 = arith.negf %512 : vector<8x128xf32>
    %514 = math.exp %513 : vector<8x128xf32>
    %cst_124 = arith.constant 1.000000e+00 : f32
    %515 = vector.broadcast %cst_124 : f32 to vector<8x128xf32>
    %516 = arith.addf %515, %514 : vector<8x128xf32>
    %517 = arith.divf %515, %516 : vector<8x128xf32>
    %518 = math.tanh %511 : vector<8x128xf32>
    %519 = arith.mulf %517, %518 : vector<8x128xf32>
    %cst_125 = arith.constant dense<0.000000e+00> : vector<8x512xf32>
    %520 = tpu.matmul %457, %17, %cst_125 {dimension_numbers = #tpu.dot_dimension_numbers<[1], [0], [0], [1], [0, 0, 1, 1], [], []>} : vector<8x128xf32>, vector<128x512xf32>, vector<8x512xf32> -> vector<8x512xf32>
    %521 = arith.addf %492, %520 : vector<8x512xf32>
    %522 = vector.extract_strided_slice %521 {offsets = [0, 128], sizes = [8, 128], strides = [1, 1]} : vector<8x512xf32> to vector<8x128xf32>
    %523 = arith.negf %522 : vector<8x128xf32>
    %524 = math.exp %523 : vector<8x128xf32>
    %cst_126 = arith.constant 1.000000e+00 : f32
    %525 = vector.broadcast %cst_126 : f32 to vector<8x128xf32>
    %526 = arith.addf %525, %524 : vector<8x128xf32>
    %527 = arith.divf %525, %526 : vector<8x128xf32>
    %528 = arith.mulf %527, %449 : vector<8x128xf32>
    %529 = vector.extract_strided_slice %521 {offsets = [0, 0], sizes = [8, 128], strides = [1, 1]} : vector<8x512xf32> to vector<8x128xf32>
    %530 = arith.negf %529 : vector<8x128xf32>
    %531 = math.exp %530 : vector<8x128xf32>
    %cst_127 = arith.constant 1.000000e+00 : f32
    %532 = vector.broadcast %cst_127 : f32 to vector<8x128xf32>
    %533 = arith.addf %532, %531 : vector<8x128xf32>
    %534 = arith.divf %532, %533 : vector<8x128xf32>
    %535 = vector.extract_strided_slice %521 {offsets = [0, 256], sizes = [8, 128], strides = [1, 1]} : vector<8x512xf32> to vector<8x128xf32>
    %536 = math.tanh %535 : vector<8x128xf32>
    %537 = arith.mulf %534, %536 : vector<8x128xf32>
    %538 = arith.addf %528, %537 : vector<8x128xf32>
    %539 = vector.extract_strided_slice %521 {offsets = [0, 384], sizes = [8, 128], strides = [1, 1]} : vector<8x512xf32> to vector<8x128xf32>
    %540 = arith.negf %539 : vector<8x128xf32>
    %541 = math.exp %540 : vector<8x128xf32>
    %cst_128 = arith.constant 1.000000e+00 : f32
    %542 = vector.broadcast %cst_128 : f32 to vector<8x128xf32>
    %543 = arith.addf %542, %541 : vector<8x128xf32>
    %544 = arith.divf %542, %543 : vector<8x128xf32>
    %545 = math.tanh %538 : vector<8x128xf32>
    %546 = arith.mulf %544, %545 : vector<8x128xf32>
    %547 = vector.broadcast %482 : i32 to vector<8x1xi32>
    %548 = arith.cmpi slt, %547, %13 : vector<8x1xi32>
    %cst_129 = arith.constant 0.000000e+00 : f32
    %549 = vector.shape_cast %548 : vector<8x1xi1> to vector<8x1xi1>
    %550 = vector.broadcast %549 : vector<8x1xi1> to vector<8x128xi1>
    %551 = vector.broadcast %cst_129 : f32 to vector<8x128xf32>
    %552 = arith.select %550, %519, %551 : vector<8x128xi1>, vector<8x128xf32>
    %553 = arith.addf %464, %552 : vector<8x128xf32>
    %554 = vector.broadcast %483 : i32 to vector<8x1xi32>
    %555 = arith.cmpi slt, %554, %13 : vector<8x1xi32>
    %cst_130 = arith.constant 0.000000e+00 : f32
    %556 = vector.shape_cast %555 : vector<8x1xi1> to vector<8x1xi1>
    %557 = vector.broadcast %556 : vector<8x1xi1> to vector<8x128xi1>
    %558 = vector.broadcast %cst_130 : f32 to vector<8x128xf32>
    %559 = arith.select %557, %546, %558 : vector<8x128xi1>, vector<8x128xf32>
    %560 = arith.addf %471, %559 : vector<8x128xf32>
    %561 = vector.broadcast %482 : i32 to vector<8x1xi32>
    %562 = arith.cmpi eq, %561, %15 : vector<8x1xi32>
    %563 = vector.shape_cast %562 : vector<8x1xi1> to vector<8x1xi1>
    %564 = vector.broadcast %563 : vector<8x1xi1> to vector<8x128xi1>
    %565 = arith.select %564, %519, %476 : vector<8x128xi1>, vector<8x128xf32>
    %566 = vector.broadcast %483 : i32 to vector<8x1xi32>
    %567 = arith.cmpi eq, %566, %15 : vector<8x1xi32>
    %568 = vector.shape_cast %567 : vector<8x1xi1> to vector<8x1xi1>
    %569 = vector.broadcast %568 : vector<8x1xi1> to vector<8x128xi1>
    %570 = arith.select %569, %546, %481 : vector<8x128xi1>, vector<8x128xf32>
    %c6_i32 = arith.constant 6 : i32
    %571 = arith.addi %18, %c6_i32 : i32
    %572 = arith.subi %20, %c6_i32 : i32
    %c8_i32_131 = arith.constant 8 : i32
    %573 = arith.muli %c6_i32, %c8_i32_131 : i32
    %574 = tpu.assume_multiple %573, 8 : i32
    %c7_i32_132 = arith.constant 7 : i32
    %575 = arith.subi %c7_i32_132, %c6_i32 : i32
    %c8_i32_133 = arith.constant 8 : i32
    %576 = arith.muli %575, %c8_i32_133 : i32
    %577 = tpu.assume_multiple %576, 8 : i32
    %578 = arith.index_cast %574 : i32 to index
    %c0_134 = arith.constant 0 : index
    %579 = vector.load %arg15[%578, %c0_134] : memref<64x512xf32, #tpu.memory_space<vmem>>, vector<8x512xf32>
    %580 = arith.index_cast %577 : i32 to index
    %c0_135 = arith.constant 0 : index
    %581 = vector.load %arg16[%580, %c0_135] : memref<64x512xf32, #tpu.memory_space<vmem>>, vector<8x512xf32>
    %cst_136 = arith.constant dense<0.000000e+00> : vector<8x512xf32>
    %582 = tpu.matmul %519, %16, %cst_136 {dimension_numbers = #tpu.dot_dimension_numbers<[1], [0], [0], [1], [0, 0, 1, 1], [], []>} : vector<8x128xf32>, vector<128x512xf32>, vector<8x512xf32> -> vector<8x512xf32>
    %583 = arith.addf %579, %582 : vector<8x512xf32>
    %584 = vector.extract_strided_slice %583 {offsets = [0, 128], sizes = [8, 128], strides = [1, 1]} : vector<8x512xf32> to vector<8x128xf32>
    %585 = arith.negf %584 : vector<8x128xf32>
    %586 = math.exp %585 : vector<8x128xf32>
    %cst_137 = arith.constant 1.000000e+00 : f32
    %587 = vector.broadcast %cst_137 : f32 to vector<8x128xf32>
    %588 = arith.addf %587, %586 : vector<8x128xf32>
    %589 = arith.divf %587, %588 : vector<8x128xf32>
    %590 = arith.mulf %589, %511 : vector<8x128xf32>
    %591 = vector.extract_strided_slice %583 {offsets = [0, 0], sizes = [8, 128], strides = [1, 1]} : vector<8x512xf32> to vector<8x128xf32>
    %592 = arith.negf %591 : vector<8x128xf32>
    %593 = math.exp %592 : vector<8x128xf32>
    %cst_138 = arith.constant 1.000000e+00 : f32
    %594 = vector.broadcast %cst_138 : f32 to vector<8x128xf32>
    %595 = arith.addf %594, %593 : vector<8x128xf32>
    %596 = arith.divf %594, %595 : vector<8x128xf32>
    %597 = vector.extract_strided_slice %583 {offsets = [0, 256], sizes = [8, 128], strides = [1, 1]} : vector<8x512xf32> to vector<8x128xf32>
    %598 = math.tanh %597 : vector<8x128xf32>
    %599 = arith.mulf %596, %598 : vector<8x128xf32>
    %600 = arith.addf %590, %599 : vector<8x128xf32>
    %601 = vector.extract_strided_slice %583 {offsets = [0, 384], sizes = [8, 128], strides = [1, 1]} : vector<8x512xf32> to vector<8x128xf32>
    %602 = arith.negf %601 : vector<8x128xf32>
    %603 = math.exp %602 : vector<8x128xf32>
    %cst_139 = arith.constant 1.000000e+00 : f32
    %604 = vector.broadcast %cst_139 : f32 to vector<8x128xf32>
    %605 = arith.addf %604, %603 : vector<8x128xf32>
    %606 = arith.divf %604, %605 : vector<8x128xf32>
    %607 = math.tanh %600 : vector<8x128xf32>
    %608 = arith.mulf %606, %607 : vector<8x128xf32>
    %cst_140 = arith.constant dense<0.000000e+00> : vector<8x512xf32>
    %609 = tpu.matmul %546, %17, %cst_140 {dimension_numbers = #tpu.dot_dimension_numbers<[1], [0], [0], [1], [0, 0, 1, 1], [], []>} : vector<8x128xf32>, vector<128x512xf32>, vector<8x512xf32> -> vector<8x512xf32>
    %610 = arith.addf %581, %609 : vector<8x512xf32>
    %611 = vector.extract_strided_slice %610 {offsets = [0, 128], sizes = [8, 128], strides = [1, 1]} : vector<8x512xf32> to vector<8x128xf32>
    %612 = arith.negf %611 : vector<8x128xf32>
    %613 = math.exp %612 : vector<8x128xf32>
    %cst_141 = arith.constant 1.000000e+00 : f32
    %614 = vector.broadcast %cst_141 : f32 to vector<8x128xf32>
    %615 = arith.addf %614, %613 : vector<8x128xf32>
    %616 = arith.divf %614, %615 : vector<8x128xf32>
    %617 = arith.mulf %616, %538 : vector<8x128xf32>
    %618 = vector.extract_strided_slice %610 {offsets = [0, 0], sizes = [8, 128], strides = [1, 1]} : vector<8x512xf32> to vector<8x128xf32>
    %619 = arith.negf %618 : vector<8x128xf32>
    %620 = math.exp %619 : vector<8x128xf32>
    %cst_142 = arith.constant 1.000000e+00 : f32
    %621 = vector.broadcast %cst_142 : f32 to vector<8x128xf32>
    %622 = arith.addf %621, %620 : vector<8x128xf32>
    %623 = arith.divf %621, %622 : vector<8x128xf32>
    %624 = vector.extract_strided_slice %610 {offsets = [0, 256], sizes = [8, 128], strides = [1, 1]} : vector<8x512xf32> to vector<8x128xf32>
    %625 = math.tanh %624 : vector<8x128xf32>
    %626 = arith.mulf %623, %625 : vector<8x128xf32>
    %627 = arith.addf %617, %626 : vector<8x128xf32>
    %628 = vector.extract_strided_slice %610 {offsets = [0, 384], sizes = [8, 128], strides = [1, 1]} : vector<8x512xf32> to vector<8x128xf32>
    %629 = arith.negf %628 : vector<8x128xf32>
    %630 = math.exp %629 : vector<8x128xf32>
    %cst_143 = arith.constant 1.000000e+00 : f32
    %631 = vector.broadcast %cst_143 : f32 to vector<8x128xf32>
    %632 = arith.addf %631, %630 : vector<8x128xf32>
    %633 = arith.divf %631, %632 : vector<8x128xf32>
    %634 = math.tanh %627 : vector<8x128xf32>
    %635 = arith.mulf %633, %634 : vector<8x128xf32>
    %636 = vector.broadcast %571 : i32 to vector<8x1xi32>
    %637 = arith.cmpi slt, %636, %13 : vector<8x1xi32>
    %cst_144 = arith.constant 0.000000e+00 : f32
    %638 = vector.shape_cast %637 : vector<8x1xi1> to vector<8x1xi1>
    %639 = vector.broadcast %638 : vector<8x1xi1> to vector<8x128xi1>
    %640 = vector.broadcast %cst_144 : f32 to vector<8x128xf32>
    %641 = arith.select %639, %608, %640 : vector<8x128xi1>, vector<8x128xf32>
    %642 = arith.addf %553, %641 : vector<8x128xf32>
    %643 = vector.broadcast %572 : i32 to vector<8x1xi32>
    %644 = arith.cmpi slt, %643, %13 : vector<8x1xi32>
    %cst_145 = arith.constant 0.000000e+00 : f32
    %645 = vector.shape_cast %644 : vector<8x1xi1> to vector<8x1xi1>
    %646 = vector.broadcast %645 : vector<8x1xi1> to vector<8x128xi1>
    %647 = vector.broadcast %cst_145 : f32 to vector<8x128xf32>
    %648 = arith.select %646, %635, %647 : vector<8x128xi1>, vector<8x128xf32>
    %649 = arith.addf %560, %648 : vector<8x128xf32>
    %650 = vector.broadcast %571 : i32 to vector<8x1xi32>
    %651 = arith.cmpi eq, %650, %15 : vector<8x1xi32>
    %652 = vector.shape_cast %651 : vector<8x1xi1> to vector<8x1xi1>
    %653 = vector.broadcast %652 : vector<8x1xi1> to vector<8x128xi1>
    %654 = arith.select %653, %608, %565 : vector<8x128xi1>, vector<8x128xf32>
    %655 = vector.broadcast %572 : i32 to vector<8x1xi32>
    %656 = arith.cmpi eq, %655, %15 : vector<8x1xi32>
    %657 = vector.shape_cast %656 : vector<8x1xi1> to vector<8x1xi1>
    %658 = vector.broadcast %657 : vector<8x1xi1> to vector<8x128xi1>
    %659 = arith.select %658, %635, %570 : vector<8x128xi1>, vector<8x128xf32>
    %c7_i32_146 = arith.constant 7 : i32
    %660 = arith.addi %18, %c7_i32_146 : i32
    %661 = arith.subi %20, %c7_i32_146 : i32
    %c8_i32_147 = arith.constant 8 : i32
    %662 = arith.muli %c7_i32_146, %c8_i32_147 : i32
    %663 = tpu.assume_multiple %662, 8 : i32
    %c7_i32_148 = arith.constant 7 : i32
    %664 = arith.subi %c7_i32_148, %c7_i32_146 : i32
    %c8_i32_149 = arith.constant 8 : i32
    %665 = arith.muli %664, %c8_i32_149 : i32
    %666 = tpu.assume_multiple %665, 8 : i32
    %667 = arith.index_cast %663 : i32 to index
    %c0_150 = arith.constant 0 : index
    %668 = vector.load %arg15[%667, %c0_150] : memref<64x512xf32, #tpu.memory_space<vmem>>, vector<8x512xf32>
    %669 = arith.index_cast %666 : i32 to index
    %c0_151 = arith.constant 0 : index
    %670 = vector.load %arg16[%669, %c0_151] : memref<64x512xf32, #tpu.memory_space<vmem>>, vector<8x512xf32>
    %cst_152 = arith.constant dense<0.000000e+00> : vector<8x512xf32>
    %671 = tpu.matmul %608, %16, %cst_152 {dimension_numbers = #tpu.dot_dimension_numbers<[1], [0], [0], [1], [0, 0, 1, 1], [], []>} : vector<8x128xf32>, vector<128x512xf32>, vector<8x512xf32> -> vector<8x512xf32>
    %672 = arith.addf %668, %671 : vector<8x512xf32>
    %673 = vector.extract_strided_slice %672 {offsets = [0, 128], sizes = [8, 128], strides = [1, 1]} : vector<8x512xf32> to vector<8x128xf32>
    %674 = arith.negf %673 : vector<8x128xf32>
    %675 = math.exp %674 : vector<8x128xf32>
    %cst_153 = arith.constant 1.000000e+00 : f32
    %676 = vector.broadcast %cst_153 : f32 to vector<8x128xf32>
    %677 = arith.addf %676, %675 : vector<8x128xf32>
    %678 = arith.divf %676, %677 : vector<8x128xf32>
    %679 = arith.mulf %678, %600 : vector<8x128xf32>
    %680 = vector.extract_strided_slice %672 {offsets = [0, 0], sizes = [8, 128], strides = [1, 1]} : vector<8x512xf32> to vector<8x128xf32>
    %681 = arith.negf %680 : vector<8x128xf32>
    %682 = math.exp %681 : vector<8x128xf32>
    %cst_154 = arith.constant 1.000000e+00 : f32
    %683 = vector.broadcast %cst_154 : f32 to vector<8x128xf32>
    %684 = arith.addf %683, %682 : vector<8x128xf32>
    %685 = arith.divf %683, %684 : vector<8x128xf32>
    %686 = vector.extract_strided_slice %672 {offsets = [0, 256], sizes = [8, 128], strides = [1, 1]} : vector<8x512xf32> to vector<8x128xf32>
    %687 = math.tanh %686 : vector<8x128xf32>
    %688 = arith.mulf %685, %687 : vector<8x128xf32>
    %689 = arith.addf %679, %688 : vector<8x128xf32>
    %690 = vector.extract_strided_slice %672 {offsets = [0, 384], sizes = [8, 128], strides = [1, 1]} : vector<8x512xf32> to vector<8x128xf32>
    %691 = arith.negf %690 : vector<8x128xf32>
    %692 = math.exp %691 : vector<8x128xf32>
    %cst_155 = arith.constant 1.000000e+00 : f32
    %693 = vector.broadcast %cst_155 : f32 to vector<8x128xf32>
    %694 = arith.addf %693, %692 : vector<8x128xf32>
    %695 = arith.divf %693, %694 : vector<8x128xf32>
    %696 = math.tanh %689 : vector<8x128xf32>
    %697 = arith.mulf %695, %696 : vector<8x128xf32>
    %cst_156 = arith.constant dense<0.000000e+00> : vector<8x512xf32>
    %698 = tpu.matmul %635, %17, %cst_156 {dimension_numbers = #tpu.dot_dimension_numbers<[1], [0], [0], [1], [0, 0, 1, 1], [], []>} : vector<8x128xf32>, vector<128x512xf32>, vector<8x512xf32> -> vector<8x512xf32>
    %699 = arith.addf %670, %698 : vector<8x512xf32>
    %700 = vector.extract_strided_slice %699 {offsets = [0, 128], sizes = [8, 128], strides = [1, 1]} : vector<8x512xf32> to vector<8x128xf32>
    %701 = arith.negf %700 : vector<8x128xf32>
    %702 = math.exp %701 : vector<8x128xf32>
    %cst_157 = arith.constant 1.000000e+00 : f32
    %703 = vector.broadcast %cst_157 : f32 to vector<8x128xf32>
    %704 = arith.addf %703, %702 : vector<8x128xf32>
    %705 = arith.divf %703, %704 : vector<8x128xf32>
    %706 = arith.mulf %705, %627 : vector<8x128xf32>
    %707 = vector.extract_strided_slice %699 {offsets = [0, 0], sizes = [8, 128], strides = [1, 1]} : vector<8x512xf32> to vector<8x128xf32>
    %708 = arith.negf %707 : vector<8x128xf32>
    %709 = math.exp %708 : vector<8x128xf32>
    %cst_158 = arith.constant 1.000000e+00 : f32
    %710 = vector.broadcast %cst_158 : f32 to vector<8x128xf32>
    %711 = arith.addf %710, %709 : vector<8x128xf32>
    %712 = arith.divf %710, %711 : vector<8x128xf32>
    %713 = vector.extract_strided_slice %699 {offsets = [0, 256], sizes = [8, 128], strides = [1, 1]} : vector<8x512xf32> to vector<8x128xf32>
    %714 = math.tanh %713 : vector<8x128xf32>
    %715 = arith.mulf %712, %714 : vector<8x128xf32>
    %716 = arith.addf %706, %715 : vector<8x128xf32>
    %717 = vector.extract_strided_slice %699 {offsets = [0, 384], sizes = [8, 128], strides = [1, 1]} : vector<8x512xf32> to vector<8x128xf32>
    %718 = arith.negf %717 : vector<8x128xf32>
    %719 = math.exp %718 : vector<8x128xf32>
    %cst_159 = arith.constant 1.000000e+00 : f32
    %720 = vector.broadcast %cst_159 : f32 to vector<8x128xf32>
    %721 = arith.addf %720, %719 : vector<8x128xf32>
    %722 = arith.divf %720, %721 : vector<8x128xf32>
    %723 = math.tanh %716 : vector<8x128xf32>
    %724 = arith.mulf %722, %723 : vector<8x128xf32>
    %725 = vector.broadcast %660 : i32 to vector<8x1xi32>
    %726 = arith.cmpi slt, %725, %13 : vector<8x1xi32>
    %cst_160 = arith.constant 0.000000e+00 : f32
    %727 = vector.shape_cast %726 : vector<8x1xi1> to vector<8x1xi1>
    %728 = vector.broadcast %727 : vector<8x1xi1> to vector<8x128xi1>
    %729 = vector.broadcast %cst_160 : f32 to vector<8x128xf32>
    %730 = arith.select %728, %697, %729 : vector<8x128xi1>, vector<8x128xf32>
    %731 = arith.addf %642, %730 : vector<8x128xf32>
    %732 = vector.broadcast %661 : i32 to vector<8x1xi32>
    %733 = arith.cmpi slt, %732, %13 : vector<8x1xi32>
    %cst_161 = arith.constant 0.000000e+00 : f32
    %734 = vector.shape_cast %733 : vector<8x1xi1> to vector<8x1xi1>
    %735 = vector.broadcast %734 : vector<8x1xi1> to vector<8x128xi1>
    %736 = vector.broadcast %cst_161 : f32 to vector<8x128xf32>
    %737 = arith.select %735, %724, %736 : vector<8x128xi1>, vector<8x128xf32>
    %738 = arith.addf %649, %737 : vector<8x128xf32>
    %739 = vector.broadcast %660 : i32 to vector<8x1xi32>
    %740 = arith.cmpi eq, %739, %15 : vector<8x1xi32>
    %741 = vector.shape_cast %740 : vector<8x1xi1> to vector<8x1xi1>
    %742 = vector.broadcast %741 : vector<8x1xi1> to vector<8x128xi1>
    %743 = arith.select %742, %697, %654 : vector<8x128xi1>, vector<8x128xf32>
    %744 = vector.broadcast %661 : i32 to vector<8x1xi32>
    %745 = arith.cmpi eq, %744, %15 : vector<8x1xi32>
    %746 = vector.shape_cast %745 : vector<8x1xi1> to vector<8x1xi1>
    %747 = vector.broadcast %746 : vector<8x1xi1> to vector<8x128xi1>
    %748 = arith.select %747, %724, %659 : vector<8x128xi1>, vector<8x128xf32>
    %c8_i32_162 = arith.constant 8 : i32
    %c0_163 = arith.constant 0 : index
    %c0_164 = arith.constant 0 : index
    %c0_165 = arith.constant 0 : index
    %749 = vector.load %arg14[%c0_163, %c0_164, %c0_165] : memref<8x8x128xf32, #tpu.memory_space<vmem>>, vector<1x8x128xf32>
    %750 = vector.shape_cast %749 : vector<1x8x128xf32> to vector<8x128xf32>
    %751 = vector.shape_cast %697 : vector<8x128xf32> to vector<1x8x128xf32>
    tpu.vector_store %arg14[%c0_163, %c0_164, %c0_165], %751 {strides = array<i32>} : memref<8x8x128xf32, #tpu.memory_space<vmem>>, vector<1x8x128xf32>,
    %c1_166 = arith.constant 1 : index
    %c0_167 = arith.constant 0 : index
    %c0_168 = arith.constant 0 : index
    %752 = vector.load %arg14[%c1_166, %c0_167, %c0_168] : memref<8x8x128xf32, #tpu.memory_space<vmem>>, vector<1x8x128xf32>
    %753 = vector.shape_cast %752 : vector<1x8x128xf32> to vector<8x128xf32>
    %754 = vector.shape_cast %689 : vector<8x128xf32> to vector<1x8x128xf32>
    tpu.vector_store %arg14[%c1_166, %c0_167, %c0_168], %754 {strides = array<i32>} : memref<8x8x128xf32, #tpu.memory_space<vmem>>, vector<1x8x128xf32>,
    %c2_169 = arith.constant 2 : index
    %c0_170 = arith.constant 0 : index
    %c0_171 = arith.constant 0 : index
    %755 = vector.load %arg14[%c2_169, %c0_170, %c0_171] : memref<8x8x128xf32, #tpu.memory_space<vmem>>, vector<1x8x128xf32>
    %756 = vector.shape_cast %755 : vector<1x8x128xf32> to vector<8x128xf32>
    %757 = vector.shape_cast %724 : vector<8x128xf32> to vector<1x8x128xf32>
    tpu.vector_store %arg14[%c2_169, %c0_170, %c0_171], %757 {strides = array<i32>} : memref<8x8x128xf32, #tpu.memory_space<vmem>>, vector<1x8x128xf32>,
    %c3_172 = arith.constant 3 : index
    %c0_173 = arith.constant 0 : index
    %c0_174 = arith.constant 0 : index
    %758 = vector.load %arg14[%c3_172, %c0_173, %c0_174] : memref<8x8x128xf32, #tpu.memory_space<vmem>>, vector<1x8x128xf32>
    %759 = vector.shape_cast %758 : vector<1x8x128xf32> to vector<8x128xf32>
    %760 = vector.shape_cast %716 : vector<8x128xf32> to vector<1x8x128xf32>
    tpu.vector_store %arg14[%c3_172, %c0_173, %c0_174], %760 {strides = array<i32>} : memref<8x8x128xf32, #tpu.memory_space<vmem>>, vector<1x8x128xf32>,
    %c4_175 = arith.constant 4 : index
    %c0_176 = arith.constant 0 : index
    %c0_177 = arith.constant 0 : index
    %761 = vector.load %arg14[%c4_175, %c0_176, %c0_177] : memref<8x8x128xf32, #tpu.memory_space<vmem>>, vector<1x8x128xf32>
    %762 = vector.shape_cast %761 : vector<1x8x128xf32> to vector<8x128xf32>
    %763 = vector.shape_cast %731 : vector<8x128xf32> to vector<1x8x128xf32>
    tpu.vector_store %arg14[%c4_175, %c0_176, %c0_177], %763 {strides = array<i32>} : memref<8x8x128xf32, #tpu.memory_space<vmem>>, vector<1x8x128xf32>,
    %c5_178 = arith.constant 5 : index
    %c0_179 = arith.constant 0 : index
    %c0_180 = arith.constant 0 : index
    %764 = vector.load %arg14[%c5_178, %c0_179, %c0_180] : memref<8x8x128xf32, #tpu.memory_space<vmem>>, vector<1x8x128xf32>
    %765 = vector.shape_cast %764 : vector<1x8x128xf32> to vector<8x128xf32>
    %766 = vector.shape_cast %738 : vector<8x128xf32> to vector<1x8x128xf32>
    tpu.vector_store %arg14[%c5_178, %c0_179, %c0_180], %766 {strides = array<i32>} : memref<8x8x128xf32, #tpu.memory_space<vmem>>, vector<1x8x128xf32>,
    %c6_181 = arith.constant 6 : index
    %c0_182 = arith.constant 0 : index
    %c0_183 = arith.constant 0 : index
    %767 = vector.load %arg14[%c6_181, %c0_182, %c0_183] : memref<8x8x128xf32, #tpu.memory_space<vmem>>, vector<1x8x128xf32>
    %768 = vector.shape_cast %767 : vector<1x8x128xf32> to vector<8x128xf32>
    %769 = vector.shape_cast %743 : vector<8x128xf32> to vector<1x8x128xf32>
    tpu.vector_store %arg14[%c6_181, %c0_182, %c0_183], %769 {strides = array<i32>} : memref<8x8x128xf32, #tpu.memory_space<vmem>>, vector<1x8x128xf32>,
    %c7_184 = arith.constant 7 : index
    %c0_185 = arith.constant 0 : index
    %c0_186 = arith.constant 0 : index
    %770 = vector.load %arg14[%c7_184, %c0_185, %c0_186] : memref<8x8x128xf32, #tpu.memory_space<vmem>>, vector<1x8x128xf32>
    %771 = vector.shape_cast %770 : vector<1x8x128xf32> to vector<8x128xf32>
    %772 = vector.shape_cast %748 : vector<8x128xf32> to vector<1x8x128xf32>
    tpu.vector_store %arg14[%c7_184, %c0_185, %c0_186], %772 {strides = array<i32>} : memref<8x8x128xf32, #tpu.memory_space<vmem>>, vector<1x8x128xf32>,
    %c0_i32_187 = arith.constant 0 : i32
    %773 = arith.cmpi eq, %arg1, %c0_i32_187 : i32
    %774 = arith.extui %773 : i1 to i32
    %c0_i32_188 = arith.constant 0 : i32
    %775 = arith.cmpi ne, %774, %c0_i32_188 : i32
    scf.if %775 {
      %c1_i32_189 = arith.constant 1 : i32
      %776 = vector.broadcast %c1_i32_189 : i32 to vector<8x1xi32>
      %777 = arith.maxsi %13, %776 : vector<8x1xi32>
      %778 = arith.sitofp %777 : vector<8x1xi32> to vector<8x1xf32>
      %cst_190 = arith.constant 1.000000e+00 : f32
      %779 = vector.broadcast %cst_190 : f32 to vector<8x1xf32>
      %780 = arith.divf %779, %778 : vector<8x1xf32>
      %781 = vector.broadcast %780 : vector<8x1xf32> to vector<8x128xf32>
      %782 = arith.mulf %731, %781 : vector<8x128xf32>
      %783 = math.tanh %782 : vector<8x128xf32>
      %c0_191 = arith.constant 0 : index
      %c0_192 = arith.constant 0 : index
      %784 = vector.load %arg9[%c0_191, %c0_192] : memref<8x512xf32, #tpu.memory_space<vmem>>, vector<8x128xf32>
      tpu.vector_store %arg9[%c0_191, %c0_192], %783 {strides = array<i32>} : memref<8x512xf32, #tpu.memory_space<vmem>>, vector<8x128xf32>,
      %785 = vector.broadcast %780 : vector<8x1xf32> to vector<8x128xf32>
      %786 = arith.mulf %738, %785 : vector<8x128xf32>
      %787 = math.tanh %786 : vector<8x128xf32>
      %c0_193 = arith.constant 0 : index
      %c128 = arith.constant 128 : index
      %788 = vector.load %arg9[%c0_193, %c128] : memref<8x512xf32, #tpu.memory_space<vmem>>, vector<8x128xf32>
      tpu.vector_store %arg9[%c0_193, %c128], %787 {strides = array<i32>} : memref<8x512xf32, #tpu.memory_space<vmem>>, vector<8x128xf32>,
      %789 = math.tanh %743 : vector<8x128xf32>
      %c0_194 = arith.constant 0 : index
      %c256 = arith.constant 256 : index
      %790 = vector.load %arg9[%c0_194, %c256] : memref<8x512xf32, #tpu.memory_space<vmem>>, vector<8x128xf32>
      tpu.vector_store %arg9[%c0_194, %c256], %789 {strides = array<i32>} : memref<8x512xf32, #tpu.memory_space<vmem>>, vector<8x128xf32>,
      %791 = math.tanh %748 : vector<8x128xf32>
      %c0_195 = arith.constant 0 : index
      %c384 = arith.constant 384 : index
      %792 = vector.load %arg9[%c0_195, %c384] : memref<8x512xf32, #tpu.memory_space<vmem>>, vector<8x128xf32>
      tpu.vector_store %arg9[%c0_195, %c384], %791 {strides = array<i32>} : memref<8x512xf32, #tpu.memory_space<vmem>>, vector<8x128xf32>,
    } else {
    }
    return
  }
  func.func @transform_0(%arg0: i32, %arg1: i32) -> (i32, i32) {
    %c0_i32 = arith.constant 0 : i32
    %c0_i32_0 = arith.constant 0 : i32
    return %arg0, %c0_i32 : i32, i32
  }
  func.func @transform_1(%arg0: i32, %arg1: i32) -> (i32, i32, i32) {
    %c0_i32 = arith.constant 0 : i32
    %c0_i32_0 = arith.constant 0 : i32
    return %arg0, %arg1, %c0_i32 : i32, i32, i32
  }
  func.func @transform_2(%arg0: i32, %arg1: i32) -> (i32, i32, i32) {
    %c0_i32 = arith.constant 0 : i32
    %0 = arith.subi %c0_i32, %arg1 : i32
    %c0_i32_0 = arith.constant 0 : i32
    %c0_i32_1 = arith.constant 0 : i32
    return %arg0, %0, %c0_i32_0 : i32, i32, i32
  }
  func.func @transform_7(%arg0: i32, %arg1: i32) -> (i32, i32) {
    %c0_i32 = arith.constant 0 : i32
    %c0_i32_0 = arith.constant 0 : i32
    return %arg0, %c0_i32 : i32, i32
  }
}

</mosaic_0001>

<bundles_post_ra>
// kernel: tpu_custom_call.1
= control target key start
LH: loop header
LB: loop body
LE: loop exit
PB: predicated region body
PF: predicated region fallthrough
CT: control target
= control target key end

     0   :  { %12 = vsyncpa [#allocation11], 0  ;;  %s7708_s0 = inlined_call_operand.vmem [shape: s32[8,1], index: 0, kind: input, shape index: {}]   ;;  %s7709_s1 = inlined_call_operand.vmem [shape: f32[1,64,32], index: 1, kind: input, shape index: {}]   ;;  %s7710_s2 = inlined_call_operand.vmem [shape: f32[1,64,32], index: 2, kind: input, shape index: {}]   ;;  %s7711_s3 = inlined_call_operand.vmem [shape: f32[32,512], index: 3, kind: input, shape index: {}]   ;;  %s7712_s4 = inlined_call_operand.hbm [shape: f32[32,512], index: 4, kind: input, shape index: {}]   ;;  %s7713_s5 = inlined_call_operand.hbm [shape: f32[128,512], index: 5, kind: input, shape index: {}]   ;;  %s7714_s6 = inlined_call_operand.hbm [shape: f32[128,512], index: 6, kind: input, shape index: {}]   ;;  %s7715_s7 = inlined_call_operand.hbm [shape: f32[8,512], index: 7, kind: output, shape index: {}]  }
   0x1   :  { %v55_v0 = vld [vmem:[%s7711_s3] sm:$0xff]  ;;  %v57_v1 = vld [vmem:[%s7711_s3 + $0x8] sm:$0xff]  ;;  %v59_v2 = vld [vmem:[%s7711_s3 + $0x10] sm:$0xff] }
   0x2   :  { %v61_v3 = vld [vmem:[%s7711_s3 + $0x18] sm:$0xff]  ;;  %v63_v4 = vld [vmem:[%s7711_s3 + $0x20] sm:$0xff]  ;;  %v65_v5 = vld [vmem:[%s7711_s3 + $0x28] sm:$0xff] }
   0x3   :  { %v67_v6 = vld [vmem:[%s7711_s3 + $0x30] sm:$0xff]  ;;  %v69_v7 = vld [vmem:[%s7711_s3 + $0x38] sm:$0xff]  ;;  %v71_v8 = vld [vmem:[%s7711_s3 + $0x40] sm:$0xff] }
   0x4   :  { %v73_v9 = vld [vmem:[%s7711_s3 + $0x48] sm:$0xff]  ;;  %v75_v10 = vld [vmem:[%s7711_s3 + $0x50] sm:$0xff]  ;;  %v77_v11 = vld [vmem:[%s7711_s3 + $0x58] sm:$0xff] }
   0x5   :  { %v79_v12 = vld [vmem:[%s7711_s3 + $0x60] sm:$0xff]  ;;  %v81_v13 = vld [vmem:[%s7711_s3 + $0x68] sm:$0xff]  ;;  %v83_v14 = vld [vmem:[%s7711_s3 + $0x70] sm:$0xff] }
   0x6   :  { %v85_v15 = vld [vmem:[%s7711_s3 + $0x78] sm:$0xff] }
   0x7   :  { %92 = vsyncadd [#allocation9], 2048  ;;  %s101_s12 = sshll.u32 %s7712_s4, 4  ;;  %s4544_s13 = smov [#allocation3]   ;;  %s102_s12 = int_to_ptr.hbm [resolvable:$true] %s101_s12 }
   0x8   :  { %s103_s14 = sshll.u32 %s4544_s13, 4  ;;  %s115_s17 = sshll.u32 %s7713_s5, 4  ;;  %s104_s14 = int_to_ptr.vmem [resolvable:$true] %s103_s14  ;;  %s116_s17 = int_to_ptr.hbm [resolvable:$true] %s115_s17 }
   0x9   :  { %106 = dma.hbm_to_vmem [thread:$0]  %s102_s12, 2048, %s104_s14, [#allocation9 + $0x1] }
   0xa   :  { %s4545_s18 = smov [#allocation4]   ;;  %s129_s3 = sshll.u32 %s7714_s6, 4  ;;  %s130_s3 = int_to_ptr.hbm [resolvable:$true] %s129_s3 }
   0xb   :  { %s117_s19 = sshll.u32 %s4545_s18, 4  ;;  %s4546_s4 = smov [#allocation5]   ;;  %s118_s19 = int_to_ptr.vmem [resolvable:$true] %s117_s19 }
   0xc   :  { %120 = dma.hbm_to_vmem [thread:$0]  %s116_s17, 8192, %s118_s19, [#allocation9 + $0x2] }
   0xd   :  { %s131_s22 = sshll.u32 %s4546_s4, 4  ;;  %s132_s22 = int_to_ptr.vmem [resolvable:$true] %s131_s22 }
   0xe   :  { %134 = dma.hbm_to_vmem [thread:$0]  %s130_s3, 8192, %s132_s22, [#allocation9 + $0x3] }
   0xf   :  { %4534 = dma.done.wait [#allocation9], 2048 }
  0x10   :  { %4535 = vsyncadd [#allocation9], 4294965248 }
  0x11   :  { %4536 = dma.done.wait [#allocation9 + $0x1], 2048 }
  0x12   :  { %4537 = vsyncadd [#allocation9 + $0x1], 4294965248 }
  0x13   :  { %4538 = dma.done.wait [#allocation9 + $0x2], 8192 }
  0x14   :  { %4539 = vsyncadd [#allocation9 + $0x2], 4294959104 }
  0x15   :  { %4540 = dma.done.wait [#allocation9 + $0x3], 8192 }
  0x16   :  { %4541 = vsyncadd [#allocation9 + $0x3], 4294959104  ;;  %216 = vmatpush.msra.mxu0 %v79_v12  ;;  %257 = vmatpush.msra.mxu1 %v81_v13  ;;  %vm179_vm0 = vcmask 261120   ;;  %v155_v16 = vld [vmem:[%s7709_s1] sm:$0xff]  ;;  %v421_v18 = vld [vmem:[#allocation3 + $0x68] sm:$0xff]  ;;  %s3568_s10 = sshll.u32 %s7715_s7, 4  ;;  %s3569_s10 = int_to_ptr.hbm [resolvable:$true] %s3568_s10 }
  0x17   :  { %298 = vmatpush.msra.mxu2 %v83_v14  ;;  %339 = vmatpush.msra.mxu3 %v85_v15  ;;  %v420_v17 = vld [vmem:[#allocation3 + $0x60] sm:$0xff]  ;;  %v423_v19 = vld [vmem:[#allocation3 + $0x78] sm:$0xff]  ;;  %v422_v20 = vld [vmem:[#allocation3 + $0x70] sm:$0xff] }
  0x18   :  { %217 = vmatpush.msra.mxu0 %v71_v8  ;;  %258 = vmatpush.msra.mxu1 %v73_v9  ;;  %v416_v21 = vld [vmem:[#allocation3 + $0x40] sm:$0xff]  ;;  %v417_v22 = vld [vmem:[#allocation3 + $0x48] sm:$0xff]  ;;  %v419_v23 = vld [vmem:[#allocation3 + $0x58] sm:$0xff] }
  0x19   :  { %299 = vmatpush.msra.mxu2 %v75_v10  ;;  %340 = vmatpush.msra.mxu3 %v77_v11  ;;  %v418_v24 = vld [vmem:[#allocation3 + $0x50] sm:$0xff]  ;;  %v412_v25 = vld [vmem:[#allocation3 + $0x20] sm:$0xff]  ;;  %v413_v26 = vld [vmem:[#allocation3 + $0x28] sm:$0xff] }
  0x1a   :  { %218 = vmatpush.msra.mxu0 %v63_v4  ;;  %259 = vmatpush.msra.mxu1 %v65_v5  ;;  %v415_v27 = vld [vmem:[#allocation3 + $0x38] sm:$0xff]  ;;  %v156_v28 = vld [vmem:[%s7709_s1 + $0x8] sm:$0xff]  ;;  %v414_v29 = vld [vmem:[#allocation3 + $0x30] sm:$0xff] }
  0x1b   :  { %300 = vmatpush.msra.mxu2 %v67_v6  ;;  %341 = vmatpush.msra.mxu3 %v69_v7  ;;  %v157_v30 = vld [vmem:[%s7709_s1 + $0x10] sm:$0xff]  ;;  %v408_v31 = vld [vmem:[#allocation3] sm:$0xff]  ;;  %v409_v32 = vld [vmem:[#allocation3 + $0x8] sm:$0xff] }
  0x1c   :  { %219 = vmatpush.msra.mxu0 %v55_v0  ;;  %260 = vmatpush.msra.mxu1 %v57_v1  ;;  %v411_v33 = vld [vmem:[#allocation3 + $0x18] sm:$0xff]  ;;  %v410_v35 = vld [vmem:[#allocation3 + $0x10] sm:$0xff]  ;;  %v159_v36 = vld [vmem:[%s7709_s1 + $0x20] sm:$0xff] }
  0x1d   :  { %301 = vmatpush.msra.mxu2 %v59_v2  ;;  %342 = vmatpush.msra.mxu3 %v61_v3  ;;  %v158_v34 = vld [vmem:[%s7709_s1 + $0x18] sm:$0xff]  ;;  %v4682_v37 = vld [vmem:[#allocation4 + $0x1e0] sm:$0xff]  ;;  %v4684_v38 = vld [vmem:[#allocation4 + $0x1e8] sm:$0xff] }
  0x1e   :  { %3628 = vmatmul.msk.f32.vlgmr.msra.gmra.mxu0 %vm179_vm0, %v155_v16  ;;  %3636 = vmatmul.msk.f32.vlgmr.msra.gmra.mxu1 %vm179_vm0, %v155_v16  ;;  %v4686_v39 = vld [vmem:[#allocation4 + $0x1c0] sm:$0xff]  ;;  %v4690_v40 = vld [vmem:[#allocation4 + $0x1c8] sm:$0xff]  ;;  %v4692_v41 = vld [vmem:[#allocation4 + $0x1f8] sm:$0xff] }
  0x1f   :  { %3644 = vmatmul.msk.f32.vlgmr.msra.gmra.mxu2 %vm179_vm0, %v155_v16  ;;  %3652 = vmatmul.msk.f32.vlgmr.msra.gmra.mxu3 %vm179_vm0, %v155_v16  ;;  %v160_v42 = vld [vmem:[%s7709_s1 + $0x28] sm:$0xff]  ;;  %v4704_v43 = vld [vmem:[#allocation4 + $0x1a0] sm:$0xff]  ;;  %v4708_v45 = vld [vmem:[#allocation4 + $0x1d8] sm:$0xff] }
  0x20   :  { %460 = vmatpush.msrb.mxu0 %v420_v17  ;;  %501 = vmatpush.msrb.mxu1 %v421_v18  ;;  %v4706_v44 = vld [vmem:[#allocation4 + $0x1a8] sm:$0xff]  ;;  %v4712_v46 = vld [vmem:[#allocation4 + $0x1f0] sm:$0xff]  ;;  %v4714_v47 = vld [vmem:[#allocation4 + $0x180] sm:$0xff] }
  0x21   :  { %583 = vmatpush.msrb.mxu3 %v423_v19  ;;  %542 = vmatpush.msrb.mxu2 %v422_v20  ;;  %v4716_v48 = vld [vmem:[#allocation4 + $0x188] sm:$0xff]  ;;  %v4720_v49 = vld [vmem:[#allocation4 + $0x1d0] sm:$0xff]  ;;  %v4722_v50 = vld [vmem:[#allocation4 + $0x1b8] sm:$0xff] }
  0x22   :  { %461 = vmatpush.msrb.mxu0 %v416_v21  ;;  %502 = vmatpush.msrb.mxu1 %v417_v22  ;;  %v4726_v51 = vld [vmem:[#allocation4 + $0x1b0] sm:$0xff]  ;;  %v4738_v54 = vld [vmem:[#allocation4 + $0x198] sm:$0xff]  ;;  %v4742_v55 = vld [vmem:[#allocation4 + $0x160] sm:$0xff] }
  0x23   :  { %584 = vmatpush.msrb.mxu3 %v419_v23  ;;  %543 = vmatpush.msrb.mxu2 %v418_v24  ;;  %v161_v52 = vld [vmem:[%s7709_s1 + $0x30] sm:$0xff]  ;;  %v4744_v56 = vld [vmem:[#allocation4 + $0x168] sm:$0xff]  ;;  %v4750_v58 = vld [vmem:[#allocation4 + $0x178] sm:$0xff] }
  0x24   :  { %462 = vmatpush.msrb.mxu0 %v412_v25  ;;  %503 = vmatpush.msrb.mxu1 %v413_v26  ;;  %v4736_v53 = vld [vmem:[#allocation4 + $0x190] sm:$0xff]  ;;  %v4752_v59 = vld [vmem:[#allocation4 + $0x140] sm:$0xff]  ;;  %v4754_v60 = vld [vmem:[#allocation4 + $0x148] sm:$0xff] }
  0x25   :  { %585 = vmatpush.msrb.mxu3 %v415_v27  ;;  %544 = vmatpush.msrb.mxu2 %v414_v29  ;;  %v4746_v57 = vld [vmem:[#allocation4 + $0x170] sm:$0xff]  ;;  %v4758_v61 = vld [vmem:[#allocation4 + $0x120] sm:$0xff]  ;;  %v4764_v63 = vld [vmem:[#allocation4 + $0x158] sm:$0xff] }
  0x26   :  { %3629 = vmatmul.msk.f32.gmra.mxu0 %vm179_vm0, %v156_v28  ;;  %3637 = vmatmul.msk.f32.gmra.mxu1 %vm179_vm0, %v156_v28  ;;  %v4762_v62 = vld [vmem:[#allocation4 + $0x150] sm:$0xff]  ;;  %v4766_v0 = vld [vmem:[#allocation4 + $0x128] sm:$0xff]  ;;  %v162_v1 = vld [vmem:[%s7709_s1 + $0x38] sm:$0xff] }
  0x27   :  { %3645 = vmatmul.msk.f32.gmra.mxu2 %vm179_vm0, %v156_v28  ;;  %3653 = vmatmul.msk.f32.gmra.mxu3 %vm179_vm0, %v156_v28  ;;  %v4777_v2 = vld [vmem:[#allocation4 + $0x130] sm:$0xff]  ;;  %v4779_v3 = vld [vmem:[#allocation4 + $0x138] sm:$0xff]  ;;  %v4783_v4 = vld [vmem:[#allocation4 + $0x100] sm:$0xff] }
  0x28   :  { %463 = vmatpush.msrb.mxu0 %v408_v31  ;;  %504 = vmatpush.msrb.mxu1 %v409_v32  ;;  %v4785_v5 = vld [vmem:[#allocation4 + $0x108] sm:$0xff]  ;;  %v4789_v6 = vld [vmem:[#allocation4 + $0x110] sm:$0xff]  ;;  %v4791_v7 = vld [vmem:[#allocation4 + $0x118] sm:$0xff] }
  0x29   :  { %586 = vmatpush.msrb.mxu3 %v411_v33  ;;  %545 = vmatpush.msrb.mxu2 %v410_v35  ;;  %v4795_v8 = vld [vmem:[#allocation4 + $0xe0] sm:$0xff]  ;;  %v4797_v9 = vld [vmem:[#allocation4 + $0xe8] sm:$0xff]  ;;  %v4801_v10 = vld [vmem:[#allocation4 + $0xf0] sm:$0xff] }
  0x2a   :  { %805 = vmatpush.msra.mxu0 %v4682_v37  ;;  %825 = vmatpush.msra.mxu1 %v4684_v38  ;;  %v4803_v11 = vld [vmem:[#allocation4 + $0xf8] sm:$0xff]  ;;  %v4807_v12 = vld [vmem:[#allocation4 + $0xc0] sm:$0xff]  ;;  %v4809_v13 = vld [vmem:[#allocation4 + $0xc8] sm:$0xff] }
  0x2b   :  { %865 = vmatpush.msra.mxu3 %v4692_v41  ;;  %845 = vmatpush.msra.mxu2 %v4712_v46  ;;  %v400_v14 = vld [vmem:[%s7710_s2] sm:$0xff]  ;;  %v4820_v15 = vld [vmem:[#allocation4 + $0xd0] sm:$0xff]  ;;  %v4822_v16 = vld [vmem:[#allocation4 + $0xd8] sm:$0xff] }
  0x2c   :  { %806 = vmatpush.msra.mxu0 %v4686_v39  ;;  %826 = vmatpush.msra.mxu1 %v4690_v40  ;;  %v4826_v17 = vld [vmem:[#allocation4 + $0xa0] sm:$0xff]  ;;  %v4828_v18 = vld [vmem:[#allocation4 + $0xa8] sm:$0xff]  ;;  %v4832_v19 = vld [vmem:[#allocation4 + $0xb0] sm:$0xff] }
  0x2d   :  { %866 = vmatpush.msra.mxu3 %v4708_v45  ;;  %846 = vmatpush.msra.mxu2 %v4720_v49  ;;  %v4834_v20 = vld [vmem:[#allocation4 + $0xb8] sm:$0xff]  ;;  %v4838_v21 = vld [vmem:[#allocation4 + $0x80] sm:$0xff]  ;;  %v4840_v22 = vld [vmem:[#allocation4 + $0x88] sm:$0xff] }
  0x2e   :  { %3630 = vmatmul.msk.f32.gmra.mxu0 %vm179_vm0, %v157_v30  ;;  %3638 = vmatmul.msk.f32.gmra.mxu1 %vm179_vm0, %v157_v30  ;;  %v4844_v23 = vld [vmem:[#allocation4 + $0x90] sm:$0xff]  ;;  %v4846_v24 = vld [vmem:[#allocation4 + $0x98] sm:$0xff]  ;;  %v4850_v25 = vld [vmem:[#allocation4 + $0x60] sm:$0xff] }
  0x2f   :  { %3646 = vmatmul.msk.f32.gmra.mxu2 %vm179_vm0, %v157_v30  ;;  %3654 = vmatmul.msk.f32.gmra.mxu3 %vm179_vm0, %v157_v30  ;;  %v4852_v26 = vld [vmem:[#allocation4 + $0x68] sm:$0xff]  ;;  %v4863_v28 = vld [vmem:[#allocation4 + $0x70] sm:$0xff]  ;;  %v4865_v29 = vld [vmem:[#allocation4 + $0x78] sm:$0xff] }
  0x30   :  { %807 = vmatpush.msra.mxu0 %v4704_v43  ;;  %827 = vmatpush.msra.mxu1 %v4706_v44  ;;  %v401_v27 = vld [vmem:[%s7710_s2 + $0x8] sm:$0xff]  ;;  %v4869_v30 = vld [vmem:[#allocation4 + $0x40] sm:$0xff]  ;;  %v4875_v32 = vld [vmem:[#allocation4 + $0x50] sm:$0xff] }
  0x31   :  { %867 = vmatpush.msra.mxu3 %v4722_v50  ;;  %847 = vmatpush.msra.mxu2 %v4726_v51  ;;  %v4871_v31 = vld [vmem:[#allocation4 + $0x48] sm:$0xff]  ;;  %8091 = vst [vmem:[#allocation27_spill] sm:$0xff] %v4875_v32  ;;  %v4877_v33 = vld [vmem:[#allocation4 + $0x58] sm:$0xff] }
  0x32   :  { %808 = vmatpush.msra.mxu0 %v4714_v47  ;;  %828 = vmatpush.msra.mxu1 %v4716_v48  ;;  %8090 = vst [vmem:[#allocation26_spill] sm:$0xff] %v4871_v31  ;;  %v4883_v35 = vld [vmem:[#allocation4 + $0x28] sm:$0xff] }
  0x33   :  { %848 = vmatpush.msra.mxu2 %v4736_v53  ;;  %868 = vmatpush.msra.mxu3 %v4738_v54  ;;  %8092 = vst [vmem:[#allocation28_spill] sm:$0xff] %v4877_v33 }
  0x34   :  { %809 = vmatpush.msra.mxu0 %v4742_v55  ;;  %829 = vmatpush.msra.mxu1 %v4744_v56  ;;  %8094 = vst [vmem:[#allocation30_spill] sm:$0xff] %v4883_v35 }
  0x35   :  { %849 = vmatpush.msra.mxu2 %v4746_v57  ;;  %869 = vmatpush.msra.mxu3 %v4750_v58 }
  0x36   :  { %3631 = vmatmul.msk.f32.gmra.mxu0 %vm179_vm0, %v158_v34  ;;  %3639 = vmatmul.msk.f32.gmra.mxu1 %vm179_vm0, %v158_v34 }
  0x37   :  { %3647 = vmatmul.msk.f32.gmra.mxu2 %vm179_vm0, %v158_v34  ;;  %3655 = vmatmul.msk.f32.gmra.mxu3 %vm179_vm0, %v158_v34  ;;  %v4881_v34 = vld [vmem:[#allocation4 + $0x20] sm:$0xff] }
  0x38   :  { %810 = vmatpush.msra.mxu0 %v4752_v59  ;;  %830 = vmatpush.msra.mxu1 %v4754_v60  ;;  %8093 = vst [vmem:[#allocation29_spill] sm:$0xff] %v4881_v34 }
  0x39   :  { %850 = vmatpush.msra.mxu2 %v4762_v62  ;;  %870 = vmatpush.msra.mxu3 %v4764_v63 }
  0x3a   :  { %811 = vmatpush.msra.mxu0 %v4758_v61  ;;  %831 = vmatpush.msra.mxu1 %v4766_v0 }
  0x3b   :  { %851 = vmatpush.msra.mxu2 %v4777_v2  ;;  %871 = vmatpush.msra.mxu3 %v4779_v3 }
  0x3c   :  { %812 = vmatpush.msra.mxu0 %v4783_v4  ;;  %832 = vmatpush.msra.mxu1 %v4785_v5 }
  0x3d   :  { %852 = vmatpush.msra.mxu2 %v4789_v6  ;;  %872 = vmatpush.msra.mxu3 %v4791_v7 }
  0x3e   :  { %3632 = vmatmul.msk.f32.gmra.mxu0 %vm179_vm0, %v159_v36  ;;  %3640 = vmatmul.msk.f32.gmra.mxu1 %vm179_vm0, %v159_v36 }
  0x3f   :  { %3648 = vmatmul.msk.f32.gmra.mxu2 %vm179_vm0, %v159_v36  ;;  %3656 = vmatmul.msk.f32.gmra.mxu3 %vm179_vm0, %v159_v36  ;;  %v4887_v36 = vld [vmem:[#allocation4 + $0x30] sm:$0xff] }
  0x40   :  { %813 = vmatpush.msra.mxu0 %v4795_v8  ;;  %833 = vmatpush.msra.mxu1 %v4797_v9  ;;  %8095 = vst [vmem:[#allocation31_spill] sm:$0xff] %v4887_v36 }
  0x41   :  { %853 = vmatpush.msra.mxu2 %v4801_v10  ;;  %873 = vmatpush.msra.mxu3 %v4803_v11 }
  0x42   :  { %814 = vmatpush.msra.mxu0 %v4807_v12  ;;  %834 = vmatpush.msra.mxu1 %v4809_v13 }
  0x43   :  { %854 = vmatpush.msra.mxu2 %v4820_v15  ;;  %874 = vmatpush.msra.mxu3 %v4822_v16 }
  0x44   :  { %815 = vmatpush.msra.mxu0 %v4826_v17  ;;  %835 = vmatpush.msra.mxu1 %v4828_v18 }
  0x45   :  { %855 = vmatpush.msra.mxu2 %v4832_v19  ;;  %875 = vmatpush.msra.mxu3 %v4834_v20 }
  0x46   :  { %3633 = vmatmul.msk.f32.gmra.mxu0 %vm179_vm0, %v160_v42  ;;  %3641 = vmatmul.msk.f32.gmra.mxu1 %vm179_vm0, %v160_v42 }
  0x47   :  { %3649 = vmatmul.msk.f32.gmra.mxu2 %vm179_vm0, %v160_v42  ;;  %3657 = vmatmul.msk.f32.gmra.mxu3 %vm179_vm0, %v160_v42  ;;  %v4889_v42 = vld [vmem:[#allocation4 + $0x38] sm:$0xff] }
  0x48   :  { %816 = vmatpush.msra.mxu0 %v4838_v21  ;;  %836 = vmatpush.msra.mxu1 %v4840_v22  ;;  %8096 = vst [vmem:[#allocation32_spill] sm:$0xff] %v4889_v42 }
  0x49   :  { %856 = vmatpush.msra.mxu2 %v4844_v23  ;;  %876 = vmatpush.msra.mxu3 %v4846_v24 }
  0x4a   :  { %817 = vmatpush.msra.mxu0 %v4850_v25  ;;  %837 = vmatpush.msra.mxu1 %v4852_v26 }
  0x4b   :  { %857 = vmatpush.msra.mxu2 %v4863_v28  ;;  %877 = vmatpush.msra.mxu3 %v4865_v29 }
  0x4c   :  { %818 = vmatpush.msra.mxu0 %v4869_v30  ;;  %838 = vmatpush.msra.mxu1 %v4871_v31  ;;  %v4932_v31 = vld [vmem:[#allocation5 + $0x1d8] sm:$0xff] }
  0x4d   :  { %858 = vmatpush.msra.mxu2 %v4875_v32  ;;  %878 = vmatpush.msra.mxu3 %v4877_v33  ;;  %v4908_v33 = vld [vmem:[#allocation4 + $0x18] sm:$0xff]  ;;  %v4912_v32 = vld [vmem:[#allocation5 + $0x1e0] sm:$0xff]  ;;  %8108 = vst [vmem:[#allocation44_spill] sm:$0xff] %v4932_v31 }
  0x4e   :  { %3634 = vmatmul.msk.f32.gmra.mxu0 %vm179_vm0, %v161_v52  ;;  %3642 = vmatmul.msk.f32.gmra.mxu1 %vm179_vm0, %v161_v52  ;;  %8100 = vst [vmem:[#allocation36_spill] sm:$0xff] %v4908_v33 }
  0x4f   :  { %3650 = vmatmul.msk.f32.gmra.mxu2 %vm179_vm0, %v161_v52  ;;  %3658 = vmatmul.msk.f32.gmra.mxu3 %vm179_vm0, %v161_v52  ;;  %v4893_v52 = vld [vmem:[#allocation4] sm:$0xff]  ;;  %8101 = vst [vmem:[#allocation37_spill] sm:$0xff] %v4912_v32 }
  0x50   :  { %8097 = vst [vmem:[#allocation33_spill] sm:$0xff] %v4893_v52  ;;  %819 = vmatpush.msra.mxu0 %v4881_v34  ;;  %839 = vmatpush.msra.mxu1 %v4883_v35  ;;  %v4914_v34 = vld [vmem:[#allocation5 + $0x1e8] sm:$0xff]  ;;  %v4930_v35 = vld [vmem:[#allocation5 + $0x1d0] sm:$0xff] }
  0x51   :  { %859 = vmatpush.msra.mxu2 %v4887_v36  ;;  %879 = vmatpush.msra.mxu3 %v4889_v42  ;;  %8102 = vst [vmem:[#allocation38_spill] sm:$0xff] %v4914_v34  ;;  %v4918_v42 = vld [vmem:[#allocation5 + $0x1f0] sm:$0xff]  ;;  %v4926_v36 = vld [vmem:[#allocation5 + $0x1c8] sm:$0xff] }
  0x52   :  { %820 = vmatpush.msra.mxu0 %v4893_v52  ;;  %8103 = vst [vmem:[#allocation39_spill] sm:$0xff] %v4918_v42  ;;  %v4920_v52 = vld [vmem:[#allocation5 + $0x1f8] sm:$0xff] }
  0x53   :  { %8104 = vst [vmem:[#allocation40_spill] sm:$0xff] %v4920_v52  ;;  %880 = vmatpush.msra.mxu3 %v4908_v33  ;;  %v403_v33 = vld [vmem:[%s7710_s2 + $0x18] sm:$0xff] }
  0x54   :  { %8106 = vst [vmem:[#allocation42_spill] sm:$0xff] %v4926_v36 }
  0x55   :  { %8107 = vst [vmem:[#allocation43_spill] sm:$0xff] %v4930_v35 }
  0x56   :  { %3635 = vmatmul.msk.f32.gmra.mxu0 %vm179_vm0, %v162_v1  ;;  %3643 = vmatmul.msk.f32.gmra.mxu1 %vm179_vm0, %v162_v1 }
  0x57   :  { %3651 = vmatmul.msk.f32.gmra.mxu2 %vm179_vm0, %v162_v1  ;;  %3659 = vmatmul.msk.f32.gmra.mxu3 %vm179_vm0, %v162_v1  ;;  %v4895_v1 = vld [vmem:[#allocation4 + $0x8] sm:$0xff] }
  0x58   :  { %8098 = vst [vmem:[#allocation34_spill] sm:$0xff] %v4895_v1  ;;  %840 = vmatpush.msra.mxu1 %v4895_v1  ;;  %v4924_v1 = vld [vmem:[#allocation5 + $0x1c0] sm:$0xff] }
  0x59   :  { %8105 = vst [vmem:[#allocation41_spill] sm:$0xff] %v4924_v1 }
  0x5e   :  { %3660 = vmatmul.msk.f32.vlgmr.msrb.gmra.mxu0 %vm179_vm0, %v400_v14  ;;  %3668 = vmatmul.msk.f32.vlgmr.msrb.gmra.mxu1 %vm179_vm0, %v400_v14 }
  0x5f   :  { %3676 = vmatmul.msk.f32.vlgmr.msrb.gmra.mxu2 %vm179_vm0, %v400_v14  ;;  %3684 = vmatmul.msk.f32.vlgmr.msrb.gmra.mxu3 %vm179_vm0, %v400_v14  ;;  %v402_v14 = vld [vmem:[%s7710_s2 + $0x10] sm:$0xff] }
  0x60   :  { %952 = vmatpush.msrb.mxu0 %v4912_v32  ;;  %972 = vmatpush.msrb.mxu1 %v4914_v34  ;;  %v4955_v34 = vld [vmem:[#allocation5 + $0x180] sm:$0xff]  ;;  %v4975_v32 = vld [vmem:[#allocation5 + $0x178] sm:$0xff] }
  0x61   :  { %1012 = vmatpush.msrb.mxu3 %v4920_v52  ;;  %v4949_v52 = vld [vmem:[#allocation5 + $0x1b0] sm:$0xff]  ;;  %8113 = vst [vmem:[#allocation49_spill] sm:$0xff] %v4955_v34 }
  0x62   :  { %953 = vmatpush.msrb.mxu0 %v4924_v1  ;;  %973 = vmatpush.msrb.mxu1 %v4926_v36  ;;  %8111 = vst [vmem:[#allocation47_spill] sm:$0xff] %v4949_v52  ;;  %v4957_v1 = vld [vmem:[#allocation5 + $0x188] sm:$0xff]  ;;  %v4973_v36 = vld [vmem:[#allocation5 + $0x170] sm:$0xff] }
  0x63   :  { %1013 = vmatpush.msrb.mxu3 %v4932_v31  ;;  %8114 = vst [vmem:[#allocation50_spill] sm:$0xff] %v4957_v1  ;;  %v4961_v31 = vld [vmem:[#allocation5 + $0x190] sm:$0xff] }
  0x64   :  { %8115 = vst [vmem:[#allocation51_spill] sm:$0xff] %v4961_v31 }
  0x65   :  { %8119 = vst [vmem:[#allocation55_spill] sm:$0xff] %v4973_v36 }
  0x66   :  { %3661 = vmatmul.msk.f32.gmra.mxu0 %vm179_vm0, %v401_v27  ;;  %3669 = vmatmul.msk.f32.gmra.mxu1 %vm179_vm0, %v401_v27  ;;  %8120 = vst [vmem:[#allocation56_spill] sm:$0xff] %v4975_v32 }
  0x67   :  { %3677 = vmatmul.msk.f32.gmra.mxu2 %vm179_vm0, %v401_v27  ;;  %3685 = vmatmul.msk.f32.gmra.mxu3 %vm179_vm0, %v401_v27  ;;  %v4906_v27 = vld [vmem:[#allocation4 + $0x10] sm:$0xff] }
  0x68   :  { %8099 = vst [vmem:[#allocation35_spill] sm:$0xff] %v4906_v27  ;;  %860 = vmatpush.msra.mxu2 %v4906_v27  ;;  %v4938_v27 = vld [vmem:[#allocation5 + $0x1a8] sm:$0xff] }
  0x69   :  { %8110 = vst [vmem:[#allocation46_spill] sm:$0xff] %v4938_v27  ;;  %974 = vmatpush.msrb.mxu1 %v4938_v27  ;;  %v4967_v27 = vld [vmem:[#allocation5 + $0x160] sm:$0xff] }
  0x6a   :  { %992 = vmatpush.msrb.mxu2 %v4918_v42  ;;  %v4951_v42 = vld [vmem:[#allocation5 + $0x1b8] sm:$0xff]  ;;  %8117 = vst [vmem:[#allocation53_spill] sm:$0xff] %v4967_v27 }
  0x6b   :  { %8112 = vst [vmem:[#allocation48_spill] sm:$0xff] %v4951_v42  ;;  %1014 = vmatpush.msrb.mxu3 %v4951_v42  ;;  %975 = vmatpush.msrb.mxu1 %v4957_v1  ;;  %v404_v42 = vld [vmem:[%s7710_s2 + $0x20] sm:$0xff] }
  0x6c   :  { %993 = vmatpush.msrb.mxu2 %v4930_v35  ;;  %v4969_v35 = vld [vmem:[#allocation5 + $0x168] sm:$0xff]  ;;  %v4998_v1 = vld [vmem:[#allocation5 + $0x120] sm:$0xff] }
  0x6d   :  { %8118 = vst [vmem:[#allocation54_spill] sm:$0xff] %v4969_v35  ;;  %976 = vmatpush.msrb.mxu1 %v4969_v35  ;;  %v5016_v35 = vld [vmem:[#allocation5 + $0x110] sm:$0xff] }
  0x6e   :  { %3662 = vmatmul.msk.f32.gmra.mxu0 %vm179_vm0, %v402_v14  ;;  %3670 = vmatmul.msk.f32.gmra.mxu1 %vm179_vm0, %v402_v14  ;;  %8125 = vst [vmem:[#allocation61_spill] sm:$0xff] %v4998_v1 }
  0x6f   :  { %3678 = vmatmul.msk.f32.gmra.mxu2 %vm179_vm0, %v402_v14  ;;  %3686 = vmatmul.msk.f32.gmra.mxu3 %vm179_vm0, %v402_v14  ;;  %v4936_v14 = vld [vmem:[#allocation5 + $0x1a0] sm:$0xff]  ;;  %8131 = vst [vmem:[#allocation67_spill] sm:$0xff] %v5016_v35 }
  0x70   :  { %8109 = vst [vmem:[#allocation45_spill] sm:$0xff] %v4936_v14  ;;  %954 = vmatpush.msrb.mxu0 %v4936_v14  ;;  %v4963_v14 = vld [vmem:[#allocation5 + $0x198] sm:$0xff]  ;;  %994 = vmatpush.msrb.mxu2 %v4949_v52  ;;  %v4981_v52 = vld [vmem:[#allocation5 + $0x148] sm:$0xff] }
  0x71   :  { %8116 = vst [vmem:[#allocation52_spill] sm:$0xff] %v4963_v14  ;;  %1015 = vmatpush.msrb.mxu3 %v4963_v14  ;;  %977 = vmatpush.msrb.mxu1 %v4981_v52  ;;  %v4992_v14 = vld [vmem:[#allocation5 + $0x150] sm:$0xff] }
  0x72   :  { %955 = vmatpush.msrb.mxu0 %v4955_v34  ;;  %995 = vmatpush.msrb.mxu2 %v4961_v31  ;;  %8122 = vst [vmem:[#allocation58_spill] sm:$0xff] %v4981_v52  ;;  %v4994_v31 = vld [vmem:[#allocation5 + $0x158] sm:$0xff]  ;;  %v5010_v52 = vld [vmem:[#allocation5 + $0x100] sm:$0xff] }
  0x73   :  { %1016 = vmatpush.msrb.mxu3 %v4975_v32  ;;  %8123 = vst [vmem:[#allocation59_spill] sm:$0xff] %v4992_v14  ;;  %v5004_v32 = vld [vmem:[#allocation5 + $0x130] sm:$0xff]  ;;  %v5018_v34 = vld [vmem:[#allocation5 + $0x118] sm:$0xff] }
  0x74   :  { %956 = vmatpush.msrb.mxu0 %v4967_v27  ;;  %996 = vmatpush.msrb.mxu2 %v4973_v36  ;;  %8124 = vst [vmem:[#allocation60_spill] sm:$0xff] %v4994_v31  ;;  %v5000_v27 = vld [vmem:[#allocation5 + $0x128] sm:$0xff] }
  0x75   :  { %8126 = vst [vmem:[#allocation62_spill] sm:$0xff] %v5000_v27  ;;  %1017 = vmatpush.msrb.mxu3 %v4994_v31  ;;  %v5012_v36 = vld [vmem:[#allocation5 + $0x108] sm:$0xff]  ;;  %978 = vmatpush.msrb.mxu1 %v5000_v27  ;;  %v5041_v27 = vld [vmem:[#allocation5 + $0xc0] sm:$0xff] }
  0x76   :  { %3663 = vmatmul.msk.f32.gmra.mxu0 %vm179_vm0, %v403_v33  ;;  %3671 = vmatmul.msk.f32.gmra.mxu1 %vm179_vm0, %v403_v33  ;;  %8127 = vst [vmem:[#allocation63_spill] sm:$0xff] %v5004_v32  ;;  %v405_v31 = vld [vmem:[%s7710_s2 + $0x28] sm:$0xff] }
  0x77   :  { %3679 = vmatmul.msk.f32.gmra.mxu2 %vm179_vm0, %v403_v33  ;;  %3687 = vmatmul.msk.f32.gmra.mxu3 %vm179_vm0, %v403_v33  ;;  %v4979_v33 = vld [vmem:[#allocation5 + $0x140] sm:$0xff]  ;;  %8129 = vst [vmem:[#allocation65_spill] sm:$0xff] %v5010_v52 }
  0x78   :  { %8121 = vst [vmem:[#allocation57_spill] sm:$0xff] %v4979_v33  ;;  %957 = vmatpush.msrb.mxu0 %v4979_v33  ;;  %v5006_v33 = vld [vmem:[#allocation5 + $0x138] sm:$0xff]  ;;  %997 = vmatpush.msrb.mxu2 %v4992_v14  ;;  %v5024_v14 = vld [vmem:[#allocation5 + $0xe8] sm:$0xff] }
  0x79   :  { %8128 = vst [vmem:[#allocation64_spill] sm:$0xff] %v5006_v33  ;;  %1018 = vmatpush.msrb.mxu3 %v5006_v33  ;;  %979 = vmatpush.msrb.mxu1 %v5012_v36  ;;  %v5035_v33 = vld [vmem:[#allocation5 + $0xf0] sm:$0xff] }
  0x7a   :  { %8130 = vst [vmem:[#allocation66_spill] sm:$0xff] %v5012_v36  ;;  %958 = vmatpush.msrb.mxu0 %v4998_v1  ;;  %998 = vmatpush.msrb.mxu2 %v5004_v32  ;;  %v5037_v32 = vld [vmem:[#allocation5 + $0xf8] sm:$0xff]  ;;  %v5059_v36 = vld [vmem:[#allocation5 + $0xb0] sm:$0xff] }
  0x7b   :  { %8132 = vst [vmem:[#allocation68_spill] sm:$0xff] %v5018_v34  ;;  %1019 = vmatpush.msrb.mxu3 %v5018_v34  ;;  %980 = vmatpush.msrb.mxu1 %v5024_v14  ;;  %v5047_v34 = vld [vmem:[#allocation5 + $0xd0] sm:$0xff]  ;;  %v5061_v1 = vld [vmem:[#allocation5 + $0xb8] sm:$0xff] }
  0x7c   :  { %8134 = vst [vmem:[#allocation70_spill] sm:$0xff] %v5024_v14  ;;  %959 = vmatpush.msrb.mxu0 %v5010_v52  ;;  %999 = vmatpush.msrb.mxu2 %v5016_v35  ;;  %v5043_v52 = vld [vmem:[#allocation5 + $0xc8] sm:$0xff]  ;;  %v5053_v14 = vld [vmem:[#allocation5 + $0xa0] sm:$0xff] }
  0x7d   :  { %8135 = vst [vmem:[#allocation71_spill] sm:$0xff] %v5035_v33  ;;  %1020 = vmatpush.msrb.mxu3 %v5037_v32  ;;  %v5055_v35 = vld [vmem:[#allocation5 + $0xa8] sm:$0xff]  ;;  %981 = vmatpush.msrb.mxu1 %v5043_v52 }
  0x7e   :  { %3664 = vmatmul.msk.f32.gmra.mxu0 %vm179_vm0, %v404_v42  ;;  %3672 = vmatmul.msk.f32.gmra.mxu1 %vm179_vm0, %v404_v42  ;;  %8136 = vst [vmem:[#allocation72_spill] sm:$0xff] %v5037_v32  ;;  %v406_v32 = vld [vmem:[%s7710_s2 + $0x30] sm:$0xff] }
  0x7f   :  { %3680 = vmatmul.msk.f32.gmra.mxu2 %vm179_vm0, %v404_v42  ;;  %3688 = vmatmul.msk.f32.gmra.mxu3 %vm179_vm0, %v404_v42  ;;  %v5022_v42 = vld [vmem:[#allocation5 + $0xe0] sm:$0xff]  ;;  %8137 = vst [vmem:[#allocation73_spill] sm:$0xff] %v5041_v27 }
  0x80   :  { %8133 = vst [vmem:[#allocation69_spill] sm:$0xff] %v5022_v42  ;;  %960 = vmatpush.msrb.mxu0 %v5022_v42  ;;  %v5049_v42 = vld [vmem:[#allocation5 + $0xd8] sm:$0xff]  ;;  %1000 = vmatpush.msrb.mxu2 %v5035_v33  ;;  %v5067_v33 = vld [vmem:[#allocation5 + $0x88] sm:$0xff] }
  0x81   :  { %8138 = vst [vmem:[#allocation74_spill] sm:$0xff] %v5043_v52  ;;  %1021 = vmatpush.msrb.mxu3 %v5049_v42  ;;  %982 = vmatpush.msrb.mxu1 %v5055_v35  ;;  %v5084_v52 = vld [vmem:[#allocation5 + $0x60] sm:$0xff] }
  0x82   :  { %8139 = vst [vmem:[#allocation75_spill] sm:$0xff] %v5047_v34  ;;  %961 = vmatpush.msrb.mxu0 %v5041_v27  ;;  %1001 = vmatpush.msrb.mxu2 %v5047_v34  ;;  %v5080_v34 = vld [vmem:[#allocation5 + $0x98] sm:$0xff] }
  0x83   :  { %8140 = vst [vmem:[#allocation76_spill] sm:$0xff] %v5049_v42  ;;  %1022 = vmatpush.msrb.mxu3 %v5061_v1  ;;  %983 = vmatpush.msrb.mxu1 %v5067_v33  ;;  %v5078_v42 = vld [vmem:[#allocation5 + $0x90] sm:$0xff]  ;;  %v5104_v27 = vld [vmem:[#allocation5 + $0x58] sm:$0xff] }
  0x84   :  { %8141 = vst [vmem:[#allocation77_spill] sm:$0xff] %v5053_v14  ;;  %962 = vmatpush.msrb.mxu0 %v5053_v14  ;;  %1002 = vmatpush.msrb.mxu2 %v5059_v36  ;;  %v5086_v14 = vld [vmem:[#allocation5 + $0x68] sm:$0xff] }
  0x85   :  { %8142 = vst [vmem:[#allocation78_spill] sm:$0xff] %v5055_v35  ;;  %1023 = vmatpush.msrb.mxu3 %v5080_v34  ;;  %984 = vmatpush.msrb.mxu1 %v5086_v14  ;;  %v5102_v35 = vld [vmem:[#allocation5 + $0x50] sm:$0xff] }
  0x86   :  { %3665 = vmatmul.msk.f32.gmra.mxu0 %vm179_vm0, %v405_v31  ;;  %3673 = vmatmul.msk.f32.gmra.mxu1 %vm179_vm0, %v405_v31  ;;  %8143 = vst [vmem:[#allocation79_spill] sm:$0xff] %v5059_v36  ;;  %v5098_v36 = vld [vmem:[#allocation5 + $0x48] sm:$0xff] }
  0x87   :  { %3681 = vmatmul.msk.f32.gmra.mxu2 %vm179_vm0, %v405_v31  ;;  %3689 = vmatmul.msk.f32.gmra.mxu3 %vm179_vm0, %v405_v31  ;;  %8144 = vst [vmem:[#allocation80_spill] sm:$0xff] %v5061_v1  ;;  %v5065_v31 = vld [vmem:[#allocation5 + $0x80] sm:$0xff]  ;;  %v5090_v1 = vld [vmem:[#allocation5 + $0x70] sm:$0xff] }
  0x88   :  { %8145 = vst [vmem:[#allocation81_spill] sm:$0xff] %v5065_v31  ;;  %963 = vmatpush.msrb.mxu0 %v5065_v31  ;;  %v5092_v31 = vld [vmem:[#allocation5 + $0x78] sm:$0xff]  ;;  %1003 = vmatpush.msrb.mxu2 %v5078_v42 }
  0x89   :  { %8146 = vst [vmem:[#allocation82_spill] sm:$0xff] %v5067_v33  ;;  %v5096_v33 = vld [vmem:[#allocation5 + $0x40] sm:$0xff]  ;;  %1024 = vmatpush.msrb.mxu3 %v5092_v31  ;;  %985 = vmatpush.msrb.mxu1 %v5098_v36 }
  0x8a   :  { %8147 = vst [vmem:[#allocation83_spill] sm:$0xff] %v5078_v42  ;;  %964 = vmatpush.msrb.mxu0 %v5084_v52  ;;  %1004 = vmatpush.msrb.mxu2 %v5090_v1  ;;  %v5110_v42 = vld [vmem:[#allocation5 + $0x28] sm:$0xff] }
  0x8b   :  { %8148 = vst [vmem:[#allocation84_spill] sm:$0xff] %v5080_v34  ;;  %v407_v34 = vld [vmem:[%s7710_s2 + $0x38] sm:$0xff]  ;;  %1025 = vmatpush.msrb.mxu3 %v5104_v27  ;;  %986 = vmatpush.msrb.mxu1 %v5110_v42 }
  0x8c   :  { %8149 = vst [vmem:[#allocation85_spill] sm:$0xff] %v5086_v14  ;;  %965 = vmatpush.msrb.mxu0 %v5096_v33  ;;  %1005 = vmatpush.msrb.mxu2 %v5102_v35  ;;  %v5127_v14 = vld [vmem:[#allocation5] sm:$0xff] }
  0x8d   :  { %8150 = vst [vmem:[#allocation86_spill] sm:$0xff] %v5090_v1  ;;  %v5123_v1 = vld [vmem:[#allocation5 + $0x38] sm:$0xff] }
  0x8e   :  { %3666 = vmatmul.msk.f32.gmra.mxu0 %vm179_vm0, %v406_v32  ;;  %3674 = vmatmul.msk.f32.gmra.mxu1 %vm179_vm0, %v406_v32  ;;  %8151 = vst [vmem:[#allocation87_spill] sm:$0xff] %v5092_v31  ;;  %v5121_v31 = vld [vmem:[#allocation5 + $0x30] sm:$0xff] }
  0x8f   :  { %3682 = vmatmul.msk.f32.gmra.mxu2 %vm179_vm0, %v406_v32  ;;  %3690 = vmatmul.msk.f32.gmra.mxu3 %vm179_vm0, %v406_v32  ;;  %8152 = vst [vmem:[#allocation88_spill] sm:$0xff] %v5096_v33  ;;  %v5108_v32 = vld [vmem:[#allocation5 + $0x20] sm:$0xff]  ;;  %v5129_v33 = vld [vmem:[#allocation5 + $0x8] sm:$0xff] }
  0x90   :  { %8153 = vst [vmem:[#allocation89_spill] sm:$0xff] %v5102_v35  ;;  %966 = vmatpush.msrb.mxu0 %v5108_v32  ;;  %1006 = vmatpush.msrb.mxu2 %v5121_v31 }
  0x91   :  { %8154 = vst [vmem:[#allocation90_spill] sm:$0xff] %v5104_v27  ;;  %v5133_v27 = vld [vmem:[#allocation5 + $0x10] sm:$0xff]  ;;  %1026 = vmatpush.msrb.mxu3 %v5123_v1  ;;  %987 = vmatpush.msrb.mxu1 %v5129_v33 }
  0x92   :  { %8155 = vst [vmem:[#allocation91_spill] sm:$0xff] %v5108_v32  ;;  %v5135_v32 = vld [vmem:[#allocation5 + $0x18] sm:$0xff]  ;;  %967 = vmatpush.msrb.mxu0 %v5127_v14  ;;  %1007 = vmatpush.msrb.mxu2 %v5133_v27 }
  0x93   :  { %8156 = vst [vmem:[#allocation92_spill] sm:$0xff] %v5110_v42  ;;  %1027 = vmatpush.msrb.mxu3 %v5135_v32 }
  0x94   :  { %8157 = vst [vmem:[#allocation93_spill] sm:$0xff] %v5133_v27 }
  0x95   :  { %8158 = vst [vmem:[#allocation94_spill] sm:$0xff] %v5135_v32 }
  0x96   :  { %3667 = vmatmul.msk.f32.gmra.mxu0 %vm179_vm0, %v407_v34  ;;  %3675 = vmatmul.msk.f32.gmra.mxu1 %vm179_vm0, %v407_v34 }
  0x97   :  { %3683 = vmatmul.msk.f32.gmra.mxu2 %vm179_vm0, %v407_v34  ;;  %3691 = vmatmul.msk.f32.gmra.mxu3 %vm179_vm0, %v407_v34  ;;  %v4547_v34 = vmov 0.0  }
  0x9b   :  { %v5143_v42 = vpop.f32.mrf.mxu0  ;;  %v5145_v35 = vpop.f32.mrf.mxu1 }
  0x9c   :  { %8159 = vst [vmem:[#allocation95_spill] sm:$0xff] %v5143_v42 }
  0x9d   :  { %8160 = vst [vmem:[#allocation96_spill] sm:$0xff] %v5145_v35 }
  0x9e   :  { %821 = vmatmul.f32.vlgmr.msra.gmra.mxu0 %v4547_v34  ;;  %841 = vmatmul.f32.vlgmr.msra.gmra.mxu1 %v4547_v34 }
  0x9f   :  { %861 = vmatmul.f32.vlgmr.msra.gmra.mxu2 %v4547_v34  ;;  %881 = vmatmul.f32.vlgmr.msra.gmra.mxu3 %v4547_v34 }
  0xa0   :  { %1147 = vmatpush.msra.mxu0 %v4682_v37  ;;  %1167 = vmatpush.msra.mxu1 %v4684_v38 }
  0xa1   :  { %1187 = vmatpush.msra.mxu2 %v4712_v46  ;;  %1207 = vmatpush.msra.mxu3 %v4692_v41  ;;  %v5192_v41 = vld [vmem:[%s7708_s0] sm:$0xff] }
  0xa2   :  { %v5151_v27 = vpop.f32.mrf.mxu2  ;;  %v5153_v32 = vpop.f32.mrf.mxu3  ;;  %1148 = vmatpush.msra.mxu0 %v4686_v39  ;;  %1168 = vmatpush.msra.mxu1 %v4690_v40  ;;  %8163 = vst [vmem:[#allocation99_spill] sm:$0xff] %v5192_v41  ;;  %vm3699_vm1 = vcmp.gt.s32.totalorder %v5192_v41, 0  ;;  %vm3700_vm3 = vcmp.gt.s32.totalorder %v5192_v41, 7 }
  0xa3   :  { %v5157_v35 = vpop.f32.mrf.mxu0  ;;  %v5159_v42 = vpop.f32.mrf.mxu1  ;;  %1188 = vmatpush.msra.mxu2 %v4720_v49  ;;  %1208 = vmatpush.msra.mxu3 %v4708_v45 }
  0xa4   :  { %1149 = vmatpush.msra.mxu0 %v4704_v43  ;;  %1169 = vmatpush.msra.mxu1 %v4706_v44  ;;  %v5197_v43 = vadd.s32 4294967295, %v5192_v41 }
  0xa5   :  { %1189 = vmatpush.msra.mxu2 %v4726_v51  ;;  %1209 = vmatpush.msra.mxu3 %v4722_v50 }
  0xa6   :  { %968 = vmatmul.f32.vlgmr.msrb.gmra.mxu0 %v4547_v34  ;;  %988 = vmatmul.f32.vlgmr.msrb.gmra.mxu1 %v4547_v34  ;;  %vm3701_vm2 = vcmp.eq.s32.totalorder %v5197_v43, 0  ;;  %vm3702_vm4 = vcmp.eq.s32.totalorder %v5197_v43, 7  ;;  %vm3711_vm0 = vcmp.eq.s32.totalorder %v5197_v43, 1 }
  0xa7   :  { %1008 = vmatmul.f32.vlgmr.msrb.gmra.mxu2 %v4547_v34  ;;  %1028 = vmatmul.f32.vlgmr.msrb.gmra.mxu3 %v4547_v34  ;;  %v8210_v34 = vld [vmem:[#allocation52_spill] sm:$0xff] }
  0xa8   :  { %1150 = vmatpush.msra.mxu0 %v4714_v47  ;;  %1170 = vmatpush.msra.mxu1 %v4716_v48  ;;  %v7785_v48 = vmov 0  }
  0xa9   :  { %1190 = vmatpush.msra.mxu2 %v4736_v53  ;;  %1210 = vmatpush.msra.mxu3 %v4738_v54  ;;  %v5218_v49 = vsel %vm3699_vm1, 1, %v7785_v48  ;;  %v5221_v50 = vsel %vm3701_vm2, 1, %v7785_v48  ;;  %vm3712_vm1 = vcmp.eq.s32.totalorder %v5197_v43, 6  ;;  %vm3709_vm2 = vcmp.gt.s32.totalorder %v5192_v41, 1 }
  0xaa   :  { %v5171_v37 = vpop.f32.mrf.mxu2  ;;  %v5173_v38 = vpop.f32.mrf.mxu3  ;;  %1151 = vmatpush.msra.mxu0 %v4742_v55  ;;  %1171 = vmatpush.msra.mxu1 %v4744_v56  ;;  %8168 = vst [vmem:[#allocation104_spill] sm:$0xff] %v5218_v49  ;;  %v5248_v56 = vsel %vm3700_vm3, 1, %v7785_v48 }
  0xab   :  { %v5177_v39 = vpop.f32.mrf.mxu0  ;;  %v5179_v40 = vpop.f32.mrf.mxu1  ;;  %1191 = vmatpush.msra.mxu2 %v4746_v57  ;;  %1211 = vmatpush.msra.mxu3 %v4750_v58  ;;  %8169 = vst [vmem:[#allocation105_spill] sm:$0xff] %v5221_v50  ;;  %v5251_v57 = vsel %vm3702_vm4, 1, %v7785_v48  ;;  %v8176_v58 = vld [vmem:[#allocation26_spill] sm:$0xff] }
  0xac   :  { %8161 = vst [vmem:[#allocation97_spill] sm:$0xff] %v5177_v39  ;;  %1152 = vmatpush.msra.mxu0 %v4752_v59  ;;  %1172 = vmatpush.msra.mxu1 %v4754_v60  ;;  %v8177_v59 = vld [vmem:[#allocation27_spill] sm:$0xff]  ;;  %v8178_v60 = vld [vmem:[#allocation28_spill] sm:$0xff]  ;;  %v5670_v39 = vld [vmem:[#allocation4 + $0x60] sm:$0xff] }
  0xad   :  { %8162 = vst [vmem:[#allocation98_spill] sm:$0xff] %v5179_v40  ;;  %1192 = vmatpush.msra.mxu2 %v4762_v62  ;;  %1212 = vmatpush.msra.mxu3 %v4764_v63  ;;  %v8180_v62 = vld [vmem:[#allocation30_spill] sm:$0xff]  ;;  %v5667_v40 = vld [vmem:[#allocation4 + $0x98] sm:$0xff] }
  0xae   :  { %1153 = vmatpush.msra.mxu0 %v4758_v61  ;;  %1173 = vmatpush.msra.mxu1 %v4766_v0  ;;  %8174 = vst [vmem:[#allocation110_spill] sm:$0xff] %v5248_v56  ;;  %v8179_v61 = vld [vmem:[#allocation29_spill] sm:$0xff] }
  0xaf   :  { %1193 = vmatpush.msra.mxu2 %v4777_v2  ;;  %1213 = vmatpush.msra.mxu3 %v4779_v3  ;;  %8175 = vst [vmem:[#allocation111_spill] sm:$0xff] %v5251_v57  ;;  %v8183_v2 = vld [vmem:[#allocation31_spill] sm:$0xff]  ;;  %v8184_v3 = vld [vmem:[#allocation32_spill] sm:$0xff] }
  0xb0   :  { %1154 = vmatpush.msra.mxu0 %v4783_v4  ;;  %1174 = vmatpush.msra.mxu1 %v4785_v5 }
  0xb1   :  { %1194 = vmatpush.msra.mxu2 %v4789_v6  ;;  %1214 = vmatpush.msra.mxu3 %v4791_v7  ;;  %v8187_v6 = vld [vmem:[#allocation33_spill] sm:$0xff]  ;;  %v8188_v7 = vld [vmem:[#allocation34_spill] sm:$0xff] }
  0xb2   :  { %v5203_v44 = vpop.f32.mrf.mxu2  ;;  %v5205_v45 = vpop.f32.mrf.mxu3  ;;  %1155 = vmatpush.msra.mxu0 %v4795_v8  ;;  %1175 = vmatpush.msra.mxu1 %v4797_v9  ;;  %v8189_v8 = vld [vmem:[#allocation35_spill] sm:$0xff]  ;;  %v8190_v9 = vld [vmem:[#allocation36_spill] sm:$0xff] }
  0xb3   :  { %8164 = vst [vmem:[#allocation100_spill] sm:$0xff] %v5203_v44  ;;  %v5211_v46 = vpop.f32.mrf.mxu0  ;;  %v5213_v47 = vpop.f32.mrf.mxu1  ;;  %3785 = vset.pattern.permute.xlu1 %v7785_v48  ;;  %3783 = vset.pattern.permute.xlu0 %v7785_v48  ;;  %v5655_v44 = vld [vmem:[#allocation4 + $0xb8] sm:$0xff] }
  0xb4   :  { %8165 = vst [vmem:[#allocation101_spill] sm:$0xff] %v5205_v45  ;;  %1103 = vperm.xlu0 %3783, %v5218_v49   ;;  %1120 = vperm.xlu1 %3785, %v5221_v50   ;;  %v5625_v50 = vld [vmem:[#allocation4 + $0xe8] sm:$0xff]  ;;  %v5643_v49 = vld [vmem:[#allocation4 + $0xd8] sm:$0xff]  ;;  %v5664_v45 = vld [vmem:[#allocation4 + $0x90] sm:$0xff] }
  0xb5   :  { %8166 = vst [vmem:[#allocation102_spill] sm:$0xff] %v5211_v46  ;;  %1195 = vmatpush.msra.mxu2 %v4801_v10  ;;  %1215 = vmatpush.msra.mxu3 %v4803_v11  ;;  %v8191_v10 = vld [vmem:[#allocation37_spill] sm:$0xff]  ;;  %v8192_v11 = vld [vmem:[#allocation38_spill] sm:$0xff] }
  0xb6   :  { %8167 = vst [vmem:[#allocation103_spill] sm:$0xff] %v5213_v47  ;;  %1156 = vmatpush.msra.mxu0 %v4807_v12  ;;  %1176 = vmatpush.msra.mxu1 %v4809_v13  ;;  %v8193_v12 = vld [vmem:[#allocation39_spill] sm:$0xff]  ;;  %v8194_v13 = vld [vmem:[#allocation40_spill] sm:$0xff]  ;;  %v5619_v47 = vld [vmem:[#allocation4 + $0x118] sm:$0xff] }
  0xb7   :  { %1196 = vmatpush.msra.mxu2 %v4820_v15  ;;  %1216 = vmatpush.msra.mxu3 %v4822_v16  ;;  %v8195_v15 = vld [vmem:[#allocation41_spill] sm:$0xff]  ;;  %v8196_v16 = vld [vmem:[#allocation42_spill] sm:$0xff] }
  0xb8   :  { %1157 = vmatpush.msra.mxu0 %v4826_v17  ;;  %1177 = vmatpush.msra.mxu1 %v4828_v18  ;;  %v8197_v17 = vld [vmem:[#allocation43_spill] sm:$0xff]  ;;  %v8198_v18 = vld [vmem:[#allocation44_spill] sm:$0xff]  ;;  %v5622_v46 = vld [vmem:[#allocation4 + $0xe0] sm:$0xff] }
  0xb9   :  { %1197 = vmatpush.msra.mxu2 %v4832_v19  ;;  %1217 = vmatpush.msra.mxu3 %v4834_v20  ;;  %v8199_v19 = vld [vmem:[#allocation45_spill] sm:$0xff]  ;;  %v8200_v20 = vld [vmem:[#allocation46_spill] sm:$0xff] }
  0xba   :  { %v5235_v51 = vpop.f32.mrf.mxu2  ;;  %v5237_v53 = vpop.f32.mrf.mxu3  ;;  %1158 = vmatpush.msra.mxu0 %v4838_v21  ;;  %1178 = vmatpush.msra.mxu1 %v4840_v22 }
  0xbb   :  { %8170 = vst [vmem:[#allocation106_spill] sm:$0xff] %v5235_v51  ;;  %v5243_v54 = vpop.f32.mrf.mxu0  ;;  %v5245_v55 = vpop.f32.mrf.mxu1  ;;  %1198 = vmatpush.msra.mxu2 %v4844_v23  ;;  %1218 = vmatpush.msra.mxu3 %v4846_v24  ;;  %v8203_v23 = vld [vmem:[#allocation47_spill] sm:$0xff]  ;;  %v8204_v24 = vld [vmem:[#allocation48_spill] sm:$0xff] }
  0xbc   :  { %8171 = vst [vmem:[#allocation107_spill] sm:$0xff] %v5237_v53  ;;  %1112 = vperm.xlu0 %3783, %v5248_v56   ;;  %1127 = vperm.xlu1 %3785, %v5251_v57   ;;  %v5613_v51 = vld [vmem:[#allocation4 + $0x108] sm:$0xff]  ;;  %v5616_v53 = vld [vmem:[#allocation4 + $0x110] sm:$0xff]  ;;  %v5634_v57 = vld [vmem:[#allocation4 + $0xc0] sm:$0xff] }
  0xbd   :  { %8172 = vst [vmem:[#allocation108_spill] sm:$0xff] %v5243_v54  ;;  %1159 = vmatpush.msra.mxu0 %v4850_v25  ;;  %1179 = vmatpush.msra.mxu1 %v4852_v26  ;;  %v5598_v54 = vld [vmem:[#allocation4 + $0x120] sm:$0xff]  ;;  %v5637_v56 = vld [vmem:[#allocation4 + $0xc8] sm:$0xff] }
  0xbe   :  { %8173 = vst [vmem:[#allocation109_spill] sm:$0xff] %v5245_v55  ;;  %1199 = vmatpush.msra.mxu2 %v4863_v28  ;;  %1219 = vmatpush.msra.mxu3 %v4865_v29  ;;  %v8207_v28 = vld [vmem:[#allocation49_spill] sm:$0xff]  ;;  %v8208_v29 = vld [vmem:[#allocation50_spill] sm:$0xff] }
  0xbf   :  { %1160 = vmatpush.msra.mxu0 %v4869_v30  ;;  %1180 = vmatpush.msra.mxu1 %v8176_v58  ;;  %v8209_v30 = vld [vmem:[#allocation51_spill] sm:$0xff]  ;;  %v8211_v58 = vld [vmem:[#allocation53_spill] sm:$0xff] }
  0xc0   :  { %1200 = vmatpush.msra.mxu2 %v8177_v59  ;;  %1220 = vmatpush.msra.mxu3 %v8178_v60  ;;  %v8212_v59 = vld [vmem:[#allocation54_spill] sm:$0xff]  ;;  %v8213_v60 = vld [vmem:[#allocation55_spill] sm:$0xff]  ;;  %v5595_v55 = vld [vmem:[#allocation4 + $0x158] sm:$0xff] }
  0xc1   :  { %1161 = vmatpush.msra.mxu0 %v8179_v61  ;;  %1181 = vmatpush.msra.mxu1 %v8180_v62  ;;  %v8214_v61 = vld [vmem:[#allocation56_spill] sm:$0xff]  ;;  %v8215_v62 = vld [vmem:[#allocation57_spill] sm:$0xff] }
  0xc2   :  { %v5267_v63 = vpop.f32.mrf.mxu2  ;;  %v5269_v0 = vpop.f32.mrf.mxu3  ;;  %1201 = vmatpush.msra.mxu2 %v8183_v2  ;;  %1221 = vmatpush.msra.mxu3 %v8184_v3  ;;  %v8216_v2 = vld [vmem:[#allocation58_spill] sm:$0xff]  ;;  %v8217_v3 = vld [vmem:[#allocation59_spill] sm:$0xff] }
  0xc3   :  { %8181 = vst [vmem:[#allocation26_spill] sm:$0xff] %v5267_v63  ;;  %v5273_v4 = vpop.f32.mrf.mxu0  ;;  %v5275_v5 = vpop.f32.mrf.mxu1  ;;  %1162 = vmatpush.msra.mxu0 %v8187_v6  ;;  %1182 = vmatpush.msra.mxu1 %v8188_v7  ;;  %v8218_v6 = vld [vmem:[#allocation60_spill] sm:$0xff]  ;;  %v8219_v7 = vld [vmem:[#allocation61_spill] sm:$0xff] }
  0xc4   :  { %8182 = vst [vmem:[#allocation27_spill] sm:$0xff] %v5269_v0  ;;  %1202 = vmatpush.msra.mxu2 %v8189_v8  ;;  %1222 = vmatpush.msra.mxu3 %v8190_v9  ;;  %v8220_v8 = vld [vmem:[#allocation62_spill] sm:$0xff] }
  0xc5   :  { %8185 = vst [vmem:[#allocation28_spill] sm:$0xff] %v5273_v4  ;;  %1294 = vmatpush.msrb.mxu0 %v8191_v10  ;;  %1314 = vmatpush.msrb.mxu1 %v8192_v11  ;;  %v8223_v11 = vld [vmem:[#allocation63_spill] sm:$0xff] }
  0xc6   :  { %8186 = vst [vmem:[#allocation29_spill] sm:$0xff] %v5275_v5  ;;  %1334 = vmatpush.msrb.mxu2 %v8193_v12  ;;  %1354 = vmatpush.msrb.mxu3 %v8194_v13  ;;  %v8224_v12 = vld [vmem:[#allocation64_spill] sm:$0xff] }
  0xc7   :  { %1295 = vmatpush.msrb.mxu0 %v8195_v15  ;;  %1315 = vmatpush.msrb.mxu1 %v8196_v16  ;;  %v8227_v16 = vld [vmem:[#allocation65_spill] sm:$0xff] }
  0xc8   :  { %1335 = vmatpush.msrb.mxu2 %v8197_v17  ;;  %1355 = vmatpush.msrb.mxu3 %v8198_v18  ;;  %v8228_v17 = vld [vmem:[#allocation66_spill] sm:$0xff]  ;;  %v8229_v18 = vld [vmem:[#allocation67_spill] sm:$0xff] }
  0xc9   :  { %1296 = vmatpush.msrb.mxu0 %v8199_v19  ;;  %1316 = vmatpush.msrb.mxu1 %v8200_v20  ;;  %v8230_v19 = vld [vmem:[#allocation68_spill] sm:$0xff]  ;;  %v8231_v20 = vld [vmem:[#allocation69_spill] sm:$0xff] }
  0xca   :  { %v5291_v21 = vpop.f32.mrf.mxu2  ;;  %v5293_v22 = vpop.f32.mrf.mxu3  ;;  %1336 = vmatpush.msrb.mxu2 %v8203_v23  ;;  %1356 = vmatpush.msrb.mxu3 %v8204_v24  ;;  %v8232_v23 = vld [vmem:[#allocation70_spill] sm:$0xff]  ;;  %v8233_v24 = vld [vmem:[#allocation71_spill] sm:$0xff]  ;;  %8297 = vst [vmem:[#allocation69_spill] sm:$0xff] %v5613_v51 }
  0xcb   :  { %8201 = vst [vmem:[#allocation30_spill] sm:$0xff] %v5291_v21  ;;  %v5297_v25 = vpop.f32.mrf.mxu0  ;;  %v5299_v26 = vpop.f32.mrf.mxu1  ;;  %1297 = vmatpush.msrb.mxu0 %v8207_v28  ;;  %1317 = vmatpush.msrb.mxu1 %v8208_v29  ;;  %v8234_v28 = vld [vmem:[#allocation72_spill] sm:$0xff]  ;;  %v8235_v29 = vld [vmem:[#allocation73_spill] sm:$0xff] }
  0xcc   :  { %8202 = vst [vmem:[#allocation31_spill] sm:$0xff] %v5293_v22  ;;  %1337 = vmatpush.msrb.mxu2 %v8209_v30  ;;  %1357 = vmatpush.msrb.mxu3 %v8210_v34  ;;  %v8236_v30 = vld [vmem:[#allocation74_spill] sm:$0xff]  ;;  %v8237_v34 = vld [vmem:[#allocation75_spill] sm:$0xff] }
  0xcd   :  { %8205 = vst [vmem:[#allocation32_spill] sm:$0xff] %v5297_v25  ;;  %1298 = vmatpush.msrb.mxu0 %v8211_v58  ;;  %1318 = vmatpush.msrb.mxu1 %v8212_v59  ;;  %v8238_v58 = vld [vmem:[#allocation76_spill] sm:$0xff]  ;;  %v8239_v59 = vld [vmem:[#allocation77_spill] sm:$0xff] }
  0xce   :  { %8206 = vst [vmem:[#allocation33_spill] sm:$0xff] %v5299_v26  ;;  %1338 = vmatpush.msrb.mxu2 %v8213_v60  ;;  %1358 = vmatpush.msrb.mxu3 %v8214_v61  ;;  %v8240_v60 = vld [vmem:[#allocation78_spill] sm:$0xff] }
  0xcf   :  { %1299 = vmatpush.msrb.mxu0 %v8215_v62  ;;  %1319 = vmatpush.msrb.mxu1 %v8216_v2  ;;  %v8243_v2 = vld [vmem:[#allocation79_spill] sm:$0xff]  ;;  %8298 = vst [vmem:[#allocation70_spill] sm:$0xff] %v5616_v53 }
  0xd0   :  { %1339 = vmatpush.msrb.mxu2 %v8217_v3  ;;  %1359 = vmatpush.msrb.mxu3 %v8218_v6  ;;  %v8244_v3 = vld [vmem:[#allocation80_spill] sm:$0xff]  ;;  %8299 = vst [vmem:[#allocation71_spill] sm:$0xff] %v5619_v47 }
  0xd1   :  { %1300 = vmatpush.msrb.mxu0 %v8219_v7  ;;  %1320 = vmatpush.msrb.mxu1 %v8220_v8  ;;  %v8247_v8 = vld [vmem:[#allocation81_spill] sm:$0xff]  ;;  %8300 = vst [vmem:[#allocation72_spill] sm:$0xff] %v5622_v46 }
  0xd2   :  { %v5315_v9 = vpop.f32.mrf.mxu2  ;;  %v5317_v10 = vpop.f32.mrf.mxu3  ;;  %1340 = vmatpush.msrb.mxu2 %v8223_v11  ;;  %1360 = vmatpush.msrb.mxu3 %v8224_v12  ;;  %v8248_v11 = vld [vmem:[#allocation82_spill] sm:$0xff]  ;;  %v8249_v12 = vld [vmem:[#allocation83_spill] sm:$0xff]  ;;  %8301 = vst [vmem:[#allocation73_spill] sm:$0xff] %v5625_v50 }
  0xd3   :  { %8221 = vst [vmem:[#allocation34_spill] sm:$0xff] %v5315_v9  ;;  %v5321_v13 = vpop.f32.mrf.mxu0  ;;  %v5323_v15 = vpop.f32.mrf.mxu1  ;;  %1301 = vmatpush.msrb.mxu0 %v8227_v16  ;;  %1321 = vmatpush.msrb.mxu1 %v8228_v17  ;;  %v8250_v16 = vld [vmem:[#allocation84_spill] sm:$0xff]  ;;  %v8251_v17 = vld [vmem:[#allocation85_spill] sm:$0xff] }
  0xd4   :  { %8222 = vst [vmem:[#allocation35_spill] sm:$0xff] %v5317_v10  ;;  %1341 = vmatpush.msrb.mxu2 %v8229_v18  ;;  %1361 = vmatpush.msrb.mxu3 %v8230_v19  ;;  %v8252_v18 = vld [vmem:[#allocation86_spill] sm:$0xff]  ;;  %v8253_v19 = vld [vmem:[#allocation87_spill] sm:$0xff] }
  0xd5   :  { %8225 = vst [vmem:[#allocation36_spill] sm:$0xff] %v5321_v13  ;;  %1302 = vmatpush.msrb.mxu0 %v8231_v20  ;;  %1322 = vmatpush.msrb.mxu1 %v8232_v23  ;;  %v8254_v20 = vld [vmem:[#allocation88_spill] sm:$0xff]  ;;  %v8255_v23 = vld [vmem:[#allocation89_spill] sm:$0xff] }
  0xd6   :  { %8226 = vst [vmem:[#allocation37_spill] sm:$0xff] %v5323_v15  ;;  %1342 = vmatpush.msrb.mxu2 %v8233_v24  ;;  %1362 = vmatpush.msrb.mxu3 %v8234_v28  ;;  %v8256_v24 = vld [vmem:[#allocation90_spill] sm:$0xff]  ;;  %v8257_v28 = vld [vmem:[#allocation91_spill] sm:$0xff] }
  0xd7   :  { %1303 = vmatpush.msrb.mxu0 %v8235_v29  ;;  %1323 = vmatpush.msrb.mxu1 %v8236_v30  ;;  %v8258_v29 = vld [vmem:[#allocation92_spill] sm:$0xff]  ;;  %v8283_v15 = vld [vmem:[#allocation95_spill] sm:$0xff]  ;;  %8304 = vst [vmem:[#allocation76_spill] sm:$0xff] %v5634_v57 }
  0xd8   :  { %1343 = vmatpush.msrb.mxu2 %v8237_v34  ;;  %1363 = vmatpush.msrb.mxu3 %v8238_v58  ;;  %8305 = vst [vmem:[#allocation77_spill] sm:$0xff] %v5637_v56 }
  0xd9   :  { %1304 = vmatpush.msrb.mxu0 %v8239_v59  ;;  %1324 = vmatpush.msrb.mxu1 %v8240_v60  ;;  %v8264_v59 = vld [vmem:[#allocation94_spill] sm:$0xff]  ;;  %8307 = vst [vmem:[#allocation79_spill] sm:$0xff] %v5643_v49 }
  0xda   :  { %v5339_v61 = vpop.f32.mrf.mxu2  ;;  %v5341_v62 = vpop.f32.mrf.mxu3  ;;  %1344 = vmatpush.msrb.mxu2 %v8243_v2  ;;  %1364 = vmatpush.msrb.mxu3 %v8244_v3  ;;  %8311 = vst [vmem:[#allocation83_spill] sm:$0xff] %v5655_v44 }
  0xdb   :  { %8241 = vst [vmem:[#allocation38_spill] sm:$0xff] %v5339_v61  ;;  %v5345_v6 = vpop.f32.mrf.mxu0  ;;  %v5347_v7 = vpop.f32.mrf.mxu1  ;;  %1305 = vmatpush.msrb.mxu0 %v8247_v8  ;;  %1325 = vmatpush.msrb.mxu1 %v8248_v11 }
  0xdc   :  { %8242 = vst [vmem:[#allocation39_spill] sm:$0xff] %v5341_v62  ;;  %1345 = vmatpush.msrb.mxu2 %v8249_v12  ;;  %1365 = vmatpush.msrb.mxu3 %v8250_v16 }
  0xdd   :  { %8245 = vst [vmem:[#allocation40_spill] sm:$0xff] %v5345_v6  ;;  %1306 = vmatpush.msrb.mxu0 %v5084_v52  ;;  %1326 = vmatpush.msrb.mxu1 %v8251_v17 }
  0xde   :  { %8246 = vst [vmem:[#allocation41_spill] sm:$0xff] %v5347_v7  ;;  %1346 = vmatpush.msrb.mxu2 %v8252_v18  ;;  %1366 = vmatpush.msrb.mxu3 %v8253_v19 }
  0xdf   :  { %1307 = vmatpush.msrb.mxu0 %v8254_v20  ;;  %1327 = vmatpush.msrb.mxu1 %v5098_v36  ;;  %v8263_v36 = vld [vmem:[#allocation93_spill] sm:$0xff]  ;;  %8314 = vst [vmem:[#allocation86_spill] sm:$0xff] %v5664_v45 }
  0xe0   :  { %1347 = vmatpush.msrb.mxu2 %v8255_v23  ;;  %1367 = vmatpush.msrb.mxu3 %v8256_v24  ;;  %8315 = vst [vmem:[#allocation87_spill] sm:$0xff] %v5667_v40 }
  0xe1   :  { %1308 = vmatpush.msrb.mxu0 %v8257_v28  ;;  %1328 = vmatpush.msrb.mxu1 %v8258_v29  ;;  %8316 = vst [vmem:[#allocation88_spill] sm:$0xff] %v5670_v39 }
  0xe2   :  { %v5363_v30 = vpop.f32.mrf.mxu2  ;;  %v5365_v52 = vpop.f32.mrf.mxu3  ;;  %1348 = vmatpush.msrb.mxu2 %v5121_v31  ;;  %1368 = vmatpush.msrb.mxu3 %v5123_v1 }
  0xe3   :  { %8259 = vst [vmem:[#allocation42_spill] sm:$0xff] %v5363_v30  ;;  %v5369_v34 = vpop.f32.mrf.mxu0  ;;  %v5371_v58 = vpop.f32.mrf.mxu1  ;;  %1309 = vmatpush.msrb.mxu0 %v5127_v14  ;;  %1329 = vmatpush.msrb.mxu1 %v5129_v33 }
  0xe4   :  { %8260 = vst [vmem:[#allocation43_spill] sm:$0xff] %v5365_v52  ;;  %1349 = vmatpush.msrb.mxu2 %v8263_v36  ;;  %1369 = vmatpush.msrb.mxu3 %v8264_v59 }
  0xe5   :  { %8261 = vst [vmem:[#allocation44_spill] sm:$0xff] %v5369_v34  ;;  %3784 = vset.pattern.permute.xlu2 %v7785_v48 }
  0xe6   :  { %8262 = vst [vmem:[#allocation45_spill] sm:$0xff] %v5371_v58 }
  0xea   :  { %v5378_v60 = vpop.f32.mrf.mxu2  ;;  %v5380_v2 = vpop.f32.mrf.mxu3 }
  0xeb   :  { %8265 = vst [vmem:[#allocation46_spill] sm:$0xff] %v5378_v60  ;;  %v5382_v31 = vpop.f32.mrf.mxu0  ;;  %v5384_v1 = vpop.f32.mrf.mxu1  ;;  %v8284_v60 = vld [vmem:[#allocation96_spill] sm:$0xff] }
  0xec   :  { %8266 = vst [vmem:[#allocation47_spill] sm:$0xff] %v5380_v2 }
  0xed   :  { %8267 = vst [vmem:[#allocation48_spill] sm:$0xff] %v5382_v31 }
  0xee   :  { %8268 = vst [vmem:[#allocation49_spill] sm:$0xff] %v5384_v1 }
  0xf2   :  { %v5386_v3 = vpop.f32.mrf.mxu2  ;;  %v5388_v8 = vpop.f32.mrf.mxu3 }
  0xf3   :  { %8269 = vst [vmem:[#allocation50_spill] sm:$0xff] %v5386_v3  ;;  %v5390_v14 = vpop.f32.mrf.mxu0  ;;  %v5392_v33 = vpop.f32.mrf.mxu1 }
  0xf4   :  { %8270 = vst [vmem:[#allocation51_spill] sm:$0xff] %v5388_v8 }
  0xf5   :  { %8271 = vst [vmem:[#allocation52_spill] sm:$0xff] %v5390_v14 }
  0xf6   :  { %8272 = vst [vmem:[#allocation53_spill] sm:$0xff] %v5392_v33 }
  0xfa   :  { %v5394_v11 = vpop.f32.mrf.mxu2  ;;  %v5396_v12 = vpop.f32.mrf.mxu3 }
  0xfb   :  { %8273 = vst [vmem:[#allocation54_spill] sm:$0xff] %v5394_v11  ;;  %v5398_v16 = vpop.f32.mrf.mxu0  ;;  %v5400_v17 = vpop.f32.mrf.mxu1 }
  0xfc   :  { %8274 = vst [vmem:[#allocation55_spill] sm:$0xff] %v5396_v12 }
  0xfd   :  { %8275 = vst [vmem:[#allocation56_spill] sm:$0xff] %v5398_v16  ;;  %v5610_v16 = vld [vmem:[#allocation4 + $0x100] sm:$0xff] }
  0xfe   :  { %8276 = vst [vmem:[#allocation57_spill] sm:$0xff] %v5400_v17  ;;  %v5607_v17 = vld [vmem:[#allocation4 + $0x138] sm:$0xff] }
  0xff   :  { %8296 = vst [vmem:[#allocation68_spill] sm:$0xff] %v5610_v16 }
 0x102   :  { %v5402_v18 = vpop.f32.mrf.mxu2  ;;  %v5404_v19 = vpop.f32.mrf.mxu3 }
 0x103   :  { %8277 = vst [vmem:[#allocation58_spill] sm:$0xff] %v5402_v18  ;;  %v5406_v20 = vpop.f32.mrf.mxu0  ;;  %v5408_v23 = vpop.f32.mrf.mxu1  ;;  %v5601_v18 = vld [vmem:[#allocation4 + $0x128] sm:$0xff] }
 0x104   :  { %8278 = vst [vmem:[#allocation59_spill] sm:$0xff] %v5404_v19  ;;  %v5604_v19 = vld [vmem:[#allocation4 + $0x130] sm:$0xff] }
 0x105   :  { %8279 = vst [vmem:[#allocation60_spill] sm:$0xff] %v5406_v20  ;;  %v5661_v20 = vld [vmem:[#allocation4 + $0x88] sm:$0xff] }
 0x106   :  { %8280 = vst [vmem:[#allocation61_spill] sm:$0xff] %v5408_v23  ;;  %v5658_v23 = vld [vmem:[#allocation4 + $0x80] sm:$0xff] }
 0x107   :  { %8312 = vst [vmem:[#allocation84_spill] sm:$0xff] %v5658_v23 }
 0x108   :  { %8313 = vst [vmem:[#allocation85_spill] sm:$0xff] %v5661_v20 }
 0x10a   :  { %v5410_v24 = vpop.f32.mrf.mxu2  ;;  %v5412_v28 = vpop.f32.mrf.mxu3 }
 0x10b   :  { %8281 = vst [vmem:[#allocation62_spill] sm:$0xff] %v5410_v24  ;;  %v5414_v29 = vpop.f32.mrf.mxu0  ;;  %v5416_v36 = vpop.f32.mrf.mxu1  ;;  %v5649_v24 = vld [vmem:[#allocation4 + $0xa8] sm:$0xff] }
 0x10c   :  { %8282 = vst [vmem:[#allocation63_spill] sm:$0xff] %v5412_v28  ;;  %v5652_v28 = vld [vmem:[#allocation4 + $0xb0] sm:$0xff] }
 0x10d   :  { %8309 = vst [vmem:[#allocation81_spill] sm:$0xff] %v5649_v24 }
 0x10e   :  { %8310 = vst [vmem:[#allocation82_spill] sm:$0xff] %v5652_v28 }
 0x112   :  { %v5418_v59 = vpop.f32.mrf.mxu2  ;;  %v5420_v48 = vpop.f32.mrf.mxu3 }
 0x113   :  { %v486_v30 = vpop.f32.mrf.mxu0  ;;  %v527_v52 = vpop.f32.mrf.mxu1 }
 0x11a   :  { %v568_v7 = vpop.f32.mrf.mxu2  ;;  %v609_v6 = vpop.f32.mrf.mxu3 }
 0x11b   :  { %v822_v61 = vpop.f32.mrf.mxu0  ;;  %v842_v62 = vpop.f32.mrf.mxu1 }
 0x11c   :  { %v885_v13 = vadd.f32 %v822_v61, %v8283_v15  ;;  %v886_v2 = vadd.f32 %v842_v62, %v8284_v60 }
 0x11e   :  { %v3694_v58 = vmul.f32 -1.442695, %v885_v13  ;;  %v3693_v34 = vmul.f32 -1.442695, %v886_v2 }
 0x120   :  { %3786 = vpow2.f32 %v3694_v58 }
 0x121   :  { %3788 = vpow2.f32 %v3693_v34 }
 0x122   :  { %v882_v9 = vpop.f32.mrf.mxu3  ;;  %v862_v3 = vpop.f32.mrf.mxu2 }
 0x123   :  { %v888_v10 = vadd.f32 %v882_v9, %v5153_v32  ;;  %v969_v26 = vpop.f32.mrf.mxu0  ;;  %v989_v25 = vpop.f32.mrf.mxu1 }
 0x124   :  { %v1032_v8 = vadd.f32 %v969_v26, %v486_v30  ;;  %v1033_v1 = vadd.f32 %v989_v25, %v527_v52 }
 0x125   :  { %v3695_v31 = vmul.f32 -1.442695, %v888_v10  ;;  %v887_v10 = vadd.f32 %v862_v3, %v5151_v27 }
 0x126   :  { %v3787_v21 = vpop.eup %3786  ;;  %v3697_v22 = vmul.f32 -1.442695, %v1032_v8  ;;  %v3696_v15 = vmul.f32 -1.442695, %v1033_v1 }
 0x127   :  { %v3789_v5 = vpop.eup %3788  ;;  %v912_v4 = vadd.f32 1.0, %v3787_v21  ;;  %3790 = vpow2.f32 %v3695_v31 }
 0x128   :  { %v892_v61 = vadd.f32 1.0, %v3789_v5  ;;  %3792 = vpow2.f32 %v3697_v22 }
 0x129   :  { %3794 = vrcp.f32 %v912_v4  ;;  %v922_v58 = vand.u32 2147483647, %v912_v4  ;;  %v924_v5 = vand.u32 2147483648, %v912_v4  ;;  %vm918_vm6 = vweird.f32 %v912_v4 }
 0x12a   :  { %3796 = vrcp.f32 %v892_v61  ;;  %v1029_v13 = vpop.f32.mrf.mxu3  ;;  %v1009_v34 = vpop.f32.mrf.mxu2  ;;  %v904_v2 = vand.u32 2147483648, %v892_v61  ;;  %v902_v31 = vand.u32 2147483647, %v892_v61  ;;  %vm898_vm5 = vweird.f32 %v892_v61 }
 0x12b   :  { %3798 = vpow2.f32 %v3696_v15  ;;  %v1035_v26 = vadd.f32 %v1029_v13, %v609_v6  ;;  %v1034_v1 = vadd.f32 %v1009_v34, %v568_v7  ;;  %vm5434_vm8 = vcmp.eq.f32.partialorder %v922_v58, 8.507059e+37 }
 0x12c   :  { %v925_v7 = vor.u32 1.1754944e-38, %v924_v5  ;;  %v905_v34 = vor.u32 1.1754944e-38, %v904_v2  ;;  %vm5441_vm10 = vcmp.eq.f32.partialorder %v902_v31, 8.507059e+37 }
 0x12d   :  { %v3791_v62 = vpop.eup %3790  ;;  %v3698_v15 = vmul.f32 -1.442695, %v1035_v26 }
 0x12e   :  { %v3793_v32 = vpop.eup %3792  ;;  %v5425_v9 = vadd.f32 1.0, %v3791_v62 }
 0x12f   :  { %v3795_v25 = vpop.eup %3794  ;;  %v5428_v30 = vadd.f32 1.0, %v3793_v32 }
 0x130   :  { %v3797_v21 = vpop.eup %3796  ;;  %v914_v52 = vmul.f32 %v3795_v25, %v912_v4  ;;  %3800 = vrcp.f32 %v5425_v9  ;;  %vm919_vm7 = vweird.f32 %v3795_v25  ;;  %vm940_vm4 = vweird.f32 %v5425_v9 }
 0x131   :  { %v3799_v22 = vpop.eup %3798  ;;  %v894_v60 = vmul.f32 %v3797_v21, %v892_v61  ;;  %3802 = vrcp.f32 %v5428_v30  ;;  %vm899_vm9 = vweird.f32 %v3797_v21  ;;  %vm920_vm11 = vmor %vm918_vm6, %vm919_vm7  ;;  %vm1065_vm12 = vweird.f32 %v5428_v30 }
 0x132   :  { %v915_v8 = vsub.f32 1.0, %v914_v52  ;;  %v5432_v6 = vadd.f32 1.0, %v3799_v22  ;;  %3804 = vtanh.f32 %v887_v10  ;;  %v946_v22 = vand.u32 2147483648, %v5425_v9  ;;  %vm900_vm13 = vmor %vm898_vm5, %vm899_vm9 }
 0x133   :  { %v895_v27 = vsub.f32 1.0, %v894_v60 }
 0x134   :  { %v916_v3 = vmul.f32 %v3795_v25, %v915_v8  ;;  %3806 = vrcp.f32 %v5432_v6  ;;  %v1051_v2 = vand.u32 2147483648, %v5432_v6  ;;  %v1049_v31 = vand.u32 2147483647, %v5432_v6 }
 0x135   :  { %v896_v62 = vmul.f32 %v3797_v21, %v895_v27  ;;  %3808 = vtanh.f32 %v1034_v1  ;;  %v1069_v1 = vand.u32 2147483647, %v5428_v30  ;;  %vm1045_vm7 = vweird.f32 %v5432_v6 }
 0x136   :  { %v5439_v32 = vpop.eup %3800  ;;  %v917_v10 = vadd.f32 %v3795_v25, %v916_v3  ;;  %3810 = vpow2.f32 %v3698_v15 }
 0x137   :  { %v897_v52 = vadd.f32 %v3797_v21, %v896_v62  ;;  %v936_v58 = vmul.f32 %v5439_v32, %v5425_v9  ;;  %v3803_v5 = vpop.eup %3802  ;;  %vm941_vm14 = vweird.f32 %v5439_v32 }
 0x138   :  { %v921_v60 = vsel %vm920_vm11, %v3795_v25, %v917_v10  ;;  %v3805_v8 = vpop.eup %3804  ;;  %v1061_v3 = vmul.f32 %v3803_v5, %v5428_v30  ;;  %v1071_v25 = vand.u32 2147483648, %v5428_v30  ;;  %vm1066_vm15 = vweird.f32 %v3803_v5  ;;  %vm5494_vm6 = vmor %vm940_vm4, %vm941_vm14 }
 0x139   :  { %v901_v4 = vsel %vm900_vm13, %v3797_v21, %v897_v52  ;;  %v926_v15 = vsel %vm5434_vm8, %v925_v7, %v921_v60  ;;  %v937_v27 = vsub.f32 1.0, %v936_v58  ;;  %vm1067_vm5 = vmor %vm1065_vm12, %vm1066_vm15  ;;  %vm1070_vm8 = vcmp.eq.f32.partialorder %v1069_v1, 8.507059e+37 }
 0x13a   :  { %v3807_v62 = vpop.eup %3806  ;;  %v906_v61 = vsel %vm5441_vm10, %v905_v34, %v901_v4  ;;  %v929_v11 = vmul.f32 %v3805_v8, %v926_v15  ;;  %v1062_v21 = vsub.f32 1.0, %v1061_v3  ;;  %v8289_v8 = vmov 0  }
 0x13b   :  { %v3809_v10 = vpop.eup %3808  ;;  %v908_v12 = vmul.f32 0.0, %v906_v61  ;;  %v938_v33 = vmul.f32 %v5439_v32, %v937_v27  ;;  %v1041_v13 = vmul.f32 %v3807_v62, %v5432_v6  ;;  %v5472_v4 = vsel %vm3711_vm0, 1, %v8289_v8  ;;  %v5527_v61 = vld [vmem:[#allocation4 + $0x1f8] sm:$0xff] }
 0x13c   :  { %v3811_v7 = vpop.eup %3810  ;;  %v1063_v58 = vmul.f32 %v3803_v5, %v1062_v21  ;;  %8290 = vst [vmem:[#allocation64_spill] sm:$0xff] %v5472_v4  ;;  %v5475_v15 = vsel %vm3712_vm1, 1, %v8289_v8  ;;  %v5480_v27 = vsel %vm3709_vm2, 1, %v8289_v8  ;;  %vm1046_vm3 = vweird.f32 %v3807_v62  ;;  %1462 = vperm.xlu0 %3783, %v5472_v4   ;;  %v5628_v4 = vld [vmem:[#allocation4 + $0xf0] sm:$0xff] }
 0x13d   :  { %v5466_v34 = vadd.f32 %v929_v11, %v908_v12  ;;  %v939_v26 = vadd.f32 %v5439_v32, %v938_v33  ;;  %v1042_v52 = vsub.f32 1.0, %v1041_v13  ;;  %v5469_v60 = vadd.f32 1.0, %v3811_v7  ;;  %8291 = vst [vmem:[#allocation65_spill] sm:$0xff] %v5475_v15  ;;  %1469 = vperm.xlu1 %3785, %v5475_v15   ;;  %1445 = vperm.xlu2 %3784, %v5480_v27   ;;  %vm1047_vm9 = vmor %vm1045_vm7, %vm1046_vm3  ;;  %v1104_v7 = vpop.permute.xlu0 %1103  ;;  %v5631_v15 = vld [vmem:[#allocation4 + $0xf8] sm:$0xff] }
 0x13e   :  { %8292 = vst [vmem:[#allocation66_spill] sm:$0xff] %v5480_v27  ;;  %v1064_v33 = vadd.f32 %v3803_v5, %v1063_v58  ;;  %v944_v12 = vand.u32 2147483647, %v5425_v9  ;;  %v1072_v3 = vor.u32 1.1754944e-38, %v1071_v25  ;;  %v1052_v30 = vor.u32 1.1754944e-38, %v1051_v2  ;;  %v5640_v27 = vld [vmem:[#allocation4 + $0xd0] sm:$0xff] }
 0x13f   :  { %3812 = vtanh.f32 %v5466_v34  ;;  %v1043_v11 = vmul.f32 %v3807_v62, %v1042_v52  ;;  %v943_v9 = vsel %vm5494_vm6, %v5439_v32, %v939_v26  ;;  %v1121_v52 = vpop.permute.xlu1 %1120  ;;  %v947_v58 = vor.u32 1.1754944e-38, %v946_v22  ;;  %8302 = vst [vmem:[#allocation74_spill] sm:$0xff] %v5628_v4 }
 0x140   :  { %3814 = vrcp.f32 %v5469_v60  ;;  %v1068_v13 = vsel %vm1067_vm5, %v3803_v5, %v1064_v33  ;;  %vm1050_vm10 = vcmp.eq.f32.partialorder %v1049_v31, 8.507059e+37  ;;  %vm945_vm11 = vcmp.eq.f32.partialorder %v944_v12, 8.507059e+37  ;;  %v5521_v12 = vld [vmem:[#allocation4 + $0x1e8] sm:$0xff]  ;;  %8303 = vst [vmem:[#allocation75_spill] sm:$0xff] %v5631_v15 }
 0x141   :  { %v1044_v21 = vadd.f32 %v3807_v62, %v1043_v11  ;;  %v1073_v25 = vsel %vm1070_vm8, %v1072_v3, %v1068_v13  ;;  %vm3710_vm12 = vcmp.gt.s32.totalorder %v5192_v41, 6  ;;  %v948_v5 = vsel %vm945_vm11, %v947_v58, %v943_v9  ;;  %v5524_v3 = vld [vmem:[#allocation4 + $0x1f0] sm:$0xff]  ;;  %v5534_v9 = vld [vmem:[#allocation4 + $0x1c8] sm:$0xff]  ;;  %8306 = vst [vmem:[#allocation78_spill] sm:$0xff] %v5640_v27 }
 0x142   :  { %v1076_v63 = vmul.f32 %v3809_v10, %v1073_v25  ;;  %vm1105_vm13 = vcmp.eq.s32.totalorder %v1104_v7, 1  ;;  %vm1122_vm14 = vcmp.eq.s32.totalorder %v1121_v52, 1  ;;  %v5508_v22 = vsel %vm3710_vm12, 1, %v8289_v8  ;;  %v5541_v7 = vld [vmem:[#allocation4 + $0x1d8] sm:$0xff]  ;;  %v5544_v52 = vld [vmem:[#allocation4 + $0x1a0] sm:$0xff]  ;;  %v5592_v41 = vld [vmem:[#allocation4 + $0x150] sm:$0xff] }
 0x143   :  { %v1048_v14 = vsel %vm1047_vm9, %v3807_v62, %v1044_v21  ;;  %8295 = vst [vmem:[#allocation67_spill] sm:$0xff] %v5508_v22  ;;  %v1091_v33 = vand.u32 2147483647, %v5469_v60  ;;  %v5530_v21 = vld [vmem:[#allocation4 + $0x1c0] sm:$0xff]  ;;  %vm1087_vm0 = vweird.f32 %v5469_v60 }
 0x144   :  { %v1053_v0 = vsel %vm1050_vm10, %v1052_v30, %v1048_v14  ;;  %v1093_v14 = vand.u32 2147483648, %v5469_v60  ;;  %v5537_v30 = vld [vmem:[#allocation4 + $0x1d0] sm:$0xff] }
 0x145   :  { %v3813_v6 = vpop.eup %3812  ;;  %v1055_v1 = vmul.f32 0.0, %v1053_v0  ;;  %1454 = vperm.xlu2 %3784, %v5508_v22   ;;  %vm1092_vm3 = vcmp.eq.f32.partialorder %v1091_v33, 8.507059e+37  ;;  %v5570_v33 = vld [vmem:[#allocation4 + $0x160] sm:$0xff] }
 0x146   :  { %v3815_v32 = vpop.eup %3814  ;;  %v951_v2 = vmul.f32 %v3813_v6, %v948_v5  ;;  %v1094_v25 = vor.u32 1.1754944e-38, %v1093_v14  ;;  %v5547_v6 = vld [vmem:[#allocation4 + $0x1a8] sm:$0xff]  ;;  %v5550_v5 = vld [vmem:[#allocation4 + $0x1b0] sm:$0xff]  ;;  %v5646_v22 = vld [vmem:[#allocation4 + $0xa0] sm:$0xff] }
 0x147   :  { %v5504_v26 = vadd.f32 %v1076_v63, %v1055_v1  ;;  %v1083_v11 = vmul.f32 %v3815_v32, %v5469_v60  ;;  %v5517_v63 = vld [vmem:[#allocation4 + $0x1e0] sm:$0xff]  ;;  %vm1088_vm15 = vweird.f32 %v3815_v32  ;;  %v5564_v14 = vld [vmem:[#allocation4 + $0x190] sm:$0xff]  ;;  %8308 = vst [vmem:[#allocation80_spill] sm:$0xff] %v5646_v22 }
 0x148   :  { %v5510_v31 = vsel %vm1105_vm13, %v951_v2, 0.0  ;;  %v5512_v62 = vsel %vm1122_vm14, %v951_v2, 0.0  ;;  %1163 = vmatmul.f32.vlgmr.msra.gmra.mxu0 %v951_v2  ;;  %1183 = vmatmul.f32.vlgmr.msra.gmra.mxu1 %v951_v2  ;;  %vm1089_vm1 = vmor %vm1087_vm0, %vm1088_vm15 }
 0x149   :  { %3816 = vtanh.f32 %v5504_v26  ;;  %v1084_v0 = vsub.f32 1.0, %v1083_v11  ;;  %1203 = vmatmul.f32.vlgmr.msra.gmra.mxu2 %v951_v2  ;;  %1223 = vmatmul.f32.vlgmr.msra.gmra.mxu3 %v951_v2  ;;  %v5553_v2 = vld [vmem:[#allocation4 + $0x1b8] sm:$0xff]  ;;  %v5556_v11 = vld [vmem:[#allocation4 + $0x180] sm:$0xff] }
 0x14a   :  { %1489 = vmatpush.msra.mxu0 %v5517_v63  ;;  %1509 = vmatpush.msra.mxu1 %v5521_v12 }
 0x14b   :  { %v1085_v10 = vmul.f32 %v3815_v32, %v1084_v0  ;;  %1529 = vmatpush.msra.mxu2 %v5524_v3  ;;  %1549 = vmatpush.msra.mxu3 %v5527_v61 }
 0x14c   :  { %1490 = vmatpush.msra.mxu0 %v5530_v21  ;;  %1510 = vmatpush.msra.mxu1 %v5534_v9 }
 0x14d   :  { %v1086_v13 = vadd.f32 %v3815_v32, %v1085_v10  ;;  %1530 = vmatpush.msra.mxu2 %v5537_v30  ;;  %1550 = vmatpush.msra.mxu3 %v5541_v7  ;;  %v5567_v10 = vld [vmem:[#allocation4 + $0x198] sm:$0xff] }
 0x14e   :  { %1491 = vmatpush.msra.mxu0 %v5544_v52  ;;  %1511 = vmatpush.msra.mxu1 %v5547_v6 }
 0x14f   :  { %v3817_v60 = vpop.eup %3816  ;;  %v1090_v58 = vsel %vm1089_vm1, %v3815_v32, %v1086_v13  ;;  %1531 = vmatpush.msra.mxu2 %v5550_v5  ;;  %1551 = vmatpush.msra.mxu3 %v5553_v2  ;;  %v5561_v32 = vld [vmem:[#allocation4 + $0x188] sm:$0xff]  ;;  %vm3721_vm1 = vcmp.eq.s32.totalorder %v5197_v43, 2 }
 0x150   :  { %v1095_v1 = vsel %vm1092_vm3, %v1094_v25, %v1090_v58  ;;  %1492 = vmatpush.msra.mxu0 %v5556_v11  ;;  %1512 = vmatpush.msra.mxu1 %v5561_v32  ;;  %v5577_v13 = vld [vmem:[#allocation4 + $0x168] sm:$0xff]  ;;  %v5580_v25 = vld [vmem:[#allocation4 + $0x170] sm:$0xff]  ;;  %v5586_v58 = vld [vmem:[#allocation4 + $0x140] sm:$0xff] }
 0x151   :  { %v5559_v0 = vmul.f32 %v3817_v60, %v1095_v1  ;;  %1532 = vmatpush.msra.mxu2 %v5564_v14  ;;  %1552 = vmatpush.msra.mxu3 %v5567_v10  ;;  %v5583_v60 = vld [vmem:[#allocation4 + $0x178] sm:$0xff]  ;;  %v5589_v1 = vld [vmem:[#allocation4 + $0x148] sm:$0xff] }
 0x152   :  { %1493 = vmatpush.msra.mxu0 %v5570_v33  ;;  %1513 = vmatpush.msra.mxu1 %v5577_v13 }
 0x153   :  { %1310 = vmatmul.f32.vlgmr.msrb.gmra.mxu0 %v5559_v0  ;;  %1330 = vmatmul.f32.vlgmr.msrb.gmra.mxu1 %v5559_v0 }
 0x154   :  { %1350 = vmatmul.f32.vlgmr.msrb.gmra.mxu2 %v5559_v0  ;;  %1370 = vmatmul.f32.vlgmr.msrb.gmra.mxu3 %v5559_v0 }
 0x155   :  { %1533 = vmatpush.msra.mxu2 %v5580_v25  ;;  %1553 = vmatpush.msra.mxu3 %v5583_v60 }
 0x156   :  { %1494 = vmatpush.msra.mxu0 %v5586_v58  ;;  %1514 = vmatpush.msra.mxu1 %v5589_v1 }
 0x157   :  { %1534 = vmatpush.msra.mxu2 %v5592_v41  ;;  %1554 = vmatpush.msra.mxu3 %v5595_v55 }
 0x158   :  { %1495 = vmatpush.msra.mxu0 %v5598_v54  ;;  %1515 = vmatpush.msra.mxu1 %v5601_v18 }
 0x159   :  { %1535 = vmatpush.msra.mxu2 %v5604_v19  ;;  %1555 = vmatpush.msra.mxu3 %v5607_v17 }
 0x15a   :  { %1496 = vmatpush.msra.mxu0 %v5610_v16  ;;  %1516 = vmatpush.msra.mxu1 %v5613_v51 }
 0x15b   :  { %1536 = vmatpush.msra.mxu2 %v5616_v53  ;;  %1556 = vmatpush.msra.mxu3 %v5619_v47 }
 0x15c   :  { %1497 = vmatpush.msra.mxu0 %v5622_v46  ;;  %1517 = vmatpush.msra.mxu1 %v5625_v50 }
 0x15d   :  { %1537 = vmatpush.msra.mxu2 %v5628_v4  ;;  %1557 = vmatpush.msra.mxu3 %v5631_v15 }
 0x15e   :  { %1498 = vmatpush.msra.mxu0 %v5634_v57  ;;  %1518 = vmatpush.msra.mxu1 %v5637_v56 }
 0x15f   :  { %1538 = vmatpush.msra.mxu2 %v5640_v27  ;;  %1558 = vmatpush.msra.mxu3 %v5643_v49 }
 0x160   :  { %1499 = vmatpush.msra.mxu0 %v5646_v22  ;;  %1519 = vmatpush.msra.mxu1 %v5649_v24 }
 0x161   :  { %1539 = vmatpush.msra.mxu2 %v5652_v28  ;;  %1559 = vmatpush.msra.mxu3 %v5655_v44  ;;  %v5673_v44 = vld [vmem:[#allocation4 + $0x68] sm:$0xff] }
 0x162   :  { %1500 = vmatpush.msra.mxu0 %v5658_v23  ;;  %1520 = vmatpush.msra.mxu1 %v5661_v20  ;;  %8317 = vst [vmem:[#allocation89_spill] sm:$0xff] %v5673_v44  ;;  %v5676_v23 = vld [vmem:[#allocation4 + $0x70] sm:$0xff]  ;;  %v5679_v20 = vld [vmem:[#allocation4 + $0x78] sm:$0xff] }
 0x163   :  { %1540 = vmatpush.msra.mxu2 %v5664_v45  ;;  %1560 = vmatpush.msra.mxu3 %v5667_v40  ;;  %8318 = vst [vmem:[#allocation90_spill] sm:$0xff] %v5676_v23  ;;  %v5682_v45 = vld [vmem:[#allocation4 + $0x40] sm:$0xff]  ;;  %v5685_v40 = vld [vmem:[#allocation4 + $0x48] sm:$0xff] }
 0x164   :  { %1501 = vmatpush.msra.mxu0 %v5670_v39  ;;  %1521 = vmatpush.msra.mxu1 %v5673_v44  ;;  %8319 = vst [vmem:[#allocation91_spill] sm:$0xff] %v5679_v20  ;;  %v5688_v39 = vld [vmem:[#allocation4 + $0x50] sm:$0xff]  ;;  %v5691_v44 = vld [vmem:[#allocation4 + $0x58] sm:$0xff] }
 0x165   :  { %1541 = vmatpush.msra.mxu2 %v5676_v23  ;;  %1561 = vmatpush.msra.mxu3 %v5679_v20  ;;  %8320 = vst [vmem:[#allocation92_spill] sm:$0xff] %v5682_v45  ;;  %v5694_v23 = vld [vmem:[#allocation4 + $0x20] sm:$0xff]  ;;  %v5697_v20 = vld [vmem:[#allocation4 + $0x28] sm:$0xff] }
 0x166   :  { %1502 = vmatpush.msra.mxu0 %v5682_v45  ;;  %8321 = vst [vmem:[#allocation93_spill] sm:$0xff] %v5685_v40  ;;  %1522 = vmatpush.msra.mxu1 %v5685_v40  ;;  %v5700_v45 = vld [vmem:[#allocation4 + $0x30] sm:$0xff]  ;;  %v5703_v40 = vld [vmem:[#allocation4 + $0x38] sm:$0xff] }
 0x167   :  { %8322 = vst [vmem:[#allocation94_spill] sm:$0xff] %v5688_v39  ;;  %1542 = vmatpush.msra.mxu2 %v5688_v39  ;;  %1562 = vmatpush.msra.mxu3 %v5691_v44  ;;  %v5706_v39 = vld [vmem:[#allocation4] sm:$0xff] }
 0x168   :  { %8323 = vst [vmem:[#allocation95_spill] sm:$0xff] %v5691_v44  ;;  %1503 = vmatpush.msra.mxu0 %v5694_v23  ;;  %1523 = vmatpush.msra.mxu1 %v5697_v20  ;;  %v5709_v44 = vld [vmem:[#allocation4 + $0x8] sm:$0xff] }
 0x169   :  { %8324 = vst [vmem:[#allocation96_spill] sm:$0xff] %v5694_v23  ;;  %1543 = vmatpush.msra.mxu2 %v5700_v45  ;;  %1563 = vmatpush.msra.mxu3 %v5703_v40  ;;  %v5712_v23 = vld [vmem:[#allocation4 + $0x10] sm:$0xff] }
 0x16a   :  { %8325 = vst [vmem:[#allocation112_spill] sm:$0xff] %v5697_v20  ;;  %1504 = vmatpush.msra.mxu0 %v5706_v39  ;;  %1524 = vmatpush.msra.mxu1 %v5709_v44  ;;  %v5715_v20 = vld [vmem:[#allocation4 + $0x18] sm:$0xff] }
 0x16b   :  { %8326 = vst [vmem:[#allocation113_spill] sm:$0xff] %v5700_v45  ;;  %1544 = vmatpush.msra.mxu2 %v5712_v23  ;;  %1564 = vmatpush.msra.mxu3 %v5715_v20  ;;  %v5718_v45 = vld [vmem:[#allocation5 + $0x1e0] sm:$0xff] }
 0x16c   :  { %8327 = vst [vmem:[#allocation114_spill] sm:$0xff] %v5703_v40  ;;  %1636 = vmatpush.msrb.mxu0 %v5718_v45  ;;  %v5721_v40 = vld [vmem:[#allocation5 + $0x1e8] sm:$0xff] }
 0x16d   :  { %8328 = vst [vmem:[#allocation115_spill] sm:$0xff] %v5706_v39  ;;  %1656 = vmatpush.msrb.mxu1 %v5721_v40  ;;  %v5724_v39 = vld [vmem:[#allocation5 + $0x1f0] sm:$0xff] }
 0x16e   :  { %8329 = vst [vmem:[#allocation116_spill] sm:$0xff] %v5709_v44  ;;  %1676 = vmatpush.msrb.mxu2 %v5724_v39  ;;  %v5727_v44 = vld [vmem:[#allocation5 + $0x1f8] sm:$0xff] }
 0x16f   :  { %8330 = vst [vmem:[#allocation117_spill] sm:$0xff] %v5712_v23  ;;  %1696 = vmatpush.msrb.mxu3 %v5727_v44  ;;  %v5730_v23 = vld [vmem:[#allocation5 + $0x1c0] sm:$0xff] }
 0x170   :  { %8331 = vst [vmem:[#allocation118_spill] sm:$0xff] %v5715_v20  ;;  %1637 = vmatpush.msrb.mxu0 %v5730_v23  ;;  %v5733_v20 = vld [vmem:[#allocation5 + $0x1c8] sm:$0xff] }
 0x171   :  { %8332 = vst [vmem:[#allocation119_spill] sm:$0xff] %v5718_v45  ;;  %1657 = vmatpush.msrb.mxu1 %v5733_v20  ;;  %v5736_v45 = vld [vmem:[#allocation5 + $0x1d0] sm:$0xff] }
 0x172   :  { %8333 = vst [vmem:[#allocation120_spill] sm:$0xff] %v5721_v40  ;;  %1677 = vmatpush.msrb.mxu2 %v5736_v45  ;;  %v5739_v40 = vld [vmem:[#allocation5 + $0x1d8] sm:$0xff] }
 0x173   :  { %8334 = vst [vmem:[#allocation121_spill] sm:$0xff] %v5724_v39  ;;  %1697 = vmatpush.msrb.mxu3 %v5739_v40  ;;  %v5742_v39 = vld [vmem:[#allocation5 + $0x1a0] sm:$0xff] }
 0x174   :  { %8335 = vst [vmem:[#allocation122_spill] sm:$0xff] %v5727_v44  ;;  %1638 = vmatpush.msrb.mxu0 %v5742_v39  ;;  %v5745_v44 = vld [vmem:[#allocation5 + $0x1a8] sm:$0xff] }
 0x175   :  { %8336 = vst [vmem:[#allocation123_spill] sm:$0xff] %v5730_v23  ;;  %1658 = vmatpush.msrb.mxu1 %v5745_v44  ;;  %v5748_v23 = vld [vmem:[#allocation5 + $0x1b0] sm:$0xff] }
 0x176   :  { %8337 = vst [vmem:[#allocation124_spill] sm:$0xff] %v5733_v20  ;;  %1678 = vmatpush.msrb.mxu2 %v5748_v23  ;;  %v5751_v20 = vld [vmem:[#allocation5 + $0x1b8] sm:$0xff] }
 0x177   :  { %8338 = vst [vmem:[#allocation125_spill] sm:$0xff] %v5736_v45  ;;  %1698 = vmatpush.msrb.mxu3 %v5751_v20  ;;  %v5754_v45 = vld [vmem:[#allocation5 + $0x180] sm:$0xff] }
 0x178   :  { %8339 = vst [vmem:[#allocation126_spill] sm:$0xff] %v5739_v40  ;;  %1639 = vmatpush.msrb.mxu0 %v5754_v45  ;;  %v5757_v40 = vld [vmem:[#allocation5 + $0x188] sm:$0xff] }
 0x179   :  { %8340 = vst [vmem:[#allocation127_spill] sm:$0xff] %v5742_v39  ;;  %1659 = vmatpush.msrb.mxu1 %v5757_v40  ;;  %v5760_v39 = vld [vmem:[#allocation5 + $0x190] sm:$0xff] }
 0x17a   :  { %8341 = vst [vmem:[#allocation128_spill] sm:$0xff] %v5745_v44  ;;  %1679 = vmatpush.msrb.mxu2 %v5760_v39  ;;  %v5763_v44 = vld [vmem:[#allocation5 + $0x198] sm:$0xff] }
 0x17b   :  { %8342 = vst [vmem:[#allocation129_spill] sm:$0xff] %v5748_v23  ;;  %1699 = vmatpush.msrb.mxu3 %v5763_v44  ;;  %v5766_v23 = vld [vmem:[#allocation5 + $0x160] sm:$0xff] }
 0x17c   :  { %8343 = vst [vmem:[#allocation130_spill] sm:$0xff] %v5751_v20  ;;  %1640 = vmatpush.msrb.mxu0 %v5766_v23  ;;  %v5769_v20 = vld [vmem:[#allocation5 + $0x168] sm:$0xff] }
 0x17d   :  { %8344 = vst [vmem:[#allocation131_spill] sm:$0xff] %v5754_v45  ;;  %1660 = vmatpush.msrb.mxu1 %v5769_v20  ;;  %v5772_v45 = vld [vmem:[#allocation5 + $0x170] sm:$0xff] }
 0x17e   :  { %8345 = vst [vmem:[#allocation132_spill] sm:$0xff] %v5757_v40  ;;  %1680 = vmatpush.msrb.mxu2 %v5772_v45  ;;  %v5775_v40 = vld [vmem:[#allocation5 + $0x178] sm:$0xff] }
 0x17f   :  { %8346 = vst [vmem:[#allocation133_spill] sm:$0xff] %v5760_v39  ;;  %1700 = vmatpush.msrb.mxu3 %v5775_v40  ;;  %v5778_v39 = vld [vmem:[#allocation5 + $0x140] sm:$0xff] }
 0x180   :  { %8347 = vst [vmem:[#allocation134_spill] sm:$0xff] %v5763_v44  ;;  %1641 = vmatpush.msrb.mxu0 %v5778_v39  ;;  %v5781_v44 = vld [vmem:[#allocation5 + $0x148] sm:$0xff] }
 0x181   :  { %8348 = vst [vmem:[#allocation135_spill] sm:$0xff] %v5766_v23  ;;  %1661 = vmatpush.msrb.mxu1 %v5781_v44  ;;  %v5784_v23 = vld [vmem:[#allocation5 + $0x150] sm:$0xff] }
 0x182   :  { %8349 = vst [vmem:[#allocation136_spill] sm:$0xff] %v5769_v20  ;;  %1681 = vmatpush.msrb.mxu2 %v5784_v23  ;;  %v5787_v20 = vld [vmem:[#allocation5 + $0x158] sm:$0xff] }
 0x183   :  { %8350 = vst [vmem:[#allocation137_spill] sm:$0xff] %v5772_v45  ;;  %1701 = vmatpush.msrb.mxu3 %v5787_v20  ;;  %v5790_v45 = vld [vmem:[#allocation5 + $0x120] sm:$0xff] }
 0x184   :  { %8351 = vst [vmem:[#allocation138_spill] sm:$0xff] %v5775_v40  ;;  %1642 = vmatpush.msrb.mxu0 %v5790_v45  ;;  %v5793_v40 = vld [vmem:[#allocation5 + $0x128] sm:$0xff] }
 0x185   :  { %8352 = vst [vmem:[#allocation139_spill] sm:$0xff] %v5778_v39  ;;  %1662 = vmatpush.msrb.mxu1 %v5793_v40  ;;  %v5796_v39 = vld [vmem:[#allocation5 + $0x130] sm:$0xff] }
 0x186   :  { %8353 = vst [vmem:[#allocation140_spill] sm:$0xff] %v5781_v44  ;;  %1682 = vmatpush.msrb.mxu2 %v5796_v39  ;;  %v5799_v44 = vld [vmem:[#allocation5 + $0x138] sm:$0xff] }
 0x187   :  { %8354 = vst [vmem:[#allocation141_spill] sm:$0xff] %v5784_v23  ;;  %1702 = vmatpush.msrb.mxu3 %v5799_v44  ;;  %v5802_v23 = vld [vmem:[#allocation5 + $0x100] sm:$0xff] }
 0x188   :  { %8355 = vst [vmem:[#allocation142_spill] sm:$0xff] %v5787_v20  ;;  %1643 = vmatpush.msrb.mxu0 %v5802_v23  ;;  %v5805_v20 = vld [vmem:[#allocation5 + $0x108] sm:$0xff] }
 0x189   :  { %8356 = vst [vmem:[#allocation143_spill] sm:$0xff] %v5790_v45  ;;  %1663 = vmatpush.msrb.mxu1 %v5805_v20  ;;  %v5808_v45 = vld [vmem:[#allocation5 + $0x110] sm:$0xff] }
 0x18a   :  { %8357 = vst [vmem:[#allocation144_spill] sm:$0xff] %v5793_v40  ;;  %1683 = vmatpush.msrb.mxu2 %v5808_v45  ;;  %v5811_v40 = vld [vmem:[#allocation5 + $0x118] sm:$0xff] }
 0x18b   :  { %8358 = vst [vmem:[#allocation145_spill] sm:$0xff] %v5796_v39  ;;  %1703 = vmatpush.msrb.mxu3 %v5811_v40  ;;  %v5814_v39 = vld [vmem:[#allocation5 + $0xe0] sm:$0xff] }
 0x18c   :  { %8359 = vst [vmem:[#allocation146_spill] sm:$0xff] %v5799_v44  ;;  %1644 = vmatpush.msrb.mxu0 %v5814_v39  ;;  %v5817_v44 = vld [vmem:[#allocation5 + $0xe8] sm:$0xff] }
 0x18d   :  { %8360 = vst [vmem:[#allocation147_spill] sm:$0xff] %v5802_v23  ;;  %1664 = vmatpush.msrb.mxu1 %v5817_v44  ;;  %v5820_v23 = vld [vmem:[#allocation5 + $0xf0] sm:$0xff] }
 0x18e   :  { %8361 = vst [vmem:[#allocation148_spill] sm:$0xff] %v5805_v20  ;;  %1684 = vmatpush.msrb.mxu2 %v5820_v23  ;;  %v5823_v20 = vld [vmem:[#allocation5 + $0xf8] sm:$0xff] }
 0x18f   :  { %8362 = vst [vmem:[#allocation149_spill] sm:$0xff] %v5808_v45  ;;  %1704 = vmatpush.msrb.mxu3 %v5823_v20  ;;  %v5826_v45 = vld [vmem:[#allocation5 + $0xc0] sm:$0xff] }
 0x190   :  { %8363 = vst [vmem:[#allocation150_spill] sm:$0xff] %v5811_v40  ;;  %1645 = vmatpush.msrb.mxu0 %v5826_v45  ;;  %v5829_v40 = vld [vmem:[#allocation5 + $0xc8] sm:$0xff] }
 0x191   :  { %8364 = vst [vmem:[#allocation151_spill] sm:$0xff] %v5814_v39  ;;  %1665 = vmatpush.msrb.mxu1 %v5829_v40  ;;  %v5832_v39 = vld [vmem:[#allocation5 + $0xd0] sm:$0xff] }
 0x192   :  { %8365 = vst [vmem:[#allocation152_spill] sm:$0xff] %v5817_v44  ;;  %1685 = vmatpush.msrb.mxu2 %v5832_v39  ;;  %v5835_v44 = vld [vmem:[#allocation5 + $0xd8] sm:$0xff] }
 0x193   :  { %8366 = vst [vmem:[#allocation153_spill] sm:$0xff] %v5820_v23  ;;  %1705 = vmatpush.msrb.mxu3 %v5835_v44  ;;  %v5838_v23 = vld [vmem:[#allocation5 + $0xa0] sm:$0xff] }
 0x194   :  { %8367 = vst [vmem:[#allocation154_spill] sm:$0xff] %v5823_v20  ;;  %1646 = vmatpush.msrb.mxu0 %v5838_v23  ;;  %v5841_v20 = vld [vmem:[#allocation5 + $0xa8] sm:$0xff] }
 0x195   :  { %8368 = vst [vmem:[#allocation155_spill] sm:$0xff] %v5826_v45  ;;  %1666 = vmatpush.msrb.mxu1 %v5841_v20  ;;  %v5844_v45 = vld [vmem:[#allocation5 + $0xb0] sm:$0xff] }
 0x196   :  { %8369 = vst [vmem:[#allocation156_spill] sm:$0xff] %v5829_v40  ;;  %1686 = vmatpush.msrb.mxu2 %v5844_v45  ;;  %v5847_v40 = vld [vmem:[#allocation5 + $0xb8] sm:$0xff] }
 0x197   :  { %8370 = vst [vmem:[#allocation157_spill] sm:$0xff] %v5832_v39  ;;  %1706 = vmatpush.msrb.mxu3 %v5847_v40  ;;  %v5850_v39 = vld [vmem:[#allocation5 + $0x80] sm:$0xff]  ;;  %v5936_v53 = vpop.permute.xlu2 %1445 }
 0x198   :  { %8371 = vst [vmem:[#allocation158_spill] sm:$0xff] %v5835_v44  ;;  %1647 = vmatpush.msrb.mxu0 %v5850_v39  ;;  %v5853_v44 = vld [vmem:[#allocation5 + $0x88] sm:$0xff]  ;;  %vm1447_vm15 = vcmp.eq.s32.totalorder %v5936_v53, 1 }
 0x199   :  { %8372 = vst [vmem:[#allocation159_spill] sm:$0xff] %v5838_v23  ;;  %1667 = vmatpush.msrb.mxu1 %v5853_v44  ;;  %v5856_v23 = vld [vmem:[#allocation5 + $0x90] sm:$0xff] }
 0x19a   :  { %8373 = vst [vmem:[#allocation160_spill] sm:$0xff] %v5841_v20  ;;  %1687 = vmatpush.msrb.mxu2 %v5856_v23  ;;  %v5859_v20 = vld [vmem:[#allocation5 + $0x98] sm:$0xff] }
 0x19b   :  { %8374 = vst [vmem:[#allocation161_spill] sm:$0xff] %v5844_v45  ;;  %1707 = vmatpush.msrb.mxu3 %v5859_v20  ;;  %v5862_v45 = vld [vmem:[#allocation5 + $0x60] sm:$0xff] }
 0x19c   :  { %8375 = vst [vmem:[#allocation162_spill] sm:$0xff] %v5847_v40  ;;  %1648 = vmatpush.msrb.mxu0 %v5862_v45  ;;  %v5865_v40 = vld [vmem:[#allocation5 + $0x68] sm:$0xff] }
 0x19d   :  { %8376 = vst [vmem:[#allocation163_spill] sm:$0xff] %v5850_v39  ;;  %1668 = vmatpush.msrb.mxu1 %v5865_v40  ;;  %v5868_v39 = vld [vmem:[#allocation5 + $0x70] sm:$0xff] }
 0x19e   :  { %8377 = vst [vmem:[#allocation164_spill] sm:$0xff] %v5853_v44  ;;  %1688 = vmatpush.msrb.mxu2 %v5868_v39  ;;  %v5871_v44 = vld [vmem:[#allocation5 + $0x78] sm:$0xff] }
 0x19f   :  { %8378 = vst [vmem:[#allocation165_spill] sm:$0xff] %v5856_v23  ;;  %1708 = vmatpush.msrb.mxu3 %v5871_v44  ;;  %v5874_v23 = vld [vmem:[#allocation5 + $0x40] sm:$0xff] }
 0x1a0   :  { %8379 = vst [vmem:[#allocation166_spill] sm:$0xff] %v5859_v20  ;;  %1649 = vmatpush.msrb.mxu0 %v5874_v23  ;;  %v5877_v20 = vld [vmem:[#allocation5 + $0x48] sm:$0xff] }
 0x1a1   :  { %8380 = vst [vmem:[#allocation167_spill] sm:$0xff] %v5862_v45  ;;  %1669 = vmatpush.msrb.mxu1 %v5877_v20  ;;  %v5880_v45 = vld [vmem:[#allocation5 + $0x50] sm:$0xff] }
 0x1a2   :  { %8381 = vst [vmem:[#allocation168_spill] sm:$0xff] %v5865_v40  ;;  %1689 = vmatpush.msrb.mxu2 %v5880_v45  ;;  %v5883_v40 = vld [vmem:[#allocation5 + $0x58] sm:$0xff] }
 0x1a3   :  { %8382 = vst [vmem:[#allocation169_spill] sm:$0xff] %v5868_v39  ;;  %1709 = vmatpush.msrb.mxu3 %v5883_v40  ;;  %v5886_v39 = vld [vmem:[#allocation5 + $0x20] sm:$0xff] }
 0x1a4   :  { %8383 = vst [vmem:[#allocation170_spill] sm:$0xff] %v5871_v44  ;;  %1650 = vmatpush.msrb.mxu0 %v5886_v39  ;;  %v5889_v44 = vld [vmem:[#allocation5 + $0x28] sm:$0xff] }
 0x1a5   :  { %8384 = vst [vmem:[#allocation171_spill] sm:$0xff] %v5874_v23  ;;  %1670 = vmatpush.msrb.mxu1 %v5889_v44  ;;  %v5892_v23 = vld [vmem:[#allocation5 + $0x30] sm:$0xff] }
 0x1a6   :  { %8385 = vst [vmem:[#allocation172_spill] sm:$0xff] %v5877_v20  ;;  %1690 = vmatpush.msrb.mxu2 %v5892_v23  ;;  %v5895_v20 = vld [vmem:[#allocation5 + $0x38] sm:$0xff] }
 0x1a7   :  { %8386 = vst [vmem:[#allocation173_spill] sm:$0xff] %v5880_v45  ;;  %1710 = vmatpush.msrb.mxu3 %v5895_v20  ;;  %v5898_v45 = vld [vmem:[#allocation5] sm:$0xff] }
 0x1a8   :  { %8387 = vst [vmem:[#allocation174_spill] sm:$0xff] %v5883_v40  ;;  %1651 = vmatpush.msrb.mxu0 %v5898_v45  ;;  %v5901_v40 = vld [vmem:[#allocation5 + $0x8] sm:$0xff] }
 0x1a9   :  { %8388 = vst [vmem:[#allocation175_spill] sm:$0xff] %v5886_v39  ;;  %1671 = vmatpush.msrb.mxu1 %v5901_v40  ;;  %v5904_v39 = vld [vmem:[#allocation5 + $0x10] sm:$0xff] }
 0x1aa   :  { %8389 = vst [vmem:[#allocation176_spill] sm:$0xff] %v5889_v44  ;;  %1691 = vmatpush.msrb.mxu2 %v5904_v39  ;;  %v5907_v44 = vld [vmem:[#allocation5 + $0x18] sm:$0xff] }
 0x1ab   :  { %8390 = vst [vmem:[#allocation177_spill] sm:$0xff] %v5892_v23  ;;  %1711 = vmatpush.msrb.mxu3 %v5907_v44 }
 0x1ac   :  { %8391 = vst [vmem:[#allocation178_spill] sm:$0xff] %v5895_v20 }
 0x1ad   :  { %8392 = vst [vmem:[#allocation179_spill] sm:$0xff] %v5898_v45 }
 0x1ae   :  { %8393 = vst [vmem:[#allocation180_spill] sm:$0xff] %v5901_v40 }
 0x1af   :  { %8394 = vst [vmem:[#allocation181_spill] sm:$0xff] %v5904_v39 }
 0x1b0   :  { %8395 = vst [vmem:[#allocation182_spill] sm:$0xff] %v5907_v44 }
 0x1c5   :  { %v1164_v23 = vpop.f32.mrf.mxu0  ;;  %v1184_v28 = vpop.f32.mrf.mxu1 }
 0x1c6   :  { %v1227_v20 = vadd.f32 %v1164_v23, %v5157_v35  ;;  %v1228_v24 = vadd.f32 %v1184_v28, %v5159_v42 }
 0x1c8   :  { %v3704_v22 = vmul.f32 -1.442695, %v1227_v20  ;;  %v3703_v45 = vmul.f32 -1.442695, %v1228_v24 }
 0x1ca   :  { %3818 = vpow2.f32 %v3704_v22 }
 0x1cb   :  { %3820 = vpow2.f32 %v3703_v45 }
 0x1cc   :  { %v1224_v49 = vpop.f32.mrf.mxu3  ;;  %v1204_v42 = vpop.f32.mrf.mxu2 }
 0x1cd   :  { %v1230_v40 = vadd.f32 %v1224_v49, %v5173_v38 }
 0x1cf   :  { %v3705_v27 = vmul.f32 -1.442695, %v1230_v40  ;;  %v1229_v40 = vadd.f32 %v1204_v42, %v5171_v37 }
 0x1d0   :  { %v3819_v56 = vpop.eup %3818  ;;  %v1311_v39 = vpop.f32.mrf.mxu0 }
 0x1d1   :  { %v1331_v57 = vpop.f32.mrf.mxu1  ;;  %v3821_v15 = vpop.eup %3820  ;;  %v1254_v4 = vadd.f32 1.0, %v3819_v56  ;;  %3822 = vpow2.f32 %v3705_v27  ;;  %v1374_v44 = vadd.f32 %v1311_v39, %v5414_v29 }
 0x1d2   :  { %v1375_v35 = vadd.f32 %v1331_v57, %v5416_v36  ;;  %v1234_v23 = vadd.f32 1.0, %v3821_v15  ;;  %v5920_v36 = vpop.permute.xlu0 %1112 }
 0x1d3   :  { %3824 = vrcp.f32 %v1254_v4  ;;  %v3707_v20 = vmul.f32 -1.442695, %v1374_v44  ;;  %v1264_v15 = vand.u32 2147483647, %v1254_v4  ;;  %vm1260_vm4 = vweird.f32 %v1254_v4 }
 0x1d4   :  { %3826 = vrcp.f32 %v1234_v23  ;;  %v3706_v45 = vmul.f32 -1.442695, %v1375_v35  ;;  %v1246_v37 = vand.u32 2147483648, %v1234_v23  ;;  %v1266_v42 = vand.u32 2147483648, %v1254_v4 }
 0x1d5   :  { %3828 = vpow2.f32 %v3707_v20  ;;  %vm1240_vm7 = vweird.f32 %v1234_v23  ;;  %vm1265_vm8 = vcmp.eq.f32.partialorder %v1264_v15, 8.507059e+37 }
 0x1d6   :  { %3830 = vpow2.f32 %v3706_v45 }
 0x1d7   :  { %v3823_v24 = vpop.eup %3822  ;;  %v1371_v38 = vpop.f32.mrf.mxu3 }
 0x1d8   :  { %v5916_v49 = vadd.f32 1.0, %v3823_v24  ;;  %v1377_v56 = vadd.f32 %v1371_v38, %v5420_v48  ;;  %v1244_v38 = vand.u32 2147483647, %v1234_v23 }
 0x1d9   :  { %v3825_v28 = vpop.eup %3824 }
 0x1da   :  { %v3827_v39 = vpop.eup %3826  ;;  %v1256_v29 = vmul.f32 %v3825_v28, %v1254_v4  ;;  %3832 = vrcp.f32 %v5916_v49  ;;  %v3708_v27 = vmul.f32 -1.442695, %v1377_v56  ;;  %vm1261_vm5 = vweird.f32 %v3825_v28  ;;  %v5938_v51 = vpop.permute.xlu0 %1462 }
 0x1db   :  { %v1236_v57 = vmul.f32 %v3827_v39, %v1234_v23  ;;  %3834 = vtanh.f32 %v1229_v40  ;;  %v3829_v22 = vpop.eup %3828  ;;  %vm1241_vm6 = vweird.f32 %v3827_v39  ;;  %vm1262_vm9 = vmor %vm1260_vm4, %vm1261_vm5  ;;  %v1286_v23 = vand.u32 2147483647, %v5916_v49 }
 0x1dc   :  { %v1257_v44 = vsub.f32 1.0, %v1256_v29  ;;  %v3831_v20 = vpop.eup %3830  ;;  %v5922_v48 = vadd.f32 1.0, %v3829_v22  ;;  %3836 = vpow2.f32 %v3708_v27  ;;  %v1351_v29 = vpop.f32.mrf.mxu2  ;;  %vm1242_vm10 = vmor %vm1240_vm7, %vm1241_vm6  ;;  %v1247_v22 = vor.u32 1.1754944e-38, %v1246_v37 }
 0x1dd   :  { %v1237_v35 = vsub.f32 1.0, %v1236_v57  ;;  %v5924_v50 = vadd.f32 1.0, %v3831_v20  ;;  %v1267_v57 = vor.u32 1.1754944e-38, %v1266_v42  ;;  %v1376_v15 = vadd.f32 %v1351_v29, %v5418_v59 }
 0x1de   :  { %v1258_v45 = vmul.f32 %v3825_v28, %v1257_v44  ;;  %3838 = vrcp.f32 %v5922_v48  ;;  %vm1245_vm11 = vcmp.eq.f32.partialorder %v1244_v38, 8.507059e+37  ;;  %vm1282_vm12 = vweird.f32 %v5916_v49 }
 0x1df   :  { %v1238_v24 = vmul.f32 %v3827_v39, %v1237_v35  ;;  %3840 = vrcp.f32 %v5924_v50  ;;  %vm5945_vm13 = vcmp.eq.f32.partialorder %v1286_v23, 8.507059e+37  ;;  %vm1464_vm0 = vcmp.eq.s32.totalorder %v5938_v51, 1 }
 0x1e0   :  { %v5926_v46 = vpop.eup %3832  ;;  %v1259_v40 = vadd.f32 %v3825_v28, %v1258_v45  ;;  %3842 = vtanh.f32 %v1376_v15  ;;  %v1413_v23 = vand.u32 2147483648, %v5922_v48 }
 0x1e1   :  { %v1239_v56 = vadd.f32 %v3827_v39, %v1238_v24  ;;  %v1278_v44 = vmul.f32 %v5926_v46, %v5916_v49  ;;  %v3835_v27 = vpop.eup %3834  ;;  %vm1283_vm14 = vweird.f32 %v5926_v46 }
 0x1e2   :  { %v1263_v35 = vsel %vm1262_vm9, %v3825_v28, %v1259_v40  ;;  %v3837_v24 = vpop.eup %3836  ;;  %vm5975_vm5 = vmor %vm1282_vm12, %vm1283_vm14  ;;  %vm1407_vm9 = vweird.f32 %v5922_v48  ;;  %vm3722_vm14 = vcmp.eq.s32.totalorder %v5197_v43, 5 }
 0x1e3   :  { %v1243_v20 = vsel %vm1242_vm10, %v3827_v39, %v1239_v56  ;;  %v1268_v45 = vsel %vm1265_vm8, %v1267_v57, %v1263_v35  ;;  %v1279_v4 = vsub.f32 1.0, %v1278_v44  ;;  %v5942_v28 = vadd.f32 1.0, %v3837_v24 }
 0x1e4   :  { %v1248_v42 = vsel %vm1245_vm11, %v1247_v22, %v1243_v20  ;;  %v1271_v47 = vmul.f32 %v3835_v27, %v1268_v45  ;;  %v3839_v40 = vpop.eup %3838  ;;  %v1288_v39 = vand.u32 2147483648, %v5916_v49  ;;  %v1393_v44 = vand.u32 2147483648, %v5924_v50 }
 0x1e5   :  { %v1250_v16 = vmul.f32 %v1248_v42, %v5466_v34  ;;  %v1280_v37 = vmul.f32 %v5926_v46, %v1279_v4  ;;  %v3841_v38 = vpop.eup %3840  ;;  %v1403_v34 = vmul.f32 %v3839_v40, %v5922_v48  ;;  %3844 = vrcp.f32 %v5942_v28 }
 0x1e6   :  { %v1383_v57 = vmul.f32 %v3841_v38, %v5924_v50  ;;  %v1411_v27 = vand.u32 2147483647, %v5922_v48  ;;  %v1391_v35 = vand.u32 2147483647, %v5924_v50  ;;  %vm1408_vm4 = vweird.f32 %v3839_v40  ;;  %v3843_v24 = vpop.eup %3842 }
 0x1e7   :  { %v5950_v29 = vadd.f32 %v1271_v47, %v1250_v16  ;;  %v1281_v56 = vadd.f32 %v5926_v46, %v1280_v37  ;;  %v5963_v47 = vld [vmem:[%s7708_s0] sm:$0xff]  ;;  %v1404_v16 = vsub.f32 1.0, %v1403_v34  ;;  %v5982_v45 = vsel %vm3721_vm1, 1, %v8289_v8  ;;  %vm1409_vm10 = vmor %vm1407_vm9, %vm1408_vm4 }
 0x1e8   :  { %vm3720_vm3 = vcmp.gt.s32.totalorder %v5963_v47, 5  ;;  %v1384_v22 = vsub.f32 1.0, %v1383_v57  ;;  %8400 = vst [vmem:[#allocation183_spill] sm:$0xff] %v5982_v45  ;;  %vm3719_vm6 = vcmp.gt.s32.totalorder %v5963_v47, 2  ;;  %vm1388_vm7 = vweird.f32 %v3841_v38  ;;  %1804 = vperm.xlu1 %3785, %v5982_v45  }
 0x1e9   :  { %3846 = vtanh.f32 %v5950_v29  ;;  %v1405_v20 = vmul.f32 %v3839_v40, %v1404_v16  ;;  %v5985_v4 = vsel %vm3720_vm3, 1, %v8289_v8  ;;  %v1285_v49 = vsel %vm5975_vm5, %v5926_v46, %v1281_v56 }
 0x1ea   :  { %8401 = vst [vmem:[#allocation184_spill] sm:$0xff] %v5985_v4  ;;  %v1385_v42 = vmul.f32 %v3841_v38, %v1384_v22  ;;  %1796 = vperm.xlu0 %3783, %v5985_v4   ;;  %v5994_v37 = vsel %vm3719_vm6, 1, %v8289_v8  ;;  %v1289_v34 = vor.u32 1.1754944e-38, %v1288_v39  ;;  %vm1387_vm8 = vweird.f32 %v5924_v50 }
 0x1eb   :  { %8402 = vst [vmem:[#allocation185_spill] sm:$0xff] %v5994_v37  ;;  %v1406_v57 = vadd.f32 %v3839_v40, %v1405_v20  ;;  %1787 = vperm.xlu2 %3784, %v5994_v37   ;;  %v5999_v16 = vpop.eup %3844  ;;  %v1394_v46 = vor.u32 1.1754944e-38, %v1393_v44  ;;  %vm1412_vm11 = vcmp.eq.f32.partialorder %v1411_v27, 8.507059e+37  ;;  %v1414_v22 = vor.u32 1.1754944e-38, %v1413_v23  ;;  %vm1389_vm12 = vmor %vm1387_vm8, %vm1388_vm7 }
 0x1ec   :  { %v1386_v56 = vadd.f32 %v3841_v38, %v1385_v42  ;;  %v1290_v45 = vsel %vm5945_vm13, %v1289_v34, %v1285_v49  ;;  %v1425_v48 = vmul.f32 %v5999_v16, %v5942_v28  ;;  %vm1392_vm1 = vcmp.eq.f32.partialorder %v1391_v35, 8.507059e+37  ;;  %v1128_v42 = vpop.permute.xlu1 %1127  ;;  %v8426_v49 = vld [vmem:[#allocation89_spill] sm:$0xff]  ;;  %v8428_v34 = vld [vmem:[#allocation91_spill] sm:$0xff] }
 0x1ed   :  { %v1410_v50 = vsel %vm1409_vm10, %v3839_v40, %v1406_v57  ;;  %vm1430_vm13 = vweird.f32 %v5999_v16  ;;  %v1435_v53 = vand.u32 2147483648, %v5942_v28  ;;  %vm1129_vm3 = vcmp.eq.s32.totalorder %v1128_v42, 1  ;;  %v8429_v57 = vld [vmem:[#allocation92_spill] sm:$0xff]  ;;  %v8440_v42 = vld [vmem:[#allocation118_spill] sm:$0xff] }
 0x1ee   :  { %v1390_v39 = vsel %vm1389_vm12, %v3841_v38, %v1386_v56  ;;  %v1415_v44 = vsel %vm1412_vm11, %v1414_v22, %v1410_v50  ;;  %v1426_v23 = vsub.f32 1.0, %v1425_v48  ;;  %v6017_v38 = vsel %vm3722_vm14, 1, %v8289_v8  ;;  %v8432_v56 = vld [vmem:[#allocation95_spill] sm:$0xff]  ;;  %v8433_v22 = vld [vmem:[#allocation96_spill] sm:$0xff]  ;;  %v8435_v50 = vld [vmem:[#allocation113_spill] sm:$0xff] }
 0x1ef   :  { %v3847_v15 = vpop.eup %3846  ;;  %v1395_v4 = vsel %vm1392_vm1, %v1394_v46, %v1390_v39  ;;  %v1418_v27 = vmul.f32 %v3843_v24, %v1415_v44  ;;  %vm1114_vm5 = vcmp.eq.s32.totalorder %v5920_v36, 1  ;;  %v8422_v36 = vld [vmem:[#allocation85_spill] sm:$0xff]  ;;  %v8425_v24 = vld [vmem:[#allocation88_spill] sm:$0xff]  ;;  %v8431_v46 = vld [vmem:[#allocation94_spill] sm:$0xff] }
 0x1f0   :  { %v1293_v20 = vmul.f32 %v3847_v15, %v1290_v45  ;;  %v1397_v37 = vmul.f32 %v1395_v4, %v5504_v26  ;;  %v1427_v35 = vmul.f32 %v5999_v16, %v1426_v23  ;;  %v8424_v4 = vld [vmem:[#allocation87_spill] sm:$0xff]  ;;  %v8434_v15 = vld [vmem:[#allocation112_spill] sm:$0xff]  ;;  %v8436_v48 = vld [vmem:[#allocation114_spill] sm:$0xff] }
 0x1f1   :  { %v8437_v39 = vld [vmem:[#allocation115_spill] sm:$0xff]  ;;  %v8438_v44 = vld [vmem:[#allocation116_spill] sm:$0xff] }
 0x1f2   :  { %v1448_v59 = vsel %vm1447_vm15, %v1293_v20, 0.0  ;;  %v6014_v40 = vsel %vm1464_vm0, %v1293_v20, %v5512_v62  ;;  %1505 = vmatmul.f32.vlgmr.msra.gmra.mxu0 %v1293_v20  ;;  %1525 = vmatmul.f32.vlgmr.msra.gmra.mxu1 %v1293_v20  ;;  %v6023_v26 = vadd.f32 %v1418_v27, %v1397_v37  ;;  %v1428_v51 = vadd.f32 %v5999_v16, %v1427_v35  ;;  %v8427_v37 = vld [vmem:[#allocation90_spill] sm:$0xff]  ;;  %v8441_v27 = vld [vmem:[#allocation119_spill] sm:$0xff]  ;;  %v8442_v23 = vld [vmem:[#allocation120_spill] sm:$0xff] }
 0x1f3   :  { %v6021_v45 = vadd.f32 %v1448_v59, %v5510_v31  ;;  %1545 = vmatmul.f32.vlgmr.msra.gmra.mxu2 %v1293_v20  ;;  %1565 = vmatmul.f32.vlgmr.msra.gmra.mxu3 %v1293_v20  ;;  %vm1429_vm15 = vweird.f32 %v5942_v28  ;;  %v1433_v31 = vand.u32 2147483647, %v5942_v28  ;;  %v8423_v28 = vld [vmem:[#allocation86_spill] sm:$0xff]  ;;  %v8439_v20 = vld [vmem:[#allocation117_spill] sm:$0xff] }
 0x1f4   :  { %1831 = vmatpush.msra.mxu0 %v5517_v63  ;;  %1851 = vmatpush.msra.mxu1 %v5521_v12  ;;  %3848 = vtanh.f32 %v6023_v26  ;;  %vm6039_vm0 = vmor %vm1429_vm15, %vm1430_vm13  ;;  %v1455_v12 = vpop.permute.xlu2 %1454  ;;  %v8443_v59 = vld [vmem:[#allocation121_spill] sm:$0xff]  ;;  %v8444_v35 = vld [vmem:[#allocation122_spill] sm:$0xff] }
 0x1f5   :  { %1811 = vperm.xlu2 %3784, %v6017_v38   ;;  %1871 = vmatpush.msra.mxu2 %v5524_v3  ;;  %v1432_v63 = vsel %vm6039_vm0, %v5999_v16, %v1428_v51  ;;  %v1470_v3 = vpop.permute.xlu1 %1469  ;;  %vm1434_vm4 = vcmp.eq.f32.partialorder %v1433_v31, 8.507059e+37  ;;  %vm1456_vm6 = vcmp.eq.s32.totalorder %v1455_v12, 1  ;;  %v8430_v16 = vld [vmem:[#allocation93_spill] sm:$0xff]  ;;  %v8445_v51 = vld [vmem:[#allocation123_spill] sm:$0xff]  ;;  %v8448_v62 = vld [vmem:[#allocation126_spill] sm:$0xff]  ;;  %vm3729_vm0 = vcmp.gt.s32.totalorder %v5963_v47, 3 }
 0x1f6   :  { %1891 = vmatpush.msra.mxu3 %v5527_v61  ;;  %1832 = vmatpush.msra.mxu0 %v5530_v21  ;;  %v1436_v61 = vor.u32 1.1754944e-38, %v1435_v53  ;;  %vm1471_vm7 = vcmp.eq.s32.totalorder %v1470_v3, 1  ;;  %v8446_v53 = vld [vmem:[#allocation124_spill] sm:$0xff]  ;;  %v8447_v31 = vld [vmem:[#allocation125_spill] sm:$0xff] }
 0x1f7   :  { %1852 = vmatpush.msra.mxu1 %v5534_v9  ;;  %1872 = vmatpush.msra.mxu2 %v5537_v30  ;;  %v8450_v12 = vld [vmem:[#allocation128_spill] sm:$0xff]  ;;  %v8451_v3 = vld [vmem:[#allocation129_spill] sm:$0xff] }
 0x1f8   :  { %1892 = vmatpush.msra.mxu3 %v5541_v7  ;;  %1833 = vmatpush.msra.mxu0 %v5544_v52  ;;  %v1437_v9 = vsel %vm1434_vm4, %v1436_v61, %v1432_v63  ;;  %v1130_v7 = vsel %vm1129_vm3, %v5559_v0, 0.0  ;;  %v1115_v52 = vsel %vm1114_vm5, %v5559_v0, 0.0  ;;  %v8406_v0 = vld [vmem:[#allocation69_spill] sm:$0xff]  ;;  %v8449_v63 = vld [vmem:[#allocation127_spill] sm:$0xff]  ;;  %v8452_v61 = vld [vmem:[#allocation130_spill] sm:$0xff] }
 0x1f9   :  { %1853 = vmatpush.msra.mxu1 %v5547_v6  ;;  %1873 = vmatpush.msra.mxu2 %v5550_v5 }
 0x1fa   :  { %1893 = vmatpush.msra.mxu3 %v5553_v2  ;;  %1834 = vmatpush.msra.mxu0 %v5556_v11  ;;  %v3849_v21 = vpop.eup %3848  ;;  %v8405_v11 = vld [vmem:[#allocation68_spill] sm:$0xff] }
 0x1fb   :  { %1854 = vmatpush.msra.mxu1 %v5561_v32  ;;  %1874 = vmatpush.msra.mxu2 %v5564_v14  ;;  %v1440_v30 = vmul.f32 %v3849_v21, %v1437_v9  ;;  %v8407_v32 = vld [vmem:[#allocation70_spill] sm:$0xff]  ;;  %v8408_v14 = vld [vmem:[#allocation71_spill] sm:$0xff]  ;;  %v8454_v9 = vld [vmem:[#allocation132_spill] sm:$0xff] }
 0x1fc   :  { %1894 = vmatpush.msra.mxu3 %v5567_v10  ;;  %1835 = vmatpush.msra.mxu0 %v5570_v33  ;;  %v8409_v10 = vld [vmem:[#allocation72_spill] sm:$0xff]  ;;  %v8416_v33 = vld [vmem:[#allocation79_spill] sm:$0xff] }
 0x1fd   :  { %1855 = vmatpush.msra.mxu1 %v5577_v13  ;;  %1875 = vmatpush.msra.mxu2 %v5580_v25  ;;  %v1457_v6 = vsel %vm1456_vm6, %v1440_v30, 0.0  ;;  %v6063_v5 = vsel %vm1471_vm7, %v1440_v30, %v1130_v7  ;;  %v8417_v13 = vld [vmem:[#allocation80_spill] sm:$0xff]  ;;  %v8418_v25 = vld [vmem:[#allocation81_spill] sm:$0xff]  ;;  %v8453_v21 = vld [vmem:[#allocation131_spill] sm:$0xff] }
 0x1fe   :  { %1895 = vmatpush.msra.mxu3 %v5583_v60  ;;  %1836 = vmatpush.msra.mxu0 %v5586_v58  ;;  %v6065_v2 = vadd.f32 %v1457_v6, %v1115_v52  ;;  %v8419_v60 = vld [vmem:[#allocation82_spill] sm:$0xff]  ;;  %v8420_v58 = vld [vmem:[#allocation83_spill] sm:$0xff]  ;;  %v8458_v6 = vld [vmem:[#allocation136_spill] sm:$0xff] }
 0x1ff   :  { %1652 = vmatmul.f32.vlgmr.msrb.gmra.mxu0 %v1440_v30  ;;  %1672 = vmatmul.f32.vlgmr.msrb.gmra.mxu1 %v1440_v30  ;;  %v8456_v7 = vld [vmem:[#allocation134_spill] sm:$0xff]  ;;  %v8457_v52 = vld [vmem:[#allocation135_spill] sm:$0xff] }
 0x200   :  { %1692 = vmatmul.f32.vlgmr.msrb.gmra.mxu2 %v1440_v30  ;;  %1712 = vmatmul.f32.vlgmr.msrb.gmra.mxu3 %v1440_v30  ;;  %v8455_v30 = vld [vmem:[#allocation133_spill] sm:$0xff] }
 0x201   :  { %1856 = vmatpush.msra.mxu1 %v5589_v1  ;;  %1876 = vmatpush.msra.mxu2 %v5592_v41  ;;  %v8410_v41 = vld [vmem:[#allocation73_spill] sm:$0xff]  ;;  %v8421_v1 = vld [vmem:[#allocation84_spill] sm:$0xff] }
 0x202   :  { %1896 = vmatpush.msra.mxu3 %v5595_v55  ;;  %1837 = vmatpush.msra.mxu0 %v5598_v54  ;;  %v8411_v55 = vld [vmem:[#allocation74_spill] sm:$0xff]  ;;  %v8412_v54 = vld [vmem:[#allocation75_spill] sm:$0xff] }
 0x203   :  { %1857 = vmatpush.msra.mxu1 %v5601_v18  ;;  %1877 = vmatpush.msra.mxu2 %v5604_v19  ;;  %v8413_v18 = vld [vmem:[#allocation76_spill] sm:$0xff]  ;;  %v8414_v19 = vld [vmem:[#allocation77_spill] sm:$0xff] }
 0x204   :  { %1897 = vmatpush.msra.mxu3 %v5607_v17  ;;  %1838 = vmatpush.msra.mxu0 %v8405_v11  ;;  %v8415_v17 = vld [vmem:[#allocation78_spill] sm:$0xff]  ;;  %v8459_v11 = vld [vmem:[#allocation137_spill] sm:$0xff] }
 0x205   :  { %1858 = vmatpush.msra.mxu1 %v8406_v0  ;;  %1878 = vmatpush.msra.mxu2 %v8407_v32  ;;  %v8460_v0 = vld [vmem:[#allocation138_spill] sm:$0xff]  ;;  %v8461_v32 = vld [vmem:[#allocation139_spill] sm:$0xff] }
 0x206   :  { %1898 = vmatpush.msra.mxu3 %v8408_v14  ;;  %1839 = vmatpush.msra.mxu0 %v8409_v10  ;;  %v8462_v14 = vld [vmem:[#allocation140_spill] sm:$0xff]  ;;  %v8463_v10 = vld [vmem:[#allocation141_spill] sm:$0xff] }
 0x207   :  { %1859 = vmatpush.msra.mxu1 %v8410_v41  ;;  %1879 = vmatpush.msra.mxu2 %v8411_v55  ;;  %v8464_v41 = vld [vmem:[#allocation142_spill] sm:$0xff]  ;;  %v8465_v55 = vld [vmem:[#allocation143_spill] sm:$0xff] }
 0x208   :  { %1899 = vmatpush.msra.mxu3 %v8412_v54  ;;  %1840 = vmatpush.msra.mxu0 %v8413_v18  ;;  %v8466_v54 = vld [vmem:[#allocation144_spill] sm:$0xff]  ;;  %v8467_v18 = vld [vmem:[#allocation145_spill] sm:$0xff] }
 0x209   :  { %1860 = vmatpush.msra.mxu1 %v8414_v19  ;;  %1880 = vmatpush.msra.mxu2 %v8415_v17  ;;  %v8468_v19 = vld [vmem:[#allocation146_spill] sm:$0xff]  ;;  %v8469_v17 = vld [vmem:[#allocation147_spill] sm:$0xff] }
 0x20a   :  { %1900 = vmatpush.msra.mxu3 %v8416_v33  ;;  %1841 = vmatpush.msra.mxu0 %v8417_v13  ;;  %v8470_v33 = vld [vmem:[#allocation148_spill] sm:$0xff]  ;;  %v8471_v13 = vld [vmem:[#allocation149_spill] sm:$0xff] }
 0x20b   :  { %1861 = vmatpush.msra.mxu1 %v8418_v25  ;;  %1881 = vmatpush.msra.mxu2 %v8419_v60  ;;  %v8472_v25 = vld [vmem:[#allocation150_spill] sm:$0xff]  ;;  %v8473_v60 = vld [vmem:[#allocation151_spill] sm:$0xff] }
 0x20c   :  { %1901 = vmatpush.msra.mxu3 %v8420_v58  ;;  %1842 = vmatpush.msra.mxu0 %v8421_v1  ;;  %v8474_v58 = vld [vmem:[#allocation152_spill] sm:$0xff]  ;;  %v8475_v1 = vld [vmem:[#allocation153_spill] sm:$0xff] }
 0x20d   :  { %1862 = vmatpush.msra.mxu1 %v8422_v36  ;;  %1882 = vmatpush.msra.mxu2 %v8423_v28  ;;  %v8476_v36 = vld [vmem:[#allocation154_spill] sm:$0xff]  ;;  %v8477_v28 = vld [vmem:[#allocation155_spill] sm:$0xff] }
 0x20e   :  { %1902 = vmatpush.msra.mxu3 %v8424_v4  ;;  %1843 = vmatpush.msra.mxu0 %v8425_v24  ;;  %v8478_v4 = vld [vmem:[#allocation156_spill] sm:$0xff]  ;;  %v8479_v24 = vld [vmem:[#allocation157_spill] sm:$0xff] }
 0x20f   :  { %1863 = vmatpush.msra.mxu1 %v8426_v49  ;;  %1883 = vmatpush.msra.mxu2 %v8427_v37  ;;  %v8480_v49 = vld [vmem:[#allocation158_spill] sm:$0xff]  ;;  %v8481_v37 = vld [vmem:[#allocation159_spill] sm:$0xff] }
 0x210   :  { %1903 = vmatpush.msra.mxu3 %v8428_v34  ;;  %1844 = vmatpush.msra.mxu0 %v8429_v57  ;;  %v8482_v34 = vld [vmem:[#allocation160_spill] sm:$0xff]  ;;  %v8483_v57 = vld [vmem:[#allocation161_spill] sm:$0xff] }
 0x211   :  { %1864 = vmatpush.msra.mxu1 %v8430_v16  ;;  %1884 = vmatpush.msra.mxu2 %v8431_v46  ;;  %v8484_v16 = vld [vmem:[#allocation162_spill] sm:$0xff]  ;;  %v8485_v46 = vld [vmem:[#allocation163_spill] sm:$0xff] }
 0x212   :  { %1904 = vmatpush.msra.mxu3 %v8432_v56  ;;  %1845 = vmatpush.msra.mxu0 %v8433_v22  ;;  %v8486_v56 = vld [vmem:[#allocation164_spill] sm:$0xff]  ;;  %v8487_v22 = vld [vmem:[#allocation165_spill] sm:$0xff] }
 0x213   :  { %1865 = vmatpush.msra.mxu1 %v8434_v15  ;;  %1885 = vmatpush.msra.mxu2 %v8435_v50  ;;  %v8488_v15 = vld [vmem:[#allocation166_spill] sm:$0xff]  ;;  %v8489_v50 = vld [vmem:[#allocation167_spill] sm:$0xff] }
 0x214   :  { %1905 = vmatpush.msra.mxu3 %v8436_v48  ;;  %1846 = vmatpush.msra.mxu0 %v8437_v39  ;;  %v8490_v48 = vld [vmem:[#allocation168_spill] sm:$0xff]  ;;  %v8491_v39 = vld [vmem:[#allocation169_spill] sm:$0xff] }
 0x215   :  { %1866 = vmatpush.msra.mxu1 %v8438_v44  ;;  %1886 = vmatpush.msra.mxu2 %v8439_v20  ;;  %v8492_v44 = vld [vmem:[#allocation170_spill] sm:$0xff]  ;;  %v8493_v20 = vld [vmem:[#allocation171_spill] sm:$0xff] }
 0x216   :  { %1906 = vmatpush.msra.mxu3 %v8440_v42  ;;  %1978 = vmatpush.msrb.mxu0 %v8441_v27  ;;  %v8494_v42 = vld [vmem:[#allocation172_spill] sm:$0xff]  ;;  %v8495_v27 = vld [vmem:[#allocation173_spill] sm:$0xff] }
 0x217   :  { %1998 = vmatpush.msrb.mxu1 %v8442_v23  ;;  %2018 = vmatpush.msrb.mxu2 %v8443_v59  ;;  %v8496_v23 = vld [vmem:[#allocation174_spill] sm:$0xff]  ;;  %v8497_v59 = vld [vmem:[#allocation175_spill] sm:$0xff] }
 0x218   :  { %2038 = vmatpush.msrb.mxu3 %v8444_v35  ;;  %1979 = vmatpush.msrb.mxu0 %v8445_v51  ;;  %v8498_v35 = vld [vmem:[#allocation176_spill] sm:$0xff]  ;;  %v8499_v51 = vld [vmem:[#allocation177_spill] sm:$0xff] }
 0x219   :  { %1999 = vmatpush.msrb.mxu1 %v8446_v53  ;;  %2019 = vmatpush.msrb.mxu2 %v8447_v31  ;;  %v8500_v53 = vld [vmem:[#allocation178_spill] sm:$0xff]  ;;  %v8501_v31 = vld [vmem:[#allocation179_spill] sm:$0xff] }
 0x21a   :  { %2039 = vmatpush.msrb.mxu3 %v8448_v62  ;;  %1980 = vmatpush.msrb.mxu0 %v8449_v63  ;;  %v8502_v62 = vld [vmem:[#allocation180_spill] sm:$0xff]  ;;  %v8503_v63 = vld [vmem:[#allocation181_spill] sm:$0xff] }
 0x21b   :  { %2000 = vmatpush.msrb.mxu1 %v8450_v12  ;;  %2020 = vmatpush.msrb.mxu2 %v8451_v3  ;;  %v8504_v12 = vld [vmem:[#allocation182_spill] sm:$0xff] }
 0x21c   :  { %2040 = vmatpush.msrb.mxu3 %v8452_v61  ;;  %1981 = vmatpush.msrb.mxu0 %v8453_v21  ;;  %v8505_v21 = vld [vmem:[#allocation97_spill] sm:$0xff] }
 0x21d   :  { %2001 = vmatpush.msrb.mxu1 %v8454_v9  ;;  %2021 = vmatpush.msrb.mxu2 %v8455_v30  ;;  %v8506_v30 = vld [vmem:[#allocation98_spill] sm:$0xff] }
 0x21e   :  { %2041 = vmatpush.msrb.mxu3 %v8456_v7  ;;  %1982 = vmatpush.msrb.mxu0 %v8457_v52 }
 0x21f   :  { %2002 = vmatpush.msrb.mxu1 %v8458_v6  ;;  %2022 = vmatpush.msrb.mxu2 %v8459_v11 }
 0x220   :  { %2042 = vmatpush.msrb.mxu3 %v8460_v0  ;;  %1983 = vmatpush.msrb.mxu0 %v8461_v32  ;;  %v8507_v0 = vld [vmem:[#allocation101_spill] sm:$0xff] }
 0x221   :  { %2003 = vmatpush.msrb.mxu1 %v8462_v14  ;;  %2023 = vmatpush.msrb.mxu2 %v8463_v10 }
 0x222   :  { %2043 = vmatpush.msrb.mxu3 %v8464_v41  ;;  %1984 = vmatpush.msrb.mxu0 %v8465_v55 }
 0x223   :  { %2004 = vmatpush.msrb.mxu1 %v8466_v54  ;;  %2024 = vmatpush.msrb.mxu2 %v8467_v18 }
 0x224   :  { %2044 = vmatpush.msrb.mxu3 %v8468_v19  ;;  %1985 = vmatpush.msrb.mxu0 %v8469_v17 }
 0x225   :  { %2005 = vmatpush.msrb.mxu1 %v8470_v33  ;;  %2025 = vmatpush.msrb.mxu2 %v8471_v13  ;;  %v8508_v33 = vld [vmem:[#allocation60_spill] sm:$0xff] }
 0x226   :  { %2045 = vmatpush.msrb.mxu3 %v8472_v25  ;;  %1986 = vmatpush.msrb.mxu0 %v8473_v60  ;;  %v8509_v25 = vld [vmem:[#allocation61_spill] sm:$0xff] }
 0x227   :  { %2006 = vmatpush.msrb.mxu1 %v8474_v58  ;;  %2026 = vmatpush.msrb.mxu2 %v8475_v1  ;;  %v8510_v1 = vld [vmem:[#allocation100_spill] sm:$0xff] }
 0x228   :  { %2046 = vmatpush.msrb.mxu3 %v8476_v36  ;;  %1987 = vmatpush.msrb.mxu0 %v8477_v28 }
 0x229   :  { %2007 = vmatpush.msrb.mxu1 %v8478_v4  ;;  %2027 = vmatpush.msrb.mxu2 %v8479_v24 }
 0x22a   :  { %2047 = vmatpush.msrb.mxu3 %v8480_v49  ;;  %1988 = vmatpush.msrb.mxu0 %v8481_v37 }
 0x22b   :  { %2008 = vmatpush.msrb.mxu1 %v8482_v34  ;;  %2028 = vmatpush.msrb.mxu2 %v8483_v57 }
 0x22c   :  { %2048 = vmatpush.msrb.mxu3 %v8484_v16  ;;  %1989 = vmatpush.msrb.mxu0 %v8485_v46 }
 0x22d   :  { %2009 = vmatpush.msrb.mxu1 %v8486_v56  ;;  %2029 = vmatpush.msrb.mxu2 %v8487_v22  ;;  %v8511_v56 = vld [vmem:[#allocation63_spill] sm:$0xff] }
 0x22e   :  { %2049 = vmatpush.msrb.mxu3 %v8488_v15  ;;  %1990 = vmatpush.msrb.mxu0 %v8489_v50 }
 0x22f   :  { %2010 = vmatpush.msrb.mxu1 %v8490_v48  ;;  %2030 = vmatpush.msrb.mxu2 %v8491_v39 }
 0x230   :  { %2050 = vmatpush.msrb.mxu3 %v8492_v44  ;;  %1991 = vmatpush.msrb.mxu0 %v8493_v20 }
 0x231   :  { %2011 = vmatpush.msrb.mxu1 %v8494_v42  ;;  %2031 = vmatpush.msrb.mxu2 %v8495_v27 }
 0x232   :  { %2051 = vmatpush.msrb.mxu3 %v8496_v23  ;;  %1992 = vmatpush.msrb.mxu0 %v8497_v59 }
 0x233   :  { %2012 = vmatpush.msrb.mxu1 %v8498_v35  ;;  %2032 = vmatpush.msrb.mxu2 %v8499_v51 }
 0x234   :  { %2052 = vmatpush.msrb.mxu3 %v8500_v53  ;;  %1993 = vmatpush.msrb.mxu0 %v8501_v31 }
 0x235   :  { %2013 = vmatpush.msrb.mxu1 %v8502_v62  ;;  %2033 = vmatpush.msrb.mxu2 %v8503_v63 }
 0x236   :  { %2053 = vmatpush.msrb.mxu3 %v8504_v12 }
 0x26f   :  { %v1506_v3 = vpop.f32.mrf.mxu0  ;;  %v1526_v61 = vpop.f32.mrf.mxu1 }
 0x270   :  { %v1569_v9 = vadd.f32 %v1506_v3, %v8505_v21  ;;  %v1570_v7 = vadd.f32 %v1526_v61, %v8506_v30 }
 0x272   :  { %v3714_v52 = vmul.f32 -1.442695, %v1569_v9  ;;  %v3713_v6 = vmul.f32 -1.442695, %v1570_v7 }
 0x274   :  { %3850 = vpow2.f32 %v3714_v52 }
 0x275   :  { %3852 = vpow2.f32 %v3713_v6 }
 0x276   :  { %v1566_v11 = vpop.f32.mrf.mxu3  ;;  %v1546_v17 = vpop.f32.mrf.mxu2 }
 0x277   :  { %v1572_v32 = vadd.f32 %v1566_v11, %v8507_v0  ;;  %v1571_v36 = vadd.f32 %v1546_v17, %v8510_v1  ;;  %v8512_v0 = vld [vmem:[#allocation62_spill] sm:$0xff]  ;;  %v1788_v17 = vpop.permute.xlu2 %1787 }
 0x278   :  { %vm1789_vm5 = vcmp.eq.s32.totalorder %v1788_v17, 1  ;;  %v6314_v17 = vld [vmem:[#allocation4 + $0x1b8] sm:$0xff] }
 0x279   :  { %v3715_v14 = vmul.f32 -1.442695, %v1572_v32 }
 0x27a   :  { %v3851_v10 = vpop.eup %3850 }
 0x27b   :  { %v3853_v41 = vpop.eup %3852  ;;  %v1596_v55 = vadd.f32 1.0, %v3851_v10  ;;  %3854 = vpow2.f32 %v3715_v14 }
 0x27c   :  { %v1576_v54 = vadd.f32 1.0, %v3853_v41  ;;  %v1653_v18 = vpop.f32.mrf.mxu0  ;;  %v1673_v19 = vpop.f32.mrf.mxu1 }
 0x27d   :  { %3856 = vrcp.f32 %v1596_v55  ;;  %v1716_v13 = vadd.f32 %v1653_v18, %v8508_v33  ;;  %v1717_v60 = vadd.f32 %v1673_v19, %v8509_v25  ;;  %v1606_v48 = vand.u32 2147483647, %v1596_v55  ;;  %v6325_v25 = vld [vmem:[#allocation4 + $0x190] sm:$0xff] }
 0x27e   :  { %3858 = vrcp.f32 %v1576_v54  ;;  %v1588_v50 = vand.u32 2147483648, %v1576_v54  ;;  %v1608_v39 = vand.u32 2147483648, %v1596_v55  ;;  %v1586_v44 = vand.u32 2147483647, %v1576_v54 }
 0x27f   :  { %v3717_v28 = vmul.f32 -1.442695, %v1716_v13  ;;  %v3716_v24 = vmul.f32 -1.442695, %v1717_v60  ;;  %vm1602_vm10 = vweird.f32 %v1596_v55  ;;  %vm1582_vm11 = vweird.f32 %v1576_v54 }
 0x280   :  { %vm1607_vm14 = vcmp.eq.f32.partialorder %v1606_v48, 8.507059e+37  ;;  %v1609_v62 = vor.u32 1.1754944e-38, %v1608_v39  ;;  %v1589_v61 = vor.u32 1.1754944e-38, %v1588_v50  ;;  %vm1587_vm13 = vcmp.eq.f32.partialorder %v1586_v44, 8.507059e+37 }
 0x281   :  { %v3855_v58 = vpop.eup %3854  ;;  %3860 = vpow2.f32 %v3717_v28  ;;  %v1797_v28 = vpop.permute.xlu0 %1796 }
 0x282   :  { %v6180_v4 = vadd.f32 1.0, %v3855_v58 }
 0x283   :  { %v3857_v49 = vpop.eup %3856  ;;  %v1713_v37 = vpop.f32.mrf.mxu3 }
 0x284   :  { %v3859_v34 = vpop.eup %3858  ;;  %v1598_v57 = vmul.f32 %v3857_v49, %v1596_v55  ;;  %3862 = vrcp.f32 %v6180_v4  ;;  %v1719_v22 = vadd.f32 %v1713_v37, %v8511_v56  ;;  %vm1603_vm8 = vweird.f32 %v3857_v49  ;;  %v1693_v12 = vpop.f32.mrf.mxu2 }
 0x285   :  { %v1578_v16 = vmul.f32 %v3859_v34, %v1576_v54  ;;  %3864 = vtanh.f32 %v1571_v36  ;;  %vm1583_vm9 = vweird.f32 %v3859_v34  ;;  %vm1604_vm12 = vmor %vm1602_vm10, %vm1603_vm8  ;;  %v1718_v32 = vadd.f32 %v1693_v12, %v8512_v0  ;;  %v6293_v0 = vld [vmem:[#allocation4 + $0x1d0] sm:$0xff] }
 0x286   :  { %v1599_v46 = vsub.f32 1.0, %v1598_v57  ;;  %3866 = vpow2.f32 %v3716_v24  ;;  %v3718_v42 = vmul.f32 -1.442695, %v1719_v22  ;;  %vm1584_vm1 = vmor %vm1582_vm11, %vm1583_vm9  ;;  %v1628_v41 = vand.u32 2147483647, %v6180_v4 }
 0x287   :  { %v1579_v15 = vsub.f32 1.0, %v1578_v16  ;;  %v3861_v27 = vpop.eup %3860  ;;  %v1630_v54 = vand.u32 2147483648, %v6180_v4  ;;  %vm1624_vm3 = vweird.f32 %v6180_v4  ;;  %vm3730_vm9 = vcmp.gt.s32.totalorder %v5963_v47, 4 }
 0x288   :  { %v1600_v20 = vmul.f32 %v3857_v49, %v1599_v46  ;;  %v6186_v51 = vadd.f32 1.0, %v3861_v27  ;;  %3868 = vpow2.f32 %v3718_v42  ;;  %vm6209_vm4 = vcmp.eq.f32.partialorder %v1628_v41, 8.507059e+37  ;;  %v6306_v41 = vld [vmem:[#allocation4 + $0x1a8] sm:$0xff] }
 0x289   :  { %v1580_v23 = vmul.f32 %v3859_v34, %v1579_v15  ;;  %v1631_v58 = vor.u32 1.1754944e-38, %v1630_v54  ;;  %v6232_v16 = vsel %vm3730_vm9, 1, %v8289_v8  ;;  %vm3731_vm11 = vcmp.eq.s32.totalorder %v5197_v43, 3 }
 0x28a   :  { %v6184_v59 = vpop.eup %3862  ;;  %v1601_v35 = vadd.f32 %v3857_v49, %v1600_v20  ;;  %3870 = vrcp.f32 %v6186_v51  ;;  %v1753_v1 = vand.u32 2147483647, %v6186_v51  ;;  %vm1749_vm7 = vweird.f32 %v6186_v51  ;;  %2138 = vperm.xlu1 %3785, %v6232_v16  }
 0x28b   :  { %v3865_v53 = vpop.eup %3864  ;;  %v1581_v31 = vadd.f32 %v3859_v34, %v1580_v23  ;;  %v1620_v63 = vmul.f32 %v6184_v59, %v6180_v4  ;;  %vm1625_vm15 = vweird.f32 %v6184_v59  ;;  %v6222_v4 = vsel %vm3729_vm0, 1, %v8289_v8 }
 0x28c   :  { %v3867_v3 = vpop.eup %3866  ;;  %v1605_v21 = vsel %vm1604_vm12, %v3857_v49, %v1601_v35  ;;  %vm6216_vm6 = vmor %vm1624_vm3, %vm1625_vm15  ;;  %2129 = vperm.xlu0 %3783, %v6222_v4   ;;  %vm6235_vm12 = vcmp.eq.f32.partialorder %v1753_v1, 8.507059e+37  ;;  %v6242_v15 = vsel %vm3731_vm11, 1, %v8289_v8  ;;  %v6337_v1 = vld [vmem:[#allocation4 + $0x160] sm:$0xff]  ;;  %vm1798_vm9 = vcmp.eq.s32.totalorder %v1797_v28, 1  ;;  %v6439_v28 = vld [vmem:[#allocation4 + $0x98] sm:$0xff] }
 0x28d   :  { %v1585_v9 = vsel %vm1584_vm1, %v3859_v34, %v1581_v31  ;;  %v1610_v30 = vsel %vm1607_vm14, %v1609_v62, %v1605_v21  ;;  %v1621_v7 = vsub.f32 1.0, %v1620_v63  ;;  %v6192_v52 = vadd.f32 1.0, %v3867_v3  ;;  %2146 = vperm.xlu2 %3784, %v6242_v15   ;;  %v6273_v21 = vld [vmem:[#allocation4 + $0x1e0] sm:$0xff]  ;;  %8535 = vst [vmem:[#allocation82_spill] sm:$0xff] %v6439_v28 }
 0x28e   :  { %v1590_v6 = vsel %vm1587_vm13, %v1589_v61, %v1585_v9  ;;  %v1613_v11 = vmul.f32 %v3865_v53, %v1610_v30  ;;  %v3869_v55 = vpop.eup %3868  ;;  %v1755_v34 = vand.u32 2147483648, %v6186_v51  ;;  %vm3732_vm14 = vcmp.eq.s32.totalorder %v5197_v43, 4  ;;  %v6277_v30 = vld [vmem:[#allocation4 + $0x1e8] sm:$0xff] }
 0x28f   :  { %v1592_v14 = vmul.f32 %v1590_v6, %v5950_v29  ;;  %v1622_v10 = vmul.f32 %v6184_v59, %v1621_v7  ;;  %3872 = vrcp.f32 %v6192_v52  ;;  %v6202_v19 = vadd.f32 1.0, %v3869_v55  ;;  %v1805_v29 = vpop.permute.xlu1 %1804  ;;  %v6287_v6 = vld [vmem:[#allocation4 + $0x1c0] sm:$0xff]  ;;  %v6309_v55 = vld [vmem:[#allocation4 + $0x1b0] sm:$0xff] }
 0x290   :  { %v3871_v33 = vpop.eup %3870  ;;  %3874 = vtanh.f32 %v1718_v32  ;;  %vm1806_vm8 = vcmp.eq.s32.totalorder %v1805_v29, 1  ;;  %v1735_v48 = vand.u32 2147483648, %v6192_v52  ;;  %v1733_v39 = vand.u32 2147483647, %v6192_v52  ;;  %v6322_v29 = vld [vmem:[#allocation4 + $0x188] sm:$0xff] }
 0x291   :  { %v6200_v18 = vadd.f32 %v1613_v11, %v1592_v14  ;;  %v1623_v13 = vadd.f32 %v6184_v59, %v1622_v10  ;;  %v1745_v60 = vmul.f32 %v3871_v33, %v6186_v51  ;;  %vm1750_vm10 = vweird.f32 %v3871_v33  ;;  %v6290_v11 = vld [vmem:[#allocation4 + $0x1c8] sm:$0xff]  ;;  %v6298_v14 = vld [vmem:[#allocation4 + $0x1d8] sm:$0xff] }
 0x292   :  { %vm1751_vm13 = vmor %vm1749_vm7, %vm1750_vm10  ;;  %v1756_v27 = vor.u32 1.1754944e-38, %v1755_v34  ;;  %vm1729_vm15 = vweird.f32 %v6192_v52  ;;  %v6260_v53 = vsel %vm3732_vm14, 1, %v8289_v8  ;;  %v1736_v12 = vor.u32 1.1754944e-38, %v1735_v48  ;;  %v6349_v34 = vld [vmem:[#allocation4 + $0x178] sm:$0xff]  ;;  %v6364_v48 = vld [vmem:[#allocation4 + $0x120] sm:$0xff]  ;;  %2469 = vperm.xlu1 %3785, %v6232_v16  }
 0x293   :  { %3876 = vtanh.f32 %v6200_v18  ;;  %v1746_v24 = vsub.f32 1.0, %v1745_v60  ;;  %v1627_v49 = vsel %vm6216_vm6, %v6184_v59, %v1623_v13  ;;  %vm1734_vm3 = vcmp.eq.f32.partialorder %v1733_v39, 8.507059e+37  ;;  %v6430_v60 = vld [vmem:[#allocation4 + $0x80] sm:$0xff]  ;;  %v8623_v16 = vld [vmem:[#allocation111_spill] sm:$0xff] }
 0x294   :  { %3878 = vrcp.f32 %v6202_v19  ;;  %v1632_v50 = vsel %vm6209_vm4, %v1631_v58, %v1627_v49  ;;  %2153 = vperm.xlu0 %3783, %v6260_v53   ;;  %v1777_v54 = vand.u32 2147483648, %v6202_v19  ;;  %v1775_v13 = vand.u32 2147483647, %v6202_v19  ;;  %v6334_v58 = vld [vmem:[#allocation4 + $0x198] sm:$0xff]  ;;  %v6346_v49 = vld [vmem:[#allocation4 + $0x170] sm:$0xff]  ;;  %8532 = vst [vmem:[#allocation79_spill] sm:$0xff] %v6430_v60 }
 0x295   :  { %v3873_v36 = vpop.eup %3872  ;;  %v1747_v57 = vmul.f32 %v3871_v33, %v1746_v24  ;;  %v6343_v24 = vld [vmem:[#allocation4 + $0x168] sm:$0xff]  ;;  %2478 = vperm.xlu2 %3784, %v6222_v4   ;;  %v8624_v4 = vld [vmem:[#allocation65_spill] sm:$0xff] }
 0x296   :  { %v1725_v37 = vmul.f32 %v3873_v36, %v6192_v52  ;;  %v3875_v46 = vpop.eup %3874  ;;  %vm1730_vm1 = vweird.f32 %v3873_v36  ;;  %v6284_v52 = vld [vmem:[#allocation4 + $0x1f8] sm:$0xff]  ;;  %vm1776_vm7 = vcmp.eq.f32.partialorder %v1775_v13, 8.507059e+37 }
 0x297   :  { %v1748_v44 = vadd.f32 %v3871_v33, %v1747_v57  ;;  %vm1731_vm0 = vmor %vm1729_vm15, %vm1730_vm1  ;;  %v6352_v57 = vld [vmem:[#allocation4 + $0x140] sm:$0xff]  ;;  %v6427_v13 = vld [vmem:[#allocation4 + $0xb8] sm:$0xff] }
 0x298   :  { %v1726_v56 = vsub.f32 1.0, %v1725_v37  ;;  %v1778_v37 = vor.u32 1.1754944e-38, %v1777_v54  ;;  %v6424_v54 = vld [vmem:[#allocation4 + $0xb0] sm:$0xff]  ;;  %8531 = vst [vmem:[#allocation78_spill] sm:$0xff] %v6427_v13 }
 0x299   :  { %v3877_v47 = vpop.eup %3876  ;;  %v1752_v59 = vsel %vm1751_vm13, %v3871_v33, %v1748_v44  ;;  %v6317_v33 = vld [vmem:[#allocation4 + $0x180] sm:$0xff]  ;;  %v6367_v44 = vld [vmem:[#allocation4 + $0x128] sm:$0xff]  ;;  %8530 = vst [vmem:[#allocation77_spill] sm:$0xff] %v6424_v54 }
 0x29a   :  { %v6249_v20 = vpop.eup %3878  ;;  %v1727_v42 = vmul.f32 %v3873_v36, %v1726_v56  ;;  %v1635_v23 = vmul.f32 %v3877_v47, %v1632_v50  ;;  %v1757_v62 = vsel %vm6235_vm12, %v1756_v27, %v1752_v59  ;;  %v6358_v56 = vld [vmem:[#allocation4 + $0x150] sm:$0xff]  ;;  %v6361_v50 = vld [vmem:[#allocation4 + $0x158] sm:$0xff]  ;;  %v6376_v27 = vld [vmem:[#allocation4 + $0x100] sm:$0xff]  ;;  %2493 = vperm.xlu1 %3785, %v6242_v15  }
 0x29b   :  { %v1767_v35 = vmul.f32 %v6249_v20, %v6202_v19  ;;  %v1760_v8 = vmul.f32 %v3875_v46, %v1757_v62  ;;  %vm1772_vm4 = vweird.f32 %v6249_v20  ;;  %v6355_v46 = vld [vmem:[#allocation4 + $0x148] sm:$0xff]  ;;  %v6388_v62 = vld [vmem:[#allocation4 + $0x110] sm:$0xff]  ;;  %v8626_v15 = vld [vmem:[#allocation105_spill] sm:$0xff] }
 0x29c   :  { %v1728_v31 = vadd.f32 %v3873_v36, %v1727_v42  ;;  %v1790_v51 = vsel %vm1789_vm5, %v1635_v23, 0.0  ;;  %v6267_v63 = vsel %vm1806_vm8, %v1635_v23, %v6014_v40  ;;  %1847 = vmatmul.f32.vlgmr.msra.gmra.mxu0 %v1635_v23  ;;  %1867 = vmatmul.f32.vlgmr.msra.gmra.mxu1 %v1635_v23  ;;  %vm1771_vm5 = vweird.f32 %v6202_v19  ;;  %v6373_v42 = vld [vmem:[#allocation4 + $0x138] sm:$0xff] }
 0x29d   :  { %v1768_v3 = vsub.f32 1.0, %v1767_v35  ;;  %v6270_v61 = vadd.f32 %v1790_v51, %v6021_v45  ;;  %1887 = vmatmul.f32.vlgmr.msra.gmra.mxu2 %v1635_v23  ;;  %1907 = vmatmul.f32.vlgmr.msra.gmra.mxu3 %v1635_v23  ;;  %v6280_v45 = vld [vmem:[#allocation4 + $0x1f0] sm:$0xff]  ;;  %vm6330_vm6 = vmor %vm1771_vm5, %vm1772_vm4  ;;  %v6391_v51 = vld [vmem:[#allocation4 + $0x118] sm:$0xff] }
 0x29e   :  { %v1732_v43 = vsel %vm1731_vm0, %v3873_v36, %v1728_v31  ;;  %2171 = vmatpush.msra.mxu0 %v6273_v21  ;;  %2191 = vmatpush.msra.mxu1 %v6277_v30  ;;  %v1812_v36 = vpop.permute.xlu2 %1811  ;;  %v6385_v31 = vld [vmem:[#allocation4 + $0x108] sm:$0xff] }
 0x29f   :  { %v1737_v40 = vsel %vm1734_vm3, %v1736_v12, %v1732_v43  ;;  %v1769_v9 = vmul.f32 %v6249_v20, %v1768_v3  ;;  %2211 = vmatpush.msra.mxu2 %v6280_v45  ;;  %2231 = vmatpush.msra.mxu3 %v6284_v52  ;;  %vm1813_vm8 = vcmp.eq.s32.totalorder %v1812_v36, 1  ;;  %v6400_v12 = vld [vmem:[#allocation4 + $0xf0] sm:$0xff]  ;;  %v6403_v3 = vld [vmem:[#allocation4 + $0xf8] sm:$0xff]  ;;  %v6406_v43 = vld [vmem:[#allocation4 + $0xc0] sm:$0xff] }
 0x2a0   :  { %v1739_v7 = vmul.f32 %v1737_v40, %v6023_v26  ;;  %2172 = vmatpush.msra.mxu0 %v6287_v6  ;;  %2192 = vmatpush.msra.mxu1 %v6290_v11  ;;  %v6301_v26 = vld [vmem:[#allocation4 + $0x1a0] sm:$0xff]  ;;  %8522 = vst [vmem:[#allocation69_spill] sm:$0xff] %v6400_v12  ;;  %v6412_v40 = vld [vmem:[#allocation4 + $0xd0] sm:$0xff] }
 0x2a1   :  { %2212 = vmatpush.msra.mxu2 %v6293_v0  ;;  %2232 = vmatpush.msra.mxu3 %v6298_v14  ;;  %v1770_v10 = vadd.f32 %v6249_v20, %v1769_v9  ;;  %8523 = vst [vmem:[#allocation70_spill] sm:$0xff] %v6403_v3  ;;  %v6415_v9 = vld [vmem:[#allocation4 + $0xd8] sm:$0xff]  ;;  %v6436_v36 = vld [vmem:[#allocation4 + $0x90] sm:$0xff] }
 0x2a2   :  { %v6296_v32 = vadd.f32 %v1760_v8, %v1739_v7  ;;  %2173 = vmatpush.msra.mxu0 %v6301_v26  ;;  %2193 = vmatpush.msra.mxu1 %v6306_v41  ;;  %8524 = vst [vmem:[#allocation71_spill] sm:$0xff] %v6406_v43  ;;  %v6409_v8 = vld [vmem:[#allocation4 + $0xc8] sm:$0xff]  ;;  %v6418_v7 = vld [vmem:[#allocation4 + $0xa0] sm:$0xff] }
 0x2a3   :  { %2213 = vmatpush.msra.mxu2 %v6309_v55  ;;  %2233 = vmatpush.msra.mxu3 %v6314_v17  ;;  %v1774_v19 = vsel %vm6330_vm6, %v6249_v20, %v1770_v10  ;;  %v6370_v20 = vld [vmem:[#allocation4 + $0x130] sm:$0xff]  ;;  %8525 = vst [vmem:[#allocation72_spill] sm:$0xff] %v6409_v8  ;;  %v6421_v10 = vld [vmem:[#allocation4 + $0xa8] sm:$0xff] }
 0x2a4   :  { %3880 = vtanh.f32 %v6296_v32  ;;  %2174 = vmatpush.msra.mxu0 %v6317_v33  ;;  %2194 = vmatpush.msra.mxu1 %v6322_v29  ;;  %v1779_v47 = vsel %vm1776_vm7, %v1778_v37, %v1774_v19  ;;  %8526 = vst [vmem:[#allocation73_spill] sm:$0xff] %v6412_v40  ;;  %v6433_v19 = vld [vmem:[#allocation4 + $0x88] sm:$0xff]  ;;  %v6442_v37 = vld [vmem:[#allocation4 + $0x60] sm:$0xff] }
 0x2a5   :  { %2214 = vmatpush.msra.mxu2 %v6325_v25  ;;  %2234 = vmatpush.msra.mxu3 %v6334_v58  ;;  %8527 = vst [vmem:[#allocation74_spill] sm:$0xff] %v6415_v9 }
 0x2a6   :  { %2175 = vmatpush.msra.mxu0 %v6337_v1  ;;  %2195 = vmatpush.msra.mxu1 %v6343_v24  ;;  %8528 = vst [vmem:[#allocation75_spill] sm:$0xff] %v6418_v7 }
 0x2a7   :  { %2215 = vmatpush.msra.mxu2 %v6346_v49  ;;  %2235 = vmatpush.msra.mxu3 %v6349_v34  ;;  %8529 = vst [vmem:[#allocation76_spill] sm:$0xff] %v6421_v10 }
 0x2a8   :  { %2176 = vmatpush.msra.mxu0 %v6352_v57  ;;  %2196 = vmatpush.msra.mxu1 %v6355_v46  ;;  %8533 = vst [vmem:[#allocation80_spill] sm:$0xff] %v6433_v19 }
 0x2a9   :  { %2216 = vmatpush.msra.mxu2 %v6358_v56  ;;  %2236 = vmatpush.msra.mxu3 %v6361_v50  ;;  %8534 = vst [vmem:[#allocation81_spill] sm:$0xff] %v6436_v36 }
 0x2aa   :  { %v3881_v22 = vpop.eup %3880  ;;  %2177 = vmatpush.msra.mxu0 %v6364_v48  ;;  %2197 = vmatpush.msra.mxu1 %v6367_v44  ;;  %8536 = vst [vmem:[#allocation83_spill] sm:$0xff] %v6442_v37 }
 0x2ab   :  { %v1782_v39 = vmul.f32 %v3881_v22, %v1779_v47  ;;  %2217 = vmatpush.msra.mxu2 %v6370_v20  ;;  %2237 = vmatpush.msra.mxu3 %v6373_v42  ;;  %v6445_v22 = vld [vmem:[#allocation4 + $0x68] sm:$0xff]  ;;  %v6448_v47 = vld [vmem:[#allocation4 + $0x70] sm:$0xff] }
 0x2ac   :  { %2178 = vmatpush.msra.mxu0 %v6376_v27  ;;  %2198 = vmatpush.msra.mxu1 %v6385_v31  ;;  %8537 = vst [vmem:[#allocation84_spill] sm:$0xff] %v6445_v22 }
 0x2ad   :  { %v6380_v23 = vsel %vm1813_vm8, %v1782_v39, %v6063_v5  ;;  %v1799_v59 = vsel %vm1798_vm9, %v1782_v39, 0.0  ;;  %1994 = vmatmul.f32.vlgmr.msrb.gmra.mxu0 %v1782_v39  ;;  %2014 = vmatmul.f32.vlgmr.msrb.gmra.mxu1 %v1782_v39  ;;  %v6394_v5 = vld [vmem:[#allocation4 + $0xe0] sm:$0xff]  ;;  %8538 = vst [vmem:[#allocation85_spill] sm:$0xff] %v6448_v47 }
 0x2ae   :  { %v6383_v35 = vadd.f32 %v1799_v59, %v6065_v2  ;;  %2034 = vmatmul.f32.vlgmr.msrb.gmra.mxu2 %v1782_v39  ;;  %2054 = vmatmul.f32.vlgmr.msrb.gmra.mxu3 %v1782_v39  ;;  %v6397_v2 = vld [vmem:[#allocation4 + $0xe8] sm:$0xff]  ;;  %v6451_v39 = vld [vmem:[#allocation4 + $0x78] sm:$0xff]  ;;  %v6454_v59 = vld [vmem:[#allocation4 + $0x40] sm:$0xff] }
 0x2af   :  { %2218 = vmatpush.msra.mxu2 %v6388_v62  ;;  %2238 = vmatpush.msra.mxu3 %v6391_v51  ;;  %8521 = vst [vmem:[#allocation68_spill] sm:$0xff] %v6397_v2 }
 0x2b0   :  { %2179 = vmatpush.msra.mxu0 %v6394_v5  ;;  %2199 = vmatpush.msra.mxu1 %v6397_v2  ;;  %8539 = vst [vmem:[#allocation86_spill] sm:$0xff] %v6451_v39 }
 0x2b1   :  { %2219 = vmatpush.msra.mxu2 %v6400_v12  ;;  %2239 = vmatpush.msra.mxu3 %v6403_v3  ;;  %8540 = vst [vmem:[#allocation87_spill] sm:$0xff] %v6454_v59 }
 0x2b2   :  { %2180 = vmatpush.msra.mxu0 %v6406_v43  ;;  %2200 = vmatpush.msra.mxu1 %v6409_v8 }
 0x2b3   :  { %2220 = vmatpush.msra.mxu2 %v6412_v40  ;;  %2240 = vmatpush.msra.mxu3 %v6415_v9 }
 0x2b4   :  { %2181 = vmatpush.msra.mxu0 %v6418_v7  ;;  %2201 = vmatpush.msra.mxu1 %v6421_v10 }
 0x2b5   :  { %2221 = vmatpush.msra.mxu2 %v6424_v54  ;;  %2241 = vmatpush.msra.mxu3 %v6427_v13 }
 0x2b6   :  { %2182 = vmatpush.msra.mxu0 %v6430_v60  ;;  %2202 = vmatpush.msra.mxu1 %v6433_v19  ;;  %v8628_v19 = vld [vmem:[#allocation103_spill] sm:$0xff] }
 0x2b7   :  { %2222 = vmatpush.msra.mxu2 %v6436_v36  ;;  %2242 = vmatpush.msra.mxu3 %v6439_v28  ;;  %v6457_v28 = vld [vmem:[#allocation4 + $0x48] sm:$0xff]  ;;  %v8627_v36 = vld [vmem:[#allocation102_spill] sm:$0xff] }
 0x2b8   :  { %2183 = vmatpush.msra.mxu0 %v6442_v37  ;;  %2203 = vmatpush.msra.mxu1 %v6445_v22  ;;  %8541 = vst [vmem:[#allocation88_spill] sm:$0xff] %v6457_v28  ;;  %v6460_v37 = vld [vmem:[#allocation4 + $0x50] sm:$0xff]  ;;  %v6463_v22 = vld [vmem:[#allocation4 + $0x58] sm:$0xff] }
 0x2b9   :  { %2223 = vmatpush.msra.mxu2 %v6448_v47  ;;  %2243 = vmatpush.msra.mxu3 %v6451_v39  ;;  %8542 = vst [vmem:[#allocation89_spill] sm:$0xff] %v6460_v37  ;;  %v6466_v47 = vld [vmem:[#allocation4 + $0x20] sm:$0xff]  ;;  %v6469_v39 = vld [vmem:[#allocation4 + $0x28] sm:$0xff] }
 0x2ba   :  { %2184 = vmatpush.msra.mxu0 %v6454_v59  ;;  %2204 = vmatpush.msra.mxu1 %v6457_v28  ;;  %8543 = vst [vmem:[#allocation90_spill] sm:$0xff] %v6463_v22  ;;  %v6472_v59 = vld [vmem:[#allocation4 + $0x30] sm:$0xff]  ;;  %v6475_v28 = vld [vmem:[#allocation4 + $0x38] sm:$0xff] }
 0x2bb   :  { %2224 = vmatpush.msra.mxu2 %v6460_v37  ;;  %2244 = vmatpush.msra.mxu3 %v6463_v22  ;;  %8544 = vst [vmem:[#allocation91_spill] sm:$0xff] %v6466_v47  ;;  %v6478_v37 = vld [vmem:[#allocation4] sm:$0xff]  ;;  %v6481_v22 = vld [vmem:[#allocation4 + $0x8] sm:$0xff] }
 0x2bc   :  { %2185 = vmatpush.msra.mxu0 %v6466_v47  ;;  %8545 = vst [vmem:[#allocation92_spill] sm:$0xff] %v6469_v39  ;;  %2205 = vmatpush.msra.mxu1 %v6469_v39  ;;  %v6484_v47 = vld [vmem:[#allocation4 + $0x10] sm:$0xff]  ;;  %v6487_v39 = vld [vmem:[#allocation4 + $0x18] sm:$0xff] }
 0x2bd   :  { %8546 = vst [vmem:[#allocation93_spill] sm:$0xff] %v6472_v59  ;;  %2225 = vmatpush.msra.mxu2 %v6472_v59  ;;  %2245 = vmatpush.msra.mxu3 %v6475_v28  ;;  %v6490_v59 = vld [vmem:[#allocation5 + $0x1e0] sm:$0xff] }
 0x2be   :  { %8547 = vst [vmem:[#allocation94_spill] sm:$0xff] %v6475_v28  ;;  %2186 = vmatpush.msra.mxu0 %v6478_v37  ;;  %2206 = vmatpush.msra.mxu1 %v6481_v22  ;;  %v6493_v28 = vld [vmem:[#allocation5 + $0x1e8] sm:$0xff] }
 0x2bf   :  { %8548 = vst [vmem:[#allocation95_spill] sm:$0xff] %v6478_v37  ;;  %2226 = vmatpush.msra.mxu2 %v6484_v47  ;;  %2246 = vmatpush.msra.mxu3 %v6487_v39  ;;  %v6496_v37 = vld [vmem:[#allocation5 + $0x1f0] sm:$0xff] }
 0x2c0   :  { %8549 = vst [vmem:[#allocation96_spill] sm:$0xff] %v6481_v22  ;;  %2318 = vmatpush.msrb.mxu0 %v6490_v59  ;;  %2338 = vmatpush.msrb.mxu1 %v6493_v28  ;;  %v6499_v22 = vld [vmem:[#allocation5 + $0x1f8] sm:$0xff] }
 0x2c1   :  { %8550 = vst [vmem:[#allocation112_spill] sm:$0xff] %v6484_v47  ;;  %2358 = vmatpush.msrb.mxu2 %v6496_v37  ;;  %2378 = vmatpush.msrb.mxu3 %v6499_v22  ;;  %v6502_v47 = vld [vmem:[#allocation5 + $0x1c0] sm:$0xff] }
 0x2c2   :  { %8551 = vst [vmem:[#allocation113_spill] sm:$0xff] %v6487_v39  ;;  %2319 = vmatpush.msrb.mxu0 %v6502_v47  ;;  %v6505_v39 = vld [vmem:[#allocation5 + $0x1c8] sm:$0xff]  ;;  %2486 = vperm.xlu0 %3783, %v6260_v53   ;;  %v8622_v53 = vld [vmem:[#allocation110_spill] sm:$0xff] }
 0x2c3   :  { %8552 = vst [vmem:[#allocation114_spill] sm:$0xff] %v6490_v59  ;;  %2339 = vmatpush.msrb.mxu1 %v6505_v39  ;;  %v6508_v59 = vld [vmem:[#allocation5 + $0x1d0] sm:$0xff]  ;;  %2826 = vperm.xlu1 %3785, %v6017_v38  }
 0x2c4   :  { %8553 = vst [vmem:[#allocation115_spill] sm:$0xff] %v6493_v28  ;;  %2359 = vmatpush.msrb.mxu2 %v6508_v59  ;;  %v6511_v28 = vld [vmem:[#allocation5 + $0x1d8] sm:$0xff] }
 0x2c5   :  { %8554 = vst [vmem:[#allocation116_spill] sm:$0xff] %v6496_v37  ;;  %2379 = vmatpush.msrb.mxu3 %v6511_v28  ;;  %v6514_v37 = vld [vmem:[#allocation5 + $0x1a0] sm:$0xff] }
 0x2c6   :  { %8555 = vst [vmem:[#allocation117_spill] sm:$0xff] %v6499_v22  ;;  %2320 = vmatpush.msrb.mxu0 %v6514_v37  ;;  %v6517_v22 = vld [vmem:[#allocation5 + $0x1a8] sm:$0xff] }
 0x2c7   :  { %8556 = vst [vmem:[#allocation118_spill] sm:$0xff] %v6502_v47  ;;  %2340 = vmatpush.msrb.mxu1 %v6517_v22  ;;  %v6520_v47 = vld [vmem:[#allocation5 + $0x1b0] sm:$0xff] }
 0x2c8   :  { %8557 = vst [vmem:[#allocation119_spill] sm:$0xff] %v6505_v39  ;;  %2360 = vmatpush.msrb.mxu2 %v6520_v47  ;;  %v6523_v39 = vld [vmem:[#allocation5 + $0x1b8] sm:$0xff] }
 0x2c9   :  { %8558 = vst [vmem:[#allocation120_spill] sm:$0xff] %v6508_v59  ;;  %2380 = vmatpush.msrb.mxu3 %v6523_v39  ;;  %v6526_v59 = vld [vmem:[#allocation5 + $0x180] sm:$0xff] }
 0x2ca   :  { %8559 = vst [vmem:[#allocation121_spill] sm:$0xff] %v6511_v28  ;;  %2321 = vmatpush.msrb.mxu0 %v6526_v59  ;;  %v6529_v28 = vld [vmem:[#allocation5 + $0x188] sm:$0xff] }
 0x2cb   :  { %8560 = vst [vmem:[#allocation122_spill] sm:$0xff] %v6514_v37  ;;  %2341 = vmatpush.msrb.mxu1 %v6529_v28  ;;  %v6532_v37 = vld [vmem:[#allocation5 + $0x190] sm:$0xff] }
 0x2cc   :  { %8561 = vst [vmem:[#allocation123_spill] sm:$0xff] %v6517_v22  ;;  %2361 = vmatpush.msrb.mxu2 %v6532_v37  ;;  %v6535_v22 = vld [vmem:[#allocation5 + $0x198] sm:$0xff] }
 0x2cd   :  { %8562 = vst [vmem:[#allocation124_spill] sm:$0xff] %v6520_v47  ;;  %2381 = vmatpush.msrb.mxu3 %v6535_v22  ;;  %v6538_v47 = vld [vmem:[#allocation5 + $0x160] sm:$0xff] }
 0x2ce   :  { %8563 = vst [vmem:[#allocation125_spill] sm:$0xff] %v6523_v39  ;;  %2322 = vmatpush.msrb.mxu0 %v6538_v47  ;;  %v6541_v39 = vld [vmem:[#allocation5 + $0x168] sm:$0xff] }
 0x2cf   :  { %8564 = vst [vmem:[#allocation126_spill] sm:$0xff] %v6526_v59  ;;  %2342 = vmatpush.msrb.mxu1 %v6541_v39  ;;  %v6544_v59 = vld [vmem:[#allocation5 + $0x170] sm:$0xff] }
 0x2d0   :  { %8565 = vst [vmem:[#allocation127_spill] sm:$0xff] %v6529_v28  ;;  %2362 = vmatpush.msrb.mxu2 %v6544_v59  ;;  %v6547_v28 = vld [vmem:[#allocation5 + $0x178] sm:$0xff] }
 0x2d1   :  { %8566 = vst [vmem:[#allocation128_spill] sm:$0xff] %v6532_v37  ;;  %2382 = vmatpush.msrb.mxu3 %v6547_v28  ;;  %v6550_v37 = vld [vmem:[#allocation5 + $0x140] sm:$0xff] }
 0x2d2   :  { %8567 = vst [vmem:[#allocation129_spill] sm:$0xff] %v6535_v22  ;;  %2323 = vmatpush.msrb.mxu0 %v6550_v37  ;;  %v6553_v22 = vld [vmem:[#allocation5 + $0x148] sm:$0xff] }
 0x2d3   :  { %8568 = vst [vmem:[#allocation130_spill] sm:$0xff] %v6538_v47  ;;  %2343 = vmatpush.msrb.mxu1 %v6553_v22  ;;  %v6556_v47 = vld [vmem:[#allocation5 + $0x150] sm:$0xff] }
 0x2d4   :  { %8569 = vst [vmem:[#allocation131_spill] sm:$0xff] %v6541_v39  ;;  %2363 = vmatpush.msrb.mxu2 %v6556_v47  ;;  %v6559_v39 = vld [vmem:[#allocation5 + $0x158] sm:$0xff] }
 0x2d5   :  { %8570 = vst [vmem:[#allocation132_spill] sm:$0xff] %v6544_v59  ;;  %2383 = vmatpush.msrb.mxu3 %v6559_v39  ;;  %v6562_v59 = vld [vmem:[#allocation5 + $0x120] sm:$0xff] }
 0x2d6   :  { %8571 = vst [vmem:[#allocation133_spill] sm:$0xff] %v6547_v28  ;;  %2324 = vmatpush.msrb.mxu0 %v6562_v59  ;;  %v6565_v28 = vld [vmem:[#allocation5 + $0x128] sm:$0xff] }
 0x2d7   :  { %8572 = vst [vmem:[#allocation134_spill] sm:$0xff] %v6550_v37  ;;  %2344 = vmatpush.msrb.mxu1 %v6565_v28  ;;  %v6568_v37 = vld [vmem:[#allocation5 + $0x130] sm:$0xff] }
 0x2d8   :  { %8573 = vst [vmem:[#allocation135_spill] sm:$0xff] %v6553_v22  ;;  %2364 = vmatpush.msrb.mxu2 %v6568_v37  ;;  %v6571_v22 = vld [vmem:[#allocation5 + $0x138] sm:$0xff] }
 0x2d9   :  { %8574 = vst [vmem:[#allocation136_spill] sm:$0xff] %v6556_v47  ;;  %2384 = vmatpush.msrb.mxu3 %v6571_v22  ;;  %v6574_v47 = vld [vmem:[#allocation5 + $0x100] sm:$0xff] }
 0x2da   :  { %8575 = vst [vmem:[#allocation137_spill] sm:$0xff] %v6559_v39  ;;  %2325 = vmatpush.msrb.mxu0 %v6574_v47  ;;  %v6577_v39 = vld [vmem:[#allocation5 + $0x108] sm:$0xff] }
 0x2db   :  { %8576 = vst [vmem:[#allocation138_spill] sm:$0xff] %v6562_v59  ;;  %2345 = vmatpush.msrb.mxu1 %v6577_v39  ;;  %v6580_v59 = vld [vmem:[#allocation5 + $0x110] sm:$0xff] }
 0x2dc   :  { %8577 = vst [vmem:[#allocation139_spill] sm:$0xff] %v6565_v28  ;;  %2365 = vmatpush.msrb.mxu2 %v6580_v59  ;;  %v6583_v28 = vld [vmem:[#allocation5 + $0x118] sm:$0xff] }
 0x2dd   :  { %8578 = vst [vmem:[#allocation140_spill] sm:$0xff] %v6568_v37  ;;  %2385 = vmatpush.msrb.mxu3 %v6583_v28  ;;  %v6586_v37 = vld [vmem:[#allocation5 + $0xe0] sm:$0xff] }
 0x2de   :  { %8579 = vst [vmem:[#allocation141_spill] sm:$0xff] %v6571_v22  ;;  %2326 = vmatpush.msrb.mxu0 %v6586_v37  ;;  %v6589_v22 = vld [vmem:[#allocation5 + $0xe8] sm:$0xff] }
 0x2df   :  { %8580 = vst [vmem:[#allocation142_spill] sm:$0xff] %v6574_v47  ;;  %2346 = vmatpush.msrb.mxu1 %v6589_v22  ;;  %v6592_v47 = vld [vmem:[#allocation5 + $0xf0] sm:$0xff] }
 0x2e0   :  { %8581 = vst [vmem:[#allocation143_spill] sm:$0xff] %v6577_v39  ;;  %2366 = vmatpush.msrb.mxu2 %v6592_v47  ;;  %v6595_v39 = vld [vmem:[#allocation5 + $0xf8] sm:$0xff] }
 0x2e1   :  { %8582 = vst [vmem:[#allocation144_spill] sm:$0xff] %v6580_v59  ;;  %2386 = vmatpush.msrb.mxu3 %v6595_v39  ;;  %v6598_v59 = vld [vmem:[#allocation5 + $0xc0] sm:$0xff] }
 0x2e2   :  { %8583 = vst [vmem:[#allocation145_spill] sm:$0xff] %v6583_v28  ;;  %2327 = vmatpush.msrb.mxu0 %v6598_v59  ;;  %v6601_v28 = vld [vmem:[#allocation5 + $0xc8] sm:$0xff] }
 0x2e3   :  { %8584 = vst [vmem:[#allocation146_spill] sm:$0xff] %v6586_v37  ;;  %2347 = vmatpush.msrb.mxu1 %v6601_v28  ;;  %v6604_v37 = vld [vmem:[#allocation5 + $0xd0] sm:$0xff] }
 0x2e4   :  { %8585 = vst [vmem:[#allocation147_spill] sm:$0xff] %v6589_v22  ;;  %2367 = vmatpush.msrb.mxu2 %v6604_v37  ;;  %v6607_v22 = vld [vmem:[#allocation5 + $0xd8] sm:$0xff] }
 0x2e5   :  { %8586 = vst [vmem:[#allocation148_spill] sm:$0xff] %v6592_v47  ;;  %2387 = vmatpush.msrb.mxu3 %v6607_v22  ;;  %v6610_v47 = vld [vmem:[#allocation5 + $0xa0] sm:$0xff] }
 0x2e6   :  { %8587 = vst [vmem:[#allocation149_spill] sm:$0xff] %v6595_v39  ;;  %2328 = vmatpush.msrb.mxu0 %v6610_v47  ;;  %v6613_v39 = vld [vmem:[#allocation5 + $0xa8] sm:$0xff] }
 0x2e7   :  { %8588 = vst [vmem:[#allocation150_spill] sm:$0xff] %v6598_v59  ;;  %2348 = vmatpush.msrb.mxu1 %v6613_v39  ;;  %v6616_v59 = vld [vmem:[#allocation5 + $0xb0] sm:$0xff] }
 0x2e8   :  { %8589 = vst [vmem:[#allocation151_spill] sm:$0xff] %v6601_v28  ;;  %2368 = vmatpush.msrb.mxu2 %v6616_v59  ;;  %v6619_v28 = vld [vmem:[#allocation5 + $0xb8] sm:$0xff] }
 0x2e9   :  { %8590 = vst [vmem:[#allocation152_spill] sm:$0xff] %v6604_v37  ;;  %2388 = vmatpush.msrb.mxu3 %v6619_v28  ;;  %v6622_v37 = vld [vmem:[#allocation5 + $0x80] sm:$0xff] }
 0x2ea   :  { %8591 = vst [vmem:[#allocation153_spill] sm:$0xff] %v6607_v22  ;;  %2329 = vmatpush.msrb.mxu0 %v6622_v37  ;;  %v6625_v22 = vld [vmem:[#allocation5 + $0x88] sm:$0xff] }
 0x2eb   :  { %8592 = vst [vmem:[#allocation154_spill] sm:$0xff] %v6610_v47  ;;  %2349 = vmatpush.msrb.mxu1 %v6625_v22  ;;  %v6628_v47 = vld [vmem:[#allocation5 + $0x90] sm:$0xff] }
 0x2ec   :  { %8593 = vst [vmem:[#allocation155_spill] sm:$0xff] %v6613_v39  ;;  %2369 = vmatpush.msrb.mxu2 %v6628_v47  ;;  %v6631_v39 = vld [vmem:[#allocation5 + $0x98] sm:$0xff] }
 0x2ed   :  { %8594 = vst [vmem:[#allocation156_spill] sm:$0xff] %v6616_v59  ;;  %2389 = vmatpush.msrb.mxu3 %v6631_v39  ;;  %v6634_v59 = vld [vmem:[#allocation5 + $0x60] sm:$0xff] }
 0x2ee   :  { %8595 = vst [vmem:[#allocation157_spill] sm:$0xff] %v6619_v28  ;;  %2330 = vmatpush.msrb.mxu0 %v6634_v59  ;;  %v6637_v28 = vld [vmem:[#allocation5 + $0x68] sm:$0xff] }
 0x2ef   :  { %8596 = vst [vmem:[#allocation158_spill] sm:$0xff] %v6622_v37  ;;  %2350 = vmatpush.msrb.mxu1 %v6637_v28  ;;  %v6640_v37 = vld [vmem:[#allocation5 + $0x70] sm:$0xff] }
 0x2f0   :  { %8597 = vst [vmem:[#allocation159_spill] sm:$0xff] %v6625_v22  ;;  %2370 = vmatpush.msrb.mxu2 %v6640_v37  ;;  %v6643_v22 = vld [vmem:[#allocation5 + $0x78] sm:$0xff] }
 0x2f1   :  { %8598 = vst [vmem:[#allocation160_spill] sm:$0xff] %v6628_v47  ;;  %2390 = vmatpush.msrb.mxu3 %v6643_v22  ;;  %v6646_v47 = vld [vmem:[#allocation5 + $0x40] sm:$0xff] }
 0x2f2   :  { %8599 = vst [vmem:[#allocation161_spill] sm:$0xff] %v6631_v39  ;;  %2331 = vmatpush.msrb.mxu0 %v6646_v47  ;;  %v6649_v39 = vld [vmem:[#allocation5 + $0x48] sm:$0xff] }
 0x2f3   :  { %8600 = vst [vmem:[#allocation162_spill] sm:$0xff] %v6634_v59  ;;  %2351 = vmatpush.msrb.mxu1 %v6649_v39  ;;  %v6652_v59 = vld [vmem:[#allocation5 + $0x50] sm:$0xff] }
 0x2f4   :  { %8601 = vst [vmem:[#allocation163_spill] sm:$0xff] %v6637_v28  ;;  %2371 = vmatpush.msrb.mxu2 %v6652_v59  ;;  %v6655_v28 = vld [vmem:[#allocation5 + $0x58] sm:$0xff] }
 0x2f5   :  { %8602 = vst [vmem:[#allocation164_spill] sm:$0xff] %v6640_v37  ;;  %2391 = vmatpush.msrb.mxu3 %v6655_v28  ;;  %v6658_v37 = vld [vmem:[#allocation5 + $0x20] sm:$0xff] }
 0x2f6   :  { %8603 = vst [vmem:[#allocation165_spill] sm:$0xff] %v6643_v22  ;;  %2332 = vmatpush.msrb.mxu0 %v6658_v37  ;;  %v6661_v22 = vld [vmem:[#allocation5 + $0x28] sm:$0xff] }
 0x2f7   :  { %8604 = vst [vmem:[#allocation166_spill] sm:$0xff] %v6646_v47  ;;  %2352 = vmatpush.msrb.mxu1 %v6661_v22  ;;  %v6664_v47 = vld [vmem:[#allocation5 + $0x30] sm:$0xff] }
 0x2f8   :  { %8605 = vst [vmem:[#allocation167_spill] sm:$0xff] %v6649_v39  ;;  %2372 = vmatpush.msrb.mxu2 %v6664_v47  ;;  %v6667_v39 = vld [vmem:[#allocation5 + $0x38] sm:$0xff] }
 0x2f9   :  { %8606 = vst [vmem:[#allocation168_spill] sm:$0xff] %v6652_v59  ;;  %2392 = vmatpush.msrb.mxu3 %v6667_v39  ;;  %v6670_v59 = vld [vmem:[#allocation5] sm:$0xff] }
 0x2fa   :  { %8607 = vst [vmem:[#allocation169_spill] sm:$0xff] %v6655_v28  ;;  %2333 = vmatpush.msrb.mxu0 %v6670_v59  ;;  %v6673_v28 = vld [vmem:[#allocation5 + $0x8] sm:$0xff] }
 0x2fb   :  { %8608 = vst [vmem:[#allocation170_spill] sm:$0xff] %v6658_v37  ;;  %2353 = vmatpush.msrb.mxu1 %v6673_v28  ;;  %v6676_v37 = vld [vmem:[#allocation5 + $0x10] sm:$0xff] }
 0x2fc   :  { %8609 = vst [vmem:[#allocation171_spill] sm:$0xff] %v6661_v22  ;;  %2373 = vmatpush.msrb.mxu2 %v6676_v37  ;;  %v6679_v22 = vld [vmem:[#allocation5 + $0x18] sm:$0xff] }
 0x2fd   :  { %8610 = vst [vmem:[#allocation172_spill] sm:$0xff] %v6664_v47  ;;  %2393 = vmatpush.msrb.mxu3 %v6679_v22  ;;  %v8620_v47 = vld [vmem:[#allocation104_spill] sm:$0xff] }
 0x2fe   :  { %8611 = vst [vmem:[#allocation173_spill] sm:$0xff] %v6667_v39  ;;  %v8616_v39 = vld [vmem:[#allocation185_spill] sm:$0xff] }
 0x2ff   :  { %8612 = vst [vmem:[#allocation174_spill] sm:$0xff] %v6670_v59  ;;  %2818 = vperm.xlu0 %3783, %v8616_v39   ;;  %v8617_v59 = vld [vmem:[#allocation184_spill] sm:$0xff] }
 0x300   :  { %8613 = vst [vmem:[#allocation175_spill] sm:$0xff] %v6673_v28  ;;  %2809 = vperm.xlu2 %3784, %v8617_v59   ;;  %v8618_v28 = vld [vmem:[#allocation67_spill] sm:$0xff]  ;;  %v8625_v39 = vld [vmem:[#allocation64_spill] sm:$0xff] }
 0x301   :  { %8614 = vst [vmem:[#allocation176_spill] sm:$0xff] %v6676_v37  ;;  %v8619_v37 = vld [vmem:[#allocation183_spill] sm:$0xff] }
 0x302   :  { %8615 = vst [vmem:[#allocation177_spill] sm:$0xff] %v6679_v22  ;;  %v8621_v22 = vld [vmem:[#allocation66_spill] sm:$0xff] }
 0x303   :  { %3158 = vperm.xlu1 %3785, %v8621_v22  }
 0x307   :  { %3149 = vperm.xlu0 %3783, %v8618_v28  }
 0x308   :  { %2833 = vperm.xlu2 %3784, %v8619_v37  }
 0x30b   :  { %3166 = vperm.xlu1 %3785, %v8624_v4  }
 0x30f   :  { %3498 = vperm.xlu0 %3783, %v8620_v47  }
 0x310   :  { %3489 = vperm.xlu2 %3784, %v8622_v53   ;;  %v8629_v53 = vld [vmem:[#allocation107_spill] sm:$0xff] }
 0x313   :  { %3513 = vperm.xlu1 %3785, %v8626_v15  }
 0x317   :  { %3506 = vperm.xlu0 %3783, %v8623_v16  }
 0x318   :  { %3173 = vperm.xlu2 %3784, %v8625_v39  }
 0x319   :  { %v1848_v59 = vpop.f32.mrf.mxu0  ;;  %v1868_v28 = vpop.f32.mrf.mxu1 }
 0x31a   :  { %v1911_v38 = vadd.f32 %v1848_v59, %v8627_v36  ;;  %v1912_v37 = vadd.f32 %v1868_v28, %v8628_v19  ;;  %v8630_v19 = vld [vmem:[#allocation106_spill] sm:$0xff] }
 0x31c   :  { %v3724_v60 = vmul.f32 -1.442695, %v1911_v38  ;;  %v3723_v47 = vmul.f32 -1.442695, %v1912_v37  ;;  %v8631_v38 = vld [vmem:[#allocation56_spill] sm:$0xff]  ;;  %v8632_v37 = vld [vmem:[#allocation57_spill] sm:$0xff] }
 0x31e   :  { %3882 = vpow2.f32 %v3724_v60 }
 0x31f   :  { %3884 = vpow2.f32 %v3723_v47 }
 0x320   :  { %v1908_v22 = vpop.f32.mrf.mxu3  ;;  %v1888_v15 = vpop.f32.mrf.mxu2 }
 0x321   :  { %v1914_v13 = vadd.f32 %v1908_v22, %v8629_v53  ;;  %v1913_v28 = vadd.f32 %v1888_v15, %v8630_v19 }
 0x323   :  { %v3725_v16 = vmul.f32 -1.442695, %v1914_v13 }
 0x324   :  { %v3883_v54 = vpop.eup %3882 }
 0x325   :  { %v3885_v4 = vpop.eup %3884  ;;  %v1938_v10 = vadd.f32 1.0, %v3883_v54  ;;  %3886 = vpow2.f32 %v3725_v16 }
 0x326   :  { %v1918_v39 = vadd.f32 1.0, %v3885_v4 }
 0x327   :  { %3888 = vrcp.f32 %v1938_v10  ;;  %v1948_v8 = vand.u32 2147483647, %v1938_v10  ;;  %v1950_v19 = vand.u32 2147483648, %v1938_v10  ;;  %vm1944_vm14 = vweird.f32 %v1938_v10 }
 0x328   :  { %3890 = vrcp.f32 %v1918_v39  ;;  %v1930_v15 = vand.u32 2147483648, %v1918_v39  ;;  %vm1924_vm12 = vweird.f32 %v1918_v39 }
 0x329   :  { %vm1949_vm13 = vcmp.eq.f32.partialorder %v1948_v8, 8.507059e+37 }
 0x32a   :  { %v1995_v7 = vpop.f32.mrf.mxu0  ;;  %v2015_v36 = vpop.f32.mrf.mxu1 }
 0x32b   :  { %v3887_v59 = vpop.eup %3886  ;;  %v2058_v60 = vadd.f32 %v1995_v7, %v8631_v38  ;;  %v2059_v47 = vadd.f32 %v2015_v36, %v8632_v37  ;;  %v1928_v36 = vand.u32 2147483647, %v1918_v39  ;;  %v8633_v38 = vld [vmem:[#allocation59_spill] sm:$0xff] }
 0x32c   :  { %v6704_v9 = vadd.f32 1.0, %v3887_v59 }
 0x32d   :  { %v3889_v13 = vpop.eup %3888  ;;  %v3727_v22 = vmul.f32 -1.442695, %v2058_v60  ;;  %v3726_v53 = vmul.f32 -1.442695, %v2059_v47  ;;  %vm1929_vm0 = vcmp.eq.f32.partialorder %v1928_v36, 8.507059e+37 }
 0x32e   :  { %v3891_v54 = vpop.eup %3890  ;;  %v1940_v16 = vmul.f32 %v3889_v13, %v1938_v10  ;;  %3892 = vrcp.f32 %v6704_v9  ;;  %vm1945_vm10 = vweird.f32 %v3889_v13  ;;  %vm1966_vm4 = vweird.f32 %v6704_v9 }
 0x32f   :  { %v1920_v4 = vmul.f32 %v3891_v54, %v1918_v39  ;;  %3894 = vtanh.f32 %v1913_v28  ;;  %vm1925_vm11 = vweird.f32 %v3891_v54  ;;  %vm1946_vm1 = vmor %vm1944_vm14, %vm1945_vm10 }
 0x330   :  { %v1941_v40 = vsub.f32 1.0, %v1940_v16  ;;  %3896 = vpow2.f32 %v3727_v22  ;;  %v1951_v22 = vor.u32 1.1754944e-38, %v1950_v19  ;;  %vm1926_vm15 = vmor %vm1924_vm12, %vm1925_vm11 }
 0x331   :  { %v1921_v43 = vsub.f32 1.0, %v1920_v4  ;;  %3898 = vpow2.f32 %v3726_v53  ;;  %v2055_v7 = vpop.f32.mrf.mxu3 }
 0x332   :  { %v1942_v59 = vmul.f32 %v3889_v13, %v1941_v40  ;;  %v2061_v60 = vadd.f32 %v2055_v7, %v8633_v38  ;;  %v1931_v40 = vor.u32 1.1754944e-38, %v1930_v15 }
 0x333   :  { %v1922_v37 = vmul.f32 %v3891_v54, %v1921_v43 }
 0x334   :  { %v3893_v47 = vpop.eup %3892  ;;  %v1943_v3 = vadd.f32 %v3889_v13, %v1942_v59  ;;  %v3728_v28 = vmul.f32 -1.442695, %v2061_v60 }
 0x335   :  { %v3895_v16 = vpop.eup %3894  ;;  %v1923_v12 = vadd.f32 %v3891_v54, %v1922_v37  ;;  %v1962_v53 = vmul.f32 %v3893_v47, %v6704_v9  ;;  %vm1967_vm3 = vweird.f32 %v3893_v47 }
 0x336   :  { %v3897_v4 = vpop.eup %3896  ;;  %v1947_v2 = vsel %vm1946_vm1, %v3889_v13, %v1943_v3  ;;  %3900 = vpow2.f32 %v3728_v28  ;;  %v2035_v3 = vpop.f32.mrf.mxu2  ;;  %vm1968_vm5 = vmor %vm1966_vm4, %vm1967_vm3 }
 0x337   :  { %v3899_v43 = vpop.eup %3898  ;;  %v1927_v7 = vsel %vm1926_vm15, %v3891_v54, %v1923_v12  ;;  %v1952_v38 = vsel %vm1949_vm13, %v1951_v22, %v1947_v2  ;;  %v1963_v39 = vsub.f32 1.0, %v1962_v53  ;;  %v6709_v59 = vadd.f32 1.0, %v3897_v4  ;;  %v2130_v53 = vpop.permute.xlu0 %2129 }
 0x338   :  { %v1932_v10 = vsel %vm1929_vm0, %v1931_v40, %v1927_v7  ;;  %v1955_v60 = vmul.f32 %v3895_v16, %v1952_v38  ;;  %v6711_v37 = vadd.f32 1.0, %v3899_v43  ;;  %v1972_v2 = vand.u32 2147483648, %v6704_v9  ;;  %v2147_v16 = vpop.permute.xlu2 %2146 }
 0x339   :  { %v1934_v8 = vmul.f32 %v1932_v10, %v6200_v18  ;;  %v1964_v19 = vmul.f32 %v3893_v47, %v1963_v39  ;;  %3902 = vrcp.f32 %v6709_v59  ;;  %v1970_v54 = vand.u32 2147483647, %v6704_v9  ;;  %v8634_v18 = vld [vmem:[#allocation58_spill] sm:$0xff] }
 0x33a   :  { %3904 = vrcp.f32 %v6711_v37  ;;  %v2060_v36 = vadd.f32 %v2035_v3, %v8634_v18  ;;  %v1973_v7 = vor.u32 1.1754944e-38, %v1972_v2  ;;  %vm2148_vm6 = vcmp.eq.s32.totalorder %v2147_v16, 1 }
 0x33b   :  { %v6716_v15 = vadd.f32 %v1955_v60, %v1934_v8  ;;  %v1965_v12 = vadd.f32 %v3893_v47, %v1964_v19  ;;  %vm1971_vm7 = vcmp.eq.f32.partialorder %v1970_v54, 8.507059e+37  ;;  %vm2131_vm8 = vcmp.eq.s32.totalorder %v2130_v53, 1 }
 0x33c   :  { %v3901_v13 = vpop.eup %3900  ;;  %v2077_v8 = vand.u32 2147483648, %v6711_v37  ;;  %v2097_v19 = vand.u32 2147483648, %v6709_v59  ;;  %v2075_v2 = vand.u32 2147483647, %v6711_v37  ;;  %vm2091_vm11 = vweird.f32 %v6709_v59 }
 0x33d   :  { %3906 = vtanh.f32 %v6716_v15  ;;  %v6723_v28 = vadd.f32 1.0, %v3901_v13  ;;  %v1969_v40 = vsel %vm1968_vm5, %v3893_v47, %v1965_v12  ;;  %v2095_v13 = vand.u32 2147483647, %v6709_v59 }
 0x33e   :  { %v1974_v10 = vsel %vm1971_vm7, %v1973_v7, %v1969_v40  ;;  %vm2071_vm12 = vweird.f32 %v6711_v37  ;;  %v2078_v16 = vor.u32 1.1754944e-38, %v2077_v8  ;;  %vm2076_vm15 = vcmp.eq.f32.partialorder %v2075_v2, 8.507059e+37  ;;  %v8661_v8 = vld [vmem:[#allocation90_spill] sm:$0xff]  ;;  %v8667_v2 = vld [vmem:[#allocation96_spill] sm:$0xff] }
 0x33f   :  { %v3903_v22 = vpop.eup %3902  ;;  %3908 = vrcp.f32 %v6723_v28  ;;  %vm2096_vm13 = vcmp.eq.f32.partialorder %v2095_v13, 8.507059e+37  ;;  %vm2113_vm3 = vweird.f32 %v6723_v28  ;;  %v8665_v13 = vld [vmem:[#allocation94_spill] sm:$0xff]  ;;  %v8672_v7 = vld [vmem:[#allocation116_spill] sm:$0xff] }
 0x340   :  { %v3905_v4 = vpop.eup %3904  ;;  %v2087_v43 = vmul.f32 %v3903_v22, %v6709_v59  ;;  %3910 = vtanh.f32 %v2060_v36  ;;  %vm2092_vm9 = vweird.f32 %v3903_v22 }
 0x341   :  { %v2067_v38 = vmul.f32 %v3905_v4, %v6711_v37  ;;  %vm2072_vm10 = vweird.f32 %v3905_v4  ;;  %vm6741_vm14 = vmor %vm2091_vm11, %vm2092_vm9 }
 0x342   :  { %v2088_v9 = vsub.f32 1.0, %v2087_v43  ;;  %vm2073_vm1 = vmor %vm2071_vm12, %vm2072_vm10 }
 0x343   :  { %v3907_v39 = vpop.eup %3906  ;;  %v2068_v60 = vsub.f32 1.0, %v2067_v38  ;;  %v2098_v38 = vor.u32 1.1754944e-38, %v2097_v19  ;;  %v8662_v19 = vld [vmem:[#allocation91_spill] sm:$0xff] }
 0x344   :  { %v1977_v47 = vmul.f32 %v3907_v39, %v1974_v10  ;;  %v2089_v3 = vmul.f32 %v3903_v22, %v2088_v9 }
 0x345   :  { %v2069_v12 = vmul.f32 %v3905_v4, %v2068_v60  ;;  %v6733_v54 = vpop.eup %3908 }
 0x346   :  { %v2090_v18 = vadd.f32 %v3903_v22, %v2089_v3  ;;  %v6738_v36 = vsel %vm2148_vm6, %v1977_v47, %v6267_v63  ;;  %v2132_v40 = vsel %vm2131_vm8, %v1977_v47, 0.0  ;;  %2187 = vmatmul.f32.vlgmr.msra.gmra.mxu0 %v1977_v47  ;;  %2207 = vmatmul.f32.vlgmr.msra.gmra.mxu1 %v1977_v47  ;;  %v2109_v59 = vmul.f32 %v6733_v54, %v6723_v28  ;;  %v3911_v63 = vpop.eup %3910  ;;  %v8664_v3 = vld [vmem:[#allocation93_spill] sm:$0xff] }
 0x347   :  { %v2070_v43 = vadd.f32 %v3905_v4, %v2069_v12  ;;  %v6748_v37 = vadd.f32 %v2132_v40, %v6270_v61  ;;  %2227 = vmatmul.f32.vlgmr.msra.gmra.mxu2 %v1977_v47  ;;  %2247 = vmatmul.f32.vlgmr.msra.gmra.mxu3 %v1977_v47  ;;  %vm2114_vm0 = vweird.f32 %v6733_v54  ;;  %v8663_v47 = vld [vmem:[#allocation92_spill] sm:$0xff]  ;;  %v8666_v12 = vld [vmem:[#allocation95_spill] sm:$0xff]  ;;  %v8670_v40 = vld [vmem:[#allocation114_spill] sm:$0xff] }
 0x348   :  { %v2094_v53 = vsel %vm6741_vm14, %v3903_v22, %v2090_v18  ;;  %2511 = vmatpush.msra.mxu0 %v6273_v21  ;;  %2531 = vmatpush.msra.mxu1 %v6277_v30  ;;  %v2110_v10 = vsub.f32 1.0, %v2109_v59  ;;  %vm6781_vm4 = vmor %vm2113_vm3, %vm2114_vm0  ;;  %v8669_v18 = vld [vmem:[#allocation113_spill] sm:$0xff]  ;;  %v8674_v59 = vld [vmem:[#allocation118_spill] sm:$0xff] }
 0x349   :  { %v2074_v9 = vsel %vm2073_vm1, %v3905_v4, %v2070_v43  ;;  %v2099_v39 = vsel %vm2096_vm13, %v2098_v38, %v2094_v53  ;;  %2551 = vmatpush.msra.mxu2 %v6280_v45  ;;  %2571 = vmatpush.msra.mxu3 %v6284_v52  ;;  %v2119_v52 = vand.u32 2147483648, %v6723_v28  ;;  %v8660_v4 = vld [vmem:[#allocation89_spill] sm:$0xff]  ;;  %v8671_v43 = vld [vmem:[#allocation115_spill] sm:$0xff] }
 0x34a   :  { %v2079_v61 = vsel %vm2076_vm15, %v2078_v16, %v2074_v9  ;;  %v2102_v60 = vmul.f32 %v3911_v63, %v2099_v39  ;;  %2512 = vmatpush.msra.mxu0 %v6287_v6  ;;  %2532 = vmatpush.msra.mxu1 %v6290_v11  ;;  %v2111_v21 = vmul.f32 %v6733_v54, %v2110_v10  ;;  %v2117_v6 = vand.u32 2147483647, %v6723_v28  ;;  %v8659_v28 = vld [vmem:[#allocation88_spill] sm:$0xff]  ;;  %v8673_v38 = vld [vmem:[#allocation117_spill] sm:$0xff]  ;;  %v8675_v63 = vld [vmem:[#allocation119_spill] sm:$0xff] }
 0x34b   :  { %v2081_v22 = vmul.f32 %v2079_v61, %v6296_v32  ;;  %2552 = vmatpush.msra.mxu2 %v6293_v0  ;;  %2572 = vmatpush.msra.mxu3 %v6298_v14  ;;  %v2154_v32 = vpop.permute.xlu0 %2153  ;;  %v2139_v14 = vpop.permute.xlu1 %2138  ;;  %v8676_v16 = vld [vmem:[#allocation120_spill] sm:$0xff]  ;;  %v8677_v53 = vld [vmem:[#allocation121_spill] sm:$0xff]  ;;  %v8678_v9 = vld [vmem:[#allocation122_spill] sm:$0xff] }
 0x34c   :  { %2513 = vmatpush.msra.mxu0 %v6301_v26  ;;  %2533 = vmatpush.msra.mxu1 %v6306_v41  ;;  %v2112_v45 = vadd.f32 %v6733_v54, %v2111_v21  ;;  %v2120_v26 = vor.u32 1.1754944e-38, %v2119_v52  ;;  %vm2118_vm5 = vcmp.eq.f32.partialorder %v2117_v6, 8.507059e+37  ;;  %vm2155_vm6 = vcmp.eq.s32.totalorder %v2154_v32, 1  ;;  %v8679_v39 = vld [vmem:[#allocation123_spill] sm:$0xff]  ;;  %v8680_v10 = vld [vmem:[#allocation124_spill] sm:$0xff]  ;;  %v8681_v61 = vld [vmem:[#allocation125_spill] sm:$0xff] }
 0x34d   :  { %v6765_v30 = vadd.f32 %v2102_v60, %v2081_v22  ;;  %2553 = vmatpush.msra.mxu2 %v6309_v55  ;;  %2573 = vmatpush.msra.mxu3 %v6314_v17  ;;  %vm2140_vm7 = vcmp.eq.s32.totalorder %v2139_v14, 1  ;;  %v8682_v60 = vld [vmem:[#allocation126_spill] sm:$0xff]  ;;  %v8683_v22 = vld [vmem:[#allocation127_spill] sm:$0xff]  ;;  %v8684_v21 = vld [vmem:[#allocation128_spill] sm:$0xff] }
 0x34e   :  { %2514 = vmatpush.msra.mxu0 %v6317_v33  ;;  %2534 = vmatpush.msra.mxu1 %v6322_v29  ;;  %v2116_v0 = vsel %vm6781_vm4, %v6733_v54, %v2112_v45  ;;  %v8668_v54 = vld [vmem:[#allocation112_spill] sm:$0xff]  ;;  %v8685_v45 = vld [vmem:[#allocation129_spill] sm:$0xff]  ;;  %v8686_v52 = vld [vmem:[#allocation130_spill] sm:$0xff] }
 0x34f   :  { %3912 = vtanh.f32 %v6765_v30  ;;  %2554 = vmatpush.msra.mxu2 %v6325_v25  ;;  %2574 = vmatpush.msra.mxu3 %v6334_v58  ;;  %v2121_v55 = vsel %vm2118_vm5, %v2120_v26, %v2116_v0  ;;  %v8639_v58 = vld [vmem:[#allocation68_spill] sm:$0xff]  ;;  %v8687_v6 = vld [vmem:[#allocation131_spill] sm:$0xff]  ;;  %v8689_v0 = vld [vmem:[#allocation133_spill] sm:$0xff] }
 0x350   :  { %2515 = vmatpush.msra.mxu0 %v6337_v1  ;;  %2535 = vmatpush.msra.mxu1 %v6343_v24  ;;  %v8640_v1 = vld [vmem:[#allocation69_spill] sm:$0xff]  ;;  %v8641_v24 = vld [vmem:[#allocation70_spill] sm:$0xff]  ;;  %v8688_v11 = vld [vmem:[#allocation132_spill] sm:$0xff] }
 0x351   :  { %2555 = vmatpush.msra.mxu2 %v6346_v49  ;;  %2575 = vmatpush.msra.mxu3 %v6349_v34  ;;  %v8642_v49 = vld [vmem:[#allocation71_spill] sm:$0xff]  ;;  %v8643_v34 = vld [vmem:[#allocation72_spill] sm:$0xff]  ;;  %v8690_v32 = vld [vmem:[#allocation134_spill] sm:$0xff] }
 0x352   :  { %2516 = vmatpush.msra.mxu0 %v6352_v57  ;;  %2536 = vmatpush.msra.mxu1 %v6355_v46  ;;  %v8644_v57 = vld [vmem:[#allocation73_spill] sm:$0xff]  ;;  %v8645_v46 = vld [vmem:[#allocation74_spill] sm:$0xff]  ;;  %v8691_v14 = vld [vmem:[#allocation135_spill] sm:$0xff] }
 0x353   :  { %2556 = vmatpush.msra.mxu2 %v6358_v56  ;;  %2576 = vmatpush.msra.mxu3 %v6361_v50  ;;  %v8646_v56 = vld [vmem:[#allocation75_spill] sm:$0xff]  ;;  %v8647_v50 = vld [vmem:[#allocation76_spill] sm:$0xff] }
 0x354   :  { %2517 = vmatpush.msra.mxu0 %v6364_v48  ;;  %2537 = vmatpush.msra.mxu1 %v6367_v44  ;;  %v8648_v48 = vld [vmem:[#allocation77_spill] sm:$0xff]  ;;  %v8649_v44 = vld [vmem:[#allocation78_spill] sm:$0xff]  ;;  %v8692_v26 = vld [vmem:[#allocation136_spill] sm:$0xff] }
 0x355   :  { %v3913_v41 = vpop.eup %3912  ;;  %2557 = vmatpush.msra.mxu2 %v6370_v20  ;;  %2577 = vmatpush.msra.mxu3 %v6373_v42  ;;  %v8650_v20 = vld [vmem:[#allocation79_spill] sm:$0xff]  ;;  %v8651_v42 = vld [vmem:[#allocation80_spill] sm:$0xff] }
 0x356   :  { %v2124_v17 = vmul.f32 %v3913_v41, %v2121_v55  ;;  %2518 = vmatpush.msra.mxu0 %v6376_v27  ;;  %2538 = vmatpush.msra.mxu1 %v6385_v31  ;;  %v8652_v27 = vld [vmem:[#allocation81_spill] sm:$0xff]  ;;  %v8655_v31 = vld [vmem:[#allocation84_spill] sm:$0xff]  ;;  %v8694_v55 = vld [vmem:[#allocation138_spill] sm:$0xff] }
 0x357   :  { %2558 = vmatpush.msra.mxu2 %v6388_v62  ;;  %2578 = vmatpush.msra.mxu3 %v6391_v51  ;;  %v8656_v62 = vld [vmem:[#allocation85_spill] sm:$0xff]  ;;  %v8657_v51 = vld [vmem:[#allocation86_spill] sm:$0xff] }
 0x358   :  { %v6803_v33 = vsel %vm2155_vm6, %v2124_v17, %v6380_v23  ;;  %v2141_v29 = vsel %vm2140_vm7, %v2124_v17, 0.0  ;;  %2334 = vmatmul.f32.vlgmr.msrb.gmra.mxu0 %v2124_v17  ;;  %2354 = vmatmul.f32.vlgmr.msrb.gmra.mxu1 %v2124_v17  ;;  %v8653_v23 = vld [vmem:[#allocation82_spill] sm:$0xff]  ;;  %v8693_v41 = vld [vmem:[#allocation137_spill] sm:$0xff] }
 0x359   :  { %v6806_v25 = vadd.f32 %v2141_v29, %v6383_v35  ;;  %2374 = vmatmul.f32.vlgmr.msrb.gmra.mxu2 %v2124_v17  ;;  %2394 = vmatmul.f32.vlgmr.msrb.gmra.mxu3 %v2124_v17  ;;  %v8654_v35 = vld [vmem:[#allocation83_spill] sm:$0xff]  ;;  %v8696_v29 = vld [vmem:[#allocation140_spill] sm:$0xff] }
 0x35a   :  { %2519 = vmatpush.msra.mxu0 %v6394_v5  ;;  %2539 = vmatpush.msra.mxu1 %v8639_v58  ;;  %v8658_v5 = vld [vmem:[#allocation87_spill] sm:$0xff]  ;;  %v8697_v58 = vld [vmem:[#allocation141_spill] sm:$0xff] }
 0x35b   :  { %2559 = vmatpush.msra.mxu2 %v8640_v1  ;;  %2579 = vmatpush.msra.mxu3 %v8641_v24  ;;  %v8695_v17 = vld [vmem:[#allocation139_spill] sm:$0xff]  ;;  %v8698_v1 = vld [vmem:[#allocation142_spill] sm:$0xff] }
 0x35c   :  { %2520 = vmatpush.msra.mxu0 %v8642_v49  ;;  %2540 = vmatpush.msra.mxu1 %v8643_v34  ;;  %v8699_v24 = vld [vmem:[#allocation143_spill] sm:$0xff]  ;;  %v8700_v49 = vld [vmem:[#allocation144_spill] sm:$0xff]  ;;  %v8701_v34 = vld [vmem:[#allocation145_spill] sm:$0xff] }
 0x35d   :  { %2560 = vmatpush.msra.mxu2 %v8644_v57  ;;  %2580 = vmatpush.msra.mxu3 %v8645_v46  ;;  %v8702_v57 = vld [vmem:[#allocation146_spill] sm:$0xff]  ;;  %v8703_v46 = vld [vmem:[#allocation147_spill] sm:$0xff] }
 0x35e   :  { %2521 = vmatpush.msra.mxu0 %v8646_v56  ;;  %2541 = vmatpush.msra.mxu1 %v8647_v50  ;;  %v8704_v56 = vld [vmem:[#allocation148_spill] sm:$0xff]  ;;  %v8705_v50 = vld [vmem:[#allocation149_spill] sm:$0xff] }
 0x35f   :  { %2561 = vmatpush.msra.mxu2 %v8648_v48  ;;  %2581 = vmatpush.msra.mxu3 %v8649_v44  ;;  %v8706_v48 = vld [vmem:[#allocation150_spill] sm:$0xff]  ;;  %v8707_v44 = vld [vmem:[#allocation151_spill] sm:$0xff] }
 0x360   :  { %2522 = vmatpush.msra.mxu0 %v8650_v20  ;;  %2542 = vmatpush.msra.mxu1 %v8651_v42  ;;  %v8708_v20 = vld [vmem:[#allocation152_spill] sm:$0xff]  ;;  %v8709_v42 = vld [vmem:[#allocation153_spill] sm:$0xff] }
 0x361   :  { %2562 = vmatpush.msra.mxu2 %v8652_v27  ;;  %2582 = vmatpush.msra.mxu3 %v8653_v23  ;;  %v8710_v27 = vld [vmem:[#allocation154_spill] sm:$0xff]  ;;  %v8711_v23 = vld [vmem:[#allocation155_spill] sm:$0xff] }
 0x362   :  { %2523 = vmatpush.msra.mxu0 %v8654_v35  ;;  %2543 = vmatpush.msra.mxu1 %v8655_v31  ;;  %v8712_v35 = vld [vmem:[#allocation156_spill] sm:$0xff]  ;;  %v8713_v31 = vld [vmem:[#allocation157_spill] sm:$0xff] }
 0x363   :  { %2563 = vmatpush.msra.mxu2 %v8656_v62  ;;  %2583 = vmatpush.msra.mxu3 %v8657_v51  ;;  %v8714_v62 = vld [vmem:[#allocation158_spill] sm:$0xff]  ;;  %v8715_v51 = vld [vmem:[#allocation159_spill] sm:$0xff] }
 0x364   :  { %2524 = vmatpush.msra.mxu0 %v8658_v5  ;;  %2544 = vmatpush.msra.mxu1 %v8659_v28  ;;  %v8716_v5 = vld [vmem:[#allocation160_spill] sm:$0xff]  ;;  %v8717_v28 = vld [vmem:[#allocation161_spill] sm:$0xff] }
 0x365   :  { %2564 = vmatpush.msra.mxu2 %v8660_v4  ;;  %2584 = vmatpush.msra.mxu3 %v8661_v8  ;;  %v8718_v4 = vld [vmem:[#allocation162_spill] sm:$0xff]  ;;  %v8719_v8 = vld [vmem:[#allocation163_spill] sm:$0xff] }
 0x366   :  { %2525 = vmatpush.msra.mxu0 %v8662_v19  ;;  %2545 = vmatpush.msra.mxu1 %v8663_v47  ;;  %v8720_v19 = vld [vmem:[#allocation164_spill] sm:$0xff]  ;;  %v8721_v47 = vld [vmem:[#allocation165_spill] sm:$0xff] }
 0x367   :  { %2565 = vmatpush.msra.mxu2 %v8664_v3  ;;  %2585 = vmatpush.msra.mxu3 %v8665_v13  ;;  %v8722_v3 = vld [vmem:[#allocation166_spill] sm:$0xff]  ;;  %v8723_v13 = vld [vmem:[#allocation167_spill] sm:$0xff] }
 0x368   :  { %2526 = vmatpush.msra.mxu0 %v8666_v12  ;;  %2546 = vmatpush.msra.mxu1 %v8667_v2  ;;  %v8724_v12 = vld [vmem:[#allocation168_spill] sm:$0xff]  ;;  %v8725_v2 = vld [vmem:[#allocation169_spill] sm:$0xff] }
 0x369   :  { %2566 = vmatpush.msra.mxu2 %v8668_v54  ;;  %2586 = vmatpush.msra.mxu3 %v8669_v18  ;;  %v8726_v54 = vld [vmem:[#allocation170_spill] sm:$0xff]  ;;  %v8727_v18 = vld [vmem:[#allocation171_spill] sm:$0xff] }
 0x36a   :  { %2658 = vmatpush.msrb.mxu0 %v8670_v40  ;;  %2678 = vmatpush.msrb.mxu1 %v8671_v43  ;;  %v8728_v40 = vld [vmem:[#allocation172_spill] sm:$0xff]  ;;  %v8729_v43 = vld [vmem:[#allocation173_spill] sm:$0xff] }
 0x36b   :  { %2698 = vmatpush.msrb.mxu2 %v8672_v7  ;;  %2718 = vmatpush.msrb.mxu3 %v8673_v38  ;;  %v8730_v7 = vld [vmem:[#allocation174_spill] sm:$0xff]  ;;  %v8731_v38 = vld [vmem:[#allocation175_spill] sm:$0xff] }
 0x36c   :  { %2659 = vmatpush.msrb.mxu0 %v8674_v59  ;;  %2679 = vmatpush.msrb.mxu1 %v8675_v63  ;;  %v8732_v59 = vld [vmem:[#allocation176_spill] sm:$0xff]  ;;  %v8733_v63 = vld [vmem:[#allocation177_spill] sm:$0xff] }
 0x36d   :  { %2699 = vmatpush.msrb.mxu2 %v8676_v16  ;;  %2719 = vmatpush.msrb.mxu3 %v8677_v53 }
 0x36e   :  { %2660 = vmatpush.msrb.mxu0 %v8678_v9  ;;  %2680 = vmatpush.msrb.mxu1 %v8679_v39  ;;  %v8734_v9 = vld [vmem:[#allocation108_spill] sm:$0xff] }
 0x36f   :  { %2700 = vmatpush.msrb.mxu2 %v8680_v10  ;;  %2720 = vmatpush.msrb.mxu3 %v8681_v61  ;;  %v8735_v10 = vld [vmem:[#allocation109_spill] sm:$0xff] }
 0x370   :  { %2661 = vmatpush.msrb.mxu0 %v8682_v60  ;;  %2681 = vmatpush.msrb.mxu1 %v8683_v22 }
 0x371   :  { %2701 = vmatpush.msrb.mxu2 %v8684_v21  ;;  %2721 = vmatpush.msrb.mxu3 %v8685_v45  ;;  %v8736_v45 = vld [vmem:[#allocation27_spill] sm:$0xff] }
 0x372   :  { %2662 = vmatpush.msrb.mxu0 %v8686_v52  ;;  %2682 = vmatpush.msrb.mxu1 %v8687_v6 }
 0x373   :  { %2702 = vmatpush.msrb.mxu2 %v8688_v11  ;;  %2722 = vmatpush.msrb.mxu3 %v8689_v0 }
 0x374   :  { %2663 = vmatpush.msrb.mxu0 %v8690_v32  ;;  %2683 = vmatpush.msrb.mxu1 %v8691_v14 }
 0x375   :  { %2703 = vmatpush.msrb.mxu2 %v8692_v26  ;;  %2723 = vmatpush.msrb.mxu3 %v8693_v41 }
 0x376   :  { %2664 = vmatpush.msrb.mxu0 %v8694_v55  ;;  %2684 = vmatpush.msrb.mxu1 %v8695_v17 }
 0x377   :  { %2704 = vmatpush.msrb.mxu2 %v8696_v29  ;;  %2724 = vmatpush.msrb.mxu3 %v8697_v58  ;;  %v8737_v29 = vld [vmem:[#allocation26_spill] sm:$0xff] }
 0x378   :  { %2665 = vmatpush.msrb.mxu0 %v8698_v1  ;;  %2685 = vmatpush.msrb.mxu1 %v8699_v24  ;;  %v8738_v24 = vld [vmem:[#allocation52_spill] sm:$0xff] }
 0x379   :  { %2705 = vmatpush.msrb.mxu2 %v8700_v49  ;;  %2725 = vmatpush.msrb.mxu3 %v8701_v34  ;;  %v8739_v34 = vld [vmem:[#allocation53_spill] sm:$0xff] }
 0x37a   :  { %2666 = vmatpush.msrb.mxu0 %v8702_v57  ;;  %2686 = vmatpush.msrb.mxu1 %v8703_v46 }
 0x37b   :  { %2706 = vmatpush.msrb.mxu2 %v8704_v56  ;;  %2726 = vmatpush.msrb.mxu3 %v8705_v50 }
 0x37c   :  { %2667 = vmatpush.msrb.mxu0 %v8706_v48  ;;  %2687 = vmatpush.msrb.mxu1 %v8707_v44 }
 0x37d   :  { %2707 = vmatpush.msrb.mxu2 %v8708_v20  ;;  %2727 = vmatpush.msrb.mxu3 %v8709_v42 }
 0x37e   :  { %2668 = vmatpush.msrb.mxu0 %v8710_v27  ;;  %2688 = vmatpush.msrb.mxu1 %v8711_v23 }
 0x37f   :  { %2708 = vmatpush.msrb.mxu2 %v8712_v35  ;;  %2728 = vmatpush.msrb.mxu3 %v8713_v31 }
 0x380   :  { %2669 = vmatpush.msrb.mxu0 %v8714_v62  ;;  %2689 = vmatpush.msrb.mxu1 %v8715_v51 }
 0x381   :  { %2709 = vmatpush.msrb.mxu2 %v8716_v5  ;;  %2729 = vmatpush.msrb.mxu3 %v8717_v28 }
 0x382   :  { %2670 = vmatpush.msrb.mxu0 %v8718_v4  ;;  %2690 = vmatpush.msrb.mxu1 %v8719_v8  ;;  %v8740_v4 = vld [vmem:[#allocation55_spill] sm:$0xff] }
 0x383   :  { %2710 = vmatpush.msrb.mxu2 %v8720_v19  ;;  %2730 = vmatpush.msrb.mxu3 %v8721_v47 }
 0x384   :  { %2671 = vmatpush.msrb.mxu0 %v8722_v3  ;;  %2691 = vmatpush.msrb.mxu1 %v8723_v13 }
 0x385   :  { %2711 = vmatpush.msrb.mxu2 %v8724_v12  ;;  %2731 = vmatpush.msrb.mxu3 %v8725_v2 }
 0x386   :  { %2672 = vmatpush.msrb.mxu0 %v8726_v54  ;;  %2692 = vmatpush.msrb.mxu1 %v8727_v18 }
 0x387   :  { %2712 = vmatpush.msrb.mxu2 %v8728_v40  ;;  %2732 = vmatpush.msrb.mxu3 %v8729_v43 }
 0x388   :  { %2673 = vmatpush.msrb.mxu0 %v8730_v7  ;;  %2693 = vmatpush.msrb.mxu1 %v8731_v38 }
 0x389   :  { %2713 = vmatpush.msrb.mxu2 %v8732_v59  ;;  %2733 = vmatpush.msrb.mxu3 %v8733_v63 }
 0x3c3   :  { %v2188_v16 = vpop.f32.mrf.mxu0  ;;  %v2208_v53 = vpop.f32.mrf.mxu1 }
 0x3c4   :  { %v2251_v39 = vadd.f32 %v2188_v16, %v8734_v9  ;;  %v2252_v61 = vadd.f32 %v2208_v53, %v8735_v10 }
 0x3c6   :  { %v3734_v60 = vmul.f32 -1.442695, %v2251_v39  ;;  %v3733_v22 = vmul.f32 -1.442695, %v2252_v61 }
 0x3c8   :  { %3914 = vpow2.f32 %v3734_v60 }
 0x3c9   :  { %3916 = vpow2.f32 %v3733_v22 }
 0x3ca   :  { %v2248_v21 = vpop.f32.mrf.mxu3  ;;  %v2228_v26 = vpop.f32.mrf.mxu2 }
 0x3cb   :  { %v2254_v52 = vadd.f32 %v2248_v21, %v8736_v45  ;;  %v2253_v58 = vadd.f32 %v2228_v26, %v8737_v29  ;;  %v2470_v26 = vpop.permute.xlu1 %2469 }
 0x3cc   :  { %vm2471_vm6 = vcmp.eq.s32.totalorder %v2470_v26, 1 }
 0x3cd   :  { %v3735_v6 = vmul.f32 -1.442695, %v2254_v52 }
 0x3ce   :  { %v3915_v11 = vpop.eup %3914 }
 0x3cf   :  { %v3917_v0 = vpop.eup %3916  ;;  %v2278_v32 = vadd.f32 1.0, %v3915_v11  ;;  %3918 = vpow2.f32 %v3735_v6 }
 0x3d0   :  { %v2258_v14 = vadd.f32 1.0, %v3917_v0  ;;  %v8741_v0 = vld [vmem:[#allocation54_spill] sm:$0xff] }
 0x3d1   :  { %3920 = vrcp.f32 %v2278_v32  ;;  %v2288_v35 = vand.u32 2147483647, %v2278_v32  ;;  %v2290_v31 = vand.u32 2147483648, %v2278_v32  ;;  %vm2284_vm10 = vweird.f32 %v2278_v32 }
 0x3d2   :  { %3922 = vrcp.f32 %v2258_v14  ;;  %v2270_v23 = vand.u32 2147483648, %v2258_v14  ;;  %v2268_v62 = vand.u32 2147483647, %v2258_v14  ;;  %vm2264_vm11 = vweird.f32 %v2258_v14 }
 0x3d3   :  { %v2291_v13 = vor.u32 1.1754944e-38, %v2290_v31  ;;  %vm2289_vm1 = vcmp.eq.f32.partialorder %v2288_v35, 8.507059e+37 }
 0x3d4   :  { %v2271_v54 = vor.u32 1.1754944e-38, %v2270_v23  ;;  %vm2269_vm13 = vcmp.eq.f32.partialorder %v2268_v62, 8.507059e+37  ;;  %v6949_v62 = vld [vmem:[#allocation4 + $0x1e0] sm:$0xff] }
 0x3d5   :  { %v3919_v41 = vpop.eup %3918  ;;  %v2335_v55 = vpop.f32.mrf.mxu0 }
 0x3d6   :  { %v2355_v17 = vpop.f32.mrf.mxu1  ;;  %v6908_v1 = vadd.f32 1.0, %v3919_v41  ;;  %v2398_v49 = vadd.f32 %v2335_v55, %v8738_v24 }
 0x3d7   :  { %v2399_v57 = vadd.f32 %v2355_v17, %v8739_v34  ;;  %v3921_v46 = vpop.eup %3920 }
 0x3d8   :  { %v3923_v56 = vpop.eup %3922  ;;  %v2280_v50 = vmul.f32 %v3921_v46, %v2278_v32  ;;  %3924 = vrcp.f32 %v6908_v1  ;;  %v3737_v20 = vmul.f32 -1.442695, %v2398_v49  ;;  %vm2285_vm8 = vweird.f32 %v3921_v46 }
 0x3d9   :  { %v2260_v48 = vmul.f32 %v3923_v56, %v2258_v14  ;;  %3926 = vtanh.f32 %v2253_v58  ;;  %v3736_v42 = vmul.f32 -1.442695, %v2399_v57  ;;  %vm2265_vm9 = vweird.f32 %v3923_v56  ;;  %vm2286_vm12 = vmor %vm2284_vm10, %vm2285_vm8  ;;  %v2487_v14 = vpop.permute.xlu0 %2486 }
 0x3da   :  { %v2281_v44 = vsub.f32 1.0, %v2280_v50  ;;  %3928 = vpow2.f32 %v3737_v20  ;;  %vm2266_vm14 = vmor %vm2264_vm11, %vm2265_vm9  ;;  %v2312_v21 = vand.u32 2147483648, %v6908_v1  ;;  %vm2306_vm0 = vweird.f32 %v6908_v1 }
 0x3db   :  { %v2261_v27 = vsub.f32 1.0, %v2260_v48  ;;  %3930 = vpow2.f32 %v3736_v42  ;;  %vm2488_vm5 = vcmp.eq.s32.totalorder %v2487_v14, 1  ;;  %v7029_v14 = vld [vmem:[#allocation4 + $0x178] sm:$0xff] }
 0x3dc   :  { %v2282_v51 = vmul.f32 %v3921_v46, %v2281_v44  ;;  %v2395_v5 = vpop.f32.mrf.mxu3  ;;  %v2375_v45 = vpop.f32.mrf.mxu2  ;;  %v2313_v55 = vor.u32 1.1754944e-38, %v2312_v21 }
 0x3dd   :  { %v2262_v28 = vmul.f32 %v3923_v56, %v2261_v27  ;;  %v2401_v8 = vadd.f32 %v2395_v5, %v8740_v4  ;;  %v2400_v32 = vadd.f32 %v2375_v45, %v8741_v0  ;;  %v6961_v4 = vld [vmem:[#allocation4 + $0x1f0] sm:$0xff] }
 0x3de   :  { %v3925_v19 = vpop.eup %3924  ;;  %v2283_v47 = vadd.f32 %v3921_v46, %v2282_v51  ;;  %v6952_v51 = vld [vmem:[#allocation4 + $0x1e8] sm:$0xff]  ;;  %v7010_v45 = vld [vmem:[#allocation4 + $0x190] sm:$0xff] }
 0x3df   :  { %v2263_v3 = vadd.f32 %v3923_v56, %v2262_v28  ;;  %v2302_v12 = vmul.f32 %v3925_v19, %v6908_v1  ;;  %v3927_v2 = vpop.eup %3926  ;;  %v3738_v40 = vmul.f32 -1.442695, %v2401_v8  ;;  %vm2307_vm15 = vweird.f32 %v3925_v19  ;;  %v6964_v8 = vld [vmem:[#allocation4 + $0x1f8] sm:$0xff]  ;;  %v7085_v5 = vld [vmem:[#allocation4 + $0xf0] sm:$0xff] }
 0x3e0   :  { %v2287_v18 = vsel %vm2286_vm12, %v3921_v46, %v2283_v47  ;;  %v3929_v59 = vpop.eup %3928  ;;  %vm2308_vm3 = vmor %vm2306_vm0, %vm2307_vm15  ;;  %8750 = vst [vmem:[#allocation180_spill] sm:$0xff] %v7085_v5 }
 0x3e1   :  { %v2267_v43 = vsel %vm2266_vm14, %v3923_v56, %v2263_v3  ;;  %v2292_v7 = vsel %vm2289_vm1, %v2291_v13, %v2287_v18  ;;  %v2303_v38 = vsub.f32 1.0, %v2302_v12  ;;  %3932 = vpow2.f32 %v3738_v40  ;;  %v3931_v53 = vpop.eup %3930 }
 0x3e2   :  { %v2272_v63 = vsel %vm2269_vm13, %v2271_v54, %v2267_v43  ;;  %v2295_v16 = vmul.f32 %v3927_v2, %v2292_v7  ;;  %v6916_v10 = vadd.f32 1.0, %v3929_v59  ;;  %v6918_v61 = vadd.f32 1.0, %v3931_v53  ;;  %v6974_v2 = vld [vmem:[#allocation4 + $0x1c0] sm:$0xff]  ;;  %v6977_v54 = vld [vmem:[#allocation4 + $0x1c8] sm:$0xff]  ;;  %v6982_v43 = vld [vmem:[#allocation4 + $0x1d0] sm:$0xff] }
 0x3e3   :  { %v2274_v9 = vmul.f32 %v2272_v63, %v6716_v15  ;;  %v2304_v39 = vmul.f32 %v3925_v19, %v2303_v38  ;;  %v2310_v15 = vand.u32 2147483647, %v6908_v1  ;;  %v6985_v7 = vld [vmem:[#allocation4 + $0x1d8] sm:$0xff]  ;;  %v6992_v53 = vld [vmem:[#allocation4 + $0x1a8] sm:$0xff] }
 0x3e4   :  { %3934 = vrcp.f32 %v6916_v10  ;;  %v2417_v46 = vand.u32 2147483648, %v6918_v61  ;;  %v2435_v56 = vand.u32 2147483647, %v6916_v10  ;;  %v2437_v50 = vand.u32 2147483648, %v6916_v10 }
 0x3e5   :  { %v6920_v60 = vadd.f32 %v2295_v16, %v2274_v9  ;;  %v2305_v22 = vadd.f32 %v3925_v19, %v2304_v39  ;;  %3936 = vrcp.f32 %v6918_v61  ;;  %vm2311_vm4 = vcmp.eq.f32.partialorder %v2310_v15, 8.507059e+37  ;;  %v6989_v16 = vld [vmem:[#allocation4 + $0x1a0] sm:$0xff]  ;;  %v6996_v39 = vld [vmem:[#allocation4 + $0x1b0] sm:$0xff] }
 0x3e6   :  { %v2415_v23 = vand.u32 2147483647, %v6918_v61  ;;  %vm2431_vm9 = vweird.f32 %v6916_v10  ;;  %vm2411_vm10 = vweird.f32 %v6918_v61  ;;  %v2438_v28 = vor.u32 1.1754944e-38, %v2437_v50  ;;  %v7018_v15 = vld [vmem:[#allocation4 + $0x160] sm:$0xff] }
 0x3e7   :  { %3938 = vtanh.f32 %v6920_v60  ;;  %v3933_v52 = vpop.eup %3932  ;;  %v2309_v11 = vsel %vm2308_vm3, %v3925_v19, %v2305_v22  ;;  %v2418_v3 = vor.u32 1.1754944e-38, %v2417_v46  ;;  %vm2436_vm14 = vcmp.eq.f32.partialorder %v2435_v56, 8.507059e+37  ;;  %v7005_v22 = vld [vmem:[#allocation4 + $0x188] sm:$0xff]  ;;  %v7061_v46 = vld [vmem:[#allocation4 + $0x130] sm:$0xff]  ;;  %v7064_v56 = vld [vmem:[#allocation4 + $0x138] sm:$0xff] }
 0x3e8   :  { %v6928_v6 = vadd.f32 1.0, %v3933_v52  ;;  %v2314_v24 = vsel %vm2311_vm4, %v2313_v55, %v2309_v11  ;;  %vm2416_vm1 = vcmp.eq.f32.partialorder %v2415_v23, 8.507059e+37  ;;  %v7021_v11 = vld [vmem:[#allocation4 + $0x168] sm:$0xff]  ;;  %v7067_v50 = vld [vmem:[#allocation4 + $0x100] sm:$0xff]  ;;  %v7076_v23 = vld [vmem:[#allocation4 + $0x118] sm:$0xff] }
 0x3e9   :  { %v7037_v55 = vld [vmem:[#allocation4 + $0x148] sm:$0xff] }
 0x3ea   :  { %v3935_v41 = vpop.eup %3934  ;;  %3940 = vrcp.f32 %v6928_v6  ;;  %v2459_v0 = vand.u32 2147483648, %v6928_v6  ;;  %vm2453_vm15 = vweird.f32 %v6928_v6  ;;  %v2457_v26 = vand.u32 2147483647, %v6928_v6 }
 0x3eb   :  { %v3937_v17 = vpop.eup %3936  ;;  %v2427_v29 = vmul.f32 %v3935_v41, %v6916_v10  ;;  %3942 = vtanh.f32 %v2400_v32  ;;  %vm2432_vm7 = vweird.f32 %v3935_v41  ;;  %v6999_v10 = vld [vmem:[#allocation4 + $0x1b8] sm:$0xff]  ;;  %v7026_v32 = vld [vmem:[#allocation4 + $0x170] sm:$0xff] }
 0x3ec   :  { %v2407_v1 = vmul.f32 %v3937_v17, %v6918_v61  ;;  %vm2412_vm8 = vweird.f32 %v3937_v17  ;;  %vm6957_vm11 = vmor %vm2431_vm9, %vm2432_vm7  ;;  %v7002_v61 = vld [vmem:[#allocation4 + $0x180] sm:$0xff]  ;;  %vm2458_vm3 = vcmp.eq.f32.partialorder %v2457_v26, 8.507059e+37 }
 0x3ed   :  { %v3939_v58 = vpop.eup %3938  ;;  %v2428_v34 = vsub.f32 1.0, %v2427_v29  ;;  %vm6968_vm12 = vmor %vm2411_vm10, %vm2412_vm8  ;;  %v7046_v29 = vld [vmem:[#allocation4 + $0x150] sm:$0xff]  ;;  %v7133_v26 = vld [vmem:[#allocation4 + $0x60] sm:$0xff] }
 0x3ee   :  { %v2317_v49 = vmul.f32 %v3939_v58, %v2314_v24  ;;  %v2408_v57 = vsub.f32 1.0, %v2407_v1  ;;  %v7049_v58 = vld [vmem:[#allocation4 + $0x158] sm:$0xff]  ;;  %v2479_v24 = vpop.permute.xlu2 %2478  ;;  %v2494_v1 = vpop.permute.xlu1 %2493  ;;  %8766 = vst [vmem:[#allocation66_spill] sm:$0xff] %v7133_v26 }
 0x3ef   :  { %v2429_v48 = vmul.f32 %v3935_v41, %v2428_v34  ;;  %v7058_v34 = vld [vmem:[#allocation4 + $0x128] sm:$0xff]  ;;  %vm2480_vm4 = vcmp.eq.s32.totalorder %v2479_v24, 1  ;;  %v7142_v24 = vld [vmem:[#allocation4 + $0x78] sm:$0xff] }
 0x3f0   :  { %v6938_v44 = vsel %vm2488_vm5, %v2317_v49, %v6738_v36  ;;  %v2472_v20 = vsel %vm2471_vm6, %v2317_v49, 0.0  ;;  %2527 = vmatmul.f32.vlgmr.msra.gmra.mxu0 %v2317_v49  ;;  %2547 = vmatmul.f32.vlgmr.msra.gmra.mxu1 %v2317_v49  ;;  %v6940_v42 = vpop.eup %3940  ;;  %v2409_v27 = vmul.f32 %v3937_v17, %v2408_v57  ;;  %v2460_v57 = vor.u32 1.1754944e-38, %v2459_v0  ;;  %v7130_v0 = vld [vmem:[#allocation4 + $0x98] sm:$0xff]  ;;  %8769 = vst [vmem:[#allocation65_spill] sm:$0xff] %v7142_v24 }
 0x3f1   :  { %v6944_v35 = vadd.f32 %v2472_v20, %v6748_v37  ;;  %2567 = vmatmul.f32.vlgmr.msra.gmra.mxu2 %v2317_v49  ;;  %2587 = vmatmul.f32.vlgmr.msra.gmra.mxu3 %v2317_v49  ;;  %v2430_v31 = vadd.f32 %v3935_v41, %v2429_v48  ;;  %v2449_v36 = vmul.f32 %v6940_v42, %v6928_v6  ;;  %v3943_v19 = vpop.eup %3942  ;;  %vm2454_vm13 = vweird.f32 %v6940_v42  ;;  %v7055_v49 = vld [vmem:[#allocation4 + $0x120] sm:$0xff]  ;;  %v7070_v48 = vld [vmem:[#allocation4 + $0x108] sm:$0xff] }
 0x3f2   :  { %2851 = vmatpush.msra.mxu0 %v6949_v62  ;;  %2871 = vmatpush.msra.mxu1 %v6952_v51  ;;  %v2410_v37 = vadd.f32 %v3937_v17, %v2409_v27  ;;  %vm7042_vm0 = vmor %vm2453_vm15, %vm2454_vm13  ;;  %vm2495_vm5 = vcmp.eq.s32.totalorder %v2494_v1, 1  ;;  %v7073_v27 = vld [vmem:[#allocation4 + $0x110] sm:$0xff]  ;;  %8765 = vst [vmem:[#allocation104_spill] sm:$0xff] %v7130_v0  ;;  %v7145_v1 = vld [vmem:[#allocation4 + $0x40] sm:$0xff] }
 0x3f3   :  { %2891 = vmatpush.msra.mxu2 %v6961_v4  ;;  %2911 = vmatpush.msra.mxu3 %v6964_v8  ;;  %v2434_v13 = vsel %vm6957_vm11, %v3935_v41, %v2430_v31  ;;  %v2450_v12 = vsub.f32 1.0, %v2449_v36  ;;  %v7034_v41 = vld [vmem:[#allocation4 + $0x140] sm:$0xff]  ;;  %8770 = vst [vmem:[#allocation64_spill] sm:$0xff] %v7145_v1 }
 0x3f4   :  { %2852 = vmatpush.msra.mxu0 %v6974_v2  ;;  %2872 = vmatpush.msra.mxu1 %v6977_v54  ;;  %v2414_v18 = vsel %vm6968_vm12, %v3937_v17, %v2410_v37  ;;  %v2439_v40 = vsel %vm2436_vm14, %v2438_v28, %v2434_v13  ;;  %v7079_v36 = vld [vmem:[#allocation4 + $0xe0] sm:$0xff]  ;;  %v7082_v37 = vld [vmem:[#allocation4 + $0xe8] sm:$0xff]  ;;  %v7088_v28 = vld [vmem:[#allocation4 + $0xf8] sm:$0xff] }
 0x3f5   :  { %2892 = vmatpush.msra.mxu2 %v6982_v43  ;;  %2912 = vmatpush.msra.mxu3 %v6985_v7  ;;  %v2419_v38 = vsel %vm2416_vm1, %v2418_v3, %v2414_v18  ;;  %v2442_v59 = vmul.f32 %v3943_v19, %v2439_v40  ;;  %v2451_v63 = vmul.f32 %v6940_v42, %v2450_v12  ;;  %v7097_v13 = vld [vmem:[#allocation4 + $0xc0] sm:$0xff]  ;;  %v7100_v12 = vld [vmem:[#allocation4 + $0xc8] sm:$0xff]  ;;  %v7103_v18 = vld [vmem:[#allocation4 + $0xd0] sm:$0xff] }
 0x3f6   :  { %2853 = vmatpush.msra.mxu0 %v6989_v16  ;;  %2873 = vmatpush.msra.mxu1 %v6992_v53  ;;  %v2421_v9 = vmul.f32 %v2419_v38, %v6765_v30  ;;  %v7013_v30 = vld [vmem:[#allocation4 + $0x198] sm:$0xff]  ;;  %8748 = vst [vmem:[#allocation178_spill] sm:$0xff] %v7079_v36  ;;  %v7112_v40 = vld [vmem:[#allocation4 + $0xa8] sm:$0xff]  ;;  %v7115_v38 = vld [vmem:[#allocation4 + $0xb0] sm:$0xff] }
 0x3f7   :  { %2893 = vmatpush.msra.mxu2 %v6996_v39  ;;  %2913 = vmatpush.msra.mxu3 %v6999_v10  ;;  %v2452_v52 = vadd.f32 %v6940_v42, %v2451_v63  ;;  %8749 = vst [vmem:[#allocation179_spill] sm:$0xff] %v7082_v37  ;;  %v7121_v63 = vld [vmem:[#allocation4 + $0x80] sm:$0xff]  ;;  %v7136_v17 = vld [vmem:[#allocation4 + $0x68] sm:$0xff] }
 0x3f8   :  { %2854 = vmatpush.msra.mxu0 %v7002_v61  ;;  %2874 = vmatpush.msra.mxu1 %v7005_v22  ;;  %v7008_v21 = vadd.f32 %v2442_v59, %v2421_v9  ;;  %8751 = vst [vmem:[#allocation181_spill] sm:$0xff] %v7088_v28  ;;  %v7118_v59 = vld [vmem:[#allocation4 + $0xb8] sm:$0xff]  ;;  %v7124_v9 = vld [vmem:[#allocation4 + $0x88] sm:$0xff] }
 0x3f9   :  { %2894 = vmatpush.msra.mxu2 %v7010_v45  ;;  %2914 = vmatpush.msra.mxu3 %v7013_v30  ;;  %v2456_v6 = vsel %vm7042_vm0, %v6940_v42, %v2452_v52  ;;  %8754 = vst [vmem:[#allocation98_spill] sm:$0xff] %v7097_v13  ;;  %v7127_v52 = vld [vmem:[#allocation4 + $0x90] sm:$0xff] }
 0x3fa   :  { %2855 = vmatpush.msra.mxu0 %v7018_v15  ;;  %2875 = vmatpush.msra.mxu1 %v7021_v11  ;;  %3944 = vtanh.f32 %v7008_v21  ;;  %v2461_v42 = vsel %vm2458_vm3, %v2460_v57, %v2456_v6  ;;  %8755 = vst [vmem:[#allocation101_spill] sm:$0xff] %v7100_v12  ;;  %v7139_v6 = vld [vmem:[#allocation4 + $0x70] sm:$0xff]  ;;  %v7148_v57 = vld [vmem:[#allocation4 + $0x48] sm:$0xff] }
 0x3fb   :  { %2895 = vmatpush.msra.mxu2 %v7026_v32  ;;  %2915 = vmatpush.msra.mxu3 %v7029_v14  ;;  %8756 = vst [vmem:[#allocation60_spill] sm:$0xff] %v7103_v18 }
 0x3fc   :  { %2856 = vmatpush.msra.mxu0 %v7034_v41  ;;  %2876 = vmatpush.msra.mxu1 %v7037_v55  ;;  %8759 = vst [vmem:[#allocation63_spill] sm:$0xff] %v7112_v40 }
 0x3fd   :  { %2896 = vmatpush.msra.mxu2 %v7046_v29  ;;  %2916 = vmatpush.msra.mxu3 %v7049_v58  ;;  %8760 = vst [vmem:[#allocation62_spill] sm:$0xff] %v7115_v38 }
 0x3fe   :  { %2857 = vmatpush.msra.mxu0 %v7055_v49  ;;  %2877 = vmatpush.msra.mxu1 %v7058_v34  ;;  %8761 = vst [vmem:[#allocation185_spill] sm:$0xff] %v7118_v59 }
 0x3ff   :  { %2897 = vmatpush.msra.mxu2 %v7061_v46  ;;  %2917 = vmatpush.msra.mxu3 %v7064_v56  ;;  %8762 = vst [vmem:[#allocation184_spill] sm:$0xff] %v7121_v63 }
 0x400   :  { %2858 = vmatpush.msra.mxu0 %v7067_v50  ;;  %2878 = vmatpush.msra.mxu1 %v7070_v48  ;;  %v3945_v20 = vpop.eup %3944  ;;  %8763 = vst [vmem:[#allocation67_spill] sm:$0xff] %v7124_v9 }
 0x401   :  { %2898 = vmatpush.msra.mxu2 %v7073_v27  ;;  %2918 = vmatpush.msra.mxu3 %v7076_v23  ;;  %v2464_v31 = vmul.f32 %v3945_v20, %v2461_v42  ;;  %8764 = vst [vmem:[#allocation183_spill] sm:$0xff] %v7127_v52  ;;  %v7151_v20 = vld [vmem:[#allocation4 + $0x50] sm:$0xff]  ;;  %v7154_v42 = vld [vmem:[#allocation4 + $0x58] sm:$0xff] }
 0x402   :  { %2859 = vmatpush.msra.mxu0 %v7079_v36  ;;  %2879 = vmatpush.msra.mxu1 %v7082_v37  ;;  %8767 = vst [vmem:[#allocation110_spill] sm:$0xff] %v7136_v17 }
 0x403   :  { %2899 = vmatpush.msra.mxu2 %v7085_v5  ;;  %2919 = vmatpush.msra.mxu3 %v7088_v28  ;;  %v2481_v19 = vsel %vm2480_vm4, %v2464_v31, 0.0  ;;  %v7092_v47 = vsel %vm2495_vm5, %v2464_v31, %v6803_v33  ;;  %v7106_v33 = vld [vmem:[#allocation4 + $0xd8] sm:$0xff]  ;;  %8768 = vst [vmem:[#allocation111_spill] sm:$0xff] %v7139_v6 }
 0x404   :  { %8752 = vst [vmem:[#allocation182_spill] sm:$0xff] %v7092_v47  ;;  %2674 = vmatmul.f32.vlgmr.msrb.gmra.mxu0 %v2464_v31  ;;  %2694 = vmatmul.f32.vlgmr.msrb.gmra.mxu1 %v2464_v31  ;;  %v7095_v3 = vadd.f32 %v2481_v19, %v6806_v25  ;;  %v7109_v25 = vld [vmem:[#allocation4 + $0xa0] sm:$0xff]  ;;  %v7160_v19 = vld [vmem:[#allocation4 + $0x28] sm:$0xff] }
 0x405   :  { %2714 = vmatmul.f32.vlgmr.msrb.gmra.mxu2 %v2464_v31  ;;  %2734 = vmatmul.f32.vlgmr.msrb.gmra.mxu3 %v2464_v31  ;;  %8757 = vst [vmem:[#allocation61_spill] sm:$0xff] %v7106_v33  ;;  %v7157_v31 = vld [vmem:[#allocation4 + $0x20] sm:$0xff] }
 0x406   :  { %8753 = vst [vmem:[#allocation97_spill] sm:$0xff] %v7095_v3  ;;  %2860 = vmatpush.msra.mxu0 %v7097_v13  ;;  %2880 = vmatpush.msra.mxu1 %v7100_v12 }
 0x407   :  { %2900 = vmatpush.msra.mxu2 %v7103_v18  ;;  %2920 = vmatpush.msra.mxu3 %v7106_v33  ;;  %8758 = vst [vmem:[#allocation100_spill] sm:$0xff] %v7109_v25 }
 0x408   :  { %2861 = vmatpush.msra.mxu0 %v7109_v25  ;;  %2881 = vmatpush.msra.mxu1 %v7112_v40  ;;  %8771 = vst [vmem:[#allocation105_spill] sm:$0xff] %v7148_v57 }
 0x409   :  { %2901 = vmatpush.msra.mxu2 %v7115_v38  ;;  %2921 = vmatpush.msra.mxu3 %v7118_v59  ;;  %8772 = vst [vmem:[#allocation102_spill] sm:$0xff] %v7151_v20 }
 0x40a   :  { %2862 = vmatpush.msra.mxu0 %v7121_v63  ;;  %2882 = vmatpush.msra.mxu1 %v7124_v9  ;;  %8773 = vst [vmem:[#allocation103_spill] sm:$0xff] %v7154_v42 }
 0x40b   :  { %2902 = vmatpush.msra.mxu2 %v7127_v52  ;;  %2922 = vmatpush.msra.mxu3 %v7130_v0  ;;  %8774 = vst [vmem:[#allocation107_spill] sm:$0xff] %v7157_v31 }
 0x40c   :  { %2863 = vmatpush.msra.mxu0 %v7133_v26  ;;  %2883 = vmatpush.msra.mxu1 %v7136_v17  ;;  %8775 = vst [vmem:[#allocation106_spill] sm:$0xff] %v7160_v19  ;;  %v8847_v17 = vld [vmem:[#allocation29_spill] sm:$0xff] }
 0x40d   :  { %2903 = vmatpush.msra.mxu2 %v7139_v6  ;;  %2923 = vmatpush.msra.mxu3 %v7142_v24  ;;  %v8846_v6 = vld [vmem:[#allocation28_spill] sm:$0xff] }
 0x40e   :  { %2864 = vmatpush.msra.mxu0 %v7145_v1  ;;  %2884 = vmatpush.msra.mxu1 %v7148_v57  ;;  %v7163_v1 = vld [vmem:[#allocation4 + $0x30] sm:$0xff]  ;;  %v7166_v57 = vld [vmem:[#allocation4 + $0x38] sm:$0xff] }
 0x40f   :  { %2904 = vmatpush.msra.mxu2 %v7151_v20  ;;  %2924 = vmatpush.msra.mxu3 %v7154_v42  ;;  %8776 = vst [vmem:[#allocation56_spill] sm:$0xff] %v7163_v1  ;;  %v7169_v20 = vld [vmem:[#allocation4] sm:$0xff]  ;;  %v7172_v42 = vld [vmem:[#allocation4 + $0x8] sm:$0xff] }
 0x410   :  { %2865 = vmatpush.msra.mxu0 %v7157_v31  ;;  %2885 = vmatpush.msra.mxu1 %v7160_v19  ;;  %8777 = vst [vmem:[#allocation57_spill] sm:$0xff] %v7166_v57  ;;  %v7175_v31 = vld [vmem:[#allocation4 + $0x10] sm:$0xff]  ;;  %v7178_v19 = vld [vmem:[#allocation4 + $0x18] sm:$0xff] }
 0x411   :  { %2905 = vmatpush.msra.mxu2 %v7163_v1  ;;  %2925 = vmatpush.msra.mxu3 %v7166_v57  ;;  %8778 = vst [vmem:[#allocation59_spill] sm:$0xff] %v7169_v20  ;;  %v7181_v1 = vld [vmem:[#allocation5 + $0x1e0] sm:$0xff]  ;;  %v7184_v57 = vld [vmem:[#allocation5 + $0x1e8] sm:$0xff] }
 0x412   :  { %2866 = vmatpush.msra.mxu0 %v7169_v20  ;;  %8779 = vst [vmem:[#allocation58_spill] sm:$0xff] %v7172_v42  ;;  %2886 = vmatpush.msra.mxu1 %v7172_v42  ;;  %v7187_v20 = vld [vmem:[#allocation5 + $0x1f0] sm:$0xff]  ;;  %v7190_v42 = vld [vmem:[#allocation5 + $0x1f8] sm:$0xff] }
 0x413   :  { %8780 = vst [vmem:[#allocation68_spill] sm:$0xff] %v7175_v31  ;;  %2906 = vmatpush.msra.mxu2 %v7175_v31  ;;  %2926 = vmatpush.msra.mxu3 %v7178_v19  ;;  %v7193_v31 = vld [vmem:[#allocation5 + $0x1c0] sm:$0xff] }
 0x414   :  { %8781 = vst [vmem:[#allocation69_spill] sm:$0xff] %v7178_v19  ;;  %2998 = vmatpush.msrb.mxu0 %v7181_v1  ;;  %3018 = vmatpush.msrb.mxu1 %v7184_v57  ;;  %v7196_v19 = vld [vmem:[#allocation5 + $0x1c8] sm:$0xff] }
 0x415   :  { %8782 = vst [vmem:[#allocation70_spill] sm:$0xff] %v7181_v1  ;;  %3038 = vmatpush.msrb.mxu2 %v7187_v20  ;;  %3058 = vmatpush.msrb.mxu3 %v7190_v42  ;;  %v7199_v1 = vld [vmem:[#allocation5 + $0x1d0] sm:$0xff] }
 0x416   :  { %8783 = vst [vmem:[#allocation71_spill] sm:$0xff] %v7184_v57  ;;  %2999 = vmatpush.msrb.mxu0 %v7193_v31  ;;  %3019 = vmatpush.msrb.mxu1 %v7196_v19  ;;  %v7202_v57 = vld [vmem:[#allocation5 + $0x1d8] sm:$0xff] }
 0x417   :  { %8784 = vst [vmem:[#allocation72_spill] sm:$0xff] %v7187_v20  ;;  %3039 = vmatpush.msrb.mxu2 %v7199_v1  ;;  %3059 = vmatpush.msrb.mxu3 %v7202_v57  ;;  %v7205_v20 = vld [vmem:[#allocation5 + $0x1a0] sm:$0xff] }
 0x418   :  { %8785 = vst [vmem:[#allocation73_spill] sm:$0xff] %v7190_v42  ;;  %3000 = vmatpush.msrb.mxu0 %v7205_v20  ;;  %v7208_v42 = vld [vmem:[#allocation5 + $0x1a8] sm:$0xff] }
 0x419   :  { %8786 = vst [vmem:[#allocation74_spill] sm:$0xff] %v7193_v31  ;;  %3020 = vmatpush.msrb.mxu1 %v7208_v42  ;;  %v7211_v31 = vld [vmem:[#allocation5 + $0x1b0] sm:$0xff] }
 0x41a   :  { %8787 = vst [vmem:[#allocation75_spill] sm:$0xff] %v7196_v19  ;;  %3040 = vmatpush.msrb.mxu2 %v7211_v31  ;;  %v7214_v19 = vld [vmem:[#allocation5 + $0x1b8] sm:$0xff] }
 0x41b   :  { %8788 = vst [vmem:[#allocation76_spill] sm:$0xff] %v7199_v1  ;;  %3060 = vmatpush.msrb.mxu3 %v7214_v19  ;;  %v7217_v1 = vld [vmem:[#allocation5 + $0x180] sm:$0xff] }
 0x41c   :  { %8789 = vst [vmem:[#allocation77_spill] sm:$0xff] %v7202_v57  ;;  %3001 = vmatpush.msrb.mxu0 %v7217_v1  ;;  %v7220_v57 = vld [vmem:[#allocation5 + $0x188] sm:$0xff] }
 0x41d   :  { %8790 = vst [vmem:[#allocation78_spill] sm:$0xff] %v7205_v20  ;;  %3021 = vmatpush.msrb.mxu1 %v7220_v57  ;;  %v7223_v20 = vld [vmem:[#allocation5 + $0x190] sm:$0xff] }
 0x41e   :  { %8791 = vst [vmem:[#allocation79_spill] sm:$0xff] %v7208_v42  ;;  %3041 = vmatpush.msrb.mxu2 %v7223_v20  ;;  %v7226_v42 = vld [vmem:[#allocation5 + $0x198] sm:$0xff] }
 0x41f   :  { %8792 = vst [vmem:[#allocation80_spill] sm:$0xff] %v7211_v31  ;;  %3061 = vmatpush.msrb.mxu3 %v7226_v42  ;;  %v7229_v31 = vld [vmem:[#allocation5 + $0x160] sm:$0xff] }
 0x420   :  { %8793 = vst [vmem:[#allocation81_spill] sm:$0xff] %v7214_v19  ;;  %3002 = vmatpush.msrb.mxu0 %v7229_v31  ;;  %v7232_v19 = vld [vmem:[#allocation5 + $0x168] sm:$0xff] }
 0x421   :  { %8794 = vst [vmem:[#allocation82_spill] sm:$0xff] %v7217_v1  ;;  %3022 = vmatpush.msrb.mxu1 %v7232_v19  ;;  %v7235_v1 = vld [vmem:[#allocation5 + $0x170] sm:$0xff] }
 0x422   :  { %8795 = vst [vmem:[#allocation83_spill] sm:$0xff] %v7220_v57  ;;  %3042 = vmatpush.msrb.mxu2 %v7235_v1  ;;  %v7238_v57 = vld [vmem:[#allocation5 + $0x178] sm:$0xff] }
 0x423   :  { %8796 = vst [vmem:[#allocation84_spill] sm:$0xff] %v7223_v20  ;;  %3062 = vmatpush.msrb.mxu3 %v7238_v57  ;;  %v7241_v20 = vld [vmem:[#allocation5 + $0x140] sm:$0xff] }
 0x424   :  { %8797 = vst [vmem:[#allocation85_spill] sm:$0xff] %v7226_v42  ;;  %3003 = vmatpush.msrb.mxu0 %v7241_v20  ;;  %v7244_v42 = vld [vmem:[#allocation5 + $0x148] sm:$0xff] }
 0x425   :  { %8798 = vst [vmem:[#allocation86_spill] sm:$0xff] %v7229_v31  ;;  %3023 = vmatpush.msrb.mxu1 %v7244_v42  ;;  %v7247_v31 = vld [vmem:[#allocation5 + $0x150] sm:$0xff] }
 0x426   :  { %8799 = vst [vmem:[#allocation87_spill] sm:$0xff] %v7232_v19  ;;  %3043 = vmatpush.msrb.mxu2 %v7247_v31  ;;  %v7250_v19 = vld [vmem:[#allocation5 + $0x158] sm:$0xff] }
 0x427   :  { %8800 = vst [vmem:[#allocation88_spill] sm:$0xff] %v7235_v1  ;;  %3063 = vmatpush.msrb.mxu3 %v7250_v19  ;;  %v7253_v1 = vld [vmem:[#allocation5 + $0x120] sm:$0xff] }
 0x428   :  { %8801 = vst [vmem:[#allocation89_spill] sm:$0xff] %v7238_v57  ;;  %3004 = vmatpush.msrb.mxu0 %v7253_v1  ;;  %v7256_v57 = vld [vmem:[#allocation5 + $0x128] sm:$0xff] }
 0x429   :  { %8802 = vst [vmem:[#allocation90_spill] sm:$0xff] %v7241_v20  ;;  %3024 = vmatpush.msrb.mxu1 %v7256_v57  ;;  %v7259_v20 = vld [vmem:[#allocation5 + $0x130] sm:$0xff] }
 0x42a   :  { %8803 = vst [vmem:[#allocation91_spill] sm:$0xff] %v7244_v42  ;;  %3044 = vmatpush.msrb.mxu2 %v7259_v20  ;;  %v7262_v42 = vld [vmem:[#allocation5 + $0x138] sm:$0xff] }
 0x42b   :  { %8804 = vst [vmem:[#allocation92_spill] sm:$0xff] %v7247_v31  ;;  %3064 = vmatpush.msrb.mxu3 %v7262_v42  ;;  %v7265_v31 = vld [vmem:[#allocation5 + $0x100] sm:$0xff] }
 0x42c   :  { %8805 = vst [vmem:[#allocation93_spill] sm:$0xff] %v7250_v19  ;;  %3005 = vmatpush.msrb.mxu0 %v7265_v31  ;;  %v7268_v19 = vld [vmem:[#allocation5 + $0x108] sm:$0xff] }
 0x42d   :  { %8806 = vst [vmem:[#allocation94_spill] sm:$0xff] %v7253_v1  ;;  %3025 = vmatpush.msrb.mxu1 %v7268_v19  ;;  %v7271_v1 = vld [vmem:[#allocation5 + $0x110] sm:$0xff] }
 0x42e   :  { %8807 = vst [vmem:[#allocation95_spill] sm:$0xff] %v7256_v57  ;;  %3045 = vmatpush.msrb.mxu2 %v7271_v1  ;;  %v7274_v57 = vld [vmem:[#allocation5 + $0x118] sm:$0xff] }
 0x42f   :  { %8808 = vst [vmem:[#allocation96_spill] sm:$0xff] %v7259_v20  ;;  %3065 = vmatpush.msrb.mxu3 %v7274_v57  ;;  %v7277_v20 = vld [vmem:[#allocation5 + $0xe0] sm:$0xff] }
 0x430   :  { %8809 = vst [vmem:[#allocation112_spill] sm:$0xff] %v7262_v42  ;;  %3006 = vmatpush.msrb.mxu0 %v7277_v20  ;;  %v7280_v42 = vld [vmem:[#allocation5 + $0xe8] sm:$0xff] }
 0x431   :  { %8810 = vst [vmem:[#allocation113_spill] sm:$0xff] %v7265_v31  ;;  %3026 = vmatpush.msrb.mxu1 %v7280_v42  ;;  %v7283_v31 = vld [vmem:[#allocation5 + $0xf0] sm:$0xff] }
 0x432   :  { %8811 = vst [vmem:[#allocation114_spill] sm:$0xff] %v7268_v19  ;;  %3046 = vmatpush.msrb.mxu2 %v7283_v31  ;;  %v7286_v19 = vld [vmem:[#allocation5 + $0xf8] sm:$0xff] }
 0x433   :  { %8812 = vst [vmem:[#allocation115_spill] sm:$0xff] %v7271_v1  ;;  %3066 = vmatpush.msrb.mxu3 %v7286_v19  ;;  %v7289_v1 = vld [vmem:[#allocation5 + $0xc0] sm:$0xff] }
 0x434   :  { %8813 = vst [vmem:[#allocation116_spill] sm:$0xff] %v7274_v57  ;;  %3007 = vmatpush.msrb.mxu0 %v7289_v1  ;;  %v7292_v57 = vld [vmem:[#allocation5 + $0xc8] sm:$0xff] }
 0x435   :  { %8814 = vst [vmem:[#allocation117_spill] sm:$0xff] %v7277_v20  ;;  %3027 = vmatpush.msrb.mxu1 %v7292_v57  ;;  %v7295_v20 = vld [vmem:[#allocation5 + $0xd0] sm:$0xff] }
 0x436   :  { %8815 = vst [vmem:[#allocation118_spill] sm:$0xff] %v7280_v42  ;;  %3047 = vmatpush.msrb.mxu2 %v7295_v20  ;;  %v7298_v42 = vld [vmem:[#allocation5 + $0xd8] sm:$0xff] }
 0x437   :  { %8816 = vst [vmem:[#allocation119_spill] sm:$0xff] %v7283_v31  ;;  %3067 = vmatpush.msrb.mxu3 %v7298_v42  ;;  %v7301_v31 = vld [vmem:[#allocation5 + $0xa0] sm:$0xff] }
 0x438   :  { %8817 = vst [vmem:[#allocation120_spill] sm:$0xff] %v7286_v19  ;;  %3008 = vmatpush.msrb.mxu0 %v7301_v31  ;;  %v7304_v19 = vld [vmem:[#allocation5 + $0xa8] sm:$0xff] }
 0x439   :  { %8818 = vst [vmem:[#allocation121_spill] sm:$0xff] %v7289_v1  ;;  %3028 = vmatpush.msrb.mxu1 %v7304_v19  ;;  %v7307_v1 = vld [vmem:[#allocation5 + $0xb0] sm:$0xff] }
 0x43a   :  { %8819 = vst [vmem:[#allocation122_spill] sm:$0xff] %v7292_v57  ;;  %3048 = vmatpush.msrb.mxu2 %v7307_v1  ;;  %v7310_v57 = vld [vmem:[#allocation5 + $0xb8] sm:$0xff] }
 0x43b   :  { %8820 = vst [vmem:[#allocation123_spill] sm:$0xff] %v7295_v20  ;;  %3068 = vmatpush.msrb.mxu3 %v7310_v57  ;;  %v7313_v20 = vld [vmem:[#allocation5 + $0x80] sm:$0xff] }
 0x43c   :  { %8821 = vst [vmem:[#allocation124_spill] sm:$0xff] %v7298_v42  ;;  %3009 = vmatpush.msrb.mxu0 %v7313_v20  ;;  %v7316_v42 = vld [vmem:[#allocation5 + $0x88] sm:$0xff] }
 0x43d   :  { %8822 = vst [vmem:[#allocation125_spill] sm:$0xff] %v7301_v31  ;;  %3029 = vmatpush.msrb.mxu1 %v7316_v42  ;;  %v7319_v31 = vld [vmem:[#allocation5 + $0x90] sm:$0xff] }
 0x43e   :  { %8823 = vst [vmem:[#allocation126_spill] sm:$0xff] %v7304_v19  ;;  %3049 = vmatpush.msrb.mxu2 %v7319_v31  ;;  %v7322_v19 = vld [vmem:[#allocation5 + $0x98] sm:$0xff] }
 0x43f   :  { %8824 = vst [vmem:[#allocation127_spill] sm:$0xff] %v7307_v1  ;;  %3069 = vmatpush.msrb.mxu3 %v7322_v19  ;;  %v7325_v1 = vld [vmem:[#allocation5 + $0x60] sm:$0xff] }
 0x440   :  { %8825 = vst [vmem:[#allocation128_spill] sm:$0xff] %v7310_v57  ;;  %3010 = vmatpush.msrb.mxu0 %v7325_v1  ;;  %v7328_v57 = vld [vmem:[#allocation5 + $0x68] sm:$0xff] }
 0x441   :  { %8826 = vst [vmem:[#allocation129_spill] sm:$0xff] %v7313_v20  ;;  %3030 = vmatpush.msrb.mxu1 %v7328_v57  ;;  %v7331_v20 = vld [vmem:[#allocation5 + $0x70] sm:$0xff] }
 0x442   :  { %8827 = vst [vmem:[#allocation130_spill] sm:$0xff] %v7316_v42  ;;  %3050 = vmatpush.msrb.mxu2 %v7331_v20  ;;  %v7334_v42 = vld [vmem:[#allocation5 + $0x78] sm:$0xff] }
 0x443   :  { %8828 = vst [vmem:[#allocation131_spill] sm:$0xff] %v7319_v31  ;;  %3070 = vmatpush.msrb.mxu3 %v7334_v42  ;;  %v7337_v31 = vld [vmem:[#allocation5 + $0x40] sm:$0xff] }
 0x444   :  { %8829 = vst [vmem:[#allocation132_spill] sm:$0xff] %v7322_v19  ;;  %3011 = vmatpush.msrb.mxu0 %v7337_v31  ;;  %v7340_v19 = vld [vmem:[#allocation5 + $0x48] sm:$0xff] }
 0x445   :  { %8830 = vst [vmem:[#allocation133_spill] sm:$0xff] %v7325_v1  ;;  %3031 = vmatpush.msrb.mxu1 %v7340_v19  ;;  %v7343_v1 = vld [vmem:[#allocation5 + $0x50] sm:$0xff] }
 0x446   :  { %8831 = vst [vmem:[#allocation134_spill] sm:$0xff] %v7328_v57  ;;  %3051 = vmatpush.msrb.mxu2 %v7343_v1  ;;  %v7346_v57 = vld [vmem:[#allocation5 + $0x58] sm:$0xff] }
 0x447   :  { %8832 = vst [vmem:[#allocation135_spill] sm:$0xff] %v7331_v20  ;;  %3071 = vmatpush.msrb.mxu3 %v7346_v57  ;;  %v7349_v20 = vld [vmem:[#allocation5 + $0x20] sm:$0xff] }
 0x448   :  { %8833 = vst [vmem:[#allocation136_spill] sm:$0xff] %v7334_v42  ;;  %3012 = vmatpush.msrb.mxu0 %v7349_v20  ;;  %v7352_v42 = vld [vmem:[#allocation5 + $0x28] sm:$0xff] }
 0x449   :  { %8834 = vst [vmem:[#allocation137_spill] sm:$0xff] %v7337_v31  ;;  %3032 = vmatpush.msrb.mxu1 %v7352_v42  ;;  %v7355_v31 = vld [vmem:[#allocation5 + $0x30] sm:$0xff] }
 0x44a   :  { %8835 = vst [vmem:[#allocation138_spill] sm:$0xff] %v7340_v19  ;;  %3052 = vmatpush.msrb.mxu2 %v7355_v31  ;;  %v7358_v19 = vld [vmem:[#allocation5 + $0x38] sm:$0xff] }
 0x44b   :  { %8836 = vst [vmem:[#allocation139_spill] sm:$0xff] %v7343_v1  ;;  %3072 = vmatpush.msrb.mxu3 %v7358_v19  ;;  %v7361_v1 = vld [vmem:[#allocation5] sm:$0xff] }
 0x44c   :  { %8837 = vst [vmem:[#allocation140_spill] sm:$0xff] %v7346_v57  ;;  %3013 = vmatpush.msrb.mxu0 %v7361_v1  ;;  %v7364_v57 = vld [vmem:[#allocation5 + $0x8] sm:$0xff] }
 0x44d   :  { %8838 = vst [vmem:[#allocation141_spill] sm:$0xff] %v7349_v20  ;;  %3033 = vmatpush.msrb.mxu1 %v7364_v57  ;;  %v7367_v20 = vld [vmem:[#allocation5 + $0x10] sm:$0xff] }
 0x44e   :  { %8839 = vst [vmem:[#allocation142_spill] sm:$0xff] %v7352_v42  ;;  %3053 = vmatpush.msrb.mxu2 %v7367_v20  ;;  %v7370_v42 = vld [vmem:[#allocation5 + $0x18] sm:$0xff] }
 0x44f   :  { %8840 = vst [vmem:[#allocation143_spill] sm:$0xff] %v7355_v31  ;;  %3073 = vmatpush.msrb.mxu3 %v7370_v42 }
 0x450   :  { %8841 = vst [vmem:[#allocation144_spill] sm:$0xff] %v7358_v19 }
 0x451   :  { %8842 = vst [vmem:[#allocation145_spill] sm:$0xff] %v7361_v1 }
 0x452   :  { %8843 = vst [vmem:[#allocation146_spill] sm:$0xff] %v7364_v57  ;;  %v8848_v57 = vld [vmem:[#allocation31_spill] sm:$0xff] }
 0x453   :  { %8844 = vst [vmem:[#allocation147_spill] sm:$0xff] %v7367_v20 }
 0x454   :  { %8845 = vst [vmem:[#allocation148_spill] sm:$0xff] %v7370_v42 }
 0x46d   :  { %v2528_v31 = vpop.f32.mrf.mxu0  ;;  %v2548_v24 = vpop.f32.mrf.mxu1 }
 0x46e   :  { %v2591_v19 = vadd.f32 %v2528_v31, %v8846_v6  ;;  %v2592_v26 = vadd.f32 %v2548_v24, %v8847_v17  ;;  %v8849_v6 = vld [vmem:[#allocation30_spill] sm:$0xff] }
 0x470   :  { %v3744_v0 = vmul.f32 -1.442695, %v2591_v19  ;;  %v3743_v1 = vmul.f32 -1.442695, %v2592_v26 }
 0x472   :  { %3946 = vpow2.f32 %v3744_v0 }
 0x473   :  { %3948 = vpow2.f32 %v3743_v1 }
 0x474   :  { %v2588_v52 = vpop.f32.mrf.mxu3  ;;  %v2568_v42 = vpop.f32.mrf.mxu2 }
 0x475   :  { %v2594_v9 = vadd.f32 %v2588_v52, %v8848_v57  ;;  %v2593_v31 = vadd.f32 %v2568_v42, %v8849_v6  ;;  %v8851_v57 = vld [vmem:[#allocation49_spill] sm:$0xff] }
 0x477   :  { %v3745_v63 = vmul.f32 -1.442695, %v2594_v9 }
 0x478   :  { %v3947_v59 = vpop.eup %3946 }
 0x479   :  { %v3949_v20 = vpop.eup %3948  ;;  %v2618_v38 = vadd.f32 1.0, %v3947_v59  ;;  %3950 = vpow2.f32 %v3745_v63  ;;  %v8850_v59 = vld [vmem:[#allocation48_spill] sm:$0xff] }
 0x47a   :  { %v2598_v3 = vadd.f32 1.0, %v3949_v20 }
 0x47b   :  { %3952 = vrcp.f32 %v2618_v38  ;;  %v2628_v33 = vand.u32 2147483647, %v2618_v38  ;;  %v2630_v42 = vand.u32 2147483648, %v2618_v38  ;;  %vm2624_vm9 = vweird.f32 %v2618_v38 }
 0x47c   :  { %3954 = vrcp.f32 %v2598_v3  ;;  %v2610_v25 = vand.u32 2147483648, %v2598_v3  ;;  %v2608_v13 = vand.u32 2147483647, %v2598_v3  ;;  %vm2604_vm8 = vweird.f32 %v2598_v3 }
 0x47d   :  { %vm2629_vm12 = vcmp.eq.f32.partialorder %v2628_v33, 8.507059e+37 }
 0x47e   :  { %vm2609_vm14 = vcmp.eq.f32.partialorder %v2608_v13, 8.507059e+37 }
 0x47f   :  { %v3951_v47 = vpop.eup %3950 }
 0x480   :  { %v7377_v17 = vadd.f32 1.0, %v3951_v47 }
 0x481   :  { %v3953_v26 = vpop.eup %3952  ;;  %v2675_v0 = vpop.f32.mrf.mxu0 }
 0x482   :  { %v2695_v24 = vpop.f32.mrf.mxu1  ;;  %v3955_v1 = vpop.eup %3954  ;;  %v2620_v19 = vmul.f32 %v3953_v26, %v2618_v38  ;;  %3956 = vrcp.f32 %v7377_v17  ;;  %v2738_v63 = vadd.f32 %v2675_v0, %v8850_v59  ;;  %vm2625_vm6 = vweird.f32 %v3953_v26 }
 0x483   :  { %v2600_v9 = vmul.f32 %v3955_v1, %v2598_v3  ;;  %3958 = vtanh.f32 %v2593_v31  ;;  %v2739_v20 = vadd.f32 %v2695_v24, %v8851_v57  ;;  %vm2605_vm7 = vweird.f32 %v3955_v1  ;;  %vm2626_vm10 = vmor %vm2624_vm9, %vm2625_vm6 }
 0x484   :  { %v2621_v52 = vsub.f32 1.0, %v2620_v19  ;;  %v3747_v6 = vmul.f32 -1.442695, %v2738_v63  ;;  %v2631_v24 = vor.u32 1.1754944e-38, %v2630_v42  ;;  %vm2606_vm11 = vmor %vm2604_vm8, %vm2605_vm7  ;;  %v2652_v13 = vand.u32 2147483648, %v7377_v17 }
 0x485   :  { %v2601_v40 = vsub.f32 1.0, %v2600_v9  ;;  %v3746_v18 = vmul.f32 -1.442695, %v2739_v20  ;;  %vm2646_vm13 = vweird.f32 %v7377_v17 }
 0x486   :  { %v2622_v47 = vmul.f32 %v3953_v26, %v2621_v52  ;;  %3960 = vpow2.f32 %v3747_v6  ;;  %v2611_v52 = vor.u32 1.1754944e-38, %v2610_v25 }
 0x487   :  { %v2602_v12 = vmul.f32 %v3955_v1, %v2601_v40  ;;  %3962 = vpow2.f32 %v3746_v18  ;;  %v8852_v40 = vld [vmem:[#allocation51_spill] sm:$0xff] }
 0x488   :  { %v3957_v28 = vpop.eup %3956  ;;  %v2623_v5 = vadd.f32 %v3953_v26, %v2622_v47  ;;  %v2735_v31 = vpop.f32.mrf.mxu3 }
 0x489   :  { %v2603_v0 = vadd.f32 %v3955_v1, %v2602_v12  ;;  %v2642_v19 = vmul.f32 %v3957_v28, %v7377_v17  ;;  %v3959_v9 = vpop.eup %3958  ;;  %v2741_v63 = vadd.f32 %v2735_v31, %v8852_v40  ;;  %vm2647_vm1 = vweird.f32 %v3957_v28  ;;  %v2827_v31 = vpop.permute.xlu1 %2826 }
 0x48a   :  { %v2627_v59 = vsel %vm2626_vm10, %v3953_v26, %v2623_v5  ;;  %vm2648_vm15 = vmor %vm2646_vm13, %vm2647_vm1  ;;  %vm2828_vm4 = vcmp.eq.s32.totalorder %v2827_v31, 1 }
 0x48b   :  { %v2607_v57 = vsel %vm2606_vm11, %v3955_v1, %v2603_v0  ;;  %v2632_v3 = vsel %vm2629_vm12, %v2631_v24, %v2627_v59  ;;  %v2643_v20 = vsub.f32 1.0, %v2642_v19  ;;  %v3748_v6 = vmul.f32 -1.442695, %v2741_v63  ;;  %v2810_v1 = vpop.permute.xlu2 %2809  ;;  %v2715_v24 = vpop.f32.mrf.mxu2  ;;  %v8853_v59 = vld [vmem:[#allocation50_spill] sm:$0xff] }
 0x48c   :  { %v2612_v38 = vsel %vm2609_vm14, %v2611_v52, %v2607_v57  ;;  %v2635_v47 = vmul.f32 %v3959_v9, %v2632_v3  ;;  %v3961_v37 = vpop.eup %3960  ;;  %v2653_v0 = vor.u32 1.1754944e-38, %v2652_v13  ;;  %vm2811_vm3 = vcmp.eq.s32.totalorder %v2810_v1, 1 }
 0x48d   :  { %v2614_v12 = vmul.f32 %v2612_v38, %v6920_v60  ;;  %v2644_v42 = vmul.f32 %v3957_v28, %v2643_v20  ;;  %3964 = vpow2.f32 %v3748_v6  ;;  %v3963_v18 = vpop.eup %3962  ;;  %v7387_v25 = vadd.f32 1.0, %v3961_v37 }
 0x48e   :  { %v7389_v33 = vadd.f32 1.0, %v3963_v18  ;;  %v2650_v60 = vand.u32 2147483647, %v7377_v17  ;;  %v2740_v40 = vadd.f32 %v2715_v24, %v8853_v59  ;;  %v8872_v59 = vld [vmem:[#allocation183_spill] sm:$0xff] }
 0x48f   :  { %v7385_v36 = vadd.f32 %v2635_v47, %v2614_v12  ;;  %v2645_v5 = vadd.f32 %v3957_v28, %v2644_v42  ;;  %v2777_v42 = vand.u32 2147483648, %v7387_v25  ;;  %v2775_v13 = vand.u32 2147483647, %v7387_v25 }
 0x490   :  { %vm2651_vm0 = vcmp.eq.f32.partialorder %v2650_v60, 8.507059e+37  ;;  %v2755_v60 = vand.u32 2147483647, %v7389_v33  ;;  %vm2771_vm7 = vweird.f32 %v7387_v25  ;;  %vm2751_vm8 = vweird.f32 %v7389_v33 }
 0x491   :  { %3966 = vtanh.f32 %v7385_v36  ;;  %v2649_v37 = vsel %vm2648_vm15, %v3957_v28, %v2645_v5  ;;  %vm2776_vm11 = vcmp.eq.f32.partialorder %v2775_v13, 8.507059e+37  ;;  %v8885_v13 = vld [vmem:[#allocation57_spill] sm:$0xff] }
 0x492   :  { %3968 = vrcp.f32 %v7387_v25  ;;  %v2654_v52 = vsel %vm2651_vm0, %v2653_v0, %v2649_v37  ;;  %vm2756_vm12 = vcmp.eq.f32.partialorder %v2755_v60, 8.507059e+37  ;;  %v8866_v37 = vld [vmem:[#allocation182_spill] sm:$0xff]  ;;  %v8867_v0 = vld [vmem:[#allocation97_spill] sm:$0xff] }
 0x493   :  { %3970 = vrcp.f32 %v7389_v33  ;;  %v3965_v26 = vpop.eup %3964  ;;  %v8887_v60 = vld [vmem:[#allocation58_spill] sm:$0xff] }
 0x494   :  { %v7397_v19 = vadd.f32 1.0, %v3965_v26 }
 0x496   :  { %3972 = vrcp.f32 %v7397_v19  ;;  %vm2793_vm1 = vweird.f32 %v7397_v19 }
 0x497   :  { %v3967_v9 = vpop.eup %3966  ;;  %3974 = vtanh.f32 %v2740_v40  ;;  %v8873_v40 = vld [vmem:[#allocation104_spill] sm:$0xff] }
 0x498   :  { %v3969_v17 = vpop.eup %3968  ;;  %v2657_v63 = vmul.f32 %v3967_v9, %v2654_v52  ;;  %v8869_v9 = vld [vmem:[#allocation185_spill] sm:$0xff]  ;;  %v8870_v52 = vld [vmem:[#allocation184_spill] sm:$0xff] }
 0x499   :  { %v3971_v57 = vpop.eup %3970  ;;  %v2767_v28 = vmul.f32 %v3969_v17, %v7387_v25  ;;  %vm2772_vm5 = vweird.f32 %v3969_v17 }
 0x49a   :  { %v2747_v3 = vmul.f32 %v3971_v57, %v7389_v33  ;;  %v2812_v20 = vsel %vm2811_vm3, %v2657_v63, 0.0  ;;  %v7404_v38 = vsel %vm2828_vm4, %v2657_v63, %v6938_v44  ;;  %2867 = vmatmul.f32.vlgmr.msra.gmra.mxu0 %v2657_v63  ;;  %2887 = vmatmul.f32.vlgmr.msra.gmra.mxu1 %v2657_v63  ;;  %v2757_v44 = vand.u32 2147483648, %v7389_v33  ;;  %vm2773_vm9 = vmor %vm2771_vm7, %vm2772_vm5 }
 0x49b   :  { %v2768_v47 = vsub.f32 1.0, %v2767_v28  ;;  %v7407_v6 = vadd.f32 %v2812_v20, %v6944_v35  ;;  %2907 = vmatmul.f32.vlgmr.msra.gmra.mxu2 %v2657_v63  ;;  %2927 = vmatmul.f32.vlgmr.msra.gmra.mxu3 %v2657_v63  ;;  %vm2752_vm6 = vweird.f32 %v3971_v57  ;;  %v8874_v63 = vld [vmem:[#allocation66_spill] sm:$0xff]  ;;  %v8876_v28 = vld [vmem:[#allocation111_spill] sm:$0xff]  ;;  %v8878_v20 = vld [vmem:[#allocation64_spill] sm:$0xff] }
 0x49c   :  { %v2748_v12 = vsub.f32 1.0, %v2747_v3  ;;  %3191 = vmatpush.msra.mxu0 %v6949_v62  ;;  %3211 = vmatpush.msra.mxu1 %v6952_v51  ;;  %v7412_v18 = vpop.eup %3972  ;;  %vm2753_vm10 = vmor %vm2751_vm8, %vm2752_vm6  ;;  %v8877_v3 = vld [vmem:[#allocation65_spill] sm:$0xff] }
 0x49d   :  { %v2769_v5 = vmul.f32 %v3969_v17, %v2768_v47  ;;  %3231 = vmatpush.msra.mxu2 %v6961_v4  ;;  %3251 = vmatpush.msra.mxu3 %v6964_v8  ;;  %v2789_v62 = vmul.f32 %v7412_v18, %v7397_v19  ;;  %v2778_v8 = vor.u32 1.1754944e-38, %v2777_v42  ;;  %vm2794_vm14 = vweird.f32 %v7412_v18  ;;  %v8879_v47 = vld [vmem:[#allocation105_spill] sm:$0xff]  ;;  %v8881_v42 = vld [vmem:[#allocation103_spill] sm:$0xff] }
 0x49e   :  { %v2749_v35 = vmul.f32 %v3971_v57, %v2748_v12  ;;  %3192 = vmatpush.msra.mxu0 %v6974_v2  ;;  %3212 = vmatpush.msra.mxu1 %v6977_v54  ;;  %v2758_v2 = vor.u32 1.1754944e-38, %v2757_v44  ;;  %vm7459_vm13 = vmor %vm2793_vm1, %vm2794_vm14  ;;  %v8880_v12 = vld [vmem:[#allocation102_spill] sm:$0xff] }
 0x49f   :  { %v2770_v51 = vadd.f32 %v3969_v17, %v2769_v5  ;;  %3232 = vmatpush.msra.mxu2 %v6982_v43  ;;  %3252 = vmatpush.msra.mxu3 %v6985_v7  ;;  %v2790_v26 = vsub.f32 1.0, %v2789_v62  ;;  %v3975_v43 = vpop.eup %3974  ;;  %v8883_v44 = vld [vmem:[#allocation106_spill] sm:$0xff]  ;;  %v8884_v5 = vld [vmem:[#allocation56_spill] sm:$0xff] }
 0x4a0   :  { %v2750_v4 = vadd.f32 %v3971_v57, %v2749_v35  ;;  %3193 = vmatpush.msra.mxu0 %v6989_v16  ;;  %3213 = vmatpush.msra.mxu1 %v6992_v53  ;;  %v8886_v35 = vld [vmem:[#allocation59_spill] sm:$0xff]  ;;  %v8888_v62 = vld [vmem:[#allocation68_spill] sm:$0xff] }
 0x4a1   :  { %v2774_v54 = vsel %vm2773_vm9, %v3969_v17, %v2770_v51  ;;  %3233 = vmatpush.msra.mxu2 %v6996_v39  ;;  %3253 = vmatpush.msra.mxu3 %v6999_v10  ;;  %v2791_v53 = vmul.f32 %v7412_v18, %v2790_v26  ;;  %v8871_v17 = vld [vmem:[#allocation67_spill] sm:$0xff]  ;;  %v8889_v51 = vld [vmem:[#allocation69_spill] sm:$0xff]  ;;  %v8892_v26 = vld [vmem:[#allocation72_spill] sm:$0xff] }
 0x4a2   :  { %v2754_v7 = vsel %vm2753_vm10, %v3971_v57, %v2750_v4  ;;  %v2779_v25 = vsel %vm2776_vm11, %v2778_v8, %v2774_v54  ;;  %3194 = vmatpush.msra.mxu0 %v7002_v61  ;;  %3214 = vmatpush.msra.mxu1 %v7005_v22  ;;  %v2799_v22 = vand.u32 2147483648, %v7397_v19  ;;  %v8875_v57 = vld [vmem:[#allocation110_spill] sm:$0xff]  ;;  %v8891_v8 = vld [vmem:[#allocation71_spill] sm:$0xff] }
 0x4a3   :  { %v2759_v16 = vsel %vm2756_vm12, %v2758_v2, %v2754_v7  ;;  %v2782_v33 = vmul.f32 %v3975_v43, %v2779_v25  ;;  %3234 = vmatpush.msra.mxu2 %v7010_v45  ;;  %3254 = vmatpush.msra.mxu3 %v7013_v30  ;;  %v2792_v61 = vadd.f32 %v7412_v18, %v2791_v53  ;;  %v8890_v4 = vld [vmem:[#allocation70_spill] sm:$0xff]  ;;  %v8893_v2 = vld [vmem:[#allocation73_spill] sm:$0xff]  ;;  %v8895_v43 = vld [vmem:[#allocation75_spill] sm:$0xff] }
 0x4a4   :  { %v2761_v39 = vmul.f32 %v2759_v16, %v7008_v21  ;;  %3195 = vmatpush.msra.mxu0 %v7018_v15  ;;  %3215 = vmatpush.msra.mxu1 %v7021_v11  ;;  %v2797_v21 = vand.u32 2147483647, %v7397_v19  ;;  %v2834_v15 = vpop.permute.xlu2 %2833  ;;  %v2819_v11 = vpop.permute.xlu0 %2818  ;;  %v8868_v19 = vld [vmem:[#allocation62_spill] sm:$0xff]  ;;  %v8896_v7 = vld [vmem:[#allocation76_spill] sm:$0xff]  ;;  %v8897_v25 = vld [vmem:[#allocation77_spill] sm:$0xff] }
 0x4a5   :  { %3235 = vmatpush.msra.mxu2 %v7026_v32  ;;  %3255 = vmatpush.msra.mxu3 %v7029_v14  ;;  %v2796_v30 = vsel %vm7459_vm13, %v7412_v18, %v2792_v61  ;;  %v2800_v32 = vor.u32 1.1754944e-38, %v2799_v22  ;;  %v8856_v14 = vld [vmem:[#allocation178_spill] sm:$0xff]  ;;  %vm2835_vm0 = vcmp.eq.s32.totalorder %v2834_v15, 1  ;;  %vm2820_vm3 = vcmp.eq.s32.totalorder %v2819_v11, 1  ;;  %v8882_v18 = vld [vmem:[#allocation107_spill] sm:$0xff]  ;;  %v8900_v53 = vld [vmem:[#allocation80_spill] sm:$0xff] }
 0x4a6   :  { %v7443_v10 = vadd.f32 %v2782_v33, %v2761_v39  ;;  %3196 = vmatpush.msra.mxu0 %v7034_v41  ;;  %3216 = vmatpush.msra.mxu1 %v7037_v55  ;;  %v8857_v41 = vld [vmem:[#allocation179_spill] sm:$0xff]  ;;  %vm2798_vm15 = vcmp.eq.f32.partialorder %v2797_v21, 8.507059e+37  ;;  %v8858_v55 = vld [vmem:[#allocation180_spill] sm:$0xff]  ;;  %v8894_v54 = vld [vmem:[#allocation74_spill] sm:$0xff] }
 0x4a7   :  { %3236 = vmatpush.msra.mxu2 %v7046_v29  ;;  %3256 = vmatpush.msra.mxu3 %v7049_v58  ;;  %v8859_v29 = vld [vmem:[#allocation181_spill] sm:$0xff]  ;;  %v8898_v16 = vld [vmem:[#allocation78_spill] sm:$0xff]  ;;  %v8899_v33 = vld [vmem:[#allocation79_spill] sm:$0xff] }
 0x4a8   :  { %3976 = vtanh.f32 %v7443_v10  ;;  %3197 = vmatpush.msra.mxu0 %v7055_v49  ;;  %3217 = vmatpush.msra.mxu1 %v7058_v34  ;;  %v2801_v49 = vsel %vm2798_vm15, %v2800_v32, %v2796_v30  ;;  %v8860_v34 = vld [vmem:[#allocation98_spill] sm:$0xff]  ;;  %v8901_v39 = vld [vmem:[#allocation81_spill] sm:$0xff]  ;;  %v8903_v22 = vld [vmem:[#allocation83_spill] sm:$0xff] }
 0x4a9   :  { %3237 = vmatpush.msra.mxu2 %v7061_v46  ;;  %3257 = vmatpush.msra.mxu3 %v7064_v56  ;;  %v8861_v46 = vld [vmem:[#allocation101_spill] sm:$0xff]  ;;  %v8902_v61 = vld [vmem:[#allocation82_spill] sm:$0xff]  ;;  %v8904_v21 = vld [vmem:[#allocation84_spill] sm:$0xff] }
 0x4aa   :  { %3198 = vmatpush.msra.mxu0 %v7067_v50  ;;  %3218 = vmatpush.msra.mxu1 %v7070_v48  ;;  %v8862_v50 = vld [vmem:[#allocation60_spill] sm:$0xff]  ;;  %v8863_v48 = vld [vmem:[#allocation61_spill] sm:$0xff]  ;;  %v8906_v30 = vld [vmem:[#allocation86_spill] sm:$0xff] }
 0x4ab   :  { %3238 = vmatpush.msra.mxu2 %v7073_v27  ;;  %3258 = vmatpush.msra.mxu3 %v7076_v23  ;;  %v8864_v27 = vld [vmem:[#allocation100_spill] sm:$0xff]  ;;  %v8865_v23 = vld [vmem:[#allocation63_spill] sm:$0xff]  ;;  %v8905_v45 = vld [vmem:[#allocation85_spill] sm:$0xff] }
 0x4ac   :  { %3199 = vmatpush.msra.mxu0 %v8856_v14  ;;  %3219 = vmatpush.msra.mxu1 %v8857_v41  ;;  %v8907_v15 = vld [vmem:[#allocation87_spill] sm:$0xff]  ;;  %v8908_v11 = vld [vmem:[#allocation88_spill] sm:$0xff]  ;;  %v8909_v32 = vld [vmem:[#allocation89_spill] sm:$0xff] }
 0x4ad   :  { %3239 = vmatpush.msra.mxu2 %v8858_v55  ;;  %3259 = vmatpush.msra.mxu3 %v8859_v29  ;;  %v8910_v14 = vld [vmem:[#allocation90_spill] sm:$0xff]  ;;  %v8911_v41 = vld [vmem:[#allocation91_spill] sm:$0xff]  ;;  %v8912_v55 = vld [vmem:[#allocation92_spill] sm:$0xff] }
 0x4ae   :  { %v3977_v58 = vpop.eup %3976  ;;  %3200 = vmatpush.msra.mxu0 %v8860_v34  ;;  %3220 = vmatpush.msra.mxu1 %v8861_v46  ;;  %v8913_v29 = vld [vmem:[#allocation93_spill] sm:$0xff]  ;;  %v8916_v34 = vld [vmem:[#allocation96_spill] sm:$0xff] }
 0x4af   :  { %v2804_v56 = vmul.f32 %v3977_v58, %v2801_v49  ;;  %3240 = vmatpush.msra.mxu2 %v8862_v50  ;;  %3260 = vmatpush.msra.mxu3 %v8863_v48  ;;  %v8914_v58 = vld [vmem:[#allocation94_spill] sm:$0xff]  ;;  %v8915_v49 = vld [vmem:[#allocation95_spill] sm:$0xff]  ;;  %v8917_v46 = vld [vmem:[#allocation112_spill] sm:$0xff] }
 0x4b0   :  { %3201 = vmatpush.msra.mxu0 %v8864_v27  ;;  %3221 = vmatpush.msra.mxu1 %v8865_v23  ;;  %v8919_v50 = vld [vmem:[#allocation114_spill] sm:$0xff]  ;;  %v8920_v48 = vld [vmem:[#allocation115_spill] sm:$0xff]  ;;  %v8921_v27 = vld [vmem:[#allocation116_spill] sm:$0xff] }
 0x4b1   :  { %v7481_v1 = vsel %vm2835_vm0, %v2804_v56, %v8866_v37  ;;  %v2821_v31 = vsel %vm2820_vm3, %v2804_v56, 0.0  ;;  %3014 = vmatmul.f32.vlgmr.msrb.gmra.mxu0 %v2804_v56  ;;  %3034 = vmatmul.f32.vlgmr.msrb.gmra.mxu1 %v2804_v56  ;;  %v8922_v23 = vld [vmem:[#allocation117_spill] sm:$0xff]  ;;  %v8923_v37 = vld [vmem:[#allocation118_spill] sm:$0xff] }
 0x4b2   :  { %v7484_v24 = vadd.f32 %v2821_v31, %v8867_v0  ;;  %3054 = vmatmul.f32.vlgmr.msrb.gmra.mxu2 %v2804_v56  ;;  %3074 = vmatmul.f32.vlgmr.msrb.gmra.mxu3 %v2804_v56  ;;  %v8918_v56 = vld [vmem:[#allocation113_spill] sm:$0xff]  ;;  %v8924_v31 = vld [vmem:[#allocation119_spill] sm:$0xff]  ;;  %v8925_v0 = vld [vmem:[#allocation120_spill] sm:$0xff] }
 0x4b3   :  { %3241 = vmatpush.msra.mxu2 %v8868_v19  ;;  %3261 = vmatpush.msra.mxu3 %v8869_v9  ;;  %v8926_v19 = vld [vmem:[#allocation121_spill] sm:$0xff]  ;;  %v8927_v9 = vld [vmem:[#allocation122_spill] sm:$0xff] }
 0x4b4   :  { %3202 = vmatpush.msra.mxu0 %v8870_v52  ;;  %3222 = vmatpush.msra.mxu1 %v8871_v17  ;;  %v8928_v52 = vld [vmem:[#allocation123_spill] sm:$0xff]  ;;  %v8929_v17 = vld [vmem:[#allocation124_spill] sm:$0xff] }
 0x4b5   :  { %3242 = vmatpush.msra.mxu2 %v8872_v59  ;;  %3262 = vmatpush.msra.mxu3 %v8873_v40  ;;  %v8930_v59 = vld [vmem:[#allocation125_spill] sm:$0xff]  ;;  %v8931_v40 = vld [vmem:[#allocation126_spill] sm:$0xff] }
 0x4b6   :  { %3203 = vmatpush.msra.mxu0 %v8874_v63  ;;  %3223 = vmatpush.msra.mxu1 %v8875_v57  ;;  %v8932_v63 = vld [vmem:[#allocation127_spill] sm:$0xff]  ;;  %v8933_v57 = vld [vmem:[#allocation128_spill] sm:$0xff] }
 0x4b7   :  { %3243 = vmatpush.msra.mxu2 %v8876_v28  ;;  %3263 = vmatpush.msra.mxu3 %v8877_v3  ;;  %v8934_v28 = vld [vmem:[#allocation129_spill] sm:$0xff]  ;;  %v8935_v3 = vld [vmem:[#allocation130_spill] sm:$0xff] }
 0x4b8   :  { %3204 = vmatpush.msra.mxu0 %v8878_v20  ;;  %3224 = vmatpush.msra.mxu1 %v8879_v47  ;;  %v8936_v20 = vld [vmem:[#allocation131_spill] sm:$0xff]  ;;  %v8937_v47 = vld [vmem:[#allocation132_spill] sm:$0xff] }
 0x4b9   :  { %3244 = vmatpush.msra.mxu2 %v8880_v12  ;;  %3264 = vmatpush.msra.mxu3 %v8881_v42  ;;  %v8938_v12 = vld [vmem:[#allocation133_spill] sm:$0xff]  ;;  %v8939_v42 = vld [vmem:[#allocation134_spill] sm:$0xff] }
 0x4ba   :  { %3205 = vmatpush.msra.mxu0 %v8882_v18  ;;  %3225 = vmatpush.msra.mxu1 %v8883_v44  ;;  %v8940_v18 = vld [vmem:[#allocation135_spill] sm:$0xff]  ;;  %v8941_v44 = vld [vmem:[#allocation136_spill] sm:$0xff] }
 0x4bb   :  { %3245 = vmatpush.msra.mxu2 %v8884_v5  ;;  %3265 = vmatpush.msra.mxu3 %v8885_v13  ;;  %v8942_v5 = vld [vmem:[#allocation137_spill] sm:$0xff]  ;;  %v8943_v13 = vld [vmem:[#allocation138_spill] sm:$0xff] }
 0x4bc   :  { %3206 = vmatpush.msra.mxu0 %v8886_v35  ;;  %3226 = vmatpush.msra.mxu1 %v8887_v60  ;;  %v8944_v35 = vld [vmem:[#allocation139_spill] sm:$0xff]  ;;  %v8945_v60 = vld [vmem:[#allocation140_spill] sm:$0xff] }
 0x4bd   :  { %3246 = vmatpush.msra.mxu2 %v8888_v62  ;;  %3266 = vmatpush.msra.mxu3 %v8889_v51  ;;  %v8946_v62 = vld [vmem:[#allocation141_spill] sm:$0xff]  ;;  %v8947_v51 = vld [vmem:[#allocation142_spill] sm:$0xff] }
 0x4be   :  { %3338 = vmatpush.msrb.mxu0 %v8890_v4  ;;  %3358 = vmatpush.msrb.mxu1 %v8891_v8  ;;  %v8948_v4 = vld [vmem:[#allocation143_spill] sm:$0xff]  ;;  %v8949_v8 = vld [vmem:[#allocation144_spill] sm:$0xff] }
 0x4bf   :  { %3378 = vmatpush.msrb.mxu2 %v8892_v26  ;;  %3398 = vmatpush.msrb.mxu3 %v8893_v2  ;;  %v8950_v26 = vld [vmem:[#allocation145_spill] sm:$0xff]  ;;  %v8951_v2 = vld [vmem:[#allocation146_spill] sm:$0xff] }
 0x4c0   :  { %3339 = vmatpush.msrb.mxu0 %v8894_v54  ;;  %3359 = vmatpush.msrb.mxu1 %v8895_v43  ;;  %v8952_v54 = vld [vmem:[#allocation147_spill] sm:$0xff]  ;;  %v8953_v43 = vld [vmem:[#allocation148_spill] sm:$0xff] }
 0x4c1   :  { %3379 = vmatpush.msrb.mxu2 %v8896_v7  ;;  %3399 = vmatpush.msrb.mxu3 %v8897_v25 }
 0x4c2   :  { %3340 = vmatpush.msrb.mxu0 %v8898_v16  ;;  %3360 = vmatpush.msrb.mxu1 %v8899_v33  ;;  %v8954_v16 = vld [vmem:[#allocation32_spill] sm:$0xff] }
 0x4c3   :  { %3380 = vmatpush.msrb.mxu2 %v8900_v53  ;;  %3400 = vmatpush.msrb.mxu3 %v8901_v39  ;;  %v8955_v53 = vld [vmem:[#allocation33_spill] sm:$0xff] }
 0x4c4   :  { %3341 = vmatpush.msrb.mxu0 %v8902_v61  ;;  %3361 = vmatpush.msrb.mxu1 %v8903_v22 }
 0x4c5   :  { %3381 = vmatpush.msrb.mxu2 %v8904_v21  ;;  %3401 = vmatpush.msrb.mxu3 %v8905_v45  ;;  %v8956_v45 = vld [vmem:[#allocation35_spill] sm:$0xff] }
 0x4c6   :  { %3342 = vmatpush.msrb.mxu0 %v8906_v30  ;;  %3362 = vmatpush.msrb.mxu1 %v8907_v15 }
 0x4c7   :  { %3382 = vmatpush.msrb.mxu2 %v8908_v11  ;;  %3402 = vmatpush.msrb.mxu3 %v8909_v32 }
 0x4c8   :  { %3343 = vmatpush.msrb.mxu0 %v8910_v14  ;;  %3363 = vmatpush.msrb.mxu1 %v8911_v41  ;;  %v4437_v41 = vld [vmem:[%s7708_s0] sm:$0xff]  ;;  %s4549_s0 = smov [#allocation10]  }
 0x4c9   :  { %3383 = vmatpush.msrb.mxu2 %v8912_v55  ;;  %3403 = vmatpush.msrb.mxu3 %v8913_v29  ;;  %v3529_v29 = vsel %vm3709_vm2, %v4437_v41, 1  ;;  %s3566_s30 = sshll.u32 %s4549_s0, 4  ;;  %s3567_s30 = int_to_ptr.vmem [resolvable:$true] %s3566_s30 }
 0x4ca   :  { %3344 = vmatpush.msrb.mxu0 %v8914_v58  ;;  %3364 = vmatpush.msrb.mxu1 %v8915_v49  ;;  %v7580_v49 = vcvt.s32.f32 %v3529_v29 }
 0x4cb   :  { %3384 = vmatpush.msrb.mxu2 %v8916_v34  ;;  %3404 = vmatpush.msrb.mxu3 %v8917_v46 }
 0x4cc   :  { %3345 = vmatpush.msrb.mxu0 %v8918_v56  ;;  %3365 = vmatpush.msrb.mxu1 %v8919_v50  ;;  %v8958_v56 = vld [vmem:[#allocation34_spill] sm:$0xff]  ;;  %vm3536_vm14 = vweird.f32 %v7580_v49  ;;  %v3542_v29 = vand.u32 2147483648, %v7580_v49 }
 0x4cd   :  { %3385 = vmatpush.msrb.mxu2 %v8920_v48  ;;  %3405 = vmatpush.msrb.mxu3 %v8921_v27 }
 0x4ce   :  { %3346 = vmatpush.msrb.mxu0 %v8922_v23  ;;  %3366 = vmatpush.msrb.mxu1 %v8923_v37 }
 0x4cf   :  { %3386 = vmatpush.msrb.mxu2 %v8924_v31  ;;  %3406 = vmatpush.msrb.mxu3 %v8925_v0 }
 0x4d0   :  { %3347 = vmatpush.msrb.mxu0 %v8926_v19  ;;  %3367 = vmatpush.msrb.mxu1 %v8927_v9 }
 0x4d1   :  { %3387 = vmatpush.msrb.mxu2 %v8928_v52  ;;  %3407 = vmatpush.msrb.mxu3 %v8929_v17 }
 0x4d2   :  { %3348 = vmatpush.msrb.mxu0 %v8930_v59  ;;  %3368 = vmatpush.msrb.mxu1 %v8931_v40 }
 0x4d3   :  { %3388 = vmatpush.msrb.mxu2 %v8932_v63  ;;  %3408 = vmatpush.msrb.mxu3 %v8933_v57  ;;  %v8959_v63 = vld [vmem:[#allocation44_spill] sm:$0xff] }
 0x4d4   :  { %3349 = vmatpush.msrb.mxu0 %v8934_v28  ;;  %3369 = vmatpush.msrb.mxu1 %v8935_v3 }
 0x4d5   :  { %3389 = vmatpush.msrb.mxu2 %v8936_v20  ;;  %3409 = vmatpush.msrb.mxu3 %v8937_v47  ;;  %v8960_v20 = vld [vmem:[#allocation45_spill] sm:$0xff] }
 0x4d6   :  { %3350 = vmatpush.msrb.mxu0 %v8938_v12  ;;  %3370 = vmatpush.msrb.mxu1 %v8939_v42 }
 0x4d7   :  { %3390 = vmatpush.msrb.mxu2 %v8940_v18  ;;  %3410 = vmatpush.msrb.mxu3 %v8941_v44 }
 0x4d8   :  { %3351 = vmatpush.msrb.mxu0 %v8942_v5  ;;  %3371 = vmatpush.msrb.mxu1 %v8943_v13 }
 0x4d9   :  { %3391 = vmatpush.msrb.mxu2 %v8944_v35  ;;  %3411 = vmatpush.msrb.mxu3 %v8945_v60 }
 0x4da   :  { %3352 = vmatpush.msrb.mxu0 %v8946_v62  ;;  %3372 = vmatpush.msrb.mxu1 %v8947_v51 }
 0x4db   :  { %3392 = vmatpush.msrb.mxu2 %v8948_v4  ;;  %3412 = vmatpush.msrb.mxu3 %v8949_v8 }
 0x4dc   :  { %3353 = vmatpush.msrb.mxu0 %v8950_v26  ;;  %3373 = vmatpush.msrb.mxu1 %v8951_v2 }
 0x4dd   :  { %3393 = vmatpush.msrb.mxu2 %v8952_v54  ;;  %3413 = vmatpush.msrb.mxu3 %v8953_v43 }
 0x517   :  { %v2868_v7 = vpop.f32.mrf.mxu0  ;;  %v2888_v25 = vpop.f32.mrf.mxu1 }
 0x518   :  { %v2931_v33 = vadd.f32 %v2868_v7, %v8954_v16  ;;  %v2932_v39 = vadd.f32 %v2888_v25, %v8955_v53  ;;  %v7595_v7 = vpop.permute.xlu1 %3158  ;;  %v8961_v53 = vld [vmem:[#allocation47_spill] sm:$0xff] }
 0x51a   :  { %v3754_v61 = vmul.f32 -1.442695, %v2931_v33  ;;  %v3753_v22 = vmul.f32 -1.442695, %v2932_v39 }
 0x51c   :  { %3978 = vpow2.f32 %v3754_v61 }
 0x51d   :  { %3980 = vpow2.f32 %v3753_v22 }
 0x51e   :  { %v2928_v21 = vpop.f32.mrf.mxu3  ;;  %v2908_v34 = vpop.f32.mrf.mxu2 }
 0x51f   :  { %v2934_v30 = vadd.f32 %v2928_v21, %v8956_v45  ;;  %v2933_v50 = vadd.f32 %v2908_v34, %v8958_v56 }
 0x521   :  { %v3755_v15 = vmul.f32 -1.442695, %v2934_v30 }
 0x522   :  { %v3979_v11 = vpop.eup %3978 }
 0x523   :  { %v3981_v32 = vpop.eup %3980  ;;  %v2958_v14 = vadd.f32 1.0, %v3979_v11  ;;  %3982 = vpow2.f32 %v3755_v15 }
 0x524   :  { %v2938_v58 = vadd.f32 1.0, %v3981_v32 }
 0x525   :  { %3984 = vrcp.f32 %v2958_v14  ;;  %v2968_v19 = vand.u32 2147483647, %v2958_v14  ;;  %v2970_v40 = vand.u32 2147483648, %v2958_v14  ;;  %vm2964_vm5 = vweird.f32 %v2958_v14 }
 0x526   :  { %3986 = vrcp.f32 %v2938_v58  ;;  %v2950_v59 = vand.u32 2147483648, %v2938_v58  ;;  %v2948_v28 = vand.u32 2147483647, %v2938_v58  ;;  %vm2944_vm6 = vweird.f32 %v2938_v58 }
 0x527   :  { %3988 = vrcp.f32 %v7580_v49  ;;  %vm2969_vm7 = vcmp.eq.f32.partialorder %v2968_v19, 8.507059e+37  ;;  %v2971_v60 = vor.u32 1.1754944e-38, %v2970_v40 }
 0x528   :  { %v2951_v4 = vor.u32 1.1754944e-38, %v2950_v59  ;;  %vm2949_vm10 = vcmp.eq.f32.partialorder %v2948_v28, 8.507059e+37 }
 0x529   :  { %v3983_v46 = vpop.eup %3982 }
 0x52a   :  { %v7583_v48 = vadd.f32 1.0, %v3983_v46 }
 0x52b   :  { %v3985_v27 = vpop.eup %3984 }
 0x52c   :  { %v3987_v23 = vpop.eup %3986  ;;  %v2960_v37 = vmul.f32 %v3985_v27, %v2958_v14  ;;  %3990 = vrcp.f32 %v7583_v48  ;;  %vm2965_vm2 = vweird.f32 %v3985_v27  ;;  %vm2986_vm11 = vweird.f32 %v7583_v48 }
 0x52d   :  { %v2940_v31 = vmul.f32 %v3987_v23, %v2938_v58  ;;  %3992 = vtanh.f32 %v2933_v50  ;;  %v7589_v12 = vpop.eup %3988  ;;  %vm2945_vm4 = vweird.f32 %v3987_v23  ;;  %vm2966_vm8 = vmor %vm2964_vm5, %vm2965_vm2  ;;  %v2990_v34 = vand.u32 2147483647, %v7583_v48  ;;  %v3150_v50 = vpop.permute.xlu0 %3149 }
 0x52e   :  { %v2961_v0 = vsub.f32 1.0, %v2960_v37  ;;  %v3015_v9 = vpop.f32.mrf.mxu0  ;;  %v3035_v52 = vpop.f32.mrf.mxu1  ;;  %vm2946_vm9 = vmor %vm2944_vm6, %vm2945_vm4  ;;  %v3532_v25 = vmul.f32 %v7589_v12, %v7580_v49  ;;  %vm3537_vm1 = vweird.f32 %v7589_v12  ;;  %vm3151_vm3 = vcmp.eq.s32.totalorder %v3150_v50, 1 }
 0x52f   :  { %v2941_v17 = vsub.f32 1.0, %v2940_v31  ;;  %v3078_v57 = vadd.f32 %v3015_v9, %v8959_v63  ;;  %v3079_v47 = vadd.f32 %v3035_v52, %v8960_v20  ;;  %vm7626_vm15 = vmor %vm3536_vm14, %vm3537_vm1  ;;  %v3167_v31 = vpop.permute.xlu1 %3166  ;;  %vm2991_vm0 = vcmp.eq.f32.partialorder %v2990_v34, 8.507059e+37  ;;  %v8966_v63 = vld [vmem:[#allocation46_spill] sm:$0xff] }
 0x530   :  { %v2962_v3 = vmul.f32 %v3985_v27, %v2961_v0  ;;  %v3533_v21 = vsub.f32 1.0, %v3532_v25  ;;  %v3543_v0 = vor.u32 1.1754944e-38, %v3542_v29  ;;  %vm3168_vm4 = vcmp.eq.s32.totalorder %v3167_v31, 1  ;;  %v7657_v25 = vpop.permute.xlu2 %3489  ;;  %v8968_v31 = vld [vmem:[#allocation37_spill] sm:$0xff] }
 0x531   :  { %v2942_v42 = vmul.f32 %v3987_v23, %v2941_v17  ;;  %v3757_v18 = vmul.f32 -1.442695, %v3078_v57  ;;  %v3756_v13 = vmul.f32 -1.442695, %v3079_v47 }
 0x532   :  { %v7591_v44 = vpop.eup %3990  ;;  %v2963_v5 = vadd.f32 %v3985_v27, %v2962_v3  ;;  %v3534_v32 = vmul.f32 %v7589_v12, %v3533_v21 }
 0x533   :  { %v2943_v35 = vadd.f32 %v3987_v23, %v2942_v42  ;;  %v2982_v62 = vmul.f32 %v7591_v44, %v7583_v48  ;;  %3994 = vpow2.f32 %v3757_v18  ;;  %v3993_v51 = vpop.eup %3992  ;;  %vm2987_vm12 = vweird.f32 %v7591_v44 }
 0x534   :  { %v2967_v8 = vsel %vm2966_vm8, %v3985_v27, %v2963_v5  ;;  %3996 = vpow2.f32 %v3756_v13  ;;  %vm7619_vm13 = vmor %vm2986_vm11, %vm2987_vm12  ;;  %v3535_v27 = vadd.f32 %v7589_v12, %v3534_v32 }
 0x535   :  { %v2947_v26 = vsel %vm2946_vm9, %v3987_v23, %v2943_v35  ;;  %v2972_v2 = vsel %vm2969_vm7, %v2971_v60, %v2967_v8  ;;  %v2983_v54 = vsub.f32 1.0, %v2982_v62  ;;  %v3075_v43 = vpop.f32.mrf.mxu3  ;;  %v3055_v37 = vpop.f32.mrf.mxu2 }
 0x536   :  { %v2952_v16 = vsel %vm2949_vm10, %v2951_v4, %v2947_v26  ;;  %v2975_v33 = vmul.f32 %v3993_v51, %v2972_v2  ;;  %v3081_v39 = vadd.f32 %v3075_v43, %v8961_v53  ;;  %v3539_v9 = vsel %vm7626_vm15, %v7589_v12, %v3535_v27 }
 0x537   :  { %v2954_v61 = vmul.f32 %v2952_v16, %v7385_v36  ;;  %v2984_v22 = vmul.f32 %v7591_v44, %v2983_v54  ;;  %v2992_v36 = vand.u32 2147483648, %v7583_v48  ;;  %v3540_v48 = vand.u32 2147483647, %v7580_v49 }
 0x538   :  { %v3758_v45 = vmul.f32 -1.442695, %v3081_v39  ;;  %v3080_v57 = vadd.f32 %v3055_v37, %v8966_v63 }
 0x539   :  { %v3995_v30 = vpop.eup %3994  ;;  %v7603_v15 = vadd.f32 %v2975_v33, %v2954_v61  ;;  %v2985_v11 = vadd.f32 %v7591_v44, %v2984_v22  ;;  %v2993_v23 = vor.u32 1.1754944e-38, %v2992_v36  ;;  %vm3541_vm2 = vcmp.eq.f32.partialorder %v3540_v48, 8.507059e+37  ;;  %v3174_v36 = vpop.permute.xlu2 %3173 }
 0x53a   :  { %v3997_v14 = vpop.eup %3996  ;;  %v7608_v41 = vadd.f32 1.0, %v3995_v30  ;;  %3998 = vpow2.f32 %v3758_v45  ;;  %v3544_v3 = vsel %vm3541_vm2, %v3543_v0, %v3539_v9 }
 0x53b   :  { %4000 = vtanh.f32 %v7603_v15  ;;  %v7614_v55 = vadd.f32 1.0, %v3997_v14  ;;  %v2989_v56 = vsel %vm7619_vm13, %v7591_v44, %v2985_v11  ;;  %3548 = vperm.xlu2 %3784, %v3544_v3  }
 0x53c   :  { %4002 = vrcp.f32 %v7608_v41  ;;  %v2994_v17 = vsel %vm2991_vm0, %v2993_v23, %v2989_v56  ;;  %v3117_v5 = vand.u32 2147483648, %v7608_v41  ;;  %v3115_v62 = vand.u32 2147483647, %v7608_v41  ;;  %v8967_v23 = vld [vmem:[#allocation36_spill] sm:$0xff] }
 0x53d   :  { %4004 = vrcp.f32 %v7614_v55  ;;  %v3097_v35 = vand.u32 2147483648, %v7614_v55  ;;  %vm3111_vm7 = vweird.f32 %v7608_v41  ;;  %vm3091_vm8 = vweird.f32 %v7614_v55 }
 0x53e   :  { %vm3116_vm11 = vcmp.eq.f32.partialorder %v3115_v62, 8.507059e+37  ;;  %vm3160_vm0 = vcmp.eq.s32.totalorder %v7595_v7, 1 }
 0x53f   :  { %v3098_v54 = vor.u32 1.1754944e-38, %v3097_v35 }
 0x540   :  { %v3999_v19 = vpop.eup %3998 }
 0x541   :  { %v4001_v52 = vpop.eup %4000  ;;  %v7638_v59 = vadd.f32 1.0, %v3999_v19 }
 0x542   :  { %v4003_v40 = vpop.eup %4002  ;;  %v2997_v28 = vmul.f32 %v4001_v52, %v2994_v17 }
 0x543   :  { %v4005_v49 = vpop.eup %4004  ;;  %v3107_v20 = vmul.f32 %v4003_v40, %v7608_v41  ;;  %4006 = vrcp.f32 %v7638_v59  ;;  %vm3112_vm5 = vweird.f32 %v4003_v40  ;;  %v3139_v32 = vand.u32 2147483648, %v7638_v59 }
 0x544   :  { %v3087_v47 = vmul.f32 %v4005_v49, %v7614_v55  ;;  %3207 = vmatmul.f32.vlgmr.msra.gmra.mxu0 %v2997_v28  ;;  %3227 = vmatmul.f32.vlgmr.msra.gmra.mxu1 %v2997_v28  ;;  %v3152_v42 = vsel %vm3151_vm3, %v2997_v28, 0.0  ;;  %v7645_v18 = vsel %vm3168_vm4, %v2997_v28, %v7404_v38  ;;  %4008 = vtanh.f32 %v3080_v57  ;;  %vm3113_vm9 = vmor %vm3111_vm7, %vm3112_vm5 }
 0x545   :  { %v3108_v12 = vsub.f32 1.0, %v3107_v20  ;;  %3247 = vmatmul.f32.vlgmr.msra.gmra.mxu2 %v2997_v28  ;;  %3267 = vmatmul.f32.vlgmr.msra.gmra.mxu3 %v2997_v28  ;;  %v7649_v13 = vadd.f32 %v3152_v42, %v7407_v6  ;;  %vm3092_vm6 = vweird.f32 %v4005_v49  ;;  %v3095_v38 = vand.u32 2147483647, %v7614_v55  ;;  %v8970_v28 = vld [vmem:[#allocation38_spill] sm:$0xff] }
 0x546   :  { %v3088_v44 = vsub.f32 1.0, %v3087_v47  ;;  %v3118_v6 = vor.u32 1.1754944e-38, %v3117_v5  ;;  %vm3093_vm10 = vmor %vm3091_vm8, %vm3092_vm6  ;;  %vm3133_vm1 = vweird.f32 %v7638_v59  ;;  %v3137_v14 = vand.u32 2147483647, %v7638_v59 }
 0x547   :  { %v3109_v60 = vmul.f32 %v4003_v40, %v3108_v12  ;;  %vm3096_vm12 = vcmp.eq.f32.partialorder %v3095_v38, 8.507059e+37  ;;  %v3140_v55 = vor.u32 1.1754944e-38, %v3139_v32  ;;  %vm3175_vm3 = vcmp.eq.s32.totalorder %v3174_v36, 1  ;;  %v8971_v38 = vld [vmem:[#allocation40_spill] sm:$0xff] }
 0x548   :  { %v3089_v51 = vmul.f32 %v4005_v49, %v3088_v44  ;;  %vm3138_vm15 = vcmp.eq.f32.partialorder %v3137_v14, 8.507059e+37 }
 0x549   :  { %v4007_v4 = vpop.eup %4006  ;;  %v3110_v8 = vadd.f32 %v4003_v40, %v3109_v60 }
 0x54a   :  { %v3090_v26 = vadd.f32 %v4005_v49, %v3089_v51  ;;  %v3129_v2 = vmul.f32 %v4007_v4, %v7638_v59  ;;  %v4009_v16 = vpop.eup %4008  ;;  %vm3134_vm14 = vweird.f32 %v4007_v4 }
 0x54b   :  { %v3114_v43 = vsel %vm3113_vm9, %v4003_v40, %v3110_v8  ;;  %vm3135_vm13 = vmor %vm3133_vm1, %vm3134_vm14 }
 0x54c   :  { %v3094_v33 = vsel %vm3093_vm10, %v4005_v49, %v3090_v26  ;;  %v3119_v53 = vsel %vm3116_vm11, %v3118_v6, %v3114_v43  ;;  %v3130_v39 = vsub.f32 1.0, %v3129_v2  ;;  %v8972_v6 = vld [vmem:[#allocation41_spill] sm:$0xff] }
 0x54d   :  { %v3099_v61 = vsel %vm3096_vm12, %v3098_v54, %v3094_v33  ;;  %v3122_v22 = vmul.f32 %v4009_v16, %v3119_v53 }
 0x54e   :  { %v3101_v21 = vmul.f32 %v3099_v61, %v7443_v10  ;;  %v3131_v45 = vmul.f32 %v4007_v4, %v3130_v39 }
 0x550   :  { %v7660_v30 = vadd.f32 %v3122_v22, %v3101_v21  ;;  %v3132_v11 = vadd.f32 %v4007_v4, %v3131_v45 }
 0x552   :  { %4010 = vtanh.f32 %v7660_v30  ;;  %v3136_v41 = vsel %vm3135_vm13, %v4007_v4, %v3132_v11  ;;  %vm3491_vm13 = vcmp.eq.s32.totalorder %v7657_v25, 1 }
 0x553   :  { %v3141_v10 = vsel %vm3138_vm15, %v3140_v55, %v3136_v41 }
 0x558   :  { %v4011_v29 = vpop.eup %4010 }
 0x559   :  { %v3144_v58 = vmul.f32 %v4011_v29, %v3141_v10 }
 0x55b   :  { %v3161_v34 = vsel %vm3160_vm0, %v3144_v58, 0.0  ;;  %v7668_v46 = vsel %vm3175_vm3, %v3144_v58, %v7481_v1  ;;  %3354 = vmatmul.f32.vlgmr.msrb.gmra.mxu0 %v3144_v58  ;;  %3374 = vmatmul.f32.vlgmr.msrb.gmra.mxu1 %v3144_v58  ;;  %v8969_v1 = vld [vmem:[#allocation39_spill] sm:$0xff] }
 0x55c   :  { %v7671_v56 = vadd.f32 %v3161_v34, %v7484_v24  ;;  %3394 = vmatmul.f32.vlgmr.msrb.gmra.mxu2 %v3144_v58  ;;  %3414 = vmatmul.f32.vlgmr.msrb.gmra.mxu3 %v3144_v58  ;;  %v8973_v58 = vld [vmem:[#allocation43_spill] sm:$0xff] }
 0x5c1   :  { %v3208_v50 = vpop.f32.mrf.mxu0  ;;  %v3228_v27 = vpop.f32.mrf.mxu1 }
 0x5c2   :  { %v3271_v37 = vadd.f32 %v3208_v50, %v8967_v23  ;;  %v3272_v48 = vadd.f32 %v3228_v27, %v8968_v31  ;;  %v7684_v50 = vpop.permute.xlu0 %3498 }
 0x5c4   :  { %v3764_v7 = vmul.f32 -1.442695, %v3271_v37  ;;  %v3763_v0 = vmul.f32 -1.442695, %v3272_v48 }
 0x5c6   :  { %4012 = vpow2.f32 %v3764_v7 }
 0x5c7   :  { %4014 = vpow2.f32 %v3763_v0 }
 0x5c8   :  { %v3268_v19 = vpop.f32.mrf.mxu3  ;;  %v3248_v63 = vpop.f32.mrf.mxu2 }
 0x5c9   :  { %v3274_v9 = vadd.f32 %v3268_v19, %v8969_v1  ;;  %v3273_v3 = vadd.f32 %v3248_v63, %v8970_v28  ;;  %v8974_v28 = vld [vmem:[#allocation42_spill] sm:$0xff] }
 0x5ca   :  { %v3507_v63 = vpop.permute.xlu0 %3506 }
 0x5cb   :  { %v3765_v52 = vmul.f32 -1.442695, %v3274_v9  ;;  %vm3508_vm15 = vcmp.eq.s32.totalorder %v3507_v63, 1 }
 0x5cc   :  { %v4013_v17 = vpop.eup %4012 }
 0x5cd   :  { %v4015_v59 = vpop.eup %4014  ;;  %v3298_v24 = vadd.f32 1.0, %v4013_v17  ;;  %4016 = vpow2.f32 %v3765_v52 }
 0x5ce   :  { %v3278_v40 = vadd.f32 1.0, %v4015_v59 }
 0x5cf   :  { %4018 = vrcp.f32 %v3298_v24  ;;  %v3308_v62 = vand.u32 2147483647, %v3298_v24  ;;  %v3310_v51 = vand.u32 2147483648, %v3298_v24  ;;  %vm3304_vm6 = vweird.f32 %v3298_v24 }
 0x5d0   :  { %4020 = vrcp.f32 %v3278_v40  ;;  %v3290_v8 = vand.u32 2147483648, %v3278_v40  ;;  %v3288_v43 = vand.u32 2147483647, %v3278_v40  ;;  %vm3284_vm5 = vweird.f32 %v3278_v40 }
 0x5d1   :  { %v3311_v22 = vor.u32 1.1754944e-38, %v3310_v51  ;;  %vm3309_vm9 = vcmp.eq.f32.partialorder %v3308_v62, 8.507059e+37  ;;  %v3549_v51 = vpop.permute.xlu2 %3548 }
 0x5d2   :  { %v3291_v11 = vor.u32 1.1754944e-38, %v3290_v8  ;;  %vm3289_vm10 = vcmp.eq.f32.partialorder %v3288_v43, 8.507059e+37 }
 0x5d3   :  { %v4017_v57 = vpop.eup %4016 }
 0x5d4   :  { %v7677_v49 = vadd.f32 1.0, %v4017_v57 }
 0x5d5   :  { %v4019_v20 = vpop.eup %4018 }
 0x5d6   :  { %v4021_v47 = vpop.eup %4020  ;;  %v3300_v12 = vmul.f32 %v4019_v20, %v3298_v24  ;;  %4022 = vrcp.f32 %v7677_v49  ;;  %vm3305_vm2 = vweird.f32 %v4019_v20  ;;  %v3332_v1 = vand.u32 2147483648, %v7677_v49 }
 0x5d7   :  { %v3280_v42 = vmul.f32 %v4021_v47, %v3278_v40  ;;  %4024 = vtanh.f32 %v3273_v3  ;;  %vm3285_vm4 = vweird.f32 %v4021_v47  ;;  %vm3306_vm7 = vmor %vm3304_vm6, %vm3305_vm2  ;;  %vm3326_vm12 = vweird.f32 %v7677_v49 }
 0x5d8   :  { %v3301_v44 = vsub.f32 1.0, %v3300_v12  ;;  %v3355_v5 = vpop.f32.mrf.mxu0  ;;  %v3375_v35 = vpop.f32.mrf.mxu1  ;;  %vm3286_vm8 = vmor %vm3284_vm5, %vm3285_vm4  ;;  %v3330_v52 = vand.u32 2147483647, %v7677_v49  ;;  %v3333_v59 = vor.u32 1.1754944e-38, %v3332_v1 }
 0x5d9   :  { %v3281_v60 = vsub.f32 1.0, %v3280_v42  ;;  %v3418_v4 = vadd.f32 %v3355_v5, %v8971_v38  ;;  %v3419_v2 = vadd.f32 %v3375_v35, %v8972_v6 }
 0x5da   :  { %v3302_v26 = vmul.f32 %v4019_v20, %v3301_v44  ;;  %vm3331_vm1 = vcmp.eq.f32.partialorder %v3330_v52, 8.507059e+37 }
 0x5db   :  { %v3282_v54 = vmul.f32 %v4021_v47, %v3281_v60  ;;  %v3767_v16 = vmul.f32 -1.442695, %v3418_v4  ;;  %v3766_v39 = vmul.f32 -1.442695, %v3419_v2 }
 0x5dc   :  { %v4023_v33 = vpop.eup %4022  ;;  %v3303_v53 = vadd.f32 %v4019_v20, %v3302_v26 }
 0x5dd   :  { %v3283_v61 = vadd.f32 %v4021_v47, %v3282_v54  ;;  %v3322_v21 = vmul.f32 %v4023_v33, %v7677_v49  ;;  %4026 = vpow2.f32 %v3767_v16  ;;  %v4025_v45 = vpop.eup %4024  ;;  %vm3327_vm11 = vweird.f32 %v4023_v33 }
 0x5de   :  { %v3307_v32 = vsel %vm3306_vm7, %v4019_v20, %v3303_v53  ;;  %4028 = vpow2.f32 %v3766_v39  ;;  %vm3328_vm14 = vmor %vm3326_vm12, %vm3327_vm11 }
 0x5df   :  { %v3287_v14 = vsel %vm3286_vm8, %v4021_v47, %v3283_v61  ;;  %v3312_v41 = vsel %vm3309_vm9, %v3311_v22, %v3307_v32  ;;  %v3323_v36 = vsub.f32 1.0, %v3322_v21  ;;  %v3415_v55 = vpop.f32.mrf.mxu3  ;;  %v3395_v17 = vpop.f32.mrf.mxu2 }
 0x5e0   :  { %v3292_v29 = vsel %vm3289_vm10, %v3291_v11, %v3287_v14  ;;  %v3315_v10 = vmul.f32 %v4025_v45, %v3312_v41  ;;  %v3421_v34 = vadd.f32 %v3415_v55, %v8973_v58  ;;  %v3420_v3 = vadd.f32 %v3395_v17, %v8974_v28 }
 0x5e1   :  { %v3294_v27 = vmul.f32 %v3292_v29, %v7603_v15  ;;  %v3324_v23 = vmul.f32 %v4023_v33, %v3323_v36 }
 0x5e2   :  { %v3768_v37 = vmul.f32 -1.442695, %v3421_v34 }
 0x5e3   :  { %v4027_v31 = vpop.eup %4026  ;;  %v3316_v48 = vadd.f32 %v3315_v10, %v3294_v27  ;;  %v3325_v0 = vadd.f32 %v4023_v33, %v3324_v23 }
 0x5e4   :  { %v4029_v7 = vpop.eup %4028  ;;  %v3445_v19 = vadd.f32 1.0, %v4027_v31  ;;  %4030 = vpow2.f32 %v3768_v37  ;;  %v3514_v37 = vpop.permute.xlu1 %3513 }
 0x5e5   :  { %4032 = vtanh.f32 %v3316_v48  ;;  %v3425_v9 = vadd.f32 1.0, %v4029_v7  ;;  %v3329_v15 = vsel %vm3328_vm14, %v4023_v33, %v3325_v0  ;;  %vm3500_vm14 = vcmp.eq.s32.totalorder %v7684_v50, 1 }
 0x5e6   :  { %4034 = vrcp.f32 %v3445_v19  ;;  %v3334_v57 = vsel %vm3331_vm1, %v3333_v59, %v3329_v15  ;;  %v3455_v4 = vand.u32 2147483647, %v3445_v19  ;;  %v3457_v8 = vand.u32 2147483648, %v3445_v19 }
 0x5e7   :  { %4036 = vrcp.f32 %v3425_v9  ;;  %v3437_v26 = vand.u32 2147483648, %v3425_v9  ;;  %v3435_v54 = vand.u32 2147483647, %v3425_v9  ;;  %vm3451_vm2 = vweird.f32 %v3445_v19 }
 0x5e8   :  { %vm3431_vm4 = vweird.f32 %v3425_v9  ;;  %vm3456_vm7 = vcmp.eq.f32.partialorder %v3455_v4, 8.507059e+37  ;;  %vm3515_vm1 = vcmp.eq.s32.totalorder %v3514_v37, 1 }
 0x5e9   :  { %v3438_v39 = vor.u32 1.1754944e-38, %v3437_v26  ;;  %vm3436_vm8 = vcmp.eq.f32.partialorder %v3435_v54, 8.507059e+37 }
 0x5ea   :  { %v4031_v24 = vpop.eup %4030 }
 0x5eb   :  { %v4033_v40 = vpop.eup %4032  ;;  %v7691_v20 = vadd.f32 1.0, %v4031_v24 }
 0x5ec   :  { %v4035_v47 = vpop.eup %4034  ;;  %v3337_v12 = vmul.f32 %v4033_v40, %v3334_v57 }
 0x5ed   :  { %v4037_v42 = vpop.eup %4036  ;;  %v3447_v49 = vmul.f32 %v4035_v47, %v3445_v19  ;;  %4038 = vrcp.f32 %v7691_v20  ;;  %vm3452_vm0 = vweird.f32 %v4035_v47  ;;  %v3479_v58 = vand.u32 2147483648, %v7691_v20 }
 0x5ee   :  { %v3492_v44 = vsel %vm3491_vm13, %v3337_v12, 0.0  ;;  %v3427_v5 = vmul.f32 %v4037_v42, %v3425_v9  ;;  %4040 = vtanh.f32 %v3420_v3  ;;  %v3509_v62 = vsel %vm3508_vm15, %v3337_v12, %v7645_v18  ;;  %vm3453_vm5 = vmor %vm3451_vm2, %vm3452_vm0 }
 0x5ef   :  { %v3448_v35 = vsub.f32 1.0, %v3447_v49  ;;  %v3493_v60 = vadd.f32 %v3492_v44, %v7649_v13  ;;  %4042 = vtanh.f32 %v3509_v62  ;;  %vm3432_vm3 = vweird.f32 %v4037_v42 }
 0x5f0   :  { %v3428_v38 = vsub.f32 1.0, %v3427_v5  ;;  %v3458_v18 = vor.u32 1.1754944e-38, %v3457_v8  ;;  %vm3433_vm6 = vmor %vm3431_vm4, %vm3432_vm3  ;;  %vm3473_vm10 = vweird.f32 %v7691_v20  ;;  %v3477_v34 = vand.u32 2147483647, %v7691_v20 }
 0x5f1   :  { %v3449_v6 = vmul.f32 %v4035_v47, %v3448_v35  ;;  %v3551_v25 = vmul.f32 %v3549_v51, %v3493_v60  ;;  %v3480_v23 = vor.u32 1.1754944e-38, %v3479_v58 }
 0x5f2   :  { %v3429_v2 = vmul.f32 %v4037_v42, %v3428_v38  ;;  %vm3478_vm12 = vcmp.eq.f32.partialorder %v3477_v34, 8.507059e+37 }
 0x5f3   :  { %v4039_v43 = vpop.eup %4038  ;;  %v3450_v16 = vadd.f32 %v4035_v47, %v3449_v6  ;;  %4044 = vtanh.f32 %v3551_v25 }
 0x5f4   :  { %v3430_v13 = vadd.f32 %v4037_v42, %v3429_v2  ;;  %v3469_v33 = vmul.f32 %v4039_v43, %v7691_v20  ;;  %v4041_v53 = vpop.eup %4040  ;;  %vm3474_vm9 = vweird.f32 %v4039_v43 }
 0x5f5   :  { %v3454_v61 = vsel %vm3453_vm5, %v4035_v47, %v3450_v16  ;;  %v4043_v22 = vpop.eup %4042  ;;  %vm3475_vm11 = vmor %vm3473_vm10, %vm3474_vm9 }
 0x5f6   :  { %v3434_v21 = vsel %vm3433_vm6, %v4037_v42, %v3430_v13  ;;  %v3459_v45 = vsel %vm3456_vm7, %v3458_v18, %v3454_v61  ;;  %v3470_v11 = vsub.f32 1.0, %v3469_v33  ;;  %3558 = vst [vmem:[#allocation10 + $0x10] sm:$0xff] %v4043_v22 }
 0x5f7   :  { %v3439_v32 = vsel %vm3436_vm8, %v3438_v39, %v3434_v21  ;;  %v3462_v14 = vmul.f32 %v4041_v53, %v3459_v45 }
 0x5f8   :  { %v3441_v41 = vmul.f32 %v3439_v32, %v7660_v30  ;;  %v3471_v36 = vmul.f32 %v4039_v43, %v3470_v11 }
 0x5f9   :  { %v4045_v55 = vpop.eup %4044 }
 0x5fa   :  { %v3463_v29 = vadd.f32 %v3462_v14, %v3441_v41  ;;  %3553 = vst [vmem:[#allocation10] sm:$0xff] %v4045_v55  ;;  %v3472_v10 = vadd.f32 %v4039_v43, %v3471_v36 }
 0x5fc   :  { %4046 = vtanh.f32 %v3463_v29  ;;  %v3476_v27 = vsel %vm3475_vm11, %v4039_v43, %v3472_v10 }
 0x5fd   :  { %v3481_v30 = vsel %vm3478_vm12, %v3480_v23, %v3476_v27 }
 0x602   :  { %v4047_v31 = vpop.eup %4046 }
 0x603   :  { %v3484_v48 = vmul.f32 %v4047_v31, %v3481_v30 }
 0x605   :  { %v3501_v7 = vsel %vm3500_vm14, %v3484_v48, 0.0  ;;  %v3516_v0 = vsel %vm3515_vm1, %v3484_v48, %v7668_v46 }
 0x606   :  { %v3502_v19 = vadd.f32 %v3501_v7, %v7671_v56  ;;  %4048 = vtanh.f32 %v3516_v0 }
 0x608   :  { %v3554_v1 = vmul.f32 %v3549_v51, %v3502_v19 }
 0x60a   :  { %4050 = vtanh.f32 %v3554_v1 }
 0x60c   :  { %v4049_v9 = vpop.eup %4048 }
 0x60d   :  { %3560 = vst [vmem:[#allocation10 + $0x18] sm:$0xff] %v4049_v9 }
 0x610   :  { %v4051_v50 = vpop.eup %4050 }
 0x611   :  { %3556 = vst [vmem:[#allocation10 + $0x8] sm:$0xff] %v4051_v50 }
 0x612   :  { %3571 = dma.vmem_to_hbm [thread:$0]  %s3567_s30, 512, %s3569_s10, [#allocation11]  }
 0x613   :  { %4542 = dma.done.wait [#allocation11], 512  }
 0x614   :  { %4543 = vsyncadd [#allocation11], 4294966784 }
 0x615   :  { %3576 = vsyncpa [#allocation11], 1 }
 0x616   :  { %3577 = vsyncmov [#allocation9] }
 0x619   :  { %s3578_s11 = vpop.sfrf %3577 }
 0x61a   :  { %p3773_p0 = scmp.ne.s32.totalorder %s3578_s11, 0 }
 0x61c   :  { %3582 = shalt.err (%p3773_p0)  }
 0x61d   :  { %3584 = vsyncmov [#allocation9 + $0x1] }
 0x620   :  { %s3585_s12 = vpop.sfrf %3584 }
 0x621   :  { %p3774_p1 = scmp.ne.s32.totalorder %s3585_s12, 0 }
 0x623   :  { %3589 = shalt.err (%p3774_p1)  }
 0x624   :  { %3591 = vsyncmov [#allocation9 + $0x2] }
 0x627   :  { %s3592_s13 = vpop.sfrf %3591 }
 0x628   :  { %p3775_p2 = scmp.ne.s32.totalorder %s3592_s13, 0 }
 0x62a   :  { %3596 = shalt.err (%p3775_p2)  }
 0x62b   :  { %3598 = vsyncmov [#allocation9 + $0x3] }
 0x62e   :  { %s3599_s7 = vpop.sfrf %3598 }
 0x62f   :  { %p3776_p3 = scmp.ne.s32.totalorder %s3599_s7, 0 }
 0x631   :  { %3603 = shalt.err (%p3776_p3)  }

</bundles_post_ra>
